<compile_context>
chip_gen: v5e
topology: v5e:2x2
jax: 0.10.0
libtpu: 0.0.40
codegen_flags: <defaults>
</compile_context>

<pallas_src>
import jax
import jax.numpy as jnp
from jax.experimental import pallas as pl
from jax.experimental.pallas import tpu as pltpu

BN_EPS = 1e-5


# ----------------------------------------------------------------------------
# Wrapper-side weight / layout transforms (plain XLA, run once under jit)
# ----------------------------------------------------------------------------
def _banded_conv_weight(w_oihw, w_in, w_out):
  """Torch conv weight (Cout, Cin, KH, KW) -> (KH, Cin*w_in, Cout*w_out) banded matrices.

  out[kh][c*w_in + wi, co*w_out + j] = w[co, c, kh, wi - j] if 0 <= wi - j < KW else 0,
  so `src_rows[kh:kh+h_out, :] @ out[kh]` performs the full (kw, Cin) contraction of a
  'valid' conv row in a single MXU matmul (channel-major lane layout on both sides).
  """
  c_out, c_in, k_h, k_w = w_oihw.shape
  j = jnp.arange(w_out)
  wi = jnp.arange(w_in)
  off = wi[None, :] - j[:, None]                       # (w_out, w_in)
  valid = (off >= 0) & (off < k_w)
  off_c = jnp.clip(off, 0, k_w - 1)
  g = w_oihw[:, :, :, off_c]                           # (Cout, Cin, KH, w_out, w_in)
  g = g * valid[None, None, None, :, :].astype(w_oihw.dtype)
  g = jnp.transpose(g, (2, 1, 4, 0, 3))                # (KH, Cin, w_in, Cout, w_out)
  return g.reshape(k_h, c_in * w_in, c_out * w_out).astype(jnp.float32)


def _fold_matrix(c, w):
  """(C*w, C): sums the w positions of each channel block (per-channel BN stats)."""
  return jnp.kron(jnp.eye(c, dtype=jnp.float32), jnp.ones((w, 1), jnp.float32))


def _row_pool_sel(h, parity):
  """(h//2, h): 0/1 selector picking row 2a+parity (H half of the 2x2 max-pool)."""
  return (jnp.arange(h)[None, :] == 2 * jnp.arange(h // 2)[:, None] + parity).astype(jnp.float32)


def _col_pool_sel(c, w, parity):
  """(C*w, C*(w//2)): 0/1 selector picking column 2b+parity inside each channel block."""
  ew = (jnp.arange(w)[:, None] == 2 * jnp.arange(w // 2)[None, :] + parity).astype(jnp.float32)
  return jnp.kron(jnp.eye(c, dtype=jnp.float32), ew)


# ----------------------------------------------------------------------------
# In-kernel block: conv3x3(valid) + BatchNorm(train stats) + ReLU + MaxPool2x2
# ----------------------------------------------------------------------------
def _conv_bn_pool(src_ref, w_ref, brow_ref, g_ref, be_ref, fold_ref, exp_ref,
                  el_ref, ol_ref, se_ref, so_ref, n_imgs, y_ref=None):
  """src_ref: (N, H_in, Cin*W_in) activation scratch, lane index = c*W_in + w.

  Returns a list of per-image pooled values (H_out//2, Cout*(W_out//2)), same lane layout.
  """
  f32 = jnp.float32
  h_out = src_ref.shape[1] - 2
  wc = w_ref.shape[2]                   # Cout * W_out
  c_out = fold_ref.shape[1]
  w_out = wc // c_out

  brow = brow_ref[...]
  ysum = jnp.zeros((1, wc), f32)
  ysq = jnp.zeros((1, wc), f32)
  ys = []

  # Pass 1: raw conv output (3 banded MXU matmuls / image) + one-pass batch statistics.
  for n in range(n_imgs):
    acc = None
    for kh in range(3):
      t = jnp.dot(src_ref[n, kh:kh + h_out, :], w_ref[kh], preferred_element_type=f32)
      acc = t if acc is None else acc + t
    acc = acc + brow                                       # conv bias (cancels under batch BN)
    ysum = ysum + jnp.sum(acc, axis=0, keepdims=True)
    ysq = ysq + jnp.sum(acc * acc, axis=0, keepdims=True)
    if y_ref is None:
      ys.append(acc)
    else:
      y_ref[n] = acc                                       # single wide store

  # Training-mode BatchNorm (biased variance), folded to one per-lane scale/shift row.
  count = n_imgs * h_out * w_out
  ch_sum = jnp.dot(ysum, fold_ref[...], preferred_element_type=f32)    # (1, Cout)
  ch_sq = jnp.dot(ysq, fold_ref[...], preferred_element_type=f32)
  mean = ch_sum * (1.0 / count)
  var = jnp.maximum(ch_sq * (1.0 / count) - mean * mean, 0.0)
  scale = g_ref[...] * jax.lax.rsqrt(var + BN_EPS)
  shift = be_ref[...] - mean * scale
  scale_row = jnp.dot(scale, exp_ref[...], preferred_element_type=f32)  # (1, Cout*W_out)
  shift_row = jnp.dot(shift, exp_ref[...], preferred_element_type=f32)

  # Pass 2: normalize + ReLU + 2x2 max-pool via 0/1 selection matmuls (wide results only).
  pooled = []
  for n in range(n_imgs):
    y = ys[n] if y_ref is None else y_ref[n]
    t = jnp.maximum(y * scale_row + shift_row, 0.0)
    hm = jnp.maximum(jnp.dot(el_ref[...], t, preferred_element_type=f32),
                     jnp.dot(ol_ref[...], t, preferred_element_type=f32))
    pooled.append(jnp.maximum(jnp.dot(hm, se_ref[...], preferred_element_type=f32),
                              jnp.dot(hm, so_ref[...], preferred_element_type=f32)))
  return pooled


# ----------------------------------------------------------------------------
# Single fused kernel: whole network forward pass
# ----------------------------------------------------------------------------
def _network_kernel(*refs):
  (x_ref, wblur_ref,
   w1_ref, b1_ref, g1_ref, be1_ref, f1_ref, e1_ref, el1_ref, ol1_ref, se1_ref, so1_ref,
   w2_ref, b2_ref, g2_ref, be2_ref, f2_ref, e2_ref, el2_ref, ol2_ref, se2_ref, so2_ref,
   w3_ref, b3_ref, g3_ref, be3_ref, f3_ref, e3_ref, el3_ref, ol3_ref, se3_ref, so3_ref,
   l1ws_ref, l1b_ref, l2w_ref, l2b_ref,
   o_ref, a0_ref, y1_ref, p1_ref, p2_ref) = refs
  f32 = jnp.float32
  n_imgs = x_ref.shape[0]
  s0 = x_ref.shape[1] - 2

  # --- blur: 3x3 box filter (input pre-padded) as 3 banded MXU matmuls per image ---
  for n in range(n_imgs):
    a = None
    for kh in range(3):
      t = jnp.dot(x_ref[n, kh:kh + s0, :], wblur_ref[kh], preferred_element_type=f32)
      a = t if a is None else a + t
    a0_ref[n] = a                                          # (36, 36), W on lanes

  # --- block 1: conv(1->C1) + BN + ReLU + pool  (raw conv kept in VMEM scratch) ---
  p1 = _conv_bn_pool(a0_ref, w1_ref, b1_ref, g1_ref, be1_ref, f1_ref, e1_ref,
                     el1_ref, ol1_ref, se1_ref, so1_ref, n_imgs, y_ref=y1_ref)
  for n in range(n_imgs):
    p1_ref[n] = p1[n]                                      # (17, C1*17)

  # --- block 2 ---
  p2 = _conv_bn_pool(p1_ref, w2_ref, b2_ref, g2_ref, be2_ref, f2_ref, e2_ref,
                     el2_ref, ol2_ref, se2_ref, so2_ref, n_imgs)
  for n in range(n_imgs):
    p2_ref[n] = p2[n]                                      # (7, C2*7)

  # --- block 3 (pooled result kept as values: (2, C3*2) per image) ---
  p3 = _conv_bn_pool(p2_ref, w3_ref, b3_ref, g3_ref, be3_ref, f3_ref, e3_ref,
                     el3_ref, ol3_ref, se3_ref, so3_ref, n_imgs)

  # --- Flatten (NCHW order folded into l1ws) -> Linear -> Linear -> Sigmoid ---
  q_rows = l1ws_ref.shape[0]
  for n in range(n_imgs):
    q = p3[n]                                              # rows = pooled H, lanes = c*2 + w
    hvec = l1b_ref[...]
    for h in range(q_rows):
      hvec = hvec + jnp.dot(q[h:h + 1, :], l1ws_ref[h], preferred_element_type=f32)
    out = jnp.dot(hvec, l2w_ref[...], preferred_element_type=f32) + l2b_ref[...]
    o_ref[n:n + 1, :] = jax.nn.sigmoid(out)


# ----------------------------------------------------------------------------
# Wrapper: layout / weight prep (once, by XLA) + one pallas_call
# ----------------------------------------------------------------------------
def network_forward(x_nchw, params):
  n, c_in, h, w = x_nchw.shape
  assert c_in == 1 and h == w, "single-channel square images assumed"
  f32 = jnp.float32

  c1 = params["conv1"]["w"].shape[0]
  c2 = params["conv2"]["w"].shape[0]
  c3 = params["conv3"]["w"].shape[0]
  hidden = params["lin1"]["w"].shape[1]

  s0 = h            # blur output (padding=1)      36
  s1 = s0 - 2       # conv1 output                 34
  q1 = s1 // 2      # pool1                        17
  s2 = q1 - 2       # conv2 output                 15
  q2 = s2 // 2      # pool2                         7
  s3 = q2 - 2       # conv3 output                  5
  q3 = s3 // 2      # pool3                         2
  assert params["lin1"]["w"].shape[0] == q3 * q3 * c3

  # Padded input, W on lanes (no trailing C=1 dim).
  x = jnp.pad(x_nchw[:, 0].astype(f32), ((0, 0), (1, 1), (1, 1)))       # (N, 38, 38)

  blur_w = jnp.full((1, 1, 3, 3), 1.0 / 9.0, f32)
  wblur = _banded_conv_weight(blur_w, s0 + 2, s0)                       # (3, 38, 36)
  w1 = _banded_conv_weight(params["conv1"]["w"].astype(f32), s0, s1)    # (3, 36, C1*34)
  w2 = _banded_conv_weight(params["conv2"]["w"].astype(f32), q1, s2)    # (3, C1*17, C2*15)
  w3 = _banded_conv_weight(params["conv3"]["w"].astype(f32), q2, s3)    # (3, C2*7,  C3*5)

  def row(v):
    return v.reshape(1, -1).astype(f32)

  def bias_row(b, w_out):
    return jnp.repeat(b.astype(f32), w_out)[None, :]

  b1r = bias_row(params["conv1"]["b"], s1)
  b2r = bias_row(params["conv2"]["b"], s2)
  b3r = bias_row(params["conv3"]["b"], s3)
  g1, be1 = row(params["conv1"]["gamma"]), row(params["conv1"]["beta"])
  g2, be2 = row(params["conv2"]["gamma"]), row(params["conv2"]["beta"])
  g3, be3 = row(params["conv3"]["gamma"]), row(params["conv3"]["beta"])
  f1, f2, f3 = _fold_matrix(c1, s1), _fold_matrix(c2, s2), _fold_matrix(c3, s3)
  e1, e2, e3 = f1.T, f2.T, f3.T
  el1, ol1 = _row_pool_sel(s1, 0), _row_pool_sel(s1, 1)
  el2, ol2 = _row_pool_sel(s2, 0), _row_pool_sel(s2, 1)
  el3, ol3 = _row_pool_sel(s3, 0), _row_pool_sel(s3, 1)
  se1, so1 = _col_pool_sel(c1, s1, 0), _col_pool_sel(c1, s1, 1)
  se2, so2 = _col_pool_sel(c2, s2, 0), _col_pool_sel(c2, s2, 1)
  se3, so3 = _col_pool_sel(c3, s3, 0), _col_pool_sel(c3, s3, 1)

  # lin1 rows follow the PyTorch NCHW flatten (c, h, w); regroup to one (C3*q3, hidden) slab per
  # pooled-H row so its row index (c*q3 + w) matches the kernel's channel-major lane layout.
  l1w = params["lin1"]["w"].reshape(c3, q3, q3, hidden).astype(f32)
  l1ws = jnp.transpose(l1w, (1, 0, 2, 3)).reshape(q3, c3 * q3, hidden)
  l1b = row(params["lin1"]["b"])
  l2w = params["lin2"]["w"].astype(f32)
  l2b = row(params["lin2"]["b"])

  inputs = (x, wblur,
            w1, b1r, g1, be1, f1, e1, el1, ol1, se1, so1,
            w2, b2r, g2, be2, f2, e2, el2, ol2, se2, so2,
            w3, b3r, g3, be3, f3, e3, el3, ol3, se3, so3,
            l1ws, l1b, l2w, l2b)

  def full_spec(a):
    zeros = (0,) * a.ndim
    return pl.BlockSpec(a.shape, lambda i, _z=zeros: _z)

  out = pl.pallas_call(
      _network_kernel,
      out_shape=jax.ShapeDtypeStruct((n, 1), f32),
      grid=(1,),
      in_specs=[full_spec(a) for a in inputs],
      out_specs=pl.BlockSpec((n, 1), lambda i: (0, 0)),
      scratch_shapes=[
          pltpu.VMEM((n, s0, s0), f32),          # blurred image           [n, h, w]
          pltpu.VMEM((n, s1, c1 * s1), f32),     # block-1 raw conv output [n, h, c*W + w]
          pltpu.VMEM((n, q1, c1 * q1), f32),     # block-1 pooled          [n, h, c*W + w]
          pltpu.VMEM((n, q2, c2 * q2), f32),     # block-2 pooled          [n, h, c*W + w]
      ],
      compiler_params=pltpu.CompilerParams(
          dimension_semantics=("arbitrary",),
          vmem_limit_bytes=12 * 1024 * 1024),
  )(*inputs)
  return jnp.squeeze(out)


# ----------------------------------------------------------------------------
# Pure-JAX reference (for an in-script correctness check)
# ----------------------------------------------------------------------------
def _reference_forward(x_nchw, params):
  f32 = jnp.float32
  x = x_nchw.astype(f32)

  def conv(v, wgt, pad):
    return jax.lax.conv_general_dilated(v, wgt.astype(f32), (1, 1), pad,
                                        dimension_numbers=("NCHW", "OIHW", "NCHW"))

  def bn_relu_pool(y, p):
    y = y + p["b"].astype(f32)[None, :, None, None]
    mean = jnp.mean(y, axis=(0, 2, 3), keepdims=True)
    var = jnp.mean((y - mean) ** 2, axis=(0, 2, 3), keepdims=True)
    y = (y - mean) * jax.lax.rsqrt(var + BN_EPS)
    y = y * p["gamma"].astype(f32)[None, :, None, None] + p["beta"].astype(f32)[None, :, None, None]
    y = jnp.maximum(y, 0.0)
    nb, c, hh, ww = y.shape
    y = y[:, :, :(hh // 2) * 2, :(ww // 2) * 2]
    return y.reshape(nb, c, hh // 2, 2, ww // 2, 2).max(axis=(3, 5))

  x = conv(x, jnp.full((1, 1, 3, 3), 1.0 / 9.0, f32), [(1, 1), (1, 1)])
  for name in ("conv1", "conv2", "conv3"):
    x = bn_relu_pool(conv(x, params[name]["w"], "VALID"), params[name])
  flat = x.reshape(x.shape[0], -1)
  hvec = flat @ params["lin1"]["w"].astype(f32) + params["lin1"]["b"].astype(f32)
  out = hvec @ params["lin2"]["w"].astype(f32) + params["lin2"]["b"].astype(f32)
  return jnp.squeeze(jax.nn.sigmoid(out))


# ----------------------------------------------------------------------------
# Deterministic parameter construction (trial choices: 8 / 16 / 32 / hidden=96)
# ----------------------------------------------------------------------------
def init_params(key, c1=8, c2=16, c3=32, hidden=96, flat_features=128):
  ks = jax.random.split(key, 8)
  def nrm(k, shape, scale):
    return jax.random.normal(k, shape, jnp.float32) * scale
  return {
      "conv1": dict(w=nrm(ks[0], (c1, 1, 3, 3), 0.2), b=nrm(ks[1], (c1,), 0.05),
                    gamma=jnp.ones((c1,), jnp.float32), beta=jnp.zeros((c1,), jnp.float32)),
      "conv2": dict(w=nrm(ks[2], (c2, c1, 3, 3), 0.1), b=nrm(ks[3], (c2,), 0.05),
                    gamma=jnp.ones((c2,), jnp.float32), beta=jnp.zeros((c2,), jnp.float32)),
      "conv3": dict(w=nrm(ks[4], (c3, c2, 3, 3), 0.08), b=nrm(ks[5], (c3,), 0.05),
                    gamma=jnp.ones((c3,), jnp.float32), beta=jnp.zeros((c3,), jnp.float32)),
      "lin1": dict(w=nrm(ks[6], (flat_features, hidden), 0.05),
                   b=jnp.zeros((hidden,), jnp.float32)),
      "lin2": dict(w=nrm(ks[7], (hidden, 1), 0.1), b=jnp.zeros((1,), jnp.float32)),
  }


if __name__ == "__main__":
  key = jax.random.PRNGKey(0)
  k_in, k_par = jax.random.split(key)

  # IMAGE_SHAPE = (36, 36): 36 -> conv 34 -> pool 17 -> conv 15 -> pool 7
  #                         -> conv 5 -> pool 2  => flat features = 2*2*32 = 128.
  N, H, W = 2, 36, 36
  x = jax.random.normal(k_in, (N, 1, H, W), jnp.float32)   # NCHW, like PyTorch
  params = init_params(k_par)

  fwd = jax.jit(network_forward)
  out = jax.block_until_ready(fwd(x, params))
  ref = jax.block_until_ready(jax.jit(_reference_forward)(x, params))

  assert out.shape == (N,), out.shape
  assert bool(jnp.all((out >= 0.0) & (out <= 1.0)))
  assert bool(jnp.max(jnp.abs(out - ref)) < 3e-2), (out, ref)
  print("KERNEL_OK")
</pallas_src>

<mosaic_0001>
module attributes {stable_mosaic.version = 11 : i64} {
  func.func @_network_kernel(%arg0: i32, %arg1: memref<2x38x38xf32, #tpu.memory_space<vmem>>, %arg2: memref<3x38x36xf32, #tpu.memory_space<vmem>>, %arg3: memref<3x36x272xf32, #tpu.memory_space<vmem>>, %arg4: memref<1x272xf32, #tpu.memory_space<vmem>>, %arg5: memref<1x8xf32, #tpu.memory_space<vmem>>, %arg6: memref<1x8xf32, #tpu.memory_space<vmem>>, %arg7: memref<272x8xf32, #tpu.memory_space<vmem>>, %arg8: memref<8x272xf32, #tpu.memory_space<vmem>>, %arg9: memref<17x34xf32, #tpu.memory_space<vmem>>, %arg10: memref<17x34xf32, #tpu.memory_space<vmem>>, %arg11: memref<272x136xf32, #tpu.memory_space<vmem>>, %arg12: memref<272x136xf32, #tpu.memory_space<vmem>>, %arg13: memref<3x136x240xf32, #tpu.memory_space<vmem>>, %arg14: memref<1x240xf32, #tpu.memory_space<vmem>>, %arg15: memref<1x16xf32, #tpu.memory_space<vmem>>, %arg16: memref<1x16xf32, #tpu.memory_space<vmem>>, %arg17: memref<240x16xf32, #tpu.memory_space<vmem>>, %arg18: memref<16x240xf32, #tpu.memory_space<vmem>>, %arg19: memref<7x15xf32, #tpu.memory_space<vmem>>, %arg20: memref<7x15xf32, #tpu.memory_space<vmem>>, %arg21: memref<240x112xf32, #tpu.memory_space<vmem>>, %arg22: memref<240x112xf32, #tpu.memory_space<vmem>>, %arg23: memref<3x112x160xf32, #tpu.memory_space<vmem>>, %arg24: memref<1x160xf32, #tpu.memory_space<vmem>>, %arg25: memref<1x32xf32, #tpu.memory_space<vmem>>, %arg26: memref<1x32xf32, #tpu.memory_space<vmem>>, %arg27: memref<160x32xf32, #tpu.memory_space<vmem>>, %arg28: memref<32x160xf32, #tpu.memory_space<vmem>>, %arg29: memref<2x5xf32, #tpu.memory_space<vmem>>, %arg30: memref<2x5xf32, #tpu.memory_space<vmem>>, %arg31: memref<160x64xf32, #tpu.memory_space<vmem>>, %arg32: memref<160x64xf32, #tpu.memory_space<vmem>>, %arg33: memref<2x64x96xf32, #tpu.memory_space<vmem>>, %arg34: memref<1x96xf32, #tpu.memory_space<vmem>>, %arg35: memref<96x1xf32, #tpu.memory_space<vmem>>, %arg36: memref<1x1xf32, #tpu.memory_space<vmem>>, %arg37: memref<2x1xf32, #tpu.memory_space<vmem>>, %arg38: memref<2x36x36xf32, #tpu.memory_space<vmem>>, %arg39: memref<2x34x272xf32, #tpu.memory_space<vmem>>, %arg40: memref<2x17x136xf32, #tpu.memory_space<vmem>>, %arg41: memref<2x7x112xf32, #tpu.memory_space<vmem>>) attributes {dimension_semantics = [#tpu.dimension_semantics<arbitrary>], iteration_bounds = array<i64: 1>, scalar_prefetch = 0 : i64, scratch_operands = 4 : i64, tpu.core_type = #tpu.core_type<tc>, window_params = [{pipeline_mode = #tpu.pipeline_mode<synchronous>, transform_indices = @transform_0, window_bounds = array<i64: 2, 38, 38>}, {pipeline_mode = #tpu.pipeline_mode<synchronous>, transform_indices = @transform_1, window_bounds = array<i64: 3, 38, 36>}, {pipeline_mode = #tpu.pipeline_mode<synchronous>, transform_indices = @transform_2, window_bounds = array<i64: 3, 36, 272>}, {pipeline_mode = #tpu.pipeline_mode<synchronous>, transform_indices = @transform_3, window_bounds = array<i64: 1, 272>}, {pipeline_mode = #tpu.pipeline_mode<synchronous>, transform_indices = @transform_4, window_bounds = array<i64: 1, 8>}, {pipeline_mode = #tpu.pipeline_mode<synchronous>, transform_indices = @transform_5, window_bounds = array<i64: 1, 8>}, {pipeline_mode = #tpu.pipeline_mode<synchronous>, transform_indices = @transform_6, window_bounds = array<i64: 272, 8>}, {pipeline_mode = #tpu.pipeline_mode<synchronous>, transform_indices = @transform_7, window_bounds = array<i64: 8, 272>}, {pipeline_mode = #tpu.pipeline_mode<synchronous>, transform_indices = @transform_8, window_bounds = array<i64: 17, 34>}, {pipeline_mode = #tpu.pipeline_mode<synchronous>, transform_indices = @transform_9, window_bounds = array<i64: 17, 34>}, {pipeline_mode = #tpu.pipeline_mode<synchronous>, transform_indices = @transform_10, window_bounds = array<i64: 272, 136>}, {pipeline_mode = #tpu.pipeline_mode<synchronous>, transform_indices = @transform_11, window_bounds = array<i64: 272, 136>}, {pipeline_mode = #tpu.pipeline_mode<synchronous>, transform_indices = @transform_12, window_bounds = array<i64: 3, 136, 240>}, {pipeline_mode = #tpu.pipeline_mode<synchronous>, transform_indices = @transform_13, window_bounds = array<i64: 1, 240>}, {pipeline_mode = #tpu.pipeline_mode<synchronous>, transform_indices = @transform_14, window_bounds = array<i64: 1, 16>}, {pipeline_mode = #tpu.pipeline_mode<synchronous>, transform_indices = @transform_15, window_bounds = array<i64: 1, 16>}, {pipeline_mode = #tpu.pipeline_mode<synchronous>, transform_indices = @transform_16, window_bounds = array<i64: 240, 16>}, {pipeline_mode = #tpu.pipeline_mode<synchronous>, transform_indices = @transform_17, window_bounds = array<i64: 16, 240>}, {pipeline_mode = #tpu.pipeline_mode<synchronous>, transform_indices = @transform_18, window_bounds = array<i64: 7, 15>}, {pipeline_mode = #tpu.pipeline_mode<synchronous>, transform_indices = @transform_19, window_bounds = array<i64: 7, 15>}, {pipeline_mode = #tpu.pipeline_mode<synchronous>, transform_indices = @transform_20, window_bounds = array<i64: 240, 112>}, {pipeline_mode = #tpu.pipeline_mode<synchronous>, transform_indices = @transform_21, window_bounds = array<i64: 240, 112>}, {pipeline_mode = #tpu.pipeline_mode<synchronous>, transform_indices = @transform_22, window_bounds = array<i64: 3, 112, 160>}, {pipeline_mode = #tpu.pipeline_mode<synchronous>, transform_indices = @transform_23, window_bounds = array<i64: 1, 160>}, {pipeline_mode = #tpu.pipeline_mode<synchronous>, transform_indices = @transform_24, window_bounds = array<i64: 1, 32>}, {pipeline_mode = #tpu.pipeline_mode<synchronous>, transform_indices = @transform_25, window_bounds = array<i64: 1, 32>}, {pipeline_mode = #tpu.pipeline_mode<synchronous>, transform_indices = @transform_26, window_bounds = array<i64: 160, 32>}, {pipeline_mode = #tpu.pipeline_mode<synchronous>, transform_indices = @transform_27, window_bounds = array<i64: 32, 160>}, {pipeline_mode = #tpu.pipeline_mode<synchronous>, transform_indices = @transform_28, window_bounds = array<i64: 2, 5>}, {pipeline_mode = #tpu.pipeline_mode<synchronous>, transform_indices = @transform_29, window_bounds = array<i64: 2, 5>}, {pipeline_mode = #tpu.pipeline_mode<synchronous>, transform_indices = @transform_30, window_bounds = array<i64: 160, 64>}, {pipeline_mode = #tpu.pipeline_mode<synchronous>, transform_indices = @transform_31, window_bounds = array<i64: 160, 64>}, {pipeline_mode = #tpu.pipeline_mode<synchronous>, transform_indices = @transform_32, window_bounds = array<i64: 2, 64, 96>}, {pipeline_mode = #tpu.pipeline_mode<synchronous>, transform_indices = @transform_33, window_bounds = array<i64: 1, 96>}, {pipeline_mode = #tpu.pipeline_mode<synchronous>, transform_indices = @transform_34, window_bounds = array<i64: 96, 1>}, {pipeline_mode = #tpu.pipeline_mode<synchronous>, transform_indices = @transform_35, window_bounds = array<i64: 1, 1>}, {pipeline_mode = #tpu.pipeline_mode<synchronous>, transform_indices = @transform_36, window_bounds = array<i64: 2, 1>}]} {
    %c0 = arith.constant 0 : index
    %c0_0 = arith.constant 0 : index
    %c0_1 = arith.constant 0 : index
    %0 = vector.load %arg1[%c0, %c0_0, %c0_1] : memref<2x38x38xf32, #tpu.memory_space<vmem>>, vector<1x36x38xf32>
    %1 = vector.shape_cast %0 : vector<1x36x38xf32> to vector<36x38xf32>
    %c0_2 = arith.constant 0 : index
    %c0_3 = arith.constant 0 : index
    %c0_4 = arith.constant 0 : index
    %2 = vector.load %arg2[%c0_2, %c0_3, %c0_4] : memref<3x38x36xf32, #tpu.memory_space<vmem>>, vector<1x38x36xf32>
    %3 = vector.shape_cast %2 : vector<1x38x36xf32> to vector<38x36xf32>
    %cst = arith.constant dense<0.000000e+00> : vector<36x36xf32>
    %4 = tpu.matmul %1, %3, %cst {dimension_numbers = #tpu.dot_dimension_numbers<[1], [0], [0], [1], [0, 0, 1, 1], [], []>} : vector<36x38xf32>, vector<38x36xf32>, vector<36x36xf32> -> vector<36x36xf32>
    %c0_5 = arith.constant 0 : index
    %c1 = arith.constant 1 : index
    %c0_6 = arith.constant 0 : index
    %5 = vector.load %arg1[%c0_5, %c1, %c0_6] : memref<2x38x38xf32, #tpu.memory_space<vmem>>, vector<1x36x38xf32>
    %6 = vector.shape_cast %5 : vector<1x36x38xf32> to vector<36x38xf32>
    %c1_7 = arith.constant 1 : index
    %c0_8 = arith.constant 0 : index
    %c0_9 = arith.constant 0 : index
    %7 = vector.load %arg2[%c1_7, %c0_8, %c0_9] : memref<3x38x36xf32, #tpu.memory_space<vmem>>, vector<1x38x36xf32>
    %8 = vector.shape_cast %7 : vector<1x38x36xf32> to vector<38x36xf32>
    %cst_10 = arith.constant dense<0.000000e+00> : vector<36x36xf32>
    %9 = tpu.matmul %6, %8, %cst_10 {dimension_numbers = #tpu.dot_dimension_numbers<[1], [0], [0], [1], [0, 0, 1, 1], [], []>} : vector<36x38xf32>, vector<38x36xf32>, vector<36x36xf32> -> vector<36x36xf32>
    %10 = arith.addf %4, %9 : vector<36x36xf32>
    %c0_11 = arith.constant 0 : index
    %c2 = arith.constant 2 : index
    %c0_12 = arith.constant 0 : index
    %11 = vector.load %arg1[%c0_11, %c2, %c0_12] : memref<2x38x38xf32, #tpu.memory_space<vmem>>, vector<1x36x38xf32>
    %12 = vector.shape_cast %11 : vector<1x36x38xf32> to vector<36x38xf32>
    %c2_13 = arith.constant 2 : index
    %c0_14 = arith.constant 0 : index
    %c0_15 = arith.constant 0 : index
    %13 = vector.load %arg2[%c2_13, %c0_14, %c0_15] : memref<3x38x36xf32, #tpu.memory_space<vmem>>, vector<1x38x36xf32>
    %14 = vector.shape_cast %13 : vector<1x38x36xf32> to vector<38x36xf32>
    %cst_16 = arith.constant dense<0.000000e+00> : vector<36x36xf32>
    %15 = tpu.matmul %12, %14, %cst_16 {dimension_numbers = #tpu.dot_dimension_numbers<[1], [0], [0], [1], [0, 0, 1, 1], [], []>} : vector<36x38xf32>, vector<38x36xf32>, vector<36x36xf32> -> vector<36x36xf32>
    %16 = arith.addf %10, %15 : vector<36x36xf32>
    %c0_17 = arith.constant 0 : index
    %c0_18 = arith.constant 0 : index
    %c0_19 = arith.constant 0 : index
    %17 = vector.load %arg38[%c0_17, %c0_18, %c0_19] : memref<2x36x36xf32, #tpu.memory_space<vmem>>, vector<1x36x36xf32>
    %18 = vector.shape_cast %17 : vector<1x36x36xf32> to vector<36x36xf32>
    %19 = vector.shape_cast %16 : vector<36x36xf32> to vector<1x36x36xf32>
    tpu.vector_store %arg38[%c0_17, %c0_18, %c0_19], %19 {strides = array<i32>} : memref<2x36x36xf32, #tpu.memory_space<vmem>>, vector<1x36x36xf32>,
    %c1_20 = arith.constant 1 : index
    %c0_21 = arith.constant 0 : index
    %c0_22 = arith.constant 0 : index
    %20 = vector.load %arg1[%c1_20, %c0_21, %c0_22] : memref<2x38x38xf32, #tpu.memory_space<vmem>>, vector<1x36x38xf32>
    %21 = vector.shape_cast %20 : vector<1x36x38xf32> to vector<36x38xf32>
    %c0_23 = arith.constant 0 : index
    %c0_24 = arith.constant 0 : index
    %c0_25 = arith.constant 0 : index
    %22 = vector.load %arg2[%c0_23, %c0_24, %c0_25] : memref<3x38x36xf32, #tpu.memory_space<vmem>>, vector<1x38x36xf32>
    %23 = vector.shape_cast %22 : vector<1x38x36xf32> to vector<38x36xf32>
    %cst_26 = arith.constant dense<0.000000e+00> : vector<36x36xf32>
    %24 = tpu.matmul %21, %23, %cst_26 {dimension_numbers = #tpu.dot_dimension_numbers<[1], [0], [0], [1], [0, 0, 1, 1], [], []>} : vector<36x38xf32>, vector<38x36xf32>, vector<36x36xf32> -> vector<36x36xf32>
    %c1_27 = arith.constant 1 : index
    %c1_28 = arith.constant 1 : index
    %c0_29 = arith.constant 0 : index
    %25 = vector.load %arg1[%c1_27, %c1_28, %c0_29] : memref<2x38x38xf32, #tpu.memory_space<vmem>>, vector<1x36x38xf32>
    %26 = vector.shape_cast %25 : vector<1x36x38xf32> to vector<36x38xf32>
    %c1_30 = arith.constant 1 : index
    %c0_31 = arith.constant 0 : index
    %c0_32 = arith.constant 0 : index
    %27 = vector.load %arg2[%c1_30, %c0_31, %c0_32] : memref<3x38x36xf32, #tpu.memory_space<vmem>>, vector<1x38x36xf32>
    %28 = vector.shape_cast %27 : vector<1x38x36xf32> to vector<38x36xf32>
    %cst_33 = arith.constant dense<0.000000e+00> : vector<36x36xf32>
    %29 = tpu.matmul %26, %28, %cst_33 {dimension_numbers = #tpu.dot_dimension_numbers<[1], [0], [0], [1], [0, 0, 1, 1], [], []>} : vector<36x38xf32>, vector<38x36xf32>, vector<36x36xf32> -> vector<36x36xf32>
    %30 = arith.addf %24, %29 : vector<36x36xf32>
    %c1_34 = arith.constant 1 : index
    %c2_35 = arith.constant 2 : index
    %c0_36 = arith.constant 0 : index
    %31 = vector.load %arg1[%c1_34, %c2_35, %c0_36] : memref<2x38x38xf32, #tpu.memory_space<vmem>>, vector<1x36x38xf32>
    %32 = vector.shape_cast %31 : vector<1x36x38xf32> to vector<36x38xf32>
    %c2_37 = arith.constant 2 : index
    %c0_38 = arith.constant 0 : index
    %c0_39 = arith.constant 0 : index
    %33 = vector.load %arg2[%c2_37, %c0_38, %c0_39] : memref<3x38x36xf32, #tpu.memory_space<vmem>>, vector<1x38x36xf32>
    %34 = vector.shape_cast %33 : vector<1x38x36xf32> to vector<38x36xf32>
    %cst_40 = arith.constant dense<0.000000e+00> : vector<36x36xf32>
    %35 = tpu.matmul %32, %34, %cst_40 {dimension_numbers = #tpu.dot_dimension_numbers<[1], [0], [0], [1], [0, 0, 1, 1], [], []>} : vector<36x38xf32>, vector<38x36xf32>, vector<36x36xf32> -> vector<36x36xf32>
    %36 = arith.addf %30, %35 : vector<36x36xf32>
    %c1_41 = arith.constant 1 : index
    %c0_42 = arith.constant 0 : index
    %c0_43 = arith.constant 0 : index
    %37 = vector.load %arg38[%c1_41, %c0_42, %c0_43] : memref<2x36x36xf32, #tpu.memory_space<vmem>>, vector<1x36x36xf32>
    %38 = vector.shape_cast %37 : vector<1x36x36xf32> to vector<36x36xf32>
    %39 = vector.shape_cast %36 : vector<36x36xf32> to vector<1x36x36xf32>
    tpu.vector_store %arg38[%c1_41, %c0_42, %c0_43], %39 {strides = array<i32>} : memref<2x36x36xf32, #tpu.memory_space<vmem>>, vector<1x36x36xf32>,
    %c0_44 = arith.constant 0 : index
    %c0_45 = arith.constant 0 : index
    %40 = vector.load %arg4[%c0_44, %c0_45] : memref<1x272xf32, #tpu.memory_space<vmem>>, vector<1x272xf32>
    %cst_46 = arith.constant 0.000000e+00 : f32
    %41 = vector.broadcast %cst_46 : f32 to vector<1x272xf32>
    %cst_47 = arith.constant 0.000000e+00 : f32
    %42 = vector.broadcast %cst_47 : f32 to vector<1x272xf32>
    %c0_48 = arith.constant 0 : index
    %c0_49 = arith.constant 0 : index
    %c0_50 = arith.constant 0 : index
    %43 = vector.load %arg38[%c0_48, %c0_49, %c0_50] : memref<2x36x36xf32, #tpu.memory_space<vmem>>, vector<1x34x36xf32>
    %44 = vector.shape_cast %43 : vector<1x34x36xf32> to vector<34x36xf32>
    %c0_51 = arith.constant 0 : index
    %c0_52 = arith.constant 0 : index
    %c0_53 = arith.constant 0 : index
    %45 = vector.load %arg3[%c0_51, %c0_52, %c0_53] : memref<3x36x272xf32, #tpu.memory_space<vmem>>, vector<1x36x272xf32>
    %46 = vector.shape_cast %45 : vector<1x36x272xf32> to vector<36x272xf32>
    %cst_54 = arith.constant dense<0.000000e+00> : vector<34x272xf32>
    %47 = tpu.matmul %44, %46, %cst_54 {dimension_numbers = #tpu.dot_dimension_numbers<[1], [0], [0], [1], [0, 0, 1, 1], [], []>} : vector<34x36xf32>, vector<36x272xf32>, vector<34x272xf32> -> vector<34x272xf32>
    %c0_55 = arith.constant 0 : index
    %c1_56 = arith.constant 1 : index
    %c0_57 = arith.constant 0 : index
    %48 = vector.load %arg38[%c0_55, %c1_56, %c0_57] : memref<2x36x36xf32, #tpu.memory_space<vmem>>, vector<1x34x36xf32>
    %49 = vector.shape_cast %48 : vector<1x34x36xf32> to vector<34x36xf32>
    %c1_58 = arith.constant 1 : index
    %c0_59 = arith.constant 0 : index
    %c0_60 = arith.constant 0 : index
    %50 = vector.load %arg3[%c1_58, %c0_59, %c0_60] : memref<3x36x272xf32, #tpu.memory_space<vmem>>, vector<1x36x272xf32>
    %51 = vector.shape_cast %50 : vector<1x36x272xf32> to vector<36x272xf32>
    %cst_61 = arith.constant dense<0.000000e+00> : vector<34x272xf32>
    %52 = tpu.matmul %49, %51, %cst_61 {dimension_numbers = #tpu.dot_dimension_numbers<[1], [0], [0], [1], [0, 0, 1, 1], [], []>} : vector<34x36xf32>, vector<36x272xf32>, vector<34x272xf32> -> vector<34x272xf32>
    %53 = arith.addf %47, %52 : vector<34x272xf32>
    %c0_62 = arith.constant 0 : index
    %c2_63 = arith.constant 2 : index
    %c0_64 = arith.constant 0 : index
    %54 = vector.load %arg38[%c0_62, %c2_63, %c0_64] : memref<2x36x36xf32, #tpu.memory_space<vmem>>, vector<1x34x36xf32>
    %55 = vector.shape_cast %54 : vector<1x34x36xf32> to vector<34x36xf32>
    %c2_65 = arith.constant 2 : index
    %c0_66 = arith.constant 0 : index
    %c0_67 = arith.constant 0 : index
    %56 = vector.load %arg3[%c2_65, %c0_66, %c0_67] : memref<3x36x272xf32, #tpu.memory_space<vmem>>, vector<1x36x272xf32>
    %57 = vector.shape_cast %56 : vector<1x36x272xf32> to vector<36x272xf32>
    %cst_68 = arith.constant dense<0.000000e+00> : vector<34x272xf32>
    %58 = tpu.matmul %55, %57, %cst_68 {dimension_numbers = #tpu.dot_dimension_numbers<[1], [0], [0], [1], [0, 0, 1, 1], [], []>} : vector<34x36xf32>, vector<36x272xf32>, vector<34x272xf32> -> vector<34x272xf32>
    %59 = arith.addf %53, %58 : vector<34x272xf32>
    %60 = vector.broadcast %40 : vector<1x272xf32> to vector<34x272xf32>
    %61 = arith.addf %59, %60 : vector<34x272xf32>
    %cst_69 = arith.constant dense<0.000000e+00> : vector<272xf32>
    %62 = vector.multi_reduction <add>, %61, %cst_69 [0] : vector<34x272xf32> to vector<272xf32>
    %63 = vector.shape_cast %62 : vector<272xf32> to vector<1x272xf32>
    %64 = arith.addf %41, %63 : vector<1x272xf32>
    %65 = arith.mulf %61, %61 : vector<34x272xf32>
    %cst_70 = arith.constant dense<0.000000e+00> : vector<272xf32>
    %66 = vector.multi_reduction <add>, %65, %cst_70 [0] : vector<34x272xf32> to vector<272xf32>
    %67 = vector.shape_cast %66 : vector<272xf32> to vector<1x272xf32>
    %68 = arith.addf %42, %67 : vector<1x272xf32>
    %c0_71 = arith.constant 0 : index
    %c0_72 = arith.constant 0 : index
    %c0_73 = arith.constant 0 : index
    %69 = vector.load %arg39[%c0_71, %c0_72, %c0_73] : memref<2x34x272xf32, #tpu.memory_space<vmem>>, vector<1x34x272xf32>
    %70 = vector.shape_cast %69 : vector<1x34x272xf32> to vector<34x272xf32>
    %71 = vector.shape_cast %61 : vector<34x272xf32> to vector<1x34x272xf32>
    tpu.vector_store %arg39[%c0_71, %c0_72, %c0_73], %71 {strides = array<i32>} : memref<2x34x272xf32, #tpu.memory_space<vmem>>, vector<1x34x272xf32>,
    %c1_74 = arith.constant 1 : index
    %c0_75 = arith.constant 0 : index
    %c0_76 = arith.constant 0 : index
    %72 = vector.load %arg38[%c1_74, %c0_75, %c0_76] : memref<2x36x36xf32, #tpu.memory_space<vmem>>, vector<1x34x36xf32>
    %73 = vector.shape_cast %72 : vector<1x34x36xf32> to vector<34x36xf32>
    %c0_77 = arith.constant 0 : index
    %c0_78 = arith.constant 0 : index
    %c0_79 = arith.constant 0 : index
    %74 = vector.load %arg3[%c0_77, %c0_78, %c0_79] : memref<3x36x272xf32, #tpu.memory_space<vmem>>, vector<1x36x272xf32>
    %75 = vector.shape_cast %74 : vector<1x36x272xf32> to vector<36x272xf32>
    %cst_80 = arith.constant dense<0.000000e+00> : vector<34x272xf32>
    %76 = tpu.matmul %73, %75, %cst_80 {dimension_numbers = #tpu.dot_dimension_numbers<[1], [0], [0], [1], [0, 0, 1, 1], [], []>} : vector<34x36xf32>, vector<36x272xf32>, vector<34x272xf32> -> vector<34x272xf32>
    %c1_81 = arith.constant 1 : index
    %c1_82 = arith.constant 1 : index
    %c0_83 = arith.constant 0 : index
    %77 = vector.load %arg38[%c1_81, %c1_82, %c0_83] : memref<2x36x36xf32, #tpu.memory_space<vmem>>, vector<1x34x36xf32>
    %78 = vector.shape_cast %77 : vector<1x34x36xf32> to vector<34x36xf32>
    %c1_84 = arith.constant 1 : index
    %c0_85 = arith.constant 0 : index
    %c0_86 = arith.constant 0 : index
    %79 = vector.load %arg3[%c1_84, %c0_85, %c0_86] : memref<3x36x272xf32, #tpu.memory_space<vmem>>, vector<1x36x272xf32>
    %80 = vector.shape_cast %79 : vector<1x36x272xf32> to vector<36x272xf32>
    %cst_87 = arith.constant dense<0.000000e+00> : vector<34x272xf32>
    %81 = tpu.matmul %78, %80, %cst_87 {dimension_numbers = #tpu.dot_dimension_numbers<[1], [0], [0], [1], [0, 0, 1, 1], [], []>} : vector<34x36xf32>, vector<36x272xf32>, vector<34x272xf32> -> vector<34x272xf32>
    %82 = arith.addf %76, %81 : vector<34x272xf32>
    %c1_88 = arith.constant 1 : index
    %c2_89 = arith.constant 2 : index
    %c0_90 = arith.constant 0 : index
    %83 = vector.load %arg38[%c1_88, %c2_89, %c0_90] : memref<2x36x36xf32, #tpu.memory_space<vmem>>, vector<1x34x36xf32>
    %84 = vector.shape_cast %83 : vector<1x34x36xf32> to vector<34x36xf32>
    %c2_91 = arith.constant 2 : index
    %c0_92 = arith.constant 0 : index
    %c0_93 = arith.constant 0 : index
    %85 = vector.load %arg3[%c2_91, %c0_92, %c0_93] : memref<3x36x272xf32, #tpu.memory_space<vmem>>, vector<1x36x272xf32>
    %86 = vector.shape_cast %85 : vector<1x36x272xf32> to vector<36x272xf32>
    %cst_94 = arith.constant dense<0.000000e+00> : vector<34x272xf32>
    %87 = tpu.matmul %84, %86, %cst_94 {dimension_numbers = #tpu.dot_dimension_numbers<[1], [0], [0], [1], [0, 0, 1, 1], [], []>} : vector<34x36xf32>, vector<36x272xf32>, vector<34x272xf32> -> vector<34x272xf32>
    %88 = arith.addf %82, %87 : vector<34x272xf32>
    %89 = vector.broadcast %40 : vector<1x272xf32> to vector<34x272xf32>
    %90 = arith.addf %88, %89 : vector<34x272xf32>
    %cst_95 = arith.constant dense<0.000000e+00> : vector<272xf32>
    %91 = vector.multi_reduction <add>, %90, %cst_95 [0] : vector<34x272xf32> to vector<272xf32>
    %92 = vector.shape_cast %91 : vector<272xf32> to vector<1x272xf32>
    %93 = arith.addf %64, %92 : vector<1x272xf32>
    %94 = arith.mulf %90, %90 : vector<34x272xf32>
    %cst_96 = arith.constant dense<0.000000e+00> : vector<272xf32>
    %95 = vector.multi_reduction <add>, %94, %cst_96 [0] : vector<34x272xf32> to vector<272xf32>
    %96 = vector.shape_cast %95 : vector<272xf32> to vector<1x272xf32>
    %97 = arith.addf %68, %96 : vector<1x272xf32>
    %c1_97 = arith.constant 1 : index
    %c0_98 = arith.constant 0 : index
    %c0_99 = arith.constant 0 : index
    %98 = vector.load %arg39[%c1_97, %c0_98, %c0_99] : memref<2x34x272xf32, #tpu.memory_space<vmem>>, vector<1x34x272xf32>
    %99 = vector.shape_cast %98 : vector<1x34x272xf32> to vector<34x272xf32>
    %100 = vector.shape_cast %90 : vector<34x272xf32> to vector<1x34x272xf32>
    tpu.vector_store %arg39[%c1_97, %c0_98, %c0_99], %100 {strides = array<i32>} : memref<2x34x272xf32, #tpu.memory_space<vmem>>, vector<1x34x272xf32>,
    %c0_100 = arith.constant 0 : index
    %c0_101 = arith.constant 0 : index
    %101 = vector.load %arg7[%c0_100, %c0_101] : memref<272x8xf32, #tpu.memory_space<vmem>>, vector<272x8xf32>
    %cst_102 = arith.constant dense<0.000000e+00> : vector<1x8xf32>
    %102 = tpu.matmul %93, %101, %cst_102 {dimension_numbers = #tpu.dot_dimension_numbers<[1], [0], [0], [1], [0, 0, 1, 1], [], []>} : vector<1x272xf32>, vector<272x8xf32>, vector<1x8xf32> -> vector<1x8xf32>
    %c0_103 = arith.constant 0 : index
    %c0_104 = arith.constant 0 : index
    %103 = vector.load %arg7[%c0_103, %c0_104] : memref<272x8xf32, #tpu.memory_space<vmem>>, vector<272x8xf32>
    %cst_105 = arith.constant dense<0.000000e+00> : vector<1x8xf32>
    %104 = tpu.matmul %97, %103, %cst_105 {dimension_numbers = #tpu.dot_dimension_numbers<[1], [0], [0], [1], [0, 0, 1, 1], [], []>} : vector<1x272xf32>, vector<272x8xf32>, vector<1x8xf32> -> vector<1x8xf32>
    %cst_106 = arith.constant 4.32525965E-4 : f32
    %105 = vector.broadcast %cst_106 : f32 to vector<1x8xf32>
    %106 = arith.mulf %102, %105 : vector<1x8xf32>
    %cst_107 = arith.constant 4.32525965E-4 : f32
    %107 = vector.broadcast %cst_107 : f32 to vector<1x8xf32>
    %108 = arith.mulf %104, %107 : vector<1x8xf32>
    %109 = arith.mulf %106, %106 : vector<1x8xf32>
    %110 = arith.subf %108, %109 : vector<1x8xf32>
    %cst_108 = arith.constant 0.000000e+00 : f32
    %111 = vector.broadcast %cst_108 : f32 to vector<1x8xf32>
    %112 = arith.maximumf %110, %111 : vector<1x8xf32>
    %c0_109 = arith.constant 0 : index
    %c0_110 = arith.constant 0 : index
    %113 = vector.load %arg5[%c0_109, %c0_110] : memref<1x8xf32, #tpu.memory_space<vmem>>, vector<1x8xf32>
    %cst_111 = arith.constant 9.99999974E-6 : f32
    %114 = vector.broadcast %cst_111 : f32 to vector<1x8xf32>
    %115 = arith.addf %112, %114 : vector<1x8xf32>
    %116 = math.rsqrt %115 : vector<1x8xf32>
    %117 = arith.mulf %113, %116 : vector<1x8xf32>
    %c0_112 = arith.constant 0 : index
    %c0_113 = arith.constant 0 : index
    %118 = vector.load %arg6[%c0_112, %c0_113] : memref<1x8xf32, #tpu.memory_space<vmem>>, vector<1x8xf32>
    %119 = arith.mulf %106, %117 : vector<1x8xf32>
    %120 = arith.subf %118, %119 : vector<1x8xf32>
    %c0_114 = arith.constant 0 : index
    %c0_115 = arith.constant 0 : index
    %121 = vector.load %arg8[%c0_114, %c0_115] : memref<8x272xf32, #tpu.memory_space<vmem>>, vector<8x272xf32>
    %cst_116 = arith.constant dense<0.000000e+00> : vector<1x272xf32>
    %122 = tpu.matmul %117, %121, %cst_116 {dimension_numbers = #tpu.dot_dimension_numbers<[1], [0], [0], [1], [0, 0, 1, 1], [], []>} : vector<1x8xf32>, vector<8x272xf32>, vector<1x272xf32> -> vector<1x272xf32>
    %c0_117 = arith.constant 0 : index
    %c0_118 = arith.constant 0 : index
    %123 = vector.load %arg8[%c0_117, %c0_118] : memref<8x272xf32, #tpu.memory_space<vmem>>, vector<8x272xf32>
    %cst_119 = arith.constant dense<0.000000e+00> : vector<1x272xf32>
    %124 = tpu.matmul %120, %123, %cst_119 {dimension_numbers = #tpu.dot_dimension_numbers<[1], [0], [0], [1], [0, 0, 1, 1], [], []>} : vector<1x8xf32>, vector<8x272xf32>, vector<1x272xf32> -> vector<1x272xf32>
    %c0_120 = arith.constant 0 : index
    %c0_121 = arith.constant 0 : index
    %c0_122 = arith.constant 0 : index
    %125 = vector.load %arg39[%c0_120, %c0_121, %c0_122] : memref<2x34x272xf32, #tpu.memory_space<vmem>>, vector<1x34x272xf32>
    %126 = vector.shape_cast %125 : vector<1x34x272xf32> to vector<34x272xf32>
    %127 = vector.broadcast %122 : vector<1x272xf32> to vector<34x272xf32>
    %128 = arith.mulf %126, %127 : vector<34x272xf32>
    %129 = vector.broadcast %124 : vector<1x272xf32> to vector<34x272xf32>
    %130 = arith.addf %128, %129 : vector<34x272xf32>
    %cst_123 = arith.constant 0.000000e+00 : f32
    %131 = vector.broadcast %cst_123 : f32 to vector<34x272xf32>
    %132 = arith.maximumf %130, %131 : vector<34x272xf32>
    %c0_124 = arith.constant 0 : index
    %c0_125 = arith.constant 0 : index
    %133 = vector.load %arg9[%c0_124, %c0_125] : memref<17x34xf32, #tpu.memory_space<vmem>>, vector<17x34xf32>
    %cst_126 = arith.constant dense<0.000000e+00> : vector<17x272xf32>
    %134 = tpu.matmul %133, %132, %cst_126 {dimension_numbers = #tpu.dot_dimension_numbers<[1], [0], [0], [1], [0, 0, 1, 1], [], []>} : vector<17x34xf32>, vector<34x272xf32>, vector<17x272xf32> -> vector<17x272xf32>
    %c0_127 = arith.constant 0 : index
    %c0_128 = arith.constant 0 : index
    %135 = vector.load %arg10[%c0_127, %c0_128] : memref<17x34xf32, #tpu.memory_space<vmem>>, vector<17x34xf32>
    %cst_129 = arith.constant dense<0.000000e+00> : vector<17x272xf32>
    %136 = tpu.matmul %135, %132, %cst_129 {dimension_numbers = #tpu.dot_dimension_numbers<[1], [0], [0], [1], [0, 0, 1, 1], [], []>} : vector<17x34xf32>, vector<34x272xf32>, vector<17x272xf32> -> vector<17x272xf32>
    %137 = arith.maximumf %134, %136 : vector<17x272xf32>
    %c0_130 = arith.constant 0 : index
    %c0_131 = arith.constant 0 : index
    %138 = vector.load %arg11[%c0_130, %c0_131] : memref<272x136xf32, #tpu.memory_space<vmem>>, vector<272x136xf32>
    %cst_132 = arith.constant dense<0.000000e+00> : vector<17x136xf32>
    %139 = tpu.matmul %137, %138, %cst_132 {dimension_numbers = #tpu.dot_dimension_numbers<[1], [0], [0], [1], [0, 0, 1, 1], [], []>} : vector<17x272xf32>, vector<272x136xf32>, vector<17x136xf32> -> vector<17x136xf32>
    %c0_133 = arith.constant 0 : index
    %c0_134 = arith.constant 0 : index
    %140 = vector.load %arg12[%c0_133, %c0_134] : memref<272x136xf32, #tpu.memory_space<vmem>>, vector<272x136xf32>
    %cst_135 = arith.constant dense<0.000000e+00> : vector<17x136xf32>
    %141 = tpu.matmul %137, %140, %cst_135 {dimension_numbers = #tpu.dot_dimension_numbers<[1], [0], [0], [1], [0, 0, 1, 1], [], []>} : vector<17x272xf32>, vector<272x136xf32>, vector<17x136xf32> -> vector<17x136xf32>
    %142 = arith.maximumf %139, %141 : vector<17x136xf32>
    %c1_136 = arith.constant 1 : index
    %c0_137 = arith.constant 0 : index
    %c0_138 = arith.constant 0 : index
    %143 = vector.load %arg39[%c1_136, %c0_137, %c0_138] : memref<2x34x272xf32, #tpu.memory_space<vmem>>, vector<1x34x272xf32>
    %144 = vector.shape_cast %143 : vector<1x34x272xf32> to vector<34x272xf32>
    %145 = vector.broadcast %122 : vector<1x272xf32> to vector<34x272xf32>
    %146 = arith.mulf %144, %145 : vector<34x272xf32>
    %147 = vector.broadcast %124 : vector<1x272xf32> to vector<34x272xf32>
    %148 = arith.addf %146, %147 : vector<34x272xf32>
    %cst_139 = arith.constant 0.000000e+00 : f32
    %149 = vector.broadcast %cst_139 : f32 to vector<34x272xf32>
    %150 = arith.maximumf %148, %149 : vector<34x272xf32>
    %c0_140 = arith.constant 0 : index
    %c0_141 = arith.constant 0 : index
    %151 = vector.load %arg9[%c0_140, %c0_141] : memref<17x34xf32, #tpu.memory_space<vmem>>, vector<17x34xf32>
    %cst_142 = arith.constant dense<0.000000e+00> : vector<17x272xf32>
    %152 = tpu.matmul %151, %150, %cst_142 {dimension_numbers = #tpu.dot_dimension_numbers<[1], [0], [0], [1], [0, 0, 1, 1], [], []>} : vector<17x34xf32>, vector<34x272xf32>, vector<17x272xf32> -> vector<17x272xf32>
    %c0_143 = arith.constant 0 : index
    %c0_144 = arith.constant 0 : index
    %153 = vector.load %arg10[%c0_143, %c0_144] : memref<17x34xf32, #tpu.memory_space<vmem>>, vector<17x34xf32>
    %cst_145 = arith.constant dense<0.000000e+00> : vector<17x272xf32>
    %154 = tpu.matmul %153, %150, %cst_145 {dimension_numbers = #tpu.dot_dimension_numbers<[1], [0], [0], [1], [0, 0, 1, 1], [], []>} : vector<17x34xf32>, vector<34x272xf32>, vector<17x272xf32> -> vector<17x272xf32>
    %155 = arith.maximumf %152, %154 : vector<17x272xf32>
    %c0_146 = arith.constant 0 : index
    %c0_147 = arith.constant 0 : index
    %156 = vector.load %arg11[%c0_146, %c0_147] : memref<272x136xf32, #tpu.memory_space<vmem>>, vector<272x136xf32>
    %cst_148 = arith.constant dense<0.000000e+00> : vector<17x136xf32>
    %157 = tpu.matmul %155, %156, %cst_148 {dimension_numbers = #tpu.dot_dimension_numbers<[1], [0], [0], [1], [0, 0, 1, 1], [], []>} : vector<17x272xf32>, vector<272x136xf32>, vector<17x136xf32> -> vector<17x136xf32>
    %c0_149 = arith.constant 0 : index
    %c0_150 = arith.constant 0 : index
    %158 = vector.load %arg12[%c0_149, %c0_150] : memref<272x136xf32, #tpu.memory_space<vmem>>, vector<272x136xf32>
    %cst_151 = arith.constant dense<0.000000e+00> : vector<17x136xf32>
    %159 = tpu.matmul %155, %158, %cst_151 {dimension_numbers = #tpu.dot_dimension_numbers<[1], [0], [0], [1], [0, 0, 1, 1], [], []>} : vector<17x272xf32>, vector<272x136xf32>, vector<17x136xf32> -> vector<17x136xf32>
    %160 = arith.maximumf %157, %159 : vector<17x136xf32>
    %c0_152 = arith.constant 0 : index
    %c0_153 = arith.constant 0 : index
    %c0_154 = arith.constant 0 : index
    %161 = vector.load %arg40[%c0_152, %c0_153, %c0_154] : memref<2x17x136xf32, #tpu.memory_space<vmem>>, vector<1x17x136xf32>
    %162 = vector.shape_cast %161 : vector<1x17x136xf32> to vector<17x136xf32>
    %163 = vector.shape_cast %142 : vector<17x136xf32> to vector<1x17x136xf32>
    tpu.vector_store %arg40[%c0_152, %c0_153, %c0_154], %163 {strides = array<i32>} : memref<2x17x136xf32, #tpu.memory_space<vmem>>, vector<1x17x136xf32>,
    %c1_155 = arith.constant 1 : index
    %c0_156 = arith.constant 0 : index
    %c0_157 = arith.constant 0 : index
    %164 = vector.load %arg40[%c1_155, %c0_156, %c0_157] : memref<2x17x136xf32, #tpu.memory_space<vmem>>, vector<1x17x136xf32>
    %165 = vector.shape_cast %164 : vector<1x17x136xf32> to vector<17x136xf32>
    %166 = vector.shape_cast %160 : vector<17x136xf32> to vector<1x17x136xf32>
    tpu.vector_store %arg40[%c1_155, %c0_156, %c0_157], %166 {strides = array<i32>} : memref<2x17x136xf32, #tpu.memory_space<vmem>>, vector<1x17x136xf32>,
    %c0_158 = arith.constant 0 : index
    %c0_159 = arith.constant 0 : index
    %167 = vector.load %arg14[%c0_158, %c0_159] : memref<1x240xf32, #tpu.memory_space<vmem>>, vector<1x240xf32>
    %cst_160 = arith.constant 0.000000e+00 : f32
    %168 = vector.broadcast %cst_160 : f32 to vector<1x240xf32>
    %cst_161 = arith.constant 0.000000e+00 : f32
    %169 = vector.broadcast %cst_161 : f32 to vector<1x240xf32>
    %c0_162 = arith.constant 0 : index
    %c0_163 = arith.constant 0 : index
    %c0_164 = arith.constant 0 : index
    %170 = vector.load %arg40[%c0_162, %c0_163, %c0_164] : memref<2x17x136xf32, #tpu.memory_space<vmem>>, vector<1x15x136xf32>
    %171 = vector.shape_cast %170 : vector<1x15x136xf32> to vector<15x136xf32>
    %c0_165 = arith.constant 0 : index
    %c0_166 = arith.constant 0 : index
    %c0_167 = arith.constant 0 : index
    %172 = vector.load %arg13[%c0_165, %c0_166, %c0_167] : memref<3x136x240xf32, #tpu.memory_space<vmem>>, vector<1x136x240xf32>
    %173 = vector.shape_cast %172 : vector<1x136x240xf32> to vector<136x240xf32>
    %cst_168 = arith.constant dense<0.000000e+00> : vector<15x240xf32>
    %174 = tpu.matmul %171, %173, %cst_168 {dimension_numbers = #tpu.dot_dimension_numbers<[1], [0], [0], [1], [0, 0, 1, 1], [], []>} : vector<15x136xf32>, vector<136x240xf32>, vector<15x240xf32> -> vector<15x240xf32>
    %c0_169 = arith.constant 0 : index
    %c1_170 = arith.constant 1 : index
    %c0_171 = arith.constant 0 : index
    %175 = vector.load %arg40[%c0_169, %c1_170, %c0_171] : memref<2x17x136xf32, #tpu.memory_space<vmem>>, vector<1x15x136xf32>
    %176 = vector.shape_cast %175 : vector<1x15x136xf32> to vector<15x136xf32>
    %c1_172 = arith.constant 1 : index
    %c0_173 = arith.constant 0 : index
    %c0_174 = arith.constant 0 : index
    %177 = vector.load %arg13[%c1_172, %c0_173, %c0_174] : memref<3x136x240xf32, #tpu.memory_space<vmem>>, vector<1x136x240xf32>
    %178 = vector.shape_cast %177 : vector<1x136x240xf32> to vector<136x240xf32>
    %cst_175 = arith.constant dense<0.000000e+00> : vector<15x240xf32>
    %179 = tpu.matmul %176, %178, %cst_175 {dimension_numbers = #tpu.dot_dimension_numbers<[1], [0], [0], [1], [0, 0, 1, 1], [], []>} : vector<15x136xf32>, vector<136x240xf32>, vector<15x240xf32> -> vector<15x240xf32>
    %180 = arith.addf %174, %179 : vector<15x240xf32>
    %c0_176 = arith.constant 0 : index
    %c2_177 = arith.constant 2 : index
    %c0_178 = arith.constant 0 : index
    %181 = vector.load %arg40[%c0_176, %c2_177, %c0_178] : memref<2x17x136xf32, #tpu.memory_space<vmem>>, vector<1x15x136xf32>
    %182 = vector.shape_cast %181 : vector<1x15x136xf32> to vector<15x136xf32>
    %c2_179 = arith.constant 2 : index
    %c0_180 = arith.constant 0 : index
    %c0_181 = arith.constant 0 : index
    %183 = vector.load %arg13[%c2_179, %c0_180, %c0_181] : memref<3x136x240xf32, #tpu.memory_space<vmem>>, vector<1x136x240xf32>
    %184 = vector.shape_cast %183 : vector<1x136x240xf32> to vector<136x240xf32>
    %cst_182 = arith.constant dense<0.000000e+00> : vector<15x240xf32>
    %185 = tpu.matmul %182, %184, %cst_182 {dimension_numbers = #tpu.dot_dimension_numbers<[1], [0], [0], [1], [0, 0, 1, 1], [], []>} : vector<15x136xf32>, vector<136x240xf32>, vector<15x240xf32> -> vector<15x240xf32>
    %186 = arith.addf %180, %185 : vector<15x240xf32>
    %187 = vector.broadcast %167 : vector<1x240xf32> to vector<15x240xf32>
    %188 = arith.addf %186, %187 : vector<15x240xf32>
    %cst_183 = arith.constant dense<0.000000e+00> : vector<240xf32>
    %189 = vector.multi_reduction <add>, %188, %cst_183 [0] : vector<15x240xf32> to vector<240xf32>
    %190 = vector.shape_cast %189 : vector<240xf32> to vector<1x240xf32>
    %191 = arith.addf %168, %190 : vector<1x240xf32>
    %192 = arith.mulf %188, %188 : vector<15x240xf32>
    %cst_184 = arith.constant dense<0.000000e+00> : vector<240xf32>
    %193 = vector.multi_reduction <add>, %192, %cst_184 [0] : vector<15x240xf32> to vector<240xf32>
    %194 = vector.shape_cast %193 : vector<240xf32> to vector<1x240xf32>
    %195 = arith.addf %169, %194 : vector<1x240xf32>
    %c1_185 = arith.constant 1 : index
    %c0_186 = arith.constant 0 : index
    %c0_187 = arith.constant 0 : index
    %196 = vector.load %arg40[%c1_185, %c0_186, %c0_187] : memref<2x17x136xf32, #tpu.memory_space<vmem>>, vector<1x15x136xf32>
    %197 = vector.shape_cast %196 : vector<1x15x136xf32> to vector<15x136xf32>
    %c0_188 = arith.constant 0 : index
    %c0_189 = arith.constant 0 : index
    %c0_190 = arith.constant 0 : index
    %198 = vector.load %arg13[%c0_188, %c0_189, %c0_190] : memref<3x136x240xf32, #tpu.memory_space<vmem>>, vector<1x136x240xf32>
    %199 = vector.shape_cast %198 : vector<1x136x240xf32> to vector<136x240xf32>
    %cst_191 = arith.constant dense<0.000000e+00> : vector<15x240xf32>
    %200 = tpu.matmul %197, %199, %cst_191 {dimension_numbers = #tpu.dot_dimension_numbers<[1], [0], [0], [1], [0, 0, 1, 1], [], []>} : vector<15x136xf32>, vector<136x240xf32>, vector<15x240xf32> -> vector<15x240xf32>
    %c1_192 = arith.constant 1 : index
    %c1_193 = arith.constant 1 : index
    %c0_194 = arith.constant 0 : index
    %201 = vector.load %arg40[%c1_192, %c1_193, %c0_194] : memref<2x17x136xf32, #tpu.memory_space<vmem>>, vector<1x15x136xf32>
    %202 = vector.shape_cast %201 : vector<1x15x136xf32> to vector<15x136xf32>
    %c1_195 = arith.constant 1 : index
    %c0_196 = arith.constant 0 : index
    %c0_197 = arith.constant 0 : index
    %203 = vector.load %arg13[%c1_195, %c0_196, %c0_197] : memref<3x136x240xf32, #tpu.memory_space<vmem>>, vector<1x136x240xf32>
    %204 = vector.shape_cast %203 : vector<1x136x240xf32> to vector<136x240xf32>
    %cst_198 = arith.constant dense<0.000000e+00> : vector<15x240xf32>
    %205 = tpu.matmul %202, %204, %cst_198 {dimension_numbers = #tpu.dot_dimension_numbers<[1], [0], [0], [1], [0, 0, 1, 1], [], []>} : vector<15x136xf32>, vector<136x240xf32>, vector<15x240xf32> -> vector<15x240xf32>
    %206 = arith.addf %200, %205 : vector<15x240xf32>
    %c1_199 = arith.constant 1 : index
    %c2_200 = arith.constant 2 : index
    %c0_201 = arith.constant 0 : index
    %207 = vector.load %arg40[%c1_199, %c2_200, %c0_201] : memref<2x17x136xf32, #tpu.memory_space<vmem>>, vector<1x15x136xf32>
    %208 = vector.shape_cast %207 : vector<1x15x136xf32> to vector<15x136xf32>
    %c2_202 = arith.constant 2 : index
    %c0_203 = arith.constant 0 : index
    %c0_204 = arith.constant 0 : index
    %209 = vector.load %arg13[%c2_202, %c0_203, %c0_204] : memref<3x136x240xf32, #tpu.memory_space<vmem>>, vector<1x136x240xf32>
    %210 = vector.shape_cast %209 : vector<1x136x240xf32> to vector<136x240xf32>
    %cst_205 = arith.constant dense<0.000000e+00> : vector<15x240xf32>
    %211 = tpu.matmul %208, %210, %cst_205 {dimension_numbers = #tpu.dot_dimension_numbers<[1], [0], [0], [1], [0, 0, 1, 1], [], []>} : vector<15x136xf32>, vector<136x240xf32>, vector<15x240xf32> -> vector<15x240xf32>
    %212 = arith.addf %206, %211 : vector<15x240xf32>
    %213 = vector.broadcast %167 : vector<1x240xf32> to vector<15x240xf32>
    %214 = arith.addf %212, %213 : vector<15x240xf32>
    %cst_206 = arith.constant dense<0.000000e+00> : vector<240xf32>
    %215 = vector.multi_reduction <add>, %214, %cst_206 [0] : vector<15x240xf32> to vector<240xf32>
    %216 = vector.shape_cast %215 : vector<240xf32> to vector<1x240xf32>
    %217 = arith.addf %191, %216 : vector<1x240xf32>
    %218 = arith.mulf %214, %214 : vector<15x240xf32>
    %cst_207 = arith.constant dense<0.000000e+00> : vector<240xf32>
    %219 = vector.multi_reduction <add>, %218, %cst_207 [0] : vector<15x240xf32> to vector<240xf32>
    %220 = vector.shape_cast %219 : vector<240xf32> to vector<1x240xf32>
    %221 = arith.addf %195, %220 : vector<1x240xf32>
    %c0_208 = arith.constant 0 : index
    %c0_209 = arith.constant 0 : index
    %222 = vector.load %arg17[%c0_208, %c0_209] : memref<240x16xf32, #tpu.memory_space<vmem>>, vector<240x16xf32>
    %cst_210 = arith.constant dense<0.000000e+00> : vector<1x16xf32>
    %223 = tpu.matmul %217, %222, %cst_210 {dimension_numbers = #tpu.dot_dimension_numbers<[1], [0], [0], [1], [0, 0, 1, 1], [], []>} : vector<1x240xf32>, vector<240x16xf32>, vector<1x16xf32> -> vector<1x16xf32>
    %c0_211 = arith.constant 0 : index
    %c0_212 = arith.constant 0 : index
    %224 = vector.load %arg17[%c0_211, %c0_212] : memref<240x16xf32, #tpu.memory_space<vmem>>, vector<240x16xf32>
    %cst_213 = arith.constant dense<0.000000e+00> : vector<1x16xf32>
    %225 = tpu.matmul %221, %224, %cst_213 {dimension_numbers = #tpu.dot_dimension_numbers<[1], [0], [0], [1], [0, 0, 1, 1], [], []>} : vector<1x240xf32>, vector<240x16xf32>, vector<1x16xf32> -> vector<1x16xf32>
    %cst_214 = arith.constant 0.00222222228 : f32
    %226 = vector.broadcast %cst_214 : f32 to vector<1x16xf32>
    %227 = arith.mulf %223, %226 : vector<1x16xf32>
    %cst_215 = arith.constant 0.00222222228 : f32
    %228 = vector.broadcast %cst_215 : f32 to vector<1x16xf32>
    %229 = arith.mulf %225, %228 : vector<1x16xf32>
    %230 = arith.mulf %227, %227 : vector<1x16xf32>
    %231 = arith.subf %229, %230 : vector<1x16xf32>
    %cst_216 = arith.constant 0.000000e+00 : f32
    %232 = vector.broadcast %cst_216 : f32 to vector<1x16xf32>
    %233 = arith.maximumf %231, %232 : vector<1x16xf32>
    %c0_217 = arith.constant 0 : index
    %c0_218 = arith.constant 0 : index
    %234 = vector.load %arg15[%c0_217, %c0_218] : memref<1x16xf32, #tpu.memory_space<vmem>>, vector<1x16xf32>
    %cst_219 = arith.constant 9.99999974E-6 : f32
    %235 = vector.broadcast %cst_219 : f32 to vector<1x16xf32>
    %236 = arith.addf %233, %235 : vector<1x16xf32>
    %237 = math.rsqrt %236 : vector<1x16xf32>
    %238 = arith.mulf %234, %237 : vector<1x16xf32>
    %c0_220 = arith.constant 0 : index
    %c0_221 = arith.constant 0 : index
    %239 = vector.load %arg16[%c0_220, %c0_221] : memref<1x16xf32, #tpu.memory_space<vmem>>, vector<1x16xf32>
    %240 = arith.mulf %227, %238 : vector<1x16xf32>
    %241 = arith.subf %239, %240 : vector<1x16xf32>
    %c0_222 = arith.constant 0 : index
    %c0_223 = arith.constant 0 : index
    %242 = vector.load %arg18[%c0_222, %c0_223] : memref<16x240xf32, #tpu.memory_space<vmem>>, vector<16x240xf32>
    %cst_224 = arith.constant dense<0.000000e+00> : vector<1x240xf32>
    %243 = tpu.matmul %238, %242, %cst_224 {dimension_numbers = #tpu.dot_dimension_numbers<[1], [0], [0], [1], [0, 0, 1, 1], [], []>} : vector<1x16xf32>, vector<16x240xf32>, vector<1x240xf32> -> vector<1x240xf32>
    %c0_225 = arith.constant 0 : index
    %c0_226 = arith.constant 0 : index
    %244 = vector.load %arg18[%c0_225, %c0_226] : memref<16x240xf32, #tpu.memory_space<vmem>>, vector<16x240xf32>
    %cst_227 = arith.constant dense<0.000000e+00> : vector<1x240xf32>
    %245 = tpu.matmul %241, %244, %cst_227 {dimension_numbers = #tpu.dot_dimension_numbers<[1], [0], [0], [1], [0, 0, 1, 1], [], []>} : vector<1x16xf32>, vector<16x240xf32>, vector<1x240xf32> -> vector<1x240xf32>
    %246 = vector.broadcast %243 : vector<1x240xf32> to vector<15x240xf32>
    %247 = arith.mulf %188, %246 : vector<15x240xf32>
    %248 = vector.broadcast %245 : vector<1x240xf32> to vector<15x240xf32>
    %249 = arith.addf %247, %248 : vector<15x240xf32>
    %cst_228 = arith.constant 0.000000e+00 : f32
    %250 = vector.broadcast %cst_228 : f32 to vector<15x240xf32>
    %251 = arith.maximumf %249, %250 : vector<15x240xf32>
    %c0_229 = arith.constant 0 : index
    %c0_230 = arith.constant 0 : index
    %252 = vector.load %arg19[%c0_229, %c0_230] : memref<7x15xf32, #tpu.memory_space<vmem>>, vector<7x15xf32>
    %cst_231 = arith.constant dense<0.000000e+00> : vector<7x240xf32>
    %253 = tpu.matmul %252, %251, %cst_231 {dimension_numbers = #tpu.dot_dimension_numbers<[1], [0], [0], [1], [0, 0, 1, 1], [], []>} : vector<7x15xf32>, vector<15x240xf32>, vector<7x240xf32> -> vector<7x240xf32>
    %c0_232 = arith.constant 0 : index
    %c0_233 = arith.constant 0 : index
    %254 = vector.load %arg20[%c0_232, %c0_233] : memref<7x15xf32, #tpu.memory_space<vmem>>, vector<7x15xf32>
    %cst_234 = arith.constant dense<0.000000e+00> : vector<7x240xf32>
    %255 = tpu.matmul %254, %251, %cst_234 {dimension_numbers = #tpu.dot_dimension_numbers<[1], [0], [0], [1], [0, 0, 1, 1], [], []>} : vector<7x15xf32>, vector<15x240xf32>, vector<7x240xf32> -> vector<7x240xf32>
    %256 = arith.maximumf %253, %255 : vector<7x240xf32>
    %c0_235 = arith.constant 0 : index
    %c0_236 = arith.constant 0 : index
    %257 = vector.load %arg21[%c0_235, %c0_236] : memref<240x112xf32, #tpu.memory_space<vmem>>, vector<240x112xf32>
    %cst_237 = arith.constant dense<0.000000e+00> : vector<7x112xf32>
    %258 = tpu.matmul %256, %257, %cst_237 {dimension_numbers = #tpu.dot_dimension_numbers<[1], [0], [0], [1], [0, 0, 1, 1], [], []>} : vector<7x240xf32>, vector<240x112xf32>, vector<7x112xf32> -> vector<7x112xf32>
    %c0_238 = arith.constant 0 : index
    %c0_239 = arith.constant 0 : index
    %259 = vector.load %arg22[%c0_238, %c0_239] : memref<240x112xf32, #tpu.memory_space<vmem>>, vector<240x112xf32>
    %cst_240 = arith.constant dense<0.000000e+00> : vector<7x112xf32>
    %260 = tpu.matmul %256, %259, %cst_240 {dimension_numbers = #tpu.dot_dimension_numbers<[1], [0], [0], [1], [0, 0, 1, 1], [], []>} : vector<7x240xf32>, vector<240x112xf32>, vector<7x112xf32> -> vector<7x112xf32>
    %261 = arith.maximumf %258, %260 : vector<7x112xf32>
    %262 = vector.broadcast %243 : vector<1x240xf32> to vector<15x240xf32>
    %263 = arith.mulf %214, %262 : vector<15x240xf32>
    %264 = vector.broadcast %245 : vector<1x240xf32> to vector<15x240xf32>
    %265 = arith.addf %263, %264 : vector<15x240xf32>
    %cst_241 = arith.constant 0.000000e+00 : f32
    %266 = vector.broadcast %cst_241 : f32 to vector<15x240xf32>
    %267 = arith.maximumf %265, %266 : vector<15x240xf32>
    %c0_242 = arith.constant 0 : index
    %c0_243 = arith.constant 0 : index
    %268 = vector.load %arg19[%c0_242, %c0_243] : memref<7x15xf32, #tpu.memory_space<vmem>>, vector<7x15xf32>
    %cst_244 = arith.constant dense<0.000000e+00> : vector<7x240xf32>
    %269 = tpu.matmul %268, %267, %cst_244 {dimension_numbers = #tpu.dot_dimension_numbers<[1], [0], [0], [1], [0, 0, 1, 1], [], []>} : vector<7x15xf32>, vector<15x240xf32>, vector<7x240xf32> -> vector<7x240xf32>
    %c0_245 = arith.constant 0 : index
    %c0_246 = arith.constant 0 : index
    %270 = vector.load %arg20[%c0_245, %c0_246] : memref<7x15xf32, #tpu.memory_space<vmem>>, vector<7x15xf32>
    %cst_247 = arith.constant dense<0.000000e+00> : vector<7x240xf32>
    %271 = tpu.matmul %270, %267, %cst_247 {dimension_numbers = #tpu.dot_dimension_numbers<[1], [0], [0], [1], [0, 0, 1, 1], [], []>} : vector<7x15xf32>, vector<15x240xf32>, vector<7x240xf32> -> vector<7x240xf32>
    %272 = arith.maximumf %269, %271 : vector<7x240xf32>
    %c0_248 = arith.constant 0 : index
    %c0_249 = arith.constant 0 : index
    %273 = vector.load %arg21[%c0_248, %c0_249] : memref<240x112xf32, #tpu.memory_space<vmem>>, vector<240x112xf32>
    %cst_250 = arith.constant dense<0.000000e+00> : vector<7x112xf32>
    %274 = tpu.matmul %272, %273, %cst_250 {dimension_numbers = #tpu.dot_dimension_numbers<[1], [0], [0], [1], [0, 0, 1, 1], [], []>} : vector<7x240xf32>, vector<240x112xf32>, vector<7x112xf32> -> vector<7x112xf32>
    %c0_251 = arith.constant 0 : index
    %c0_252 = arith.constant 0 : index
    %275 = vector.load %arg22[%c0_251, %c0_252] : memref<240x112xf32, #tpu.memory_space<vmem>>, vector<240x112xf32>
    %cst_253 = arith.constant dense<0.000000e+00> : vector<7x112xf32>
    %276 = tpu.matmul %272, %275, %cst_253 {dimension_numbers = #tpu.dot_dimension_numbers<[1], [0], [0], [1], [0, 0, 1, 1], [], []>} : vector<7x240xf32>, vector<240x112xf32>, vector<7x112xf32> -> vector<7x112xf32>
    %277 = arith.maximumf %274, %276 : vector<7x112xf32>
    %c0_254 = arith.constant 0 : index
    %c0_255 = arith.constant 0 : index
    %c0_256 = arith.constant 0 : index
    %278 = vector.load %arg41[%c0_254, %c0_255, %c0_256] : memref<2x7x112xf32, #tpu.memory_space<vmem>>, vector<1x7x112xf32>
    %279 = vector.shape_cast %278 : vector<1x7x112xf32> to vector<7x112xf32>
    %280 = vector.shape_cast %261 : vector<7x112xf32> to vector<1x7x112xf32>
    tpu.vector_store %arg41[%c0_254, %c0_255, %c0_256], %280 {strides = array<i32>} : memref<2x7x112xf32, #tpu.memory_space<vmem>>, vector<1x7x112xf32>,
    %c1_257 = arith.constant 1 : index
    %c0_258 = arith.constant 0 : index
    %c0_259 = arith.constant 0 : index
    %281 = vector.load %arg41[%c1_257, %c0_258, %c0_259] : memref<2x7x112xf32, #tpu.memory_space<vmem>>, vector<1x7x112xf32>
    %282 = vector.shape_cast %281 : vector<1x7x112xf32> to vector<7x112xf32>
    %283 = vector.shape_cast %277 : vector<7x112xf32> to vector<1x7x112xf32>
    tpu.vector_store %arg41[%c1_257, %c0_258, %c0_259], %283 {strides = array<i32>} : memref<2x7x112xf32, #tpu.memory_space<vmem>>, vector<1x7x112xf32>,
    %c0_260 = arith.constant 0 : index
    %c0_261 = arith.constant 0 : index
    %284 = vector.load %arg24[%c0_260, %c0_261] : memref<1x160xf32, #tpu.memory_space<vmem>>, vector<1x160xf32>
    %cst_262 = arith.constant 0.000000e+00 : f32
    %285 = vector.broadcast %cst_262 : f32 to vector<1x160xf32>
    %cst_263 = arith.constant 0.000000e+00 : f32
    %286 = vector.broadcast %cst_263 : f32 to vector<1x160xf32>
    %c0_264 = arith.constant 0 : index
    %c0_265 = arith.constant 0 : index
    %c0_266 = arith.constant 0 : index
    %287 = vector.load %arg41[%c0_264, %c0_265, %c0_266] : memref<2x7x112xf32, #tpu.memory_space<vmem>>, vector<1x5x112xf32>
    %288 = vector.shape_cast %287 : vector<1x5x112xf32> to vector<5x112xf32>
    %c0_267 = arith.constant 0 : index
    %c0_268 = arith.constant 0 : index
    %c0_269 = arith.constant 0 : index
    %289 = vector.load %arg23[%c0_267, %c0_268, %c0_269] : memref<3x112x160xf32, #tpu.memory_space<vmem>>, vector<1x112x160xf32>
    %290 = vector.shape_cast %289 : vector<1x112x160xf32> to vector<112x160xf32>
    %cst_270 = arith.constant dense<0.000000e+00> : vector<5x160xf32>
    %291 = tpu.matmul %288, %290, %cst_270 {dimension_numbers = #tpu.dot_dimension_numbers<[1], [0], [0], [1], [0, 0, 1, 1], [], []>} : vector<5x112xf32>, vector<112x160xf32>, vector<5x160xf32> -> vector<5x160xf32>
    %c0_271 = arith.constant 0 : index
    %c1_272 = arith.constant 1 : index
    %c0_273 = arith.constant 0 : index
    %292 = vector.load %arg41[%c0_271, %c1_272, %c0_273] : memref<2x7x112xf32, #tpu.memory_space<vmem>>, vector<1x5x112xf32>
    %293 = vector.shape_cast %292 : vector<1x5x112xf32> to vector<5x112xf32>
    %c1_274 = arith.constant 1 : index
    %c0_275 = arith.constant 0 : index
    %c0_276 = arith.constant 0 : index
    %294 = vector.load %arg23[%c1_274, %c0_275, %c0_276] : memref<3x112x160xf32, #tpu.memory_space<vmem>>, vector<1x112x160xf32>
    %295 = vector.shape_cast %294 : vector<1x112x160xf32> to vector<112x160xf32>
    %cst_277 = arith.constant dense<0.000000e+00> : vector<5x160xf32>
    %296 = tpu.matmul %293, %295, %cst_277 {dimension_numbers = #tpu.dot_dimension_numbers<[1], [0], [0], [1], [0, 0, 1, 1], [], []>} : vector<5x112xf32>, vector<112x160xf32>, vector<5x160xf32> -> vector<5x160xf32>
    %297 = arith.addf %291, %296 : vector<5x160xf32>
    %c0_278 = arith.constant 0 : index
    %c2_279 = arith.constant 2 : index
    %c0_280 = arith.constant 0 : index
    %298 = vector.load %arg41[%c0_278, %c2_279, %c0_280] : memref<2x7x112xf32, #tpu.memory_space<vmem>>, vector<1x5x112xf32>
    %299 = vector.shape_cast %298 : vector<1x5x112xf32> to vector<5x112xf32>
    %c2_281 = arith.constant 2 : index
    %c0_282 = arith.constant 0 : index
    %c0_283 = arith.constant 0 : index
    %300 = vector.load %arg23[%c2_281, %c0_282, %c0_283] : memref<3x112x160xf32, #tpu.memory_space<vmem>>, vector<1x112x160xf32>
    %301 = vector.shape_cast %300 : vector<1x112x160xf32> to vector<112x160xf32>
    %cst_284 = arith.constant dense<0.000000e+00> : vector<5x160xf32>
    %302 = tpu.matmul %299, %301, %cst_284 {dimension_numbers = #tpu.dot_dimension_numbers<[1], [0], [0], [1], [0, 0, 1, 1], [], []>} : vector<5x112xf32>, vector<112x160xf32>, vector<5x160xf32> -> vector<5x160xf32>
    %303 = arith.addf %297, %302 : vector<5x160xf32>
    %304 = vector.broadcast %284 : vector<1x160xf32> to vector<5x160xf32>
    %305 = arith.addf %303, %304 : vector<5x160xf32>
    %cst_285 = arith.constant dense<0.000000e+00> : vector<160xf32>
    %306 = vector.multi_reduction <add>, %305, %cst_285 [0] : vector<5x160xf32> to vector<160xf32>
    %307 = vector.shape_cast %306 : vector<160xf32> to vector<1x160xf32>
    %308 = arith.addf %285, %307 : vector<1x160xf32>
    %309 = arith.mulf %305, %305 : vector<5x160xf32>
    %cst_286 = arith.constant dense<0.000000e+00> : vector<160xf32>
    %310 = vector.multi_reduction <add>, %309, %cst_286 [0] : vector<5x160xf32> to vector<160xf32>
    %311 = vector.shape_cast %310 : vector<160xf32> to vector<1x160xf32>
    %312 = arith.addf %286, %311 : vector<1x160xf32>
    %c1_287 = arith.constant 1 : index
    %c0_288 = arith.constant 0 : index
    %c0_289 = arith.constant 0 : index
    %313 = vector.load %arg41[%c1_287, %c0_288, %c0_289] : memref<2x7x112xf32, #tpu.memory_space<vmem>>, vector<1x5x112xf32>
    %314 = vector.shape_cast %313 : vector<1x5x112xf32> to vector<5x112xf32>
    %c0_290 = arith.constant 0 : index
    %c0_291 = arith.constant 0 : index
    %c0_292 = arith.constant 0 : index
    %315 = vector.load %arg23[%c0_290, %c0_291, %c0_292] : memref<3x112x160xf32, #tpu.memory_space<vmem>>, vector<1x112x160xf32>
    %316 = vector.shape_cast %315 : vector<1x112x160xf32> to vector<112x160xf32>
    %cst_293 = arith.constant dense<0.000000e+00> : vector<5x160xf32>
    %317 = tpu.matmul %314, %316, %cst_293 {dimension_numbers = #tpu.dot_dimension_numbers<[1], [0], [0], [1], [0, 0, 1, 1], [], []>} : vector<5x112xf32>, vector<112x160xf32>, vector<5x160xf32> -> vector<5x160xf32>
    %c1_294 = arith.constant 1 : index
    %c1_295 = arith.constant 1 : index
    %c0_296 = arith.constant 0 : index
    %318 = vector.load %arg41[%c1_294, %c1_295, %c0_296] : memref<2x7x112xf32, #tpu.memory_space<vmem>>, vector<1x5x112xf32>
    %319 = vector.shape_cast %318 : vector<1x5x112xf32> to vector<5x112xf32>
    %c1_297 = arith.constant 1 : index
    %c0_298 = arith.constant 0 : index
    %c0_299 = arith.constant 0 : index
    %320 = vector.load %arg23[%c1_297, %c0_298, %c0_299] : memref<3x112x160xf32, #tpu.memory_space<vmem>>, vector<1x112x160xf32>
    %321 = vector.shape_cast %320 : vector<1x112x160xf32> to vector<112x160xf32>
    %cst_300 = arith.constant dense<0.000000e+00> : vector<5x160xf32>
    %322 = tpu.matmul %319, %321, %cst_300 {dimension_numbers = #tpu.dot_dimension_numbers<[1], [0], [0], [1], [0, 0, 1, 1], [], []>} : vector<5x112xf32>, vector<112x160xf32>, vector<5x160xf32> -> vector<5x160xf32>
    %323 = arith.addf %317, %322 : vector<5x160xf32>
    %c1_301 = arith.constant 1 : index
    %c2_302 = arith.constant 2 : index
    %c0_303 = arith.constant 0 : index
    %324 = vector.load %arg41[%c1_301, %c2_302, %c0_303] : memref<2x7x112xf32, #tpu.memory_space<vmem>>, vector<1x5x112xf32>
    %325 = vector.shape_cast %324 : vector<1x5x112xf32> to vector<5x112xf32>
    %c2_304 = arith.constant 2 : index
    %c0_305 = arith.constant 0 : index
    %c0_306 = arith.constant 0 : index
    %326 = vector.load %arg23[%c2_304, %c0_305, %c0_306] : memref<3x112x160xf32, #tpu.memory_space<vmem>>, vector<1x112x160xf32>
    %327 = vector.shape_cast %326 : vector<1x112x160xf32> to vector<112x160xf32>
    %cst_307 = arith.constant dense<0.000000e+00> : vector<5x160xf32>
    %328 = tpu.matmul %325, %327, %cst_307 {dimension_numbers = #tpu.dot_dimension_numbers<[1], [0], [0], [1], [0, 0, 1, 1], [], []>} : vector<5x112xf32>, vector<112x160xf32>, vector<5x160xf32> -> vector<5x160xf32>
    %329 = arith.addf %323, %328 : vector<5x160xf32>
    %330 = vector.broadcast %284 : vector<1x160xf32> to vector<5x160xf32>
    %331 = arith.addf %329, %330 : vector<5x160xf32>
    %cst_308 = arith.constant dense<0.000000e+00> : vector<160xf32>
    %332 = vector.multi_reduction <add>, %331, %cst_308 [0] : vector<5x160xf32> to vector<160xf32>
    %333 = vector.shape_cast %332 : vector<160xf32> to vector<1x160xf32>
    %334 = arith.addf %308, %333 : vector<1x160xf32>
    %335 = arith.mulf %331, %331 : vector<5x160xf32>
    %cst_309 = arith.constant dense<0.000000e+00> : vector<160xf32>
    %336 = vector.multi_reduction <add>, %335, %cst_309 [0] : vector<5x160xf32> to vector<160xf32>
    %337 = vector.shape_cast %336 : vector<160xf32> to vector<1x160xf32>
    %338 = arith.addf %312, %337 : vector<1x160xf32>
    %c0_310 = arith.constant 0 : index
    %c0_311 = arith.constant 0 : index
    %339 = vector.load %arg27[%c0_310, %c0_311] : memref<160x32xf32, #tpu.memory_space<vmem>>, vector<160x32xf32>
    %cst_312 = arith.constant dense<0.000000e+00> : vector<1x32xf32>
    %340 = tpu.matmul %334, %339, %cst_312 {dimension_numbers = #tpu.dot_dimension_numbers<[1], [0], [0], [1], [0, 0, 1, 1], [], []>} : vector<1x160xf32>, vector<160x32xf32>, vector<1x32xf32> -> vector<1x32xf32>
    %c0_313 = arith.constant 0 : index
    %c0_314 = arith.constant 0 : index
    %341 = vector.load %arg27[%c0_313, %c0_314] : memref<160x32xf32, #tpu.memory_space<vmem>>, vector<160x32xf32>
    %cst_315 = arith.constant dense<0.000000e+00> : vector<1x32xf32>
    %342 = tpu.matmul %338, %341, %cst_315 {dimension_numbers = #tpu.dot_dimension_numbers<[1], [0], [0], [1], [0, 0, 1, 1], [], []>} : vector<1x160xf32>, vector<160x32xf32>, vector<1x32xf32> -> vector<1x32xf32>
    %cst_316 = arith.constant 2.000000e-02 : f32
    %343 = vector.broadcast %cst_316 : f32 to vector<1x32xf32>
    %344 = arith.mulf %340, %343 : vector<1x32xf32>
    %cst_317 = arith.constant 2.000000e-02 : f32
    %345 = vector.broadcast %cst_317 : f32 to vector<1x32xf32>
    %346 = arith.mulf %342, %345 : vector<1x32xf32>
    %347 = arith.mulf %344, %344 : vector<1x32xf32>
    %348 = arith.subf %346, %347 : vector<1x32xf32>
    %cst_318 = arith.constant 0.000000e+00 : f32
    %349 = vector.broadcast %cst_318 : f32 to vector<1x32xf32>
    %350 = arith.maximumf %348, %349 : vector<1x32xf32>
    %c0_319 = arith.constant 0 : index
    %c0_320 = arith.constant 0 : index
    %351 = vector.load %arg25[%c0_319, %c0_320] : memref<1x32xf32, #tpu.memory_space<vmem>>, vector<1x32xf32>
    %cst_321 = arith.constant 9.99999974E-6 : f32
    %352 = vector.broadcast %cst_321 : f32 to vector<1x32xf32>
    %353 = arith.addf %350, %352 : vector<1x32xf32>
    %354 = math.rsqrt %353 : vector<1x32xf32>
    %355 = arith.mulf %351, %354 : vector<1x32xf32>
    %c0_322 = arith.constant 0 : index
    %c0_323 = arith.constant 0 : index
    %356 = vector.load %arg26[%c0_322, %c0_323] : memref<1x32xf32, #tpu.memory_space<vmem>>, vector<1x32xf32>
    %357 = arith.mulf %344, %355 : vector<1x32xf32>
    %358 = arith.subf %356, %357 : vector<1x32xf32>
    %c0_324 = arith.constant 0 : index
    %c0_325 = arith.constant 0 : index
    %359 = vector.load %arg28[%c0_324, %c0_325] : memref<32x160xf32, #tpu.memory_space<vmem>>, vector<32x160xf32>
    %cst_326 = arith.constant dense<0.000000e+00> : vector<1x160xf32>
    %360 = tpu.matmul %355, %359, %cst_326 {dimension_numbers = #tpu.dot_dimension_numbers<[1], [0], [0], [1], [0, 0, 1, 1], [], []>} : vector<1x32xf32>, vector<32x160xf32>, vector<1x160xf32> -> vector<1x160xf32>
    %c0_327 = arith.constant 0 : index
    %c0_328 = arith.constant 0 : index
    %361 = vector.load %arg28[%c0_327, %c0_328] : memref<32x160xf32, #tpu.memory_space<vmem>>, vector<32x160xf32>
    %cst_329 = arith.constant dense<0.000000e+00> : vector<1x160xf32>
    %362 = tpu.matmul %358, %361, %cst_329 {dimension_numbers = #tpu.dot_dimension_numbers<[1], [0], [0], [1], [0, 0, 1, 1], [], []>} : vector<1x32xf32>, vector<32x160xf32>, vector<1x160xf32> -> vector<1x160xf32>
    %363 = vector.broadcast %360 : vector<1x160xf32> to vector<5x160xf32>
    %364 = arith.mulf %305, %363 : vector<5x160xf32>
    %365 = vector.broadcast %362 : vector<1x160xf32> to vector<5x160xf32>
    %366 = arith.addf %364, %365 : vector<5x160xf32>
    %cst_330 = arith.constant 0.000000e+00 : f32
    %367 = vector.broadcast %cst_330 : f32 to vector<5x160xf32>
    %368 = arith.maximumf %366, %367 : vector<5x160xf32>
    %c0_331 = arith.constant 0 : index
    %c0_332 = arith.constant 0 : index
    %369 = vector.load %arg29[%c0_331, %c0_332] : memref<2x5xf32, #tpu.memory_space<vmem>>, vector<2x5xf32>
    %cst_333 = arith.constant dense<0.000000e+00> : vector<2x160xf32>
    %370 = tpu.matmul %369, %368, %cst_333 {dimension_numbers = #tpu.dot_dimension_numbers<[1], [0], [0], [1], [0, 0, 1, 1], [], []>} : vector<2x5xf32>, vector<5x160xf32>, vector<2x160xf32> -> vector<2x160xf32>
    %c0_334 = arith.constant 0 : index
    %c0_335 = arith.constant 0 : index
    %371 = vector.load %arg30[%c0_334, %c0_335] : memref<2x5xf32, #tpu.memory_space<vmem>>, vector<2x5xf32>
    %cst_336 = arith.constant dense<0.000000e+00> : vector<2x160xf32>
    %372 = tpu.matmul %371, %368, %cst_336 {dimension_numbers = #tpu.dot_dimension_numbers<[1], [0], [0], [1], [0, 0, 1, 1], [], []>} : vector<2x5xf32>, vector<5x160xf32>, vector<2x160xf32> -> vector<2x160xf32>
    %373 = arith.maximumf %370, %372 : vector<2x160xf32>
    %c0_337 = arith.constant 0 : index
    %c0_338 = arith.constant 0 : index
    %374 = vector.load %arg31[%c0_337, %c0_338] : memref<160x64xf32, #tpu.memory_space<vmem>>, vector<160x64xf32>
    %cst_339 = arith.constant dense<0.000000e+00> : vector<2x64xf32>
    %375 = tpu.matmul %373, %374, %cst_339 {dimension_numbers = #tpu.dot_dimension_numbers<[1], [0], [0], [1], [0, 0, 1, 1], [], []>} : vector<2x160xf32>, vector<160x64xf32>, vector<2x64xf32> -> vector<2x64xf32>
    %c0_340 = arith.constant 0 : index
    %c0_341 = arith.constant 0 : index
    %376 = vector.load %arg32[%c0_340, %c0_341] : memref<160x64xf32, #tpu.memory_space<vmem>>, vector<160x64xf32>
    %cst_342 = arith.constant dense<0.000000e+00> : vector<2x64xf32>
    %377 = tpu.matmul %373, %376, %cst_342 {dimension_numbers = #tpu.dot_dimension_numbers<[1], [0], [0], [1], [0, 0, 1, 1], [], []>} : vector<2x160xf32>, vector<160x64xf32>, vector<2x64xf32> -> vector<2x64xf32>
    %378 = arith.maximumf %375, %377 : vector<2x64xf32>
    %379 = vector.broadcast %360 : vector<1x160xf32> to vector<5x160xf32>
    %380 = arith.mulf %331, %379 : vector<5x160xf32>
    %381 = vector.broadcast %362 : vector<1x160xf32> to vector<5x160xf32>
    %382 = arith.addf %380, %381 : vector<5x160xf32>
    %cst_343 = arith.constant 0.000000e+00 : f32
    %383 = vector.broadcast %cst_343 : f32 to vector<5x160xf32>
    %384 = arith.maximumf %382, %383 : vector<5x160xf32>
    %c0_344 = arith.constant 0 : index
    %c0_345 = arith.constant 0 : index
    %385 = vector.load %arg29[%c0_344, %c0_345] : memref<2x5xf32, #tpu.memory_space<vmem>>, vector<2x5xf32>
    %cst_346 = arith.constant dense<0.000000e+00> : vector<2x160xf32>
    %386 = tpu.matmul %385, %384, %cst_346 {dimension_numbers = #tpu.dot_dimension_numbers<[1], [0], [0], [1], [0, 0, 1, 1], [], []>} : vector<2x5xf32>, vector<5x160xf32>, vector<2x160xf32> -> vector<2x160xf32>
    %c0_347 = arith.constant 0 : index
    %c0_348 = arith.constant 0 : index
    %387 = vector.load %arg30[%c0_347, %c0_348] : memref<2x5xf32, #tpu.memory_space<vmem>>, vector<2x5xf32>
    %cst_349 = arith.constant dense<0.000000e+00> : vector<2x160xf32>
    %388 = tpu.matmul %387, %384, %cst_349 {dimension_numbers = #tpu.dot_dimension_numbers<[1], [0], [0], [1], [0, 0, 1, 1], [], []>} : vector<2x5xf32>, vector<5x160xf32>, vector<2x160xf32> -> vector<2x160xf32>
    %389 = arith.maximumf %386, %388 : vector<2x160xf32>
    %c0_350 = arith.constant 0 : index
    %c0_351 = arith.constant 0 : index
    %390 = vector.load %arg31[%c0_350, %c0_351] : memref<160x64xf32, #tpu.memory_space<vmem>>, vector<160x64xf32>
    %cst_352 = arith.constant dense<0.000000e+00> : vector<2x64xf32>
    %391 = tpu.matmul %389, %390, %cst_352 {dimension_numbers = #tpu.dot_dimension_numbers<[1], [0], [0], [1], [0, 0, 1, 1], [], []>} : vector<2x160xf32>, vector<160x64xf32>, vector<2x64xf32> -> vector<2x64xf32>
    %c0_353 = arith.constant 0 : index
    %c0_354 = arith.constant 0 : index
    %392 = vector.load %arg32[%c0_353, %c0_354] : memref<160x64xf32, #tpu.memory_space<vmem>>, vector<160x64xf32>
    %cst_355 = arith.constant dense<0.000000e+00> : vector<2x64xf32>
    %393 = tpu.matmul %389, %392, %cst_355 {dimension_numbers = #tpu.dot_dimension_numbers<[1], [0], [0], [1], [0, 0, 1, 1], [], []>} : vector<2x160xf32>, vector<160x64xf32>, vector<2x64xf32> -> vector<2x64xf32>
    %394 = arith.maximumf %391, %393 : vector<2x64xf32>
    %c0_356 = arith.constant 0 : index
    %c0_357 = arith.constant 0 : index
    %395 = vector.load %arg34[%c0_356, %c0_357] : memref<1x96xf32, #tpu.memory_space<vmem>>, vector<1x96xf32>
    %396 = vector.extract_strided_slice %378 {offsets = [0, 0], sizes = [1, 64], strides = [1, 1]} : vector<2x64xf32> to vector<1x64xf32>
    %c0_358 = arith.constant 0 : index
    %c0_359 = arith.constant 0 : index
    %c0_360 = arith.constant 0 : index
    %397 = vector.load %arg33[%c0_358, %c0_359, %c0_360] : memref<2x64x96xf32, #tpu.memory_space<vmem>>, vector<1x64x96xf32>
    %398 = vector.shape_cast %397 : vector<1x64x96xf32> to vector<64x96xf32>
    %cst_361 = arith.constant dense<0.000000e+00> : vector<1x96xf32>
    %399 = tpu.matmul %396, %398, %cst_361 {dimension_numbers = #tpu.dot_dimension_numbers<[1], [0], [0], [1], [0, 0, 1, 1], [], []>} : vector<1x64xf32>, vector<64x96xf32>, vector<1x96xf32> -> vector<1x96xf32>
    %400 = arith.addf %395, %399 : vector<1x96xf32>
    %401 = vector.extract_strided_slice %378 {offsets = [1, 0], sizes = [1, 64], strides = [1, 1]} : vector<2x64xf32> to vector<1x64xf32>
    %c1_362 = arith.constant 1 : index
    %c0_363 = arith.constant 0 : index
    %c0_364 = arith.constant 0 : index
    %402 = vector.load %arg33[%c1_362, %c0_363, %c0_364] : memref<2x64x96xf32, #tpu.memory_space<vmem>>, vector<1x64x96xf32>
    %403 = vector.shape_cast %402 : vector<1x64x96xf32> to vector<64x96xf32>
    %cst_365 = arith.constant dense<0.000000e+00> : vector<1x96xf32>
    %404 = tpu.matmul %401, %403, %cst_365 {dimension_numbers = #tpu.dot_dimension_numbers<[1], [0], [0], [1], [0, 0, 1, 1], [], []>} : vector<1x64xf32>, vector<64x96xf32>, vector<1x96xf32> -> vector<1x96xf32>
    %405 = arith.addf %400, %404 : vector<1x96xf32>
    %c0_366 = arith.constant 0 : index
    %c0_367 = arith.constant 0 : index
    %406 = vector.load %arg35[%c0_366, %c0_367] : memref<96x1xf32, #tpu.memory_space<vmem>>, vector<96x1xf32>
    %cst_368 = arith.constant dense<0.000000e+00> : vector<1x1xf32>
    %407 = tpu.matmul %405, %406, %cst_368 {dimension_numbers = #tpu.dot_dimension_numbers<[1], [0], [0], [1], [0, 0, 1, 1], [], []>} : vector<1x96xf32>, vector<96x1xf32>, vector<1x1xf32> -> vector<1x1xf32>
    %c0_369 = arith.constant 0 : index
    %c0_370 = arith.constant 0 : index
    %408 = vector.load %arg36[%c0_369, %c0_370] : memref<1x1xf32, #tpu.memory_space<vmem>>, vector<1x1xf32>
    %409 = arith.addf %407, %408 : vector<1x1xf32>
    %410 = arith.negf %409 : vector<1x1xf32>
    %411 = math.exp %410 : vector<1x1xf32>
    %cst_371 = arith.constant 1.000000e+00 : f32
    %412 = vector.broadcast %cst_371 : f32 to vector<1x1xf32>
    %413 = arith.addf %412, %411 : vector<1x1xf32>
    %414 = arith.divf %412, %413 : vector<1x1xf32>
    %c0_372 = arith.constant 0 : index
    %c0_373 = arith.constant 0 : index
    %415 = vector.load %arg37[%c0_372, %c0_373] : memref<2x1xf32, #tpu.memory_space<vmem>>, vector<1x1xf32>
    tpu.vector_store %arg37[%c0_372, %c0_373], %414 {strides = array<i32>} : memref<2x1xf32, #tpu.memory_space<vmem>>, vector<1x1xf32>,
    %c0_374 = arith.constant 0 : index
    %c0_375 = arith.constant 0 : index
    %416 = vector.load %arg34[%c0_374, %c0_375] : memref<1x96xf32, #tpu.memory_space<vmem>>, vector<1x96xf32>
    %417 = vector.extract_strided_slice %394 {offsets = [0, 0], sizes = [1, 64], strides = [1, 1]} : vector<2x64xf32> to vector<1x64xf32>
    %c0_376 = arith.constant 0 : index
    %c0_377 = arith.constant 0 : index
    %c0_378 = arith.constant 0 : index
    %418 = vector.load %arg33[%c0_376, %c0_377, %c0_378] : memref<2x64x96xf32, #tpu.memory_space<vmem>>, vector<1x64x96xf32>
    %419 = vector.shape_cast %418 : vector<1x64x96xf32> to vector<64x96xf32>
    %cst_379 = arith.constant dense<0.000000e+00> : vector<1x96xf32>
    %420 = tpu.matmul %417, %419, %cst_379 {dimension_numbers = #tpu.dot_dimension_numbers<[1], [0], [0], [1], [0, 0, 1, 1], [], []>} : vector<1x64xf32>, vector<64x96xf32>, vector<1x96xf32> -> vector<1x96xf32>
    %421 = arith.addf %416, %420 : vector<1x96xf32>
    %422 = vector.extract_strided_slice %394 {offsets = [1, 0], sizes = [1, 64], strides = [1, 1]} : vector<2x64xf32> to vector<1x64xf32>
    %c1_380 = arith.constant 1 : index
    %c0_381 = arith.constant 0 : index
    %c0_382 = arith.constant 0 : index
    %423 = vector.load %arg33[%c1_380, %c0_381, %c0_382] : memref<2x64x96xf32, #tpu.memory_space<vmem>>, vector<1x64x96xf32>
    %424 = vector.shape_cast %423 : vector<1x64x96xf32> to vector<64x96xf32>
    %cst_383 = arith.constant dense<0.000000e+00> : vector<1x96xf32>
    %425 = tpu.matmul %422, %424, %cst_383 {dimension_numbers = #tpu.dot_dimension_numbers<[1], [0], [0], [1], [0, 0, 1, 1], [], []>} : vector<1x64xf32>, vector<64x96xf32>, vector<1x96xf32> -> vector<1x96xf32>
    %426 = arith.addf %421, %425 : vector<1x96xf32>
    %c0_384 = arith.constant 0 : index
    %c0_385 = arith.constant 0 : index
    %427 = vector.load %arg35[%c0_384, %c0_385] : memref<96x1xf32, #tpu.memory_space<vmem>>, vector<96x1xf32>
    %cst_386 = arith.constant dense<0.000000e+00> : vector<1x1xf32>
    %428 = tpu.matmul %426, %427, %cst_386 {dimension_numbers = #tpu.dot_dimension_numbers<[1], [0], [0], [1], [0, 0, 1, 1], [], []>} : vector<1x96xf32>, vector<96x1xf32>, vector<1x1xf32> -> vector<1x1xf32>
    %c0_387 = arith.constant 0 : index
    %c0_388 = arith.constant 0 : index
    %429 = vector.load %arg36[%c0_387, %c0_388] : memref<1x1xf32, #tpu.memory_space<vmem>>, vector<1x1xf32>
    %430 = arith.addf %428, %429 : vector<1x1xf32>
    %431 = arith.negf %430 : vector<1x1xf32>
    %432 = math.exp %431 : vector<1x1xf32>
    %cst_389 = arith.constant 1.000000e+00 : f32
    %433 = vector.broadcast %cst_389 : f32 to vector<1x1xf32>
    %434 = arith.addf %433, %432 : vector<1x1xf32>
    %435 = arith.divf %433, %434 : vector<1x1xf32>
    %c1_390 = arith.constant 1 : index
    %c0_391 = arith.constant 0 : index
    %436 = vector.load %arg37[%c1_390, %c0_391] : memref<2x1xf32, #tpu.memory_space<vmem>>, vector<1x1xf32>
    tpu.vector_store %arg37[%c1_390, %c0_391], %435 {strides = array<i32>} : memref<2x1xf32, #tpu.memory_space<vmem>>, vector<1x1xf32>,
    return
  }
  func.func @transform_0(%arg0: i32) -> (i32, i32, i32) {
    %c0_i32 = arith.constant 0 : i32
    %c0_i32_0 = arith.constant 0 : i32
    %c0_i32_1 = arith.constant 0 : i32
    %c0_i32_2 = arith.constant 0 : i32
    return %c0_i32, %c0_i32_0, %c0_i32_1 : i32, i32, i32
  }
  func.func @transform_1(%arg0: i32) -> (i32, i32, i32) {
    %c0_i32 = arith.constant 0 : i32
    %c0_i32_0 = arith.constant 0 : i32
    %c0_i32_1 = arith.constant 0 : i32
    %c0_i32_2 = arith.constant 0 : i32
    return %c0_i32, %c0_i32_0, %c0_i32_1 : i32, i32, i32
  }
  func.func @transform_2(%arg0: i32) -> (i32, i32, i32) {
    %c0_i32 = arith.constant 0 : i32
    %c0_i32_0 = arith.constant 0 : i32
    %c0_i32_1 = arith.constant 0 : i32
    %c0_i32_2 = arith.constant 0 : i32
    return %c0_i32, %c0_i32_0, %c0_i32_1 : i32, i32, i32
  }
  func.func @transform_3(%arg0: i32) -> (i32, i32) {
    %c0_i32 = arith.constant 0 : i32
    %c0_i32_0 = arith.constant 0 : i32
    %c0_i32_1 = arith.constant 0 : i32
    return %c0_i32, %c0_i32_0 : i32, i32
  }
  func.func @transform_4(%arg0: i32) -> (i32, i32) {
    %c0_i32 = arith.constant 0 : i32
    %c0_i32_0 = arith.constant 0 : i32
    %c0_i32_1 = arith.constant 0 : i32
    return %c0_i32, %c0_i32_0 : i32, i32
  }
  func.func @transform_5(%arg0: i32) -> (i32, i32) {
    %c0_i32 = arith.constant 0 : i32
    %c0_i32_0 = arith.constant 0 : i32
    %c0_i32_1 = arith.constant 0 : i32
    return %c0_i32, %c0_i32_0 : i32, i32
  }
  func.func @transform_6(%arg0: i32) -> (i32, i32) {
    %c0_i32 = arith.constant 0 : i32
    %c0_i32_0 = arith.constant 0 : i32
    %c0_i32_1 = arith.constant 0 : i32
    return %c0_i32, %c0_i32_0 : i32, i32
  }
  func.func @transform_7(%arg0: i32) -> (i32, i32) {
    %c0_i32 = arith.constant 0 : i32
    %c0_i32_0 = arith.constant 0 : i32
    %c0_i32_1 = arith.constant 0 : i32
    return %c0_i32, %c0_i32_0 : i32, i32
  }
  func.func @transform_8(%arg0: i32) -> (i32, i32) {
    %c0_i32 = arith.constant 0 : i32
    %c0_i32_0 = arith.constant 0 : i32
    %c0_i32_1 = arith.constant 0 : i32
    return %c0_i32, %c0_i32_0 : i32, i32
  }
  func.func @transform_9(%arg0: i32) -> (i32, i32) {
    %c0_i32 = arith.constant 0 : i32
    %c0_i32_0 = arith.constant 0 : i32
    %c0_i32_1 = arith.constant 0 : i32
    return %c0_i32, %c0_i32_0 : i32, i32
  }
  func.func @transform_10(%arg0: i32) -> (i32, i32) {
    %c0_i32 = arith.constant 0 : i32
    %c0_i32_0 = arith.constant 0 : i32
    %c0_i32_1 = arith.constant 0 : i32
    return %c0_i32, %c0_i32_0 : i32, i32
  }
  func.func @transform_11(%arg0: i32) -> (i32, i32) {
    %c0_i32 = arith.constant 0 : i32
    %c0_i32_0 = arith.constant 0 : i32
    %c0_i32_1 = arith.constant 0 : i32
    return %c0_i32, %c0_i32_0 : i32, i32
  }
  func.func @transform_12(%arg0: i32) -> (i32, i32, i32) {
    %c0_i32 = arith.constant 0 : i32
    %c0_i32_0 = arith.constant 0 : i32
    %c0_i32_1 = arith.constant 0 : i32
    %c0_i32_2 = arith.constant 0 : i32
    return %c0_i32, %c0_i32_0, %c0_i32_1 : i32, i32, i32
  }
  func.func @transform_13(%arg0: i32) -> (i32, i32) {
    %c0_i32 = arith.constant 0 : i32
    %c0_i32_0 = arith.constant 0 : i32
    %c0_i32_1 = arith.constant 0 : i32
    return %c0_i32, %c0_i32_0 : i32, i32
  }
  func.func @transform_14(%arg0: i32) -> (i32, i32) {
    %c0_i32 = arith.constant 0 : i32
    %c0_i32_0 = arith.constant 0 : i32
    %c0_i32_1 = arith.constant 0 : i32
    return %c0_i32, %c0_i32_0 : i32, i32
  }
  func.func @transform_15(%arg0: i32) -> (i32, i32) {
    %c0_i32 = arith.constant 0 : i32
    %c0_i32_0 = arith.constant 0 : i32
    %c0_i32_1 = arith.constant 0 : i32
    return %c0_i32, %c0_i32_0 : i32, i32
  }
  func.func @transform_16(%arg0: i32) -> (i32, i32) {
    %c0_i32 = arith.constant 0 : i32
    %c0_i32_0 = arith.constant 0 : i32
    %c0_i32_1 = arith.constant 0 : i32
    return %c0_i32, %c0_i32_0 : i32, i32
  }
  func.func @transform_17(%arg0: i32) -> (i32, i32) {
    %c0_i32 = arith.constant 0 : i32
    %c0_i32_0 = arith.constant 0 : i32
    %c0_i32_1 = arith.constant 0 : i32
    return %c0_i32, %c0_i32_0 : i32, i32
  }
  func.func @transform_18(%arg0: i32) -> (i32, i32) {
    %c0_i32 = arith.constant 0 : i32
    %c0_i32_0 = arith.constant 0 : i32
    %c0_i32_1 = arith.constant 0 : i32
    return %c0_i32, %c0_i32_0 : i32, i32
  }
  func.func @transform_19(%arg0: i32) -> (i32, i32) {
    %c0_i32 = arith.constant 0 : i32
    %c0_i32_0 = arith.constant 0 : i32
    %c0_i32_1 = arith.constant 0 : i32
    return %c0_i32, %c0_i32_0 : i32, i32
  }
  func.func @transform_20(%arg0: i32) -> (i32, i32) {
    %c0_i32 = arith.constant 0 : i32
    %c0_i32_0 = arith.constant 0 : i32
    %c0_i32_1 = arith.constant 0 : i32
    return %c0_i32, %c0_i32_0 : i32, i32
  }
  func.func @transform_21(%arg0: i32) -> (i32, i32) {
    %c0_i32 = arith.constant 0 : i32
    %c0_i32_0 = arith.constant 0 : i32
    %c0_i32_1 = arith.constant 0 : i32
    return %c0_i32, %c0_i32_0 : i32, i32
  }
  func.func @transform_22(%arg0: i32) -> (i32, i32, i32) {
    %c0_i32 = arith.constant 0 : i32
    %c0_i32_0 = arith.constant 0 : i32
    %c0_i32_1 = arith.constant 0 : i32
    %c0_i32_2 = arith.constant 0 : i32
    return %c0_i32, %c0_i32_0, %c0_i32_1 : i32, i32, i32
  }
  func.func @transform_23(%arg0: i32) -> (i32, i32) {
    %c0_i32 = arith.constant 0 : i32
    %c0_i32_0 = arith.constant 0 : i32
    %c0_i32_1 = arith.constant 0 : i32
    return %c0_i32, %c0_i32_0 : i32, i32
  }
  func.func @transform_24(%arg0: i32) -> (i32, i32) {
    %c0_i32 = arith.constant 0 : i32
    %c0_i32_0 = arith.constant 0 : i32
    %c0_i32_1 = arith.constant 0 : i32
    return %c0_i32, %c0_i32_0 : i32, i32
  }
  func.func @transform_25(%arg0: i32) -> (i32, i32) {
    %c0_i32 = arith.constant 0 : i32
    %c0_i32_0 = arith.constant 0 : i32
    %c0_i32_1 = arith.constant 0 : i32
    return %c0_i32, %c0_i32_0 : i32, i32
  }
  func.func @transform_26(%arg0: i32) -> (i32, i32) {
    %c0_i32 = arith.constant 0 : i32
    %c0_i32_0 = arith.constant 0 : i32
    %c0_i32_1 = arith.constant 0 : i32
    return %c0_i32, %c0_i32_0 : i32, i32
  }
  func.func @transform_27(%arg0: i32) -> (i32, i32) {
    %c0_i32 = arith.constant 0 : i32
    %c0_i32_0 = arith.constant 0 : i32
    %c0_i32_1 = arith.constant 0 : i32
    return %c0_i32, %c0_i32_0 : i32, i32
  }
  func.func @transform_28(%arg0: i32) -> (i32, i32) {
    %c0_i32 = arith.constant 0 : i32
    %c0_i32_0 = arith.constant 0 : i32
    %c0_i32_1 = arith.constant 0 : i32
    return %c0_i32, %c0_i32_0 : i32, i32
  }
  func.func @transform_29(%arg0: i32) -> (i32, i32) {
    %c0_i32 = arith.constant 0 : i32
    %c0_i32_0 = arith.constant 0 : i32
    %c0_i32_1 = arith.constant 0 : i32
    return %c0_i32, %c0_i32_0 : i32, i32
  }
  func.func @transform_30(%arg0: i32) -> (i32, i32) {
    %c0_i32 = arith.constant 0 : i32
    %c0_i32_0 = arith.constant 0 : i32
    %c0_i32_1 = arith.constant 0 : i32
    return %c0_i32, %c0_i32_0 : i32, i32
  }
  func.func @transform_31(%arg0: i32) -> (i32, i32) {
    %c0_i32 = arith.constant 0 : i32
    %c0_i32_0 = arith.constant 0 : i32
    %c0_i32_1 = arith.constant 0 : i32
    return %c0_i32, %c0_i32_0 : i32, i32
  }
  func.func @transform_32(%arg0: i32) -> (i32, i32, i32) {
    %c0_i32 = arith.constant 0 : i32
    %c0_i32_0 = arith.constant 0 : i32
    %c0_i32_1 = arith.constant 0 : i32
    %c0_i32_2 = arith.constant 0 : i32
    return %c0_i32, %c0_i32_0, %c0_i32_1 : i32, i32, i32
  }
  func.func @transform_33(%arg0: i32) -> (i32, i32) {
    %c0_i32 = arith.constant 0 : i32
    %c0_i32_0 = arith.constant 0 : i32
    %c0_i32_1 = arith.constant 0 : i32
    return %c0_i32, %c0_i32_0 : i32, i32
  }
  func.func @transform_34(%arg0: i32) -> (i32, i32) {
    %c0_i32 = arith.constant 0 : i32
    %c0_i32_0 = arith.constant 0 : i32
    %c0_i32_1 = arith.constant 0 : i32
    return %c0_i32, %c0_i32_0 : i32, i32
  }
  func.func @transform_35(%arg0: i32) -> (i32, i32) {
    %c0_i32 = arith.constant 0 : i32
    %c0_i32_0 = arith.constant 0 : i32
    %c0_i32_1 = arith.constant 0 : i32
    return %c0_i32, %c0_i32_0 : i32, i32
  }
  func.func @transform_36(%arg0: i32) -> (i32, i32) {
    %c0_i32 = arith.constant 0 : i32
    %c0_i32_0 = arith.constant 0 : i32
    %c0_i32_1 = arith.constant 0 : i32
    return %c0_i32, %c0_i32_0 : i32, i32
  }
}

</mosaic_0001>

<bundles_post_ra>
// kernel: network_forward.1
= control target key start
LH: loop header
LB: loop body
LE: loop exit
PB: predicated region body
PF: predicated region fallthrough
CT: control target
= control target key end

     0   :  { %s6797_s3 = smov 1   ;;  %vm189_vm0 = vcmask 1045504   ;;  %vm173_vm1 = vcmask 310272   ;;  %s6798_s10 = smov 2   ;;  %vm597_vm2 = vcmask 1043456   ;;  %vm341_vm3 = vcmask 293888   ;;  %s10713_s0 = inlined_call_operand.smem [shape: u32[37], index: -1, kind: input, shape index: {}] }
   0x1   :  { %s6841_s6 = sld [smem:[%s10713_s0 + %s6797_s3]]   ;;  %vm346_vm4 = vcmask 289792   ;;  %s6799_s14 = smov 3   ;;  %vm1004_vm5 = vcmask 1041408   ;;  %vm1024_vm6 = vcmask 130048   ;;  %vm1032_vm7 = vcmask 123904  }
   0x2   :  { %s6846_s9 = sld [smem:[%s10713_s0]]   ;;  %s6800_s18 = smov 6   ;;  %vm1859_vm11 = vcmask 64512   ;;  %vm2055_vm12 = vcmask 277504   ;;  %vm3280_vm13 = vcmask 57344   ;;  %vm3371_vm14 = vcmask 1046528  }
   0x3   :  { %s6912_s13 = sld [smem:[%s10713_s0 + %s6798_s10]]   ;;  %s6801_s22 = smov 7   ;;  %vm3752_vm15 = vcmask 915456  }
   0x4   :  { %s6158_s17 = sld [smem:[%s10713_s0 + %s6799_s14]]   ;;  %s6802_s26 = smov 4  }
   0x5   :  { %s7428_s21 = sld [smem:[%s10713_s0 + %s6800_s18]]   ;;  %s6803_s30 = smov 5  }
   0x6   :  { %s6162_s25 = sld [smem:[%s10713_s0 + %s6801_s22]]   ;;  %s6804_s4 = smov 8  }
   0x7   :  { %v6213_v0 = vld [vmem:[%s6841_s6 + $0x70] sm:$0x3f]  ;;  %v6212_v1 = vld [vmem:[%s6841_s6 + $0x68] sm:$0xff]  ;;  %v161_v3 = vld [vmem:[%s6841_s6 + $0x20] sm:$0x3f]  ;;  %s6159_s29 = sld [smem:[%s10713_s0 + %s6802_s26]]   ;;  %s6805_s8 = smov 9  }
   0x8   :  { %v6196_v2 = vld [vmem:[%s6841_s6 + $0x48] sm:$0x3f]  ;;  %6214 = vmatpush.msk.msra.mxu2 %vm189_vm0, %v6213_v0  ;;  %v6195_v4 = vld [vmem:[%s6841_s6 + $0x40] sm:$0xff]  ;;  %6203 = vmatpush.msk.msra.mxu1 %vm189_vm0, %v161_v3  ;;  %v160_v6 = vld [vmem:[%s6841_s6 + $0x18] sm:$0xff]  ;;  %s6160_s3 = sld [smem:[%s10713_s0 + %s6803_s30]]   ;;  %s6806_s12 = smov 10  }
   0x9   :  { %6197 = vmatpush.msk.msra.mxu0 %vm189_vm0, %v6196_v2  ;;  %v6211_v5 = vld [vmem:[%s6841_s6 + $0x60] sm:$0xff]  ;;  %v6194_v7 = vld [vmem:[%s6841_s6 + $0x38] sm:$0xff]  ;;  %v159_v8 = vld [vmem:[%s6841_s6 + $0x10] sm:$0xff]  ;;  %s7663_s7 = sld [smem:[%s10713_s0 + %s6804_s4]]   ;;  %s6807_s16 = smov 11  }
   0xa   :  { %316 = vmatpush.msra.mxu2 %v6212_v1  ;;  %255 = vmatpush.msra.mxu1 %v160_v6  ;;  %v6210_v9 = vld [vmem:[%s6841_s6 + $0x58] sm:$0xff]  ;;  %v6193_v10 = vld [vmem:[%s6841_s6 + $0x30] sm:$0xff]  ;;  %v158_v11 = vld [vmem:[%s6841_s6 + $0x8] sm:$0xff]  ;;  %s7699_s11 = sld [smem:[%s10713_s0 + %s6805_s8]]   ;;  %s6808_s20 = smov 12  }
   0xb   :  { %205 = vmatpush.msra.mxu0 %v6195_v4  ;;  %v6209_v12 = vld [vmem:[%s6841_s6 + $0x50] sm:$0xff]  ;;  %v6192_v13 = vld [vmem:[%s6841_s6 + $0x28] sm:$0xff]  ;;  %v157_v15 = vld [vmem:[%s6841_s6] sm:$0xff]  ;;  %s7760_s15 = sld [smem:[%s10713_s0 + %s6806_s12]]   ;;  %s6809_s24 = smov 16  }
   0xc   :  { %317 = vmatpush.msra.mxu2 %v6211_v5  ;;  %256 = vmatpush.msra.mxu1 %v159_v8  ;;  %v275_v14 = vld [vmem:[%s6846_s9 + $0x2] sm:$0xff]  ;;  %v6256_v19 = vld [vmem:[%s6841_s6 + $0x70] sm:$0x3f]  ;;  %v278_v29 = vld [vmem:[%s6846_s9 + $0x1a] sm:$0xff]  ;;  %s7862_s19 = sld [smem:[%s10713_s0 + %s6807_s16]]   ;;  %s6810_s28 = smov 13  }
   0xd   :  { %206 = vmatpush.msra.mxu0 %v6194_v7  ;;  %v162_v16 = vld [vmem:[%s6846_s9 + $0x1] sm:$0xff]  ;;  %v276_v21 = vld [vmem:[%s6846_s9 + $0xa] sm:$0xff]  ;;  %v277_v25 = vld [vmem:[%s6846_s9 + $0x12] sm:$0xff]  ;;  %s8682_s23 = sld [smem:[%s10713_s0 + %s6808_s20]]   ;;  %s6811_s2 = smov 17  }
   0xe   :  { %318 = vmatpush.msra.mxu2 %v6210_v9  ;;  %257 = vmatpush.msra.mxu1 %v158_v11  ;;  %v152_v17 = vld [vmem:[%s6846_s9] sm:$0xff]  ;;  %v6234_v20 = vld [vmem:[%s6841_s6 + $0x48] sm:$0x3f]  ;;  %v164_v26 = vld [vmem:[%s6846_s9 + $0x11] sm:$0xff]  ;;  %s9393_s27 = sld [smem:[%s10713_s0 + %s6809_s24]]   ;;  %s6813_s10 = smov 15  }
   0xf   :  { %207 = vmatpush.msra.mxu0 %v6193_v10  ;;  %v358_v18 = vld [vmem:[%s6841_s6 + $0x20] sm:$0x3f]  ;;  %6235 = vmatpush.msk.msra.mxu3 %vm189_vm0, %v6234_v20  ;;  %v163_v22 = vld [vmem:[%s6846_s9 + $0x9] sm:$0xff]  ;;  %v6226_v28 = vld [vmem:[%s6846_s9 + $0x31] sm:$0xff]  ;;  %s6168_s1 = sld [smem:[%s10713_s0 + %s6810_s28]]   ;;  %s6812_s6 = smov 14  }
  0x10   :  { %319 = vmatpush.msra.mxu2 %v6209_v12  ;;  %258 = vmatpush.msra.mxu1 %v157_v15  ;;  %v153_v23 = vld [vmem:[%s6846_s9 + $0x8] sm:$0xff]  ;;  %v154_v27 = vld [vmem:[%s6846_s9 + $0x10] sm:$0xff]  ;;  %v165_v30 = vld [vmem:[%s6846_s9 + $0x19] sm:$0xff]  ;;  %s6172_s5 = sld [smem:[%s10713_s0 + %s6811_s2]]   ;;  %s6814_s14 = smov 18  }
  0x11   :  { %208 = vmatpush.msra.mxu0 %v6192_v13  ;;  %6215 = vmatmul.msk.f32.vlgmr.msra.gmra.mxu2 %vm173_vm1, %v275_v14  ;;  %v6225_v24 = vld [vmem:[%s6846_s9 + $0x29] sm:$0xff]  ;;  %v155_v31 = vld [vmem:[%s6846_s9 + $0x18] sm:$0xff]  ;;  %v279_v33 = vld [vmem:[%s6846_s9 + $0x22] sm:$0xf]  ;;  %s6815_s18 = smov 19   ;;  %s6816_s22 = smov 20  }
  0x12   :  { %6198 = vmatmul.msk.f32.vlgmr.msra.gmra.mxu0 %vm173_vm1, %v162_v16  ;;  %6204 = vmatmul.msk.f32.vlgmr.msra.gmra.mxu1 %vm173_vm1, %v152_v17  ;;  %v6227_v32 = vld [vmem:[%s6846_s9 + $0x39] sm:$0xff]  ;;  %v166_v34 = vld [vmem:[%s6846_s9 + $0x21] sm:$0xf]  ;;  %v6220_v37 = vld [vmem:[%s6846_s9 + $0x28] sm:$0xff]  ;;  %s6817_s26 = smov 21   ;;  %s6818_s30 = smov 22  }
  0x13   :  { %6241 = vmatpush.msk.msrb.mxu0 %vm189_vm0, %v358_v18  ;;  %6257 = vmatpush.msk.msrb.mxu1 %vm189_vm0, %v6256_v19  ;;  %v156_v35 = vld [vmem:[%s6846_s9 + $0x20] sm:$0xf]  ;;  %v6247_v38 = vld [vmem:[%s6846_s9 + $0x2a] sm:$0xff]  ;;  %v6275_v39 = vld [vmem:[%s6912_s13 + $0xd8] sm:$0xf]  ;;  %s6819_s4 = smov 26  }
  0x14   :  { %399 = vmatpush.msra.mxu3 %v6195_v4  ;;  %v6228_v36 = vld [vmem:[%s6846_s9 + $0x41] sm:$0xff]  ;;  %v6229_v41 = vld [vmem:[%s6846_s9 + $0x49] sm:$0xf]  ;;  %6278 = vmatpush.msk.msrb.mxu2 %vm597_vm2, %v6275_v39  ;;  %v6221_v44 = vld [vmem:[%s6846_s9 + $0x30] sm:$0xff]  ;;  %s6820_s8 = smov 23   ;;  %s6821_s12 = smov 27  }
  0x15   :  { %449 = vmatpush.msrb.mxu0 %v160_v6  ;;  %509 = vmatpush.msrb.mxu1 %v6212_v1  ;;  %v6921_v40 = vld [vmem:[%s6912_s13 + $0xc0] sm:$0xff]  ;;  %v6928_v43 = vld [vmem:[%s6912_s13 + $0xc8] sm:$0xff]  ;;  %v6248_v45 = vld [vmem:[%s6846_s9 + $0x32] sm:$0xff]  ;;  %s6822_s16 = smov 24   ;;  %s6823_s20 = smov 25  }
  0x16   :  { %400 = vmatpush.msra.mxu3 %v6194_v7  ;;  %v6276_v42 = vld [vmem:[%s6912_s13 + $0xe0] sm:$0xf]  ;;  %619 = vmatpush.msrb.mxu2 %v6921_v40  ;;  %v6222_v46 = vld [vmem:[%s6846_s9 + $0x38] sm:$0xff]  ;;  %v6224_v50 = vld [vmem:[%s6846_s9 + $0x48] sm:$0xf]  ;;  %s6824_s24 = smov 30  }
  0x17   :  { %450 = vmatpush.msrb.mxu0 %v159_v8  ;;  %510 = vmatpush.msrb.mxu1 %v6211_v5  ;;  %v6249_v47 = vld [vmem:[%s6846_s9 + $0x3a] sm:$0xff]  ;;  %v6250_v49 = vld [vmem:[%s6846_s9 + $0x42] sm:$0xff]  ;;  %v6251_v51 = vld [vmem:[%s6846_s9 + $0x4a] sm:$0xf]  ;;  %s6825_s28 = smov 28   ;;  %s6826_s2 = smov 29  }
  0x18   :  { %401 = vmatpush.msra.mxu3 %v6193_v10  ;;  %v6223_v48 = vld [vmem:[%s6846_s9 + $0x40] sm:$0xff]  ;;  %v6952_v53 = vld [vmem:[%s6912_s13 + $0xa8] sm:$0xff]  ;;  %v6955_v54 = vld [vmem:[%s6912_s13 + $0xb0] sm:$0xff]  ;;  %s6169_s9 = sld [smem:[%s10713_s0 + %s6812_s6]]   ;;  %s6827_s6 = smov 31  }
  0x19   :  { %6216 = vmatmul.msk.f32.gmra.mxu2 %vm173_vm1, %v276_v21  ;;  %451 = vmatpush.msrb.mxu0 %v158_v11  ;;  %v558_v52 = vld [vmem:[%s6912_s13 + $0x60] sm:$0xf]  ;;  %v6958_v55 = vld [vmem:[%s6912_s13 + $0x48] sm:$0xff]  ;;  %v6963_v56 = vld [vmem:[%s6912_s13 + $0x30] sm:$0xff] }
  0x1a   :  { %6199 = vmatmul.msk.f32.gmra.mxu0 %vm173_vm1, %v163_v22  ;;  %6205 = vmatmul.msk.f32.gmra.mxu1 %vm173_vm1, %v153_v23  ;;  %v6968_v57 = vld [vmem:[%s6912_s13 + $0x18] sm:$0xff]  ;;  %v6277_v58 = vld [vmem:[%s6912_s13 + $0xe8] sm:$0xf]  ;;  %v6973_v59 = vld [vmem:[%s6912_s13] sm:$0xff] }
  0x1b   :  { %452 = vmatpush.msrb.mxu0 %v157_v15  ;;  %511 = vmatpush.msrb.mxu1 %v6210_v9  ;;  %v6977_v60 = vld [vmem:[%s6912_s13 + $0x90] sm:$0xff]  ;;  %v6980_v61 = vld [vmem:[%s6912_s13 + $0x98] sm:$0xff]  ;;  %v6994_v0 = vld [vmem:[%s6912_s13 + $0xa0] sm:$0xff] }
  0x1c   :  { %402 = vmatpush.msra.mxu3 %v6192_v13  ;;  %620 = vmatpush.msrb.mxu2 %v6952_v53  ;;  %v6984_v62 = vld [vmem:[%s6912_s13 + $0xd0] sm:$0xff]  ;;  %v6989_v63 = vld [vmem:[%s6912_s13 + $0xb8] sm:$0xff]  ;;  %v7001_v2 = vld [vmem:[%s6912_s13 + $0x80] sm:$0xff] }
  0x1d   :  { %6236 = vmatmul.msk.f32.vlgmr.msra.gmra.mxu3 %vm173_vm1, %v6225_v24  ;;  %512 = vmatpush.msrb.mxu1 %v6209_v12  ;;  %v6998_v1 = vld [vmem:[%s6912_s13 + $0x78] sm:$0xff]  ;;  %v7004_v3 = vld [vmem:[%s6912_s13 + $0x88] sm:$0xff]  ;;  %v560_v7 = vld [vmem:[%s6912_s13 + $0x70] sm:$0xf] }
  0x1e   :  { %6284 = vmatpush.msk.msrb.mxu3 %vm597_vm2, %v6276_v42  ;;  %6290 = vmatpush.msk.msra.mxu0 %vm597_vm2, %v6277_v58  ;;  %v559_v6 = vld [vmem:[%s6912_s13 + $0x68] sm:$0xf]  ;;  %v7015_v13 = vld [vmem:[%s6912_s13 + $0x50] sm:$0xff]  ;;  %v7018_v14 = vld [vmem:[%s6912_s13 + $0x58] sm:$0xff] }
  0x1f   :  { %6296 = vmatpush.msk.msra.mxu1 %vm597_vm2, %v558_v52  ;;  %621 = vmatpush.msrb.mxu2 %v6977_v60  ;;  %v7023_v15 = vld [vmem:[%s6912_s13 + $0x38] sm:$0xff]  ;;  %v7026_v16 = vld [vmem:[%s6912_s13 + $0x40] sm:$0xff]  ;;  %v7079_v42 = vld [vmem:[%s6912_s13 + $0x8] sm:$0xff] }
  0x20   :  { %651 = vmatpush.msrb.mxu3 %v6928_v43  ;;  %683 = vmatpush.msra.mxu0 %v6984_v62  ;;  %v6327_v17 = vld [vmem:[%s6912_s13 + $0x158] sm:$0xf]  ;;  %v7038_v24 = vld [vmem:[%s6912_s13 + $0x140] sm:$0xff] }
  0x21   :  { %6217 = vmatmul.msk.f32.gmra.mxu2 %vm173_vm1, %v277_v25  ;;  %739 = vmatpush.msra.mxu1 %v6958_v55  ;;  %v7041_v25 = vld [vmem:[%s6912_s13 + $0x128] sm:$0xff]  ;;  %v7074_v39 = vld [vmem:[%s6912_s13 + $0x120] sm:$0xff] }
  0x22   :  { %6200 = vmatmul.msk.f32.gmra.mxu0 %vm173_vm1, %v164_v26  ;;  %6206 = vmatmul.msk.f32.gmra.mxu1 %vm173_vm1, %v154_v27  ;;  %v7045_v27 = vld [vmem:[%s6912_s13 + $0x20] sm:$0xff] }
  0x23   :  { %652 = vmatpush.msrb.mxu3 %v6955_v54  ;;  %740 = vmatpush.msra.mxu1 %v6963_v56  ;;  %v6328_v58 = vld [vmem:[%s6912_s13 + $0x160] sm:$0xf] }
  0x24   :  { %684 = vmatpush.msra.mxu0 %v6989_v63  ;;  %622 = vmatpush.msrb.mxu2 %v6998_v1 }
  0x25   :  { %6237 = vmatmul.msk.f32.gmra.mxu3 %vm173_vm1, %v6226_v28  ;;  %741 = vmatpush.msra.mxu1 %v6968_v57  ;;  %v7048_v28 = vld [vmem:[%s6912_s13 + $0x28] sm:$0xff] }
  0x26   :  { %653 = vmatpush.msrb.mxu3 %v6980_v61  ;;  %685 = vmatpush.msra.mxu0 %v6994_v0 }
  0x27   :  { %742 = vmatpush.msra.mxu1 %v6973_v59  ;;  %6302 = vmatpush.msk.msra.mxu2 %vm597_vm2, %v559_v6 }
  0x28   :  { %654 = vmatpush.msrb.mxu3 %v7001_v2  ;;  %686 = vmatpush.msra.mxu0 %v7004_v3 }
  0x29   :  { %6218 = vmatmul.msk.f32.gmra.mxu2 %vm173_vm1, %v278_v29  ;;  %v6326_v29 = vld [vmem:[%s6912_s13 + $0x150] sm:$0xf] }
  0x2a   :  { %6201 = vmatmul.msk.f32.gmra.mxu0 %vm173_vm1, %v165_v30  ;;  %6207 = vmatmul.msk.f32.gmra.mxu1 %vm173_vm1, %v155_v31  ;;  %v7052_v30 = vld [vmem:[%s6912_s13 + $0x110] sm:$0xff] }
  0x2b   :  { %6308 = vmatpush.msk.msra.mxu3 %vm597_vm2, %v560_v7  ;;  %771 = vmatpush.msra.mxu2 %v7015_v13 }
  0x2d   :  { %6238 = vmatmul.msk.f32.gmra.mxu3 %vm173_vm1, %v6227_v32  ;;  %772 = vmatpush.msra.mxu2 %v7023_v15 }
  0x2e   :  { %803 = vmatpush.msra.mxu3 %v7018_v14 }
  0x2f   :  { %773 = vmatpush.msra.mxu2 %v7045_v27 }
  0x30   :  { %804 = vmatpush.msra.mxu3 %v7026_v16 }
  0x31   :  { %6219 = vmatmul.msk.f32.gmra.mxu2 %vm173_vm1, %v279_v33 }
  0x32   :  { %6202 = vmatmul.msk.f32.gmra.mxu0 %vm173_vm1, %v166_v34  ;;  %6208 = vmatmul.msk.f32.gmra.mxu1 %vm173_vm1, %v156_v35  ;;  %v7062_v35 = vld [vmem:[%s6912_s13 + $0xf8] sm:$0xff] }
  0x33   :  { %805 = vmatpush.msra.mxu3 %v7048_v28  ;;  %774 = vmatpush.msra.mxu2 %v7079_v42 }
  0x35   :  { %6239 = vmatmul.msk.f32.gmra.mxu3 %vm173_vm1, %v6228_v36 }
  0x3a   :  { %6242 = vmatmul.msk.f32.vlgmr.msrb.gmra.mxu0 %vm173_vm1, %v6220_v37  ;;  %6258 = vmatmul.msk.f32.vlgmr.msrb.gmra.mxu1 %vm173_vm1, %v6247_v38  ;;  %v7071_v38 = vld [vmem:[%s6912_s13 + $0x138] sm:$0xff] }
  0x3b   :  { %6335 = vmatpush.msk.msrb.mxu1 %vm597_vm2, %v6327_v17  ;;  %6329 = vmatpush.msk.msrb.mxu0 %vm597_vm2, %v6326_v29 }
  0x3d   :  { %6240 = vmatmul.msk.f32.gmra.mxu3 %vm173_vm1, %v6229_v41  ;;  %912 = vmatpush.msrb.mxu1 %v7038_v24 }
  0x3e   :  { %880 = vmatpush.msrb.mxu0 %v7071_v38 }
  0x3f   :  { %913 = vmatpush.msrb.mxu1 %v7041_v25 }
  0x40   :  { %881 = vmatpush.msrb.mxu0 %v7074_v39 }
  0x41   :  { %914 = vmatpush.msrb.mxu1 %v7052_v30 }
  0x42   :  { %6243 = vmatmul.msk.f32.gmra.mxu0 %vm173_vm1, %v6221_v44  ;;  %6259 = vmatmul.msk.f32.gmra.mxu1 %vm173_vm1, %v6248_v45  ;;  %v7082_v44 = vld [vmem:[%s6912_s13 + $0x10] sm:$0xff]  ;;  %v7085_v45 = vld [vmem:[%s6912_s13 + $0x108] sm:$0xff] }
  0x43   :  { %915 = vmatpush.msrb.mxu1 %v7062_v35  ;;  %806 = vmatpush.msra.mxu3 %v7082_v44 }
  0x44   :  { %882 = vmatpush.msrb.mxu0 %v7085_v45 }
  0x4a   :  { %6244 = vmatmul.msk.f32.gmra.mxu0 %vm173_vm1, %v6222_v46  ;;  %6260 = vmatmul.msk.f32.gmra.mxu1 %vm173_vm1, %v6249_v47 }
  0x52   :  { %6245 = vmatmul.msk.f32.gmra.mxu0 %vm173_vm1, %v6223_v48  ;;  %6261 = vmatmul.msk.f32.gmra.mxu1 %vm173_vm1, %v6250_v49 }
  0x5a   :  { %6246 = vmatmul.msk.f32.gmra.mxu0 %vm173_vm1, %v6224_v50  ;;  %6262 = vmatmul.msk.f32.gmra.mxu1 %vm173_vm1, %v6251_v51  ;;  %v7094_v50 = vld [vmem:[%s6912_s13 + $0xf0] sm:$0xff] }
  0x5b   :  { %883 = vmatpush.msrb.mxu0 %v7094_v50 }
  0x8f   :  { %v210_v4 = vpop.f32.mrf.mxu0  ;;  %v260_v5 = vpop.f32.mrf.mxu1 }
  0x90   :  { %v261_v8 = vadd.f32 %v260_v5, %v210_v4  ;;  %v6359_v4 = vld [vmem:[%s6912_s13 + $0xd8] sm:$0xf] }
  0x94   :  { %v321_v9 = vpop.f32.mrf.mxu2 }
  0x95   :  { %v336_v10 = vadd.f32 %v321_v9, %v261_v8 }
  0x97   :  { %342 = vst.msk [vmem:[#allocation2] sm:$0xff] %vm341_vm3, %v336_v10  ;;  %v213_v11 = vpop.f32.mrf.mxu0  ;;  %v263_v12 = vpop.f32.mrf.mxu1 }
  0x98   :  { %v264_v18 = vadd.f32 %v263_v12, %v213_v11 }
  0x9c   :  { %v324_v19 = vpop.f32.mrf.mxu2 }
  0x9d   :  { %v337_v20 = vadd.f32 %v324_v19, %v264_v18 }
  0x9e   :  { %v7032_v21 = vld [vmem:[#allocation2] sm:$0xff] }
  0x9f   :  { %343 = vst.msk [vmem:[#allocation2 + $0x8] sm:$0xff] %vm341_vm3, %v337_v20  ;;  %6297 = vmatmul.msk.f32.vlgmr.msra.gmra.mxu1 %vm341_vm3, %v7032_v21  ;;  %v216_v22 = vpop.f32.mrf.mxu0  ;;  %v266_v23 = vpop.f32.mrf.mxu1 }
  0xa0   :  { %v267_v26 = vadd.f32 %v266_v23, %v216_v22  ;;  %v404_v10 = vpop.f32.mrf.mxu3  ;;  %v6361_v23 = vld [vmem:[%s6912_s13 + $0xe8] sm:$0xf] }
  0xa1   :  { %6374 = vmatpush.msk.msra.mxu1 %vm597_vm2, %v6361_v23 }
  0xa3   :  { %1254 = vmatpush.msra.mxu1 %v6984_v62  ;;  %v6360_v62 = vld [vmem:[%s6912_s13 + $0xe0] sm:$0xf] }
  0xa4   :  { %v327_v31 = vpop.f32.mrf.mxu2 }
  0xa5   :  { %v338_v32 = vadd.f32 %v327_v31, %v267_v26  ;;  %1255 = vmatpush.msra.mxu1 %v6989_v63 }
  0xa6   :  { %v561_v33 = vld [vmem:[#allocation2 + $0x1] sm:$0xff] }
  0xa7   :  { %v7059_v34 = vld [vmem:[#allocation2 + $0x8] sm:$0xff]  ;;  %344 = vst.msk [vmem:[#allocation2 + $0x10] sm:$0xff] %vm341_vm3, %v338_v32  ;;  %6279 = vmatmul.msk.f32.vlgmr.msrb.gmra.mxu2 %vm341_vm3, %v561_v33  ;;  %6285 = vmatmul.msk.f32.vlgmr.msrb.gmra.mxu3 %vm341_vm3, %v561_v33  ;;  %v219_v36 = vpop.f32.mrf.mxu0  ;;  %v269_v37 = vpop.f32.mrf.mxu1 }
  0xa8   :  { %6291 = vmatmul.msk.f32.vlgmr.msra.gmra.mxu0 %vm341_vm3, %v561_v33  ;;  %6298 = vmatmul.msk.f32.gmra.mxu1 %vm341_vm3, %v7059_v34  ;;  %v270_v41 = vadd.f32 %v269_v37, %v219_v36  ;;  %v407_v20 = vpop.f32.mrf.mxu3  ;;  %v7142_v32 = vld [vmem:[#allocation2 + $0x2] sm:$0xff]  ;;  %v7148_v37 = vld [vmem:[%s6912_s13 + $0x118] sm:$0xff] }
  0xa9   :  { %6341 = vmatpush.msk.msrb.mxu2 %vm597_vm2, %v6328_v58  ;;  %6362 = vmatpush.msk.msrb.mxu3 %vm597_vm2, %v6359_v4  ;;  %v1131_v58 = vld [vmem:[%s6912_s13 + $0x60] sm:$0xf] }
  0xaa   :  { %1256 = vmatpush.msra.mxu1 %v6994_v0  ;;  %6368 = vmatpush.msk.msra.mxu0 %vm597_vm2, %v6360_v62 }
  0xab   :  { %1190 = vmatpush.msrb.mxu3 %v6921_v40  ;;  %v7118_v40 = vld [vmem:[%s6912_s13 + $0x148] sm:$0xff] }
  0xac   :  { %v330_v46 = vpop.f32.mrf.mxu2  ;;  %944 = vmatpush.msrb.mxu2 %v7118_v40  ;;  %1257 = vmatpush.msra.mxu1 %v7004_v3 }
  0xad   :  { %v339_v47 = vadd.f32 %v330_v46, %v270_v41  ;;  %1191 = vmatpush.msrb.mxu3 %v6952_v53  ;;  %1222 = vmatpush.msra.mxu0 %v6928_v43 }
  0xae   :  { %v562_v48 = vld [vmem:[#allocation2 + $0x9] sm:$0xff] }
  0xaf   :  { %v7091_v49 = vld [vmem:[#allocation2 + $0x10] sm:$0xff]  ;;  %345 = vst.msk [vmem:[#allocation2 + $0x18] sm:$0xff] %vm341_vm3, %v339_v47  ;;  %6280 = vmatmul.msk.f32.gmra.mxu2 %vm341_vm3, %v562_v48  ;;  %6286 = vmatmul.msk.f32.gmra.mxu3 %vm341_vm3, %v562_v48  ;;  %v222_v51 = vpop.f32.mrf.mxu0  ;;  %v272_v52 = vpop.f32.mrf.mxu1  ;;  %v7169_v47 = vld [vmem:[%s6912_s13 + $0x100] sm:$0xff] }
  0xb0   :  { %6292 = vmatmul.msk.f32.gmra.mxu0 %vm341_vm3, %v562_v48  ;;  %6299 = vmatmul.msk.f32.gmra.mxu1 %vm341_vm3, %v7091_v49  ;;  %v273_v5 = vadd.f32 %v272_v52, %v222_v51  ;;  %v410_v33 = vpop.f32.mrf.mxu3  ;;  %v7162_v0 = vld [vmem:[#allocation2 + $0xa] sm:$0xff] }
  0xb1   :  { %1192 = vmatpush.msrb.mxu3 %v6977_v60  ;;  %v7132_v60 = vld [vmem:[%s6912_s13 + $0x130] sm:$0xff]  ;;  %1223 = vmatpush.msra.mxu0 %v6955_v54 }
  0xb2   :  { %945 = vmatpush.msrb.mxu2 %v7132_v60 }
  0xb3   :  { %1193 = vmatpush.msrb.mxu3 %v6998_v1  ;;  %1224 = vmatpush.msra.mxu0 %v6980_v61 }
  0xb4   :  { %v333_v6 = vpop.f32.mrf.mxu2  ;;  %946 = vmatpush.msrb.mxu2 %v7148_v37 }
  0xb5   :  { %v340_v7 = vadd.f32 %v333_v6, %v273_v5  ;;  %1225 = vmatpush.msra.mxu0 %v7001_v2  ;;  %v1132_v2 = vld [vmem:[%s6912_s13 + $0x68] sm:$0xf] }
  0xb6   :  { %v563_v8 = vld [vmem:[#allocation2 + $0x11] sm:$0xff]  ;;  %947 = vmatpush.msrb.mxu2 %v7169_v47 }
  0xb7   :  { %v7108_v9 = vld [vmem:[#allocation2 + $0x18] sm:$0xff]  ;;  %347 = vst.msk [vmem:[#allocation2 + $0x20] sm:$0xf] %vm346_vm4, %v340_v7  ;;  %6281 = vmatmul.msk.f32.gmra.mxu2 %vm341_vm3, %v563_v8  ;;  %6287 = vmatmul.msk.f32.gmra.mxu3 %vm341_vm3, %v563_v8  ;;  %v454_v11 = vpop.f32.mrf.mxu0  ;;  %v514_v17 = vpop.f32.mrf.mxu1 }
  0xb8   :  { %6293 = vmatmul.msk.f32.gmra.mxu0 %vm341_vm3, %v563_v8  ;;  %6300 = vmatmul.msk.f32.gmra.mxu1 %vm341_vm3, %v7108_v9  ;;  %v455_v12 = vadd.f32 %v454_v11, %v404_v10  ;;  %v413_v3 = vpop.f32.mrf.mxu3  ;;  %v7179_v51 = vld [vmem:[#allocation2 + $0x12] sm:$0xff] }
  0xba   :  { %v529_v53 = vadd.f32 %v514_v17, %v455_v12 }
  0xbc   :  { %535 = vst.msk [vmem:[#allocation2 + $0x28] sm:$0xff] %vm341_vm3, %v529_v53 }
  0xbe   :  { %v564_v18 = vld [vmem:[#allocation2 + $0x19] sm:$0xff]  ;;  %v565_v31 = vld [vmem:[#allocation2 + $0x21] sm:$0x3] }
  0xbf   :  { %v7124_v19 = vld [vmem:[#allocation2 + $0x20] sm:$0x3]  ;;  %6282 = vmatmul.msk.f32.gmra.mxu2 %vm341_vm3, %v564_v18  ;;  %6288 = vmatmul.msk.f32.gmra.mxu3 %vm341_vm3, %v564_v18  ;;  %v457_v22 = vpop.f32.mrf.mxu0  ;;  %v517_v26 = vpop.f32.mrf.mxu1 }
  0xc0   :  { %6294 = vmatmul.msk.f32.gmra.mxu0 %vm341_vm3, %v564_v18  ;;  %6301 = vmatmul.msk.f32.gmra.mxu1 %vm341_vm3, %v7124_v19  ;;  %v458_v1 = vadd.f32 %v457_v22, %v407_v20  ;;  %v416_v61 = vpop.f32.mrf.mxu3 }
  0xc2   :  { %v530_v29 = vadd.f32 %v517_v26, %v458_v1 }
  0xc4   :  { %536 = vst.msk [vmem:[#allocation2 + $0x30] sm:$0xff] %vm341_vm3, %v530_v29 }
  0xc7   :  { %6283 = vmatmul.msk.f32.gmra.mxu2 %vm341_vm3, %v565_v31  ;;  %6289 = vmatmul.msk.f32.gmra.mxu3 %vm341_vm3, %v565_v31  ;;  %v460_v36 = vpop.f32.mrf.mxu0  ;;  %v520_v46 = vpop.f32.mrf.mxu1 }
  0xc8   :  { %6295 = vmatmul.msk.f32.gmra.mxu0 %vm341_vm3, %v565_v31  ;;  %6336 = vmatmul.msk.f32.vlgmr.msrb.gmra.mxu1 %vm341_vm3, %v7142_v32  ;;  %v461_v41 = vadd.f32 %v460_v36, %v410_v33  ;;  %v7314_v31 = vld [vmem:[%s6158_s17] sm:$0x7]  ;;  %s6173_s17 = sld [smem:[%s10713_s0 + %s6814_s14]]   ;;  %s6829_s14 = smov 34  }
  0xca   :  { %v531_v63 = vadd.f32 %v520_v46, %v461_v41 }
  0xcc   :  { %537 = vst.msk [vmem:[#allocation2 + $0x38] sm:$0xff] %vm341_vm3, %v531_v63 }
  0xcf   :  { %6303 = vmatmul.msk.f32.vlgmr.msra.gmra.mxu2 %vm341_vm3, %v7032_v21  ;;  %6309 = vmatmul.msk.f32.vlgmr.msra.gmra.mxu3 %vm341_vm3, %v7032_v21  ;;  %v463_v43 = vpop.f32.mrf.mxu0  ;;  %v523_v48 = vpop.f32.mrf.mxu1 }
  0xd0   :  { %6330 = vmatmul.msk.f32.vlgmr.msrb.gmra.mxu0 %vm341_vm3, %v7142_v32  ;;  %6337 = vmatmul.msk.f32.gmra.mxu1 %vm341_vm3, %v7162_v0  ;;  %v464_v54 = vadd.f32 %v463_v43, %v413_v3 }
  0xd1   :  { %6380 = vmatpush.msk.msra.mxu2 %vm597_vm2, %v1131_v58  ;;  %6386 = vmatpush.msk.msra.mxu3 %vm597_vm2, %v1132_v2 }
  0xd2   :  { %v532_v21 = vadd.f32 %v523_v48, %v464_v54 }
  0xd3   :  { %1310 = vmatpush.msra.mxu2 %v6958_v55  ;;  %1342 = vmatpush.msra.mxu3 %v7015_v13  ;;  %v827_v55 = vld [vmem:[#allocation2 + $0x22] sm:$0x3]  ;;  %v1135_v13 = vld [vmem:[#allocation2 + $0x31] sm:$0xff] }
  0xd4   :  { %538 = vst.msk [vmem:[#allocation2 + $0x40] sm:$0xff] %vm341_vm3, %v532_v21  ;;  %v1116_v8 = vld [vmem:[#allocation2 + $0x38] sm:$0xff] }
  0xd5   :  { %1311 = vmatpush.msra.mxu2 %v6963_v56  ;;  %1343 = vmatpush.msra.mxu3 %v7023_v15  ;;  %v6410_v56 = vld [vmem:[%s6912_s13 + $0x150] sm:$0xf] }
  0xd6   :  { %6413 = vmatpush.msk.msrb.mxu1 %vm597_vm2, %v6410_v56 }
  0xd7   :  { %6304 = vmatmul.msk.f32.gmra.mxu2 %vm341_vm3, %v7059_v34  ;;  %6310 = vmatmul.msk.f32.gmra.mxu3 %vm341_vm3, %v7059_v34  ;;  %v466_v52 = vpop.f32.mrf.mxu0  ;;  %v526_v5 = vpop.f32.mrf.mxu1  ;;  %v826_v34 = vld [vmem:[#allocation2 + $0x1a] sm:$0xff] }
  0xd8   :  { %6331 = vmatmul.msk.f32.gmra.mxu0 %vm341_vm3, %v7162_v0  ;;  %6338 = vmatmul.msk.f32.gmra.mxu1 %vm341_vm3, %v7179_v51  ;;  %v467_v4 = vadd.f32 %v466_v52, %v416_v61 }
  0xd9   :  { %1312 = vmatpush.msra.mxu2 %v6968_v57  ;;  %1344 = vmatpush.msra.mxu3 %v7045_v27  ;;  %v1134_v57 = vld [vmem:[#allocation2 + $0x29] sm:$0xff]  ;;  %v6412_v27 = vld [vmem:[%s6912_s13 + $0x160] sm:$0xf] }
  0xda   :  { %v533_v6 = vadd.f32 %v526_v5, %v467_v4  ;;  %1450 = vmatpush.msrb.mxu1 %v7071_v38  ;;  %v1395_v38 = vld [vmem:[#allocation2 + $0x32] sm:$0xff] }
  0xdb   :  { %1313 = vmatpush.msra.mxu2 %v6973_v59  ;;  %1345 = vmatpush.msra.mxu3 %v7079_v42  ;;  %v1133_v59 = vld [vmem:[%s6912_s13 + $0x70] sm:$0xf]  ;;  %v1136_v15 = vld [vmem:[#allocation2 + $0x39] sm:$0xff] }
  0xdc   :  { %539 = vst.msk [vmem:[#allocation2 + $0x48] sm:$0xf] %vm346_vm4, %v533_v6  ;;  %1451 = vmatpush.msrb.mxu1 %v7074_v39  ;;  %6392 = vmatpush.msk.msrb.mxu0 %vm597_vm2, %v1133_v59  ;;  %v1115_v42 = vld [vmem:[#allocation2 + $0x30] sm:$0xff]  ;;  %v1117_v17 = vld [vmem:[#allocation2 + $0x40] sm:$0xff]  ;;  %vm4414_vm4 = vcmask 121856  }
  0xde   :  { %1452 = vmatpush.msrb.mxu1 %v7085_v45  ;;  %1374 = vmatpush.msrb.mxu0 %v7018_v14 }
  0xdf   :  { %6305 = vmatmul.msk.f32.gmra.mxu2 %vm341_vm3, %v7091_v49  ;;  %6311 = vmatmul.msk.f32.gmra.mxu3 %vm341_vm3, %v7091_v49 }
  0xe0   :  { %6332 = vmatmul.msk.f32.gmra.mxu0 %vm341_vm3, %v7179_v51  ;;  %6339 = vmatmul.msk.f32.gmra.mxu1 %vm341_vm3, %v826_v34 }
  0xe1   :  { %1453 = vmatpush.msrb.mxu1 %v7094_v50  ;;  %1375 = vmatpush.msrb.mxu0 %v7026_v16  ;;  %v6411_v16 = vld [vmem:[%s6912_s13 + $0x158] sm:$0xf]  ;;  %s6170_s13 = sld [smem:[%s10713_s0 + %s6813_s10]]   ;;  %s6828_s10 = smov 32  }
  0xe3   :  { %1376 = vmatpush.msrb.mxu0 %v7048_v28  ;;  %v1137_v14 = vld [vmem:[#allocation2 + $0x41] sm:$0xff]  ;;  %v1138_v28 = vld [vmem:[#allocation2 + $0x49] sm:$0x3] }
  0xe4   :  { %v7291_v53 = vld [vmem:[#allocation2 + $0x4a] sm:$0x3] }
  0xe5   :  { %1377 = vmatpush.msrb.mxu0 %v7082_v44  ;;  %v1396_v44 = vld [vmem:[#allocation2 + $0x3a] sm:$0xff] }
  0xe7   :  { %6306 = vmatmul.msk.f32.gmra.mxu2 %vm341_vm3, %v7108_v9  ;;  %6312 = vmatmul.msk.f32.gmra.mxu3 %vm341_vm3, %v7108_v9  ;;  %v7280_v9 = vld [vmem:[#allocation2 + $0x42] sm:$0xff] }
  0xe8   :  { %6333 = vmatmul.msk.f32.gmra.mxu0 %vm341_vm3, %v826_v34  ;;  %6340 = vmatmul.msk.f32.gmra.mxu1 %vm341_vm3, %v827_v55 }
  0xef   :  { %6307 = vmatmul.msk.f32.gmra.mxu2 %vm341_vm3, %v7124_v19  ;;  %6313 = vmatmul.msk.f32.gmra.mxu3 %vm341_vm3, %v7124_v19 }
  0xf0   :  { %6334 = vmatmul.msk.f32.gmra.mxu0 %vm341_vm3, %v827_v55  ;;  %6375 = vmatmul.msk.f32.vlgmr.msra.gmra.mxu1 %vm341_vm3, %v1134_v57 }
  0xf7   :  { %6342 = vmatmul.msk.f32.vlgmr.msrb.gmra.mxu2 %vm341_vm3, %v7142_v32  ;;  %6363 = vmatmul.msk.f32.vlgmr.msrb.gmra.mxu3 %vm341_vm3, %v1134_v57 }
  0xf8   :  { %6369 = vmatmul.msk.f32.vlgmr.msra.gmra.mxu0 %vm341_vm3, %v1134_v57  ;;  %6376 = vmatmul.msk.f32.gmra.mxu1 %vm341_vm3, %v1135_v13 }
  0xf9   :  { %6419 = vmatpush.msk.msrb.mxu2 %vm597_vm2, %v6411_v16  ;;  %6425 = vmatpush.msk.msrb.mxu3 %vm597_vm2, %v6412_v27 }
  0xfb   :  { %1482 = vmatpush.msrb.mxu2 %v7038_v24  ;;  %1514 = vmatpush.msrb.mxu3 %v7118_v40  ;;  %v1394_v24 = vld [vmem:[#allocation2 + $0x2a] sm:$0xff] }
  0xfd   :  { %1483 = vmatpush.msrb.mxu2 %v7041_v25  ;;  %1515 = vmatpush.msrb.mxu3 %v7132_v60  ;;  %v1118_v60 = vld [vmem:[#allocation2 + $0x48] sm:$0x3] }
  0xff   :  { %6343 = vmatmul.msk.f32.gmra.mxu2 %vm341_vm3, %v7162_v0  ;;  %6364 = vmatmul.msk.f32.gmra.mxu3 %vm341_vm3, %v1135_v13 }
 0x100   :  { %6370 = vmatmul.msk.f32.gmra.mxu0 %vm341_vm3, %v1135_v13  ;;  %6377 = vmatmul.msk.f32.gmra.mxu1 %vm341_vm3, %v1136_v15 }
 0x101   :  { %1484 = vmatpush.msrb.mxu2 %v7052_v30  ;;  %1516 = vmatpush.msrb.mxu3 %v7148_v37  ;;  %v1114_v30 = vld [vmem:[#allocation2 + $0x28] sm:$0xff]  ;;  %v7321_v37 = vperm.slane %v7314_v31, 0 }
 0x103   :  { %1485 = vmatpush.msrb.mxu2 %v7062_v35  ;;  %1517 = vmatpush.msrb.mxu3 %v7169_v47  ;;  %v7329_v47 = vperm.slane %v7314_v31, 1 }
 0x107   :  { %6344 = vmatmul.msk.f32.gmra.mxu2 %vm341_vm3, %v7179_v51  ;;  %6365 = vmatmul.msk.f32.gmra.mxu3 %vm341_vm3, %v1136_v15 }
 0x108   :  { %6371 = vmatmul.msk.f32.gmra.mxu0 %vm341_vm3, %v1136_v15  ;;  %6378 = vmatmul.msk.f32.gmra.mxu1 %vm341_vm3, %v1137_v14 }
 0x10f   :  { %6345 = vmatmul.msk.f32.gmra.mxu2 %vm341_vm3, %v826_v34  ;;  %6366 = vmatmul.msk.f32.gmra.mxu3 %vm341_vm3, %v1137_v14 }
 0x110   :  { %6372 = vmatmul.msk.f32.gmra.mxu0 %vm341_vm3, %v1137_v14  ;;  %6379 = vmatmul.msk.f32.gmra.mxu1 %vm341_vm3, %v1138_v28 }
 0x117   :  { %6346 = vmatmul.msk.f32.gmra.mxu2 %vm341_vm3, %v827_v55  ;;  %6367 = vmatmul.msk.f32.gmra.mxu3 %vm341_vm3, %v1138_v28 }
 0x118   :  { %6373 = vmatmul.msk.f32.gmra.mxu0 %vm341_vm3, %v1138_v28  ;;  %6414 = vmatmul.msk.f32.vlgmr.msrb.gmra.mxu1 %vm341_vm3, %v1394_v24 }
 0x11c   :  { %v744_v25 = vpop.f32.mrf.mxu1 }
 0x11f   :  { %6381 = vmatmul.msk.f32.vlgmr.msra.gmra.mxu2 %vm341_vm3, %v1114_v30  ;;  %6387 = vmatmul.msk.f32.vlgmr.msra.gmra.mxu3 %vm341_vm3, %v1114_v30 }
 0x120   :  { %6393 = vmatmul.msk.f32.vlgmr.msrb.gmra.mxu0 %vm341_vm3, %v1114_v30  ;;  %6415 = vmatmul.msk.f32.gmra.mxu1 %vm341_vm3, %v1395_v38 }
 0x125   :  { %v7268_v35 = vpop.f32.mrf.mxu0  ;;  %v747_v39 = vpop.f32.mrf.mxu1 }
 0x127   :  { %6382 = vmatmul.msk.f32.gmra.mxu2 %vm341_vm3, %v1115_v42  ;;  %6388 = vmatmul.msk.f32.gmra.mxu3 %vm341_vm3, %v1115_v42 }
 0x128   :  { %6394 = vmatmul.msk.f32.gmra.mxu0 %vm341_vm3, %v1115_v42  ;;  %6416 = vmatmul.msk.f32.gmra.mxu1 %vm341_vm3, %v1396_v44 }
 0x12a   :  { %v624_v45 = vpop.f32.mrf.mxu2  ;;  %v656_v49 = vpop.f32.mrf.mxu3 }
 0x12b   :  { %v745_v36 = vadd.f32 %v744_v25, %v624_v45 }
 0x12d   :  { %v7274_v50 = vpop.f32.mrf.mxu0  ;;  %v7276_v7 = vpop.f32.mrf.mxu1 }
 0x12f   :  { %6383 = vmatmul.msk.f32.gmra.mxu2 %vm341_vm3, %v1116_v8  ;;  %6389 = vmatmul.msk.f32.gmra.mxu3 %vm341_vm3, %v1116_v8 }
 0x130   :  { %6395 = vmatmul.msk.f32.gmra.mxu0 %vm341_vm3, %v1116_v8  ;;  %6417 = vmatmul.msk.f32.gmra.mxu1 %vm341_vm3, %v7280_v9 }
 0x132   :  { %v627_v10 = vpop.f32.mrf.mxu2  ;;  %v659_v11 = vpop.f32.mrf.mxu3 }
 0x133   :  { %v748_v54 = vadd.f32 %v747_v39, %v627_v10 }
 0x135   :  { %v7285_v40 = vpop.f32.mrf.mxu0  ;;  %v7287_v12 = vpop.f32.mrf.mxu1 }
 0x137   :  { %6384 = vmatmul.msk.f32.gmra.mxu2 %vm341_vm3, %v1117_v17  ;;  %6390 = vmatmul.msk.f32.gmra.mxu3 %vm341_vm3, %v1117_v17 }
 0x138   :  { %6396 = vmatmul.msk.f32.gmra.mxu0 %vm341_vm3, %v1117_v17  ;;  %6418 = vmatmul.msk.f32.gmra.mxu1 %vm341_vm3, %v7291_v53 }
 0x13a   :  { %v630_v18 = vpop.f32.mrf.mxu2  ;;  %v7296_v19 = vpop.f32.mrf.mxu3 }
 0x13b   :  { %v751_v56 = vadd.f32 %v7276_v7, %v630_v18 }
 0x13d   :  { %v7298_v20 = vpop.f32.mrf.mxu0  ;;  %v7300_v22 = vpop.f32.mrf.mxu1 }
 0x13f   :  { %6385 = vmatmul.msk.f32.gmra.mxu2 %vm341_vm3, %v1118_v60  ;;  %6391 = vmatmul.msk.f32.gmra.mxu3 %vm341_vm3, %v1118_v60 }
 0x140   :  { %6397 = vmatmul.msk.f32.gmra.mxu0 %vm341_vm3, %v1118_v60 }
 0x142   :  { %v633_v23 = vpop.f32.mrf.mxu2  ;;  %v7308_v1 = vpop.f32.mrf.mxu3 }
 0x145   :  { %v7310_v26 = vpop.f32.mrf.mxu0  ;;  %v917_v29 = vpop.f32.mrf.mxu1 }
 0x147   :  { %6420 = vmatmul.msk.f32.vlgmr.msrb.gmra.mxu2 %vm341_vm3, %v1394_v24  ;;  %6426 = vmatmul.msk.f32.vlgmr.msrb.gmra.mxu3 %vm341_vm3, %v1394_v24 }
 0x14a   :  { %v7316_v32 = vpop.f32.mrf.mxu2  ;;  %v7318_v33 = vpop.f32.mrf.mxu3 }
 0x14d   :  { %v885_v62 = vpop.f32.mrf.mxu0  ;;  %v920_v41 = vpop.f32.mrf.mxu1 }
 0x14e   :  { %v964_v46 = vadd.f32 %v885_v62, %v745_v36 }
 0x14f   :  { %6421 = vmatmul.msk.f32.gmra.mxu2 %vm341_vm3, %v1395_v38  ;;  %6427 = vmatmul.msk.f32.gmra.mxu3 %vm341_vm3, %v1395_v38 }
 0x150   :  { %v986_v63 = vadd.f32 %v7321_v37, %v964_v46  ;;  %v757_v46 = vadd.f32 %v7300_v22, %v7316_v32 }
 0x152   :  { %1099 = vst [vmem:[#allocation3] sm:$0xff] %v986_v63  ;;  %v776_v0 = vpop.f32.mrf.mxu2  ;;  %v7326_v3 = vpop.f32.mrf.mxu3  ;;  %v1044_v2 = vmul.f32 %v986_v63, %v986_v63 }
 0x153   :  { %v777_v43 = vadd.f32 %v776_v0, %v656_v49  ;;  %v754_v49 = vadd.f32 %v7287_v12, %v633_v23 }
 0x155   :  { %v965_v48 = vadd.f32 %v917_v29, %v777_v43  ;;  %v888_v21 = vpop.f32.mrf.mxu0  ;;  %v923_v51 = vpop.f32.mrf.mxu1 }
 0x156   :  { %v967_v61 = vadd.f32 %v888_v21, %v748_v54 }
 0x157   :  { %v987_v52 = vadd.f32 %v7329_v47, %v965_v48  ;;  %6422 = vmatmul.msk.f32.gmra.mxu2 %vm341_vm3, %v1396_v44  ;;  %6428 = vmatmul.msk.f32.gmra.mxu3 %vm341_vm3, %v1396_v44 }
 0x158   :  { %v989_v58 = vadd.f32 %v7321_v37, %v967_v61 }
 0x159   :  { %1100 = vst [vmem:[#allocation3 + $0x8] sm:$0xff] %v987_v52  ;;  %v1045_v28 = vmul.f32 %v987_v52, %v987_v52 }
 0x15a   :  { %v1001_v4 = vadd.f32 %v989_v58, %v986_v63  ;;  %v1047_v5 = vmul.f32 %v989_v58, %v989_v58  ;;  %1102 = vst [vmem:[#allocation3 + $0x18] sm:$0xff] %v989_v58  ;;  %v779_v6 = vpop.f32.mrf.mxu2  ;;  %v7335_v34 = vpop.f32.mrf.mxu3 }
 0x15b   :  { %v780_v55 = vadd.f32 %v779_v6, %v659_v11 }
 0x15c   :  { %v1059_v57 = vadd.f32 %v1047_v5, %v1044_v2 }
 0x15d   :  { %v968_v59 = vadd.f32 %v920_v41, %v780_v55  ;;  %v891_v13 = vpop.f32.mrf.mxu0  ;;  %v926_v15 = vpop.f32.mrf.mxu1 }
 0x15e   :  { %v970_v14 = vadd.f32 %v891_v13, %v751_v56  ;;  %v7384_v13 = vperm.slane %v7314_v31, 2  ;;  %v812_v31 = vadd.f32 %v7335_v34, %v7274_v50 }
 0x15f   :  { %v990_v16 = vadd.f32 %v7329_v47, %v968_v59  ;;  %6423 = vmatmul.msk.f32.gmra.mxu2 %vm341_vm3, %v7280_v9  ;;  %6429 = vmatmul.msk.f32.gmra.mxu3 %vm341_vm3, %v7280_v9 }
 0x160   :  { %v992_v27 = vadd.f32 %v7321_v37, %v970_v14 }
 0x161   :  { %v1013_v24 = vadd.f32 %v990_v16, %v987_v52  ;;  %v1048_v25 = vmul.f32 %v990_v16, %v990_v16  ;;  %1103 = vst [vmem:[#allocation3 + $0x20] sm:$0xff] %v990_v16 }
 0x162   :  { %v1002_v30 = vadd.f32 %v1001_v4, %v992_v27  ;;  %v1050_v38 = vmul.f32 %v992_v27, %v992_v27  ;;  %1105 = vst [vmem:[#allocation3 + $0x30] sm:$0xff] %v992_v27  ;;  %v782_v39 = vpop.f32.mrf.mxu2  ;;  %v7344_v42 = vpop.f32.mrf.mxu3 }
 0x163   :  { %v1070_v44 = vadd.f32 %v1048_v25, %v1045_v28  ;;  %v783_v45 = vadd.f32 %v782_v39, %v7296_v19  ;;  %v815_v50 = vadd.f32 %v7344_v42, %v7285_v40 }
 0x164   :  { %v1060_v7 = vadd.f32 %v1059_v57, %v1050_v38  ;;  %v809_v57 = vadd.f32 %v7326_v3, %v7268_v35 }
 0x165   :  { %v971_v8 = vadd.f32 %v923_v51, %v783_v45  ;;  %v894_v9 = vpop.f32.mrf.mxu0  ;;  %v929_v10 = vpop.f32.mrf.mxu1 }
 0x166   :  { %v973_v11 = vadd.f32 %v894_v9, %v754_v49 }
 0x167   :  { %v993_v17 = vadd.f32 %v7329_v47, %v971_v8  ;;  %6424 = vmatmul.msk.f32.gmra.mxu2 %vm341_vm3, %v7291_v53  ;;  %6430 = vmatmul.msk.f32.gmra.mxu3 %vm341_vm3, %v7291_v53 }
 0x168   :  { %v995_v18 = vadd.f32 %v7321_v37, %v973_v11 }
 0x169   :  { %v1014_v60 = vadd.f32 %v1013_v24, %v993_v17  ;;  %v1051_v29 = vmul.f32 %v993_v17, %v993_v17  ;;  %1106 = vst [vmem:[#allocation3 + $0x38] sm:$0xff] %v993_v17 }
 0x16a   :  { %v1003_v19 = vadd.f32 %v1002_v30, %v995_v18  ;;  %v1053_v12 = vmul.f32 %v995_v18, %v995_v18  ;;  %1108 = vst [vmem:[#allocation3 + $0x48] sm:$0xff] %v995_v18  ;;  %v785_v23 = vpop.f32.mrf.mxu2  ;;  %v7354_v36 = vpop.f32.mrf.mxu3 }
 0x16b   :  { %v1071_v62 = vadd.f32 %v1070_v44, %v1051_v29  ;;  %v786_v41 = vadd.f32 %v785_v23, %v7308_v1  ;;  %v818_v40 = vadd.f32 %v7354_v36, %v7298_v20 }
 0x16c   :  { %v1061_v63 = vadd.f32 %v1060_v7, %v1053_v12 }
 0x16d   :  { %v974_v0 = vadd.f32 %v926_v15, %v786_v41  ;;  %v897_v53 = vpop.f32.mrf.mxu0  ;;  %v7359_v43 = vpop.f32.mrf.mxu1 }
 0x16e   :  { %v976_v54 = vadd.f32 %v897_v53, %v757_v46 }
 0x16f   :  { %v7362_v48 = vadd.f32 %v7329_v47, %v974_v0 }
 0x170   :  { %v998_v21 = vadd.f32 %v7321_v37, %v976_v54 }
 0x171   :  { %v1054_v6 = vmul.f32 %v7362_v48, %v7362_v48  ;;  %v1015_v56 = vadd.f32 %v1014_v60, %v7362_v48 }
 0x172   :  { %v1005_v51 = vsel %vm1004_vm5, %v998_v21, 0.0  ;;  %v1056_v61 = vmul.f32 %v998_v21, %v998_v21  ;;  %1111 = vst [vmem:[#allocation3 + $0x60] sm:$0x3] %v998_v21  ;;  %v788_v1 = vpop.f32.mrf.mxu2  ;;  %v7366_v52 = vpop.f32.mrf.mxu3 }
 0x173   :  { %v7368_v22 = vadd.f32 %v1005_v51, %v1003_v19  ;;  %v789_v32 = vadd.f32 %v788_v1, %v7318_v33  ;;  %v1072_v15 = vadd.f32 %v1071_v62, %v1054_v6  ;;  %v821_v1 = vadd.f32 %v7366_v52, %v7310_v26 }
 0x174   :  { %v1062_v58 = vsel %vm1004_vm5, %v1056_v61, 0.0 }
 0x175   :  { %v7372_v2 = vadd.f32 %v1062_v58, %v1061_v63  ;;  %v977_v4 = vadd.f32 %v929_v10, %v789_v32  ;;  %v7374_v5 = vpop.f32.mrf.mxu1  ;;  %v7413_v29 = vpop.f32.mrf.mxu0 }
 0x177   :  { %v999_v55 = vadd.f32 %v7329_v47, %v977_v4 }
 0x179   :  { %v1016_v59 = vsel %vm1004_vm5, %v999_v55, 0.0  ;;  %v1057_v33 = vmul.f32 %v999_v55, %v999_v55  ;;  %1112 = vst [vmem:[#allocation3 + $0x68] sm:$0x3] %v999_v55 }
 0x17a   :  { %v7386_v14 = vadd.f32 %v1016_v59, %v1015_v56  ;;  %v949_v16 = vpop.f32.mrf.mxu2  ;;  %v7388_v27 = vpop.f32.mrf.mxu3 }
 0x17b   :  { %v1073_v28 = vsel %vm1004_vm5, %v1057_v33, 0.0  ;;  %v966_v24 = vadd.f32 %v949_v16, %v809_v57  ;;  %v1690_v57 = vld [vmem:[%s7428_s21 + $0x78] sm:$0xff]  ;;  %v1689_v33 = vld [vmem:[%s7428_s21 + $0x70] sm:$0xff]  ;;  %v1688_v16 = vld [vmem:[%s7428_s21 + $0x68] sm:$0xff] }
 0x17c   :  { %v7391_v25 = vadd.f32 %v1073_v28, %v1072_v15  ;;  %1712 = vmatpush.msra.mxu0 %v1690_v57  ;;  %1775 = vmatpush.msra.mxu3 %v1690_v57 }
 0x17d   :  { %v988_v35 = vadd.f32 %v7384_v13, %v966_v24  ;;  %v7394_v3 = vpop.f32.mrf.mxu1  ;;  %v7430_v21 = vpop.f32.mrf.mxu0 }
 0x17e   :  { %1713 = vmatpush.msra.mxu0 %v1689_v33  ;;  %1776 = vmatpush.msra.mxu3 %v1689_v33  ;;  %v1007_v33 = vrot.slane %v7368_v22, 4 }
 0x17f   :  { %1101 = vst.msk [vmem:[#allocation3 + $0x10] sm:$0xff] %vm1024_vm6, %v988_v35  ;;  %v1046_v44 = vmul.f32 %v988_v35, %v988_v35  ;;  %v1025_v49 = vsel %vm1024_vm6, %v988_v35, 0.0  ;;  %v1687_v35 = vld [vmem:[%s7428_s21 + $0x60] sm:$0xff] }
 0x180   :  { %1714 = vmatpush.msra.mxu0 %v1688_v16  ;;  %1777 = vmatpush.msra.mxu3 %v1688_v16 }
 0x181   :  { %v1081_v34 = vsel %vm1024_vm6, %v1046_v44, 0.0 }
 0x182   :  { %v952_v30 = vpop.f32.mrf.mxu2  ;;  %v7399_v38 = vpop.f32.mrf.mxu3  ;;  %1715 = vmatpush.msra.mxu0 %v1687_v35  ;;  %1778 = vmatpush.msra.mxu3 %v1687_v35  ;;  %v7494_v35 = vld [vmem:[%s7428_s21 + $0x108] sm:$0xff] }
 0x183   :  { %v969_v39 = vadd.f32 %v952_v30, %v812_v31  ;;  %1766 = vmatpush.msra.mxu2 %v7494_v35 }
 0x185   :  { %v991_v45 = vadd.f32 %v7384_v13, %v969_v39  ;;  %v7405_v9 = vpop.f32.mrf.mxu1  ;;  %v7443_v26 = vpop.f32.mrf.mxu0 }
 0x187   :  { %v1026_v7 = vsel %vm1024_vm6, %v991_v45, 0.0  ;;  %v1049_v8 = vmul.f32 %v991_v45, %v991_v45  ;;  %1104 = vst.msk [vmem:[#allocation3 + $0x28] sm:$0xff] %vm1024_vm6, %v991_v45  ;;  %v1686_v45 = vld [vmem:[%s7428_s21 + $0x58] sm:$0xff] }
 0x188   :  { %v1027_v10 = vadd.f32 %v1026_v7, %v1025_v49  ;;  %1716 = vmatpush.msra.mxu0 %v1686_v45  ;;  %1779 = vmatpush.msra.mxu3 %v1686_v45 }
 0x189   :  { %v1082_v11 = vsel %vm1024_vm6, %v1049_v8, 0.0  ;;  %v1685_v8 = vld [vmem:[%s7428_s21 + $0x50] sm:$0xff] }
 0x18a   :  { %v1083_v17 = vadd.f32 %v1082_v11, %v1081_v34  ;;  %v955_v18 = vpop.f32.mrf.mxu2  ;;  %v7411_v60 = vpop.f32.mrf.mxu3  ;;  %1717 = vmatpush.msra.mxu0 %v1685_v8  ;;  %1780 = vmatpush.msra.mxu3 %v1685_v8 }
 0x18b   :  { %v972_v19 = vadd.f32 %v955_v18, %v815_v50  ;;  %v1684_v50 = vld [vmem:[%s7428_s21 + $0x48] sm:$0xff] }
 0x18c   :  { %1718 = vmatpush.msra.mxu0 %v1684_v50  ;;  %1781 = vmatpush.msra.mxu3 %v1684_v50  ;;  %v1008_v50 = vadd.f32 %v1007_v33, %v7368_v22 }
 0x18d   :  { %v994_v12 = vadd.f32 %v7384_v13, %v972_v19  ;;  %v7421_v46 = vpop.f32.mrf.mxu1  ;;  %v7463_v34 = vpop.f32.mrf.mxu0  ;;  %v1682_v19 = vld [vmem:[%s7428_s21 + $0x38] sm:$0xff] }
 0x18f   :  { %v1028_v23 = vsel %vm1024_vm6, %v994_v12, 0.0  ;;  %v1052_v62 = vmul.f32 %v994_v12, %v994_v12  ;;  %1107 = vst.msk [vmem:[#allocation3 + $0x40] sm:$0xff] %vm1024_vm6, %v994_v12 }
 0x190   :  { %v1029_v41 = vadd.f32 %v1028_v23, %v1027_v10  ;;  %v1681_v23 = vld [vmem:[%s7428_s21 + $0x30] sm:$0xff] }
 0x191   :  { %v1084_v42 = vsel %vm1024_vm6, %v1052_v62, 0.0 }
 0x192   :  { %v1085_v63 = vadd.f32 %v1084_v42, %v1083_v17  ;;  %v958_v0 = vpop.f32.mrf.mxu2  ;;  %v7423_v53 = vpop.f32.mrf.mxu3  ;;  %v1679_v42 = vld [vmem:[%s7428_s21 + $0x20] sm:$0xff] }
 0x193   :  { %v975_v54 = vadd.f32 %v958_v0, %v818_v40  ;;  %v1680_v40 = vld [vmem:[%s7428_s21 + $0x28] sm:$0xff] }
 0x195   :  { %v997_v20 = vadd.f32 %v7384_v13, %v975_v54  ;;  %v1455_v55 = vpop.f32.mrf.mxu1  ;;  %v7477_v0 = vpop.f32.mrf.mxu0 }
 0x197   :  { %v1030_v36 = vsel %vm1024_vm6, %v997_v20, 0.0  ;;  %v1055_v51 = vmul.f32 %v997_v20, %v997_v20  ;;  %1110 = vst.msk [vmem:[#allocation3 + $0x58] sm:$0xff] %vm1024_vm6, %v997_v20  ;;  %v1678_v20 = vld [vmem:[%s7428_s21 + $0x18] sm:$0xff] }
 0x198   :  { %v1031_v61 = vadd.f32 %v1030_v36, %v1029_v41 }
 0x199   :  { %v1086_v32 = vsel %vm1024_vm6, %v1055_v51, 0.0  ;;  %v1677_v51 = vld [vmem:[%s7428_s21 + $0x10] sm:$0xff] }
 0x19a   :  { %v1087_v58 = vadd.f32 %v1086_v32, %v1085_v63  ;;  %v961_v4 = vpop.f32.mrf.mxu2  ;;  %v7438_v6 = vpop.f32.mrf.mxu3 }
 0x19b   :  { %v978_v56 = vadd.f32 %v961_v4, %v821_v1  ;;  %v1676_v1 = vld [vmem:[%s7428_s21 + $0x8] sm:$0xff] }
 0x19d   :  { %v1000_v59 = vadd.f32 %v7384_v13, %v978_v56  ;;  %v1458_v49 = vpop.f32.mrf.mxu1  ;;  %v1379_v56 = vpop.f32.mrf.mxu0 }
 0x19e   :  { %v1380_v22 = vadd.f32 %v1379_v56, %v7359_v43 }
 0x19f   :  { %v1033_v52 = vsel %vm1032_vm7, %v1000_v59, 0.0  ;;  %v1058_v15 = vmul.f32 %v1000_v59, %v1000_v59  ;;  %1113 = vst.msk [vmem:[#allocation3 + $0x70] sm:$0x3] %vm1032_vm7, %v1000_v59 }
 0x1a0   :  { %v7448_v28 = vadd.f32 %v1033_v52, %v1031_v61  ;;  %v1706_v52 = vld [vmem:[%s7428_s21 + $0xf8] sm:$0xff] }
 0x1a1   :  { %v1088_v24 = vsel %vm1032_vm7, %v1058_v15, 0.0  ;;  %1732 = vmatpush.msra.mxu1 %v1706_v52 }
 0x1a2   :  { %v7452_v31 = vadd.f32 %v1088_v24, %v1087_v58  ;;  %v1315_v30 = vpop.f32.mrf.mxu2  ;;  %v7454_v39 = vpop.f32.mrf.mxu3  ;;  %v1675_v58 = vld [vmem:[%s7428_s21] sm:$0xff] }
 0x1a3   :  { %v1316_v44 = vadd.f32 %v1315_v30, %v7388_v27  ;;  %v1683_v27 = vld [vmem:[%s7428_s21 + $0x40] sm:$0xff] }
 0x1a4   :  { %1719 = vmatpush.msra.mxu0 %v1683_v27  ;;  %1782 = vmatpush.msra.mxu3 %v1683_v27 }
 0x1a5   :  { %v1534_v7 = vadd.f32 %v1455_v55, %v1316_v44  ;;  %v1461_v62 = vpop.f32.mrf.mxu1  ;;  %v1064_v44 = vrot.slane %v7372_v2, 4 }
 0x1a6   :  { %1720 = vmatpush.msra.mxu0 %v1682_v19  ;;  %1783 = vmatpush.msra.mxu3 %v1682_v19 }
 0x1a7   :  { %v7460_v10 = vadd.f32 %v1534_v7, %v7321_v37 }
 0x1a8   :  { %1721 = vmatpush.msra.mxu0 %v1681_v23  ;;  %1784 = vmatpush.msra.mxu3 %v1681_v23 }
 0x1a9   :  { %1660 = vst [vmem:[#allocation3 + $0x78] sm:$0xff] %v7460_v10  ;;  %v1604_v45 = vmul.f32 %v7460_v10, %v7460_v10 }
 0x1aa   :  { %v1318_v11 = vpop.f32.mrf.mxu2  ;;  %v7467_v17 = vpop.f32.mrf.mxu3  ;;  %1722 = vmatpush.msra.mxu0 %v1680_v40  ;;  %1785 = vmatpush.msra.mxu3 %v1680_v40 }
 0x1ab   :  { %v1319_v18 = vadd.f32 %v1318_v11, %v7399_v38  ;;  %v1704_v11 = vld [vmem:[%s7428_s21 + $0xe8] sm:$0xff] }
 0x1ac   :  { %1723 = vmatpush.msra.mxu0 %v1679_v42  ;;  %1786 = vmatpush.msra.mxu3 %v1679_v42  ;;  %v1348_v42 = vadd.f32 %v7454_v39, %v7413_v29 }
 0x1ad   :  { %v1537_v12 = vadd.f32 %v1458_v49, %v1319_v18  ;;  %v1464_v32 = vpop.f32.mrf.mxu1 }
 0x1ae   :  { %1724 = vmatpush.msra.mxu0 %v1678_v20  ;;  %1787 = vmatpush.msra.mxu3 %v1678_v20  ;;  %v1702_v20 = vld [vmem:[%s7428_s21 + $0xd8] sm:$0xff] }
 0x1af   :  { %v1552_v41 = vadd.f32 %v1537_v12, %v7321_v37  ;;  %v1382_v12 = vpop.f32.mrf.mxu0 }
 0x1b0   :  { %1725 = vmatpush.msra.mxu0 %v1677_v51  ;;  %1788 = vmatpush.msra.mxu3 %v1677_v51 }
 0x1b1   :  { %1663 = vst [vmem:[#allocation3 + $0x90] sm:$0xff] %v1552_v41  ;;  %v1607_v15 = vmul.f32 %v1552_v41, %v1552_v41  ;;  %v1564_v49 = vadd.f32 %v1552_v41, %v7460_v10  ;;  %v1065_v10 = vadd.f32 %v1064_v44, %v7372_v2  ;;  %v1383_v44 = vadd.f32 %v1382_v12, %v7374_v5  ;;  %v1696_v12 = vld [vmem:[%s7428_s21 + $0xa8] sm:$0xff] }
 0x1b2   :  { %v1321_v63 = vpop.f32.mrf.mxu2  ;;  %v7475_v38 = vpop.f32.mrf.mxu3  ;;  %1726 = vmatpush.msra.mxu0 %v1676_v1  ;;  %1789 = vmatpush.msra.mxu3 %v1676_v1 }
 0x1b3   :  { %v1322_v54 = vadd.f32 %v1321_v63, %v7411_v60  ;;  %v1066_v29 = vrot.slane %v1065_v10, 2 }
 0x1b4   :  { %1727 = vmatpush.msra.mxu0 %v1675_v58  ;;  %1790 = vmatpush.msra.mxu3 %v1675_v58  ;;  %v1701_v58 = vld [vmem:[%s7428_s21 + $0xd0] sm:$0xff] }
 0x1b5   :  { %v1540_v36 = vadd.f32 %v1461_v62, %v1322_v54  ;;  %v1467_v8 = vpop.f32.mrf.mxu1  ;;  %v1703_v62 = vld [vmem:[%s7428_s21 + $0xe0] sm:$0xff] }
 0x1b6   :  { %1795 = vmatpush.msrb.mxu0 %v1706_v52 }
 0x1b7   :  { %v1555_v61 = vadd.f32 %v1540_v36, %v7321_v37  ;;  %v1009_v36 = vrot.slane %v1008_v50, 2 }
 0x1b9   :  { %1666 = vst [vmem:[#allocation3 + $0xa8] sm:$0xff] %v1555_v61  ;;  %v1610_v7 = vmul.f32 %v1555_v61, %v1555_v61  ;;  %v1565_v18 = vadd.f32 %v1564_v49, %v1555_v61  ;;  %v1385_v49 = vpop.f32.mrf.mxu0 }
 0x1ba   :  { %v1324_v4 = vpop.f32.mrf.mxu2  ;;  %v7485_v55 = vpop.f32.mrf.mxu3 }
 0x1bb   :  { %v1325_v60 = vadd.f32 %v1324_v4, %v7423_v53  ;;  %v1705_v53 = vld [vmem:[%s7428_s21 + $0xf0] sm:$0xff] }
 0x1bc   :  { %1733 = vmatpush.msra.mxu1 %v1705_v53  ;;  %1796 = vmatpush.msrb.mxu0 %v1705_v53 }
 0x1bd   :  { %v1543_v57 = vadd.f32 %v1464_v32, %v1325_v60 }
 0x1be   :  { %1734 = vmatpush.msra.mxu1 %v1704_v11  ;;  %1797 = vmatpush.msrb.mxu0 %v1704_v11 }
 0x1bf   :  { %v1558_v59 = vadd.f32 %v1543_v57, %v7321_v37  ;;  %v1700_v57 = vld [vmem:[%s7428_s21 + $0xc8] sm:$0xff] }
 0x1c0   :  { %1735 = vmatpush.msra.mxu1 %v1703_v62  ;;  %1798 = vmatpush.msrb.mxu0 %v1703_v62 }
 0x1c1   :  { %1669 = vst [vmem:[#allocation3 + $0xc0] sm:$0xff] %v1558_v59  ;;  %v1613_v19 = vmul.f32 %v1558_v59, %v1558_v59  ;;  %v1566_v40 = vadd.f32 %v1565_v18, %v1558_v59  ;;  %v1010_v59 = vadd.f32 %v1009_v36, %v1008_v50  ;;  %v1386_v36 = vadd.f32 %v1385_v49, %v7394_v3 }
 0x1c2   :  { %v1327_v16 = vpop.f32.mrf.mxu2  ;;  %v7491_v24 = vpop.f32.mrf.mxu3  ;;  %1736 = vmatpush.msra.mxu1 %v1702_v20  ;;  %1799 = vmatpush.msrb.mxu0 %v1702_v20 }
 0x1c3   :  { %v1328_v30 = vadd.f32 %v1327_v16, %v7438_v6  ;;  %v1619_v6 = vadd.f32 %v1607_v15, %v1604_v45  ;;  %v1699_v15 = vld [vmem:[%s7428_s21 + $0xc0] sm:$0xff]  ;;  %v1067_v16 = vadd.f32 %v1066_v29, %v1065_v10  ;;  %v1351_v45 = vadd.f32 %v7467_v17, %v7430_v21  ;;  %v1693_v29 = vld [vmem:[%s7428_s21 + $0x90] sm:$0xff] }
 0x1c4   :  { %1737 = vmatpush.msra.mxu1 %v1701_v58  ;;  %1800 = vmatpush.msrb.mxu0 %v1701_v58 }
 0x1c5   :  { %v1546_v27 = vadd.f32 %v1467_v8, %v1328_v30  ;;  %v1620_v41 = vadd.f32 %v1619_v6, %v1610_v7  ;;  %v1698_v7 = vld [vmem:[%s7428_s21 + $0xb8] sm:$0xff]  ;;  %v1011_v8 = vrot.slane %v1010_v59, 1  ;;  %v1068_v10 = vrot.slane %v1067_v16, 1 }
 0x1c6   :  { %1738 = vmatpush.msra.mxu1 %v1700_v57  ;;  %1801 = vmatpush.msrb.mxu0 %v1700_v57  ;;  %v1691_v57 = vld [vmem:[%s7428_s21 + $0x80] sm:$0xff] }
 0x1c7   :  { %v1561_v23 = vadd.f32 %v1546_v27, %v7321_v37  ;;  %v1621_v37 = vadd.f32 %v1620_v41, %v1613_v19  ;;  %v1012_v41 = vadd.f32 %v1011_v8, %v1010_v59 }
 0x1c8   :  { %1739 = vmatpush.msra.mxu1 %v1699_v15  ;;  %1802 = vmatpush.msrb.mxu0 %v1699_v15  ;;  %v1075_v15 = vrot.slane %v7391_v25, 4 }
 0x1c9   :  { %v1567_v63 = vsel %vm1004_vm5, %v1561_v23, 0.0  ;;  %v1616_v54 = vmul.f32 %v1561_v23, %v1561_v23  ;;  %1672 = vst [vmem:[#allocation3 + $0xd8] sm:$0x3] %v1561_v23  ;;  %v1697_v23 = vld [vmem:[%s7428_s21 + $0xb0] sm:$0xff] }
 0x1ca   :  { %v1568_v51 = vadd.f32 %v1567_v63, %v1566_v40  ;;  %v1487_v2 = vpop.f32.mrf.mxu2  ;;  %v1519_v61 = vpop.f32.mrf.mxu3  ;;  %1740 = vmatpush.msra.mxu1 %v1698_v7  ;;  %1803 = vmatpush.msrb.mxu0 %v1698_v7  ;;  %v1076_v7 = vadd.f32 %v1075_v15, %v7391_v25 }
 0x1cb   :  { %v1622_v1 = vsel %vm1004_vm5, %v1616_v54, 0.0  ;;  %v1535_v43 = vadd.f32 %v1487_v2, %v1348_v42  ;;  %v1536_v32 = vadd.f32 %v1519_v61, %v1380_v22  ;;  %v1695_v42 = vld [vmem:[%s7428_s21 + $0xa0] sm:$0xff]  ;;  %v1069_v54 = vadd.f32 %v1068_v10, %v1067_v16 }
 0x1cc   :  { %v1569_v39 = vrot.slane %v1568_v51, 4  ;;  %v1623_v4 = vadd.f32 %v1622_v1, %v1621_v37  ;;  %1741 = vmatpush.msra.mxu1 %v1697_v23  ;;  %1804 = vmatpush.msrb.mxu0 %v1697_v23  ;;  %v1354_v37 = vadd.f32 %v7475_v38, %v7443_v26  ;;  %v1692_v38 = vld [vmem:[%s7428_s21 + $0x88] sm:$0xff] }
 0x1cd   :  { %v7516_v60 = vadd.f32 %v1535_v43, %v7329_v47  ;;  %v7519_v56 = vadd.f32 %v1536_v32, %v7384_v13  ;;  %v1388_v43 = vpop.f32.mrf.mxu0 }
 0x1ce   :  { %v1570_v33 = vadd.f32 %v1569_v39, %v1568_v51  ;;  %v1624_v52 = vrot.slane %v1623_v4, 4  ;;  %1742 = vmatpush.msra.mxu1 %v1696_v12  ;;  %1805 = vmatpush.msrb.mxu0 %v1696_v12  ;;  %v1694_v51 = vld [vmem:[%s7428_s21 + $0x98] sm:$0xff]  ;;  %v1018_v39 = vrot.slane %v7386_v14, 4  ;;  %v1389_v59 = vadd.f32 %v1388_v43, %v7405_v9 }
 0x1cf   :  { %1661 = vst [vmem:[#allocation3 + $0x80] sm:$0xff] %v7516_v60  ;;  %v1606_v9 = vmul.f32 %v7519_v56, %v7519_v56  ;;  %v1605_v25 = vmul.f32 %v7516_v60, %v7516_v60  ;;  %v1586_v23 = vsel %vm1024_vm6, %v7519_v56, 0.0 }
 0x1d0   :  { %v1571_v30 = vrot.slane %v1570_v33, 2  ;;  %v1625_v53 = vadd.f32 %v1624_v52, %v1623_v4  ;;  %1662 = vst.msk [vmem:[#allocation3 + $0x88] sm:$0xff] %vm1024_vm6, %v7519_v56  ;;  %1743 = vmatpush.msra.mxu1 %v1695_v42  ;;  %1806 = vmatpush.msrb.mxu0 %v1695_v42  ;;  %v1707_v4 = vld [vmem:[%s7428_s21 + $0x100] sm:$0xff]  ;;  %v7559_v52 = vadd.f32 %v1018_v39, %v7386_v14  ;;  %s6174_s21 = sld [smem:[%s10713_s0 + %s6815_s18]]   ;;  %s6830_s18 = smov 33  }
 0x1d1   :  { %1767 = vmatpush.msra.mxu2 %v1707_v4 }
 0x1d2   :  { %v1572_v50 = vadd.f32 %v1571_v30, %v1570_v33  ;;  %v1626_v27 = vrot.slane %v1625_v53, 2  ;;  %v1490_v11 = vpop.f32.mrf.mxu2  ;;  %v1522_v6 = vpop.f32.mrf.mxu3  ;;  %1744 = vmatpush.msra.mxu1 %v1694_v51  ;;  %1807 = vmatpush.msrb.mxu0 %v1694_v51  ;;  %v1357_v33 = vadd.f32 %v7485_v55, %v7463_v34 }
 0x1d3   :  { %v1538_v18 = vadd.f32 %v1490_v11, %v1351_v45  ;;  %v1539_v19 = vadd.f32 %v1522_v6, %v1383_v44 }
 0x1d4   :  { %v1573_v62 = vrot.slane %v1572_v50, 1  ;;  %v1627_v5 = vadd.f32 %v1626_v27, %v1625_v53  ;;  %1745 = vmatpush.msra.mxu1 %v1693_v29  ;;  %1808 = vmatpush.msrb.mxu0 %v1693_v29  ;;  %v1035_v53 = vrot.slane %v7448_v28, 4  ;;  %v1090_v27 = vrot.slane %v7452_v31, 4 }
 0x1d5   :  { %v7532_v21 = vadd.f32 %v1538_v18, %v7329_v47  ;;  %v7535_v17 = vadd.f32 %v1539_v19, %v7384_v13  ;;  %v1391_v49 = vpop.f32.mrf.mxu0  ;;  %v1360_v19 = vadd.f32 %v7491_v24, %v7477_v0 }
 0x1d6   :  { %v1574_v40 = vadd.f32 %v1573_v62, %v1572_v50  ;;  %v1628_v22 = vrot.slane %v1627_v5, 1  ;;  %1746 = vmatpush.msra.mxu1 %v1692_v38  ;;  %1809 = vmatpush.msrb.mxu0 %v1692_v38  ;;  %v1036_v50 = vadd.f32 %v1035_v53, %v7448_v28  ;;  %v1392_v18 = vadd.f32 %v1391_v49, %v7421_v46 }
 0x1d7   :  { %1664 = vst [vmem:[#allocation3 + $0x98] sm:$0xff] %v7532_v21  ;;  %v1609_v34 = vmul.f32 %v7535_v17, %v7535_v17  ;;  %v1608_v8 = vmul.f32 %v7532_v21, %v7532_v21  ;;  %v1587_v11 = vsel %vm1024_vm6, %v7535_v17, 0.0  ;;  %v1641_v28 = vsel %vm1024_vm6, %v1606_v9, 0.0 }
 0x1d8   :  { %1665 = vst.msk [vmem:[#allocation3 + $0xa0] sm:$0xff] %vm1024_vm6, %v7535_v17  ;;  %v1601_v63 = vadd.f32 %v1574_v40, %v1012_v41  ;;  %v1629_v20 = vadd.f32 %v1628_v22, %v1627_v5  ;;  %1747 = vmatpush.msra.mxu1 %v1691_v57  ;;  %1810 = vmatpush.msrb.mxu0 %v1691_v57 }
 0x1d9   :  { %v1642_v62 = vsel %vm1024_vm6, %v1609_v34, 0.0  ;;  %v1575_v46 = vadd.f32 %v7532_v21, %v7516_v60  ;;  %v1630_v17 = vadd.f32 %v1608_v8, %v1605_v25  ;;  %v1588_v0 = vadd.f32 %v1587_v11, %v1586_v23 }
 0x1da   :  { %v1493_v2 = vpop.f32.mrf.mxu2  ;;  %v1525_v61 = vpop.f32.mrf.mxu3  ;;  %1728 = vmatmul.f32.vlgmr.msra.gmra.mxu0 %v1601_v63  ;;  %v1656_v1 = vadd.f32 %v1629_v20, %v1069_v54  ;;  %1829 = vmatpush.msrb.mxu1 %v7494_v35  ;;  %v1020_v35 = vrot.slane %v7559_v52, 2  ;;  %v1643_v63 = vadd.f32 %v1642_v62, %v1641_v28 }
 0x1db   :  { %v1541_v32 = vadd.f32 %v1493_v2, %v1354_v37  ;;  %v1542_v58 = vadd.f32 %v1525_v61, %v1386_v36  ;;  %v1037_v37 = vrot.slane %v1036_v50, 2 }
 0x1dc   :  { %1791 = vmatmul.f32.vlgmr.msra.gmra.mxu3 %v1656_v1  ;;  %1830 = vmatpush.msrb.mxu1 %v1707_v4 }
 0x1dd   :  { %v1556_v3 = vadd.f32 %v1541_v32, %v7329_v47  ;;  %v1557_v26 = vadd.f32 %v1542_v58, %v7384_v13  ;;  %v1038_v53 = vadd.f32 %v1037_v37, %v1036_v50 }
 0x1df   :  { %1667 = vst [vmem:[#allocation3 + $0xb0] sm:$0xff] %v1556_v3  ;;  %v1612_v6 = vmul.f32 %v1557_v26, %v1557_v26  ;;  %v1589_v10 = vsel %vm1024_vm6, %v1557_v26, 0.0  ;;  %v1611_v24 = vmul.f32 %v1556_v3, %v1556_v3  ;;  %v1576_v54 = vadd.f32 %v1575_v46, %v1556_v3 }
 0x1e0   :  { %1668 = vst.msk [vmem:[#allocation3 + $0xb8] sm:$0xff] %vm1024_vm6, %v1557_v26  ;;  %v1590_v20 = vadd.f32 %v1589_v10, %v1588_v0 }
 0x1e1   :  { %v1644_v40 = vsel %vm1024_vm6, %v1612_v6, 0.0  ;;  %v1631_v2 = vadd.f32 %v1630_v17, %v1611_v24 }
 0x1e2   :  { %v1496_v16 = vpop.f32.mrf.mxu2  ;;  %v1528_v30 = vpop.f32.mrf.mxu3  ;;  %v1645_v61 = vadd.f32 %v1644_v40, %v1643_v63 }
 0x1e3   :  { %v1544_v44 = vadd.f32 %v1496_v16, %v1357_v33  ;;  %v1545_v45 = vadd.f32 %v1528_v30, %v1389_v59  ;;  %v1021_v30 = vadd.f32 %v1020_v35, %v7559_v52 }
 0x1e5   :  { %v1559_v14 = vadd.f32 %v1544_v44, %v7329_v47  ;;  %v1560_v55 = vadd.f32 %v1545_v45, %v7384_v13  ;;  %v1091_v44 = vadd.f32 %v1090_v27, %v7452_v31  ;;  %v1022_v25 = vrot.slane %v1021_v30, 1 }
 0x1e7   :  { %1670 = vst [vmem:[#allocation3 + $0xc8] sm:$0xff] %v1559_v14  ;;  %v1615_v5 = vmul.f32 %v1560_v55, %v1560_v55  ;;  %v1591_v56 = vsel %vm1024_vm6, %v1560_v55, 0.0  ;;  %v1614_v36 = vmul.f32 %v1559_v14, %v1559_v14  ;;  %v1577_v1 = vadd.f32 %v1576_v54, %v1559_v14 }
 0x1e8   :  { %1671 = vst.msk [vmem:[#allocation3 + $0xd0] sm:$0xff] %vm1024_vm6, %v1560_v55  ;;  %v1592_v43 = vadd.f32 %v1591_v56, %v1590_v20  ;;  %v1023_v46 = vadd.f32 %v1022_v25, %v1021_v30  ;;  %v1993_v25 = vld [vmem:[#allocation3 + $0x38] sm:$0xff] }
 0x1e9   :  { %v1646_v51 = vsel %vm1024_vm6, %v1615_v5, 0.0  ;;  %v1632_v26 = vadd.f32 %v1631_v2, %v1614_v36  ;;  %v1856_v2 = vld [vmem:[%s6162_s25] sm:$0xff] }
 0x1ea   :  { %v1499_v12 = vpop.f32.mrf.mxu2  ;;  %v1531_v41 = vpop.f32.mrf.mxu3  ;;  %v1647_v38 = vadd.f32 %v1646_v51, %v1645_v61  ;;  %v1857_v61 = vld [vmem:[%s6162_s25 + $0x8] sm:$0xff]  ;;  %1878 = vmatpush.msrb.mxu2 %v1856_v2 }
 0x1eb   :  { %v1547_v22 = vadd.f32 %v1499_v12, %v1360_v19  ;;  %v1548_v42 = vadd.f32 %v1531_v41, %v1392_v18  ;;  %v1039_v18 = vrot.slane %v1038_v53, 1  ;;  %v1092_v19 = vrot.slane %v1091_v44, 2  ;;  %1961 = vmatpush.msrb.mxu3 %v1857_v61 }
 0x1ed   :  { %v1562_v60 = vadd.f32 %v1547_v22, %v7329_v47  ;;  %v1563_v21 = vadd.f32 %v1548_v42, %v7384_v13  ;;  %v1077_v47 = vrot.slane %v1076_v7, 2  ;;  %v1093_v5 = vadd.f32 %v1092_v19, %v1091_v44  ;;  %v1999_v19 = vld [vmem:[#allocation3 + $0x68] sm:$0x3] }
 0x1ee   :  { %v1040_v17 = vadd.f32 %v1039_v18, %v1038_v53  ;;  %v1840_v53 = vld [vmem:[%s6159_s29] sm:$0x1]  ;;  %s9582_s29 = sld [smem:[%s10713_s0 + %s6817_s26]]   ;;  %s6832_s26 = smov 36  }
 0x1ef   :  { %v1578_v32 = vsel %vm1004_vm5, %v1562_v60, 0.0  ;;  %v1617_v58 = vmul.f32 %v1562_v60, %v1562_v60  ;;  %1673 = vst [vmem:[#allocation3 + $0xe0] sm:$0x3] %v1562_v60  ;;  %v1593_v29 = vsel %vm1032_vm7, %v1563_v21, 0.0  ;;  %v1618_v3 = vmul.f32 %v1563_v21, %v1563_v21 }
 0x1f0   :  { %v1579_v39 = vadd.f32 %v1578_v32, %v1577_v1  ;;  %v1594_v4 = vadd.f32 %v1593_v29, %v1592_v43  ;;  %1674 = vst.msk [vmem:[#allocation3 + $0xe8] sm:$0x3] %vm1032_vm7, %v1563_v21  ;;  %v1078_v14 = vadd.f32 %v1077_v47, %v1076_v7  ;;  %v1094_v42 = vrot.slane %v1093_v5, 1 }
 0x1f1   :  { %v1633_v13 = vsel %vm1004_vm5, %v1617_v58, 0.0  ;;  %v1648_v57 = vsel %vm1032_vm7, %v1618_v3, 0.0  ;;  %vm5295_vm7 = vcmask 261120  }
 0x1f2   :  { %v1580_v59 = vrot.slane %v1579_v39, 4  ;;  %v1634_v33 = vadd.f32 %v1633_v13, %v1632_v26  ;;  %v1595_v15 = vrot.slane %v1594_v4, 4  ;;  %v1649_v16 = vadd.f32 %v1648_v57, %v1647_v38 }
 0x1f3   :  { %v1079_v52 = vrot.slane %v1078_v14, 1  ;;  %v1095_v20 = vadd.f32 %v1094_v42, %v1093_v5  ;;  %v1992_v5 = vld [vmem:[#allocation3 + $0x30] sm:$0xff]  ;;  %v2715_v42 = vld [vmem:[#allocation3 + $0x80] sm:$0xff] }
 0x1f4   :  { %v1581_v45 = vadd.f32 %v1580_v59, %v1579_v39  ;;  %v1635_v49 = vrot.slane %v1634_v33, 4  ;;  %v1596_v9 = vadd.f32 %v1595_v15, %v1594_v4  ;;  %v1650_v34 = vrot.slane %v1649_v16, 4  ;;  %v1858_v4 = vld [vmem:[%s6162_s25 + $0x10] sm:$0xff]  ;;  %s9571_s25 = sld [smem:[%s10713_s0 + %s6816_s22]]   ;;  %s6831_s22 = smov 35  }
 0x1f5   :  { %v1080_v12 = vadd.f32 %v1079_v52, %v1078_v14  ;;  %v1990_v52 = vld [vmem:[#allocation3 + $0x20] sm:$0xff] }
 0x1f6   :  { %v1582_v55 = vrot.slane %v1581_v45, 2  ;;  %v1636_v8 = vadd.f32 %v1635_v49, %v1634_v33  ;;  %v1597_v11 = vrot.slane %v1596_v9, 2  ;;  %v1651_v6 = vadd.f32 %v1650_v34, %v1649_v16 }
 0x1f8   :  { %v1583_v23 = vadd.f32 %v1582_v55, %v1581_v45  ;;  %v1637_v28 = vrot.slane %v1636_v8, 2  ;;  %v1598_v62 = vadd.f32 %v1597_v11, %v1596_v9  ;;  %v1652_v10 = vrot.slane %v1651_v6, 2  ;;  %v1853_v9 = vld [vmem:[%s6160_s3] sm:$0x1]  ;;  %s9918_s3 = sld [smem:[%s10713_s0 + %s6818_s30]]  }
 0x1fa   :  { %v1584_v35 = vrot.slane %v1583_v23, 1  ;;  %v1638_v50 = vadd.f32 %v1637_v28, %v1636_v8  ;;  %v1599_v31 = vrot.slane %v1598_v62, 1  ;;  %v1653_v27 = vadd.f32 %v1652_v10, %v1651_v6 }
 0x1fc   :  { %v1600_v7 = vadd.f32 %v1599_v31, %v1598_v62  ;;  %v1585_v0 = vadd.f32 %v1584_v35, %v1583_v23  ;;  %v1639_v24 = vrot.slane %v1638_v50, 1  ;;  %v1654_v40 = vrot.slane %v1653_v27, 1  ;;  %v1987_v23 = vld [vmem:[#allocation3 + $0x8] sm:$0xff]  ;;  %v2727_v35 = vld [vmem:[#allocation3 + $0xe0] sm:$0x3] }
 0x1fe   :  { %v1603_v41 = vadd.f32 %v1600_v7, %v1040_v17  ;;  %v1602_v56 = vadd.f32 %v1585_v0, %v1023_v46  ;;  %v1640_v22 = vadd.f32 %v1639_v24, %v1638_v50  ;;  %v1655_v54 = vadd.f32 %v1654_v40, %v1653_v27  ;;  %v2724_v50 = vld [vmem:[#allocation3 + $0xc8] sm:$0xff]  ;;  %v2721_v0 = vld [vmem:[#allocation3 + $0xb0] sm:$0xff]  ;;  %v2718_v24 = vld [vmem:[#allocation3 + $0x98] sm:$0xff] }
 0x1ff   :  { %v1998_v40 = vld [vmem:[#allocation3 + $0x60] sm:$0x3] }
 0x200   :  { %1748 = vmatmul.f32.vlgmr.msra.gmra.mxu1 %v1602_v56  ;;  %6431 = vmatmul.msk.f32.vlgmr.msra.gmra.mxu2 %vm1024_vm6, %v1603_v41  ;;  %v1657_v63 = vadd.f32 %v1640_v22, %v1080_v12  ;;  %v1658_v36 = vadd.f32 %v1655_v54, %v1095_v20  ;;  %v1995_v56 = vld [vmem:[#allocation3 + $0x48] sm:$0xff] }
 0x201   :  { %1898 = vmatpush.msra.mxu1 %v1857_v61  ;;  %1941 = vmatpush.msra.mxu2 %v1856_v2 }
 0x202   :  { %1811 = vmatmul.f32.vlgmr.msrb.gmra.mxu0 %v1657_v63 }
 0x208   :  { %6432 = vmatmul.msk.f32.vlgmr.msrb.gmra.mxu1 %vm1024_vm6, %v1658_v36  ;;  %v1989_v36 = vld [vmem:[#allocation3 + $0x18] sm:$0xff] }
 0x209   :  { %1918 = vmatpush.msrb.mxu1 %v1858_v4 }
 0x257   :  { %v1729_v37 = vpop.f32.mrf.mxu0 }
 0x25f   :  { %v1792_v1 = vpop.f32.mrf.mxu3 }
 0x27d   :  { %v1749_v51 = vpop.f32.mrf.mxu1 }
 0x27e   :  { %v1750_v21 = vadd.f32 %v1749_v51, %v1729_v37  ;;  %v1986_v37 = vld [vmem:[#allocation3] sm:$0xff] }
 0x27f   :  { %v1812_v60 = vpop.f32.mrf.mxu0 }
 0x280   :  { %v1813_v32 = vadd.f32 %v1812_v60, %v1792_v1  ;;  %v2726_v1 = vld [vmem:[#allocation3 + $0xd8] sm:$0x3] }
 0x283   :  { %v1769_v43 = vpop.f32.mrf.mxu2 }
 0x284   :  { %v1770_v58 = vadd.f32 %v1769_v43, %v1750_v21  ;;  %v2723_v43 = vld [vmem:[#allocation3 + $0xc0] sm:$0xff] }
 0x285   :  { %v1832_v29 = vpop.f32.mrf.mxu1 }
 0x286   :  { %v1835_v3 = vmul.f32 0.00043252597, %v1770_v58  ;;  %v1833_v26 = vadd.f32 %v1832_v29, %v1813_v32  ;;  %v2000_v58 = vld [vmem:[#allocation3 + $0x70] sm:$0x3] }
 0x288   :  { %v1837_v38 = vmul.f32 %v1835_v3, %v1835_v3  ;;  %v1836_v39 = vmul.f32 0.00043252597, %v1833_v26 }
 0x28a   :  { %v1838_v47 = vsub.f32 %v1836_v39, %v1837_v38 }
 0x28c   :  { %v1839_v13 = vmax.f32 %v1838_v47, 0.0 }
 0x28e   :  { %v1841_v57 = vadd.f32 1e-05, %v1839_v13 }
 0x290   :  { %6783 = vrsqrt.f32 %v1841_v57  ;;  %vm1848_vm9 = vweird.f32 %v1841_v57 }
 0x296   :  { %v6784_v59 = vpop.eup %6783 }
 0x297   :  { %v1843_v33 = vmul.f32 %v6784_v59, %v1841_v57  ;;  %vm1849_vm8 = vweird.f32 %v6784_v59  ;;  %v1997_v57 = vld [vmem:[#allocation3 + $0x58] sm:$0xff] }
 0x298   :  { %vm1850_vm10 = vmor %vm1848_vm9, %vm1849_vm8 }
 0x299   :  { %v1844_v15 = vmul.f32 %v6784_v59, %v1843_v33  ;;  %v1991_v33 = vld [vmem:[#allocation3 + $0x28] sm:$0xff] }
 0x29b   :  { %v1845_v16 = vmul.f32 0.5, %v1844_v15 }
 0x29d   :  { %v1846_v30 = vsub.f32 1.5, %v1845_v16 }
 0x29f   :  { %v1847_v44 = vmul.f32 %v6784_v59, %v1846_v30 }
 0x2a1   :  { %v1851_v45 = vsel %vm1850_vm10, %v6784_v59, %v1847_v44  ;;  %v1994_v59 = vld [vmem:[#allocation3 + $0x40] sm:$0xff] }
 0x2a2   :  { %v1852_v49 = vmul.f32 %v1851_v45, %v1840_v53 }
 0x2a4   :  { %6433 = vmatmul.msk.f32.vlgmr.msrb.gmra.mxu2 %vm1859_vm11, %v1852_v49  ;;  %6434 = vmatmul.msk.f32.vlgmr.msra.gmra.mxu1 %vm1859_vm11, %v1852_v49  ;;  %v1854_v34 = vmul.f32 %v1852_v49, %v1835_v3 }
 0x2a5   :  { %1981 = vmatpush.msra.mxu1 %v1858_v4 }
 0x2a6   :  { %v1855_v14 = vsub.f32 %v1853_v9, %v1854_v34 }
 0x2a8   :  { %6437 = vmatmul.msk.f32.vlgmr.msrb.gmra.mxu3 %vm1859_vm11, %v1855_v14 }
 0x2ac   :  { %6435 = vmatmul.msk.f32.vlgmr.msrb.gmra.mxu1 %vm1859_vm11, %v1852_v49  ;;  %6436 = vmatmul.msk.f32.vlgmr.msra.gmra.mxu2 %vm1859_vm11, %v1855_v14 }
 0x2b4   :  { %6438 = vmatmul.msk.f32.vlgmr.msra.gmra.mxu1 %vm1859_vm11, %v1855_v14  ;;  %v1988_v14 = vld [vmem:[#allocation3 + $0x10] sm:$0xff] }
 0x321   :  { %v1900_v55 = vpop.f32.mrf.mxu1 }
 0x322   :  { %v2002_v8 = vperm.slane %v1900_v55, 0 }
 0x324   :  { %v2017_v28 = vmul.f32 %v2002_v8, %v1999_v19  ;;  %v2014_v62 = vmul.f32 %v2002_v8, %v7362_v48  ;;  %v2011_v10 = vmul.f32 %v2002_v8, %v1993_v25  ;;  %v2008_v27 = vmul.f32 %v2002_v8, %v1990_v52  ;;  %v2714_v52 = vld [vmem:[#allocation3 + $0x78] sm:$0xff] }
 0x325   :  { %v2005_v46 = vmul.f32 %v2002_v8, %v1987_v23  ;;  %v2742_v17 = vmul.f32 %v2727_v35, %v2002_v8  ;;  %v2739_v7 = vmul.f32 %v2724_v50, %v2002_v8  ;;  %v7626_v22 = vmul.f32 %v2721_v0, %v2002_v8 }
 0x326   :  { %v7628_v48 = vmul.f32 %v2718_v24, %v2002_v8  ;;  %v7633_v51 = vmul.f32 %v2715_v42, %v2002_v8 }
 0x327   :  { %v1880_v11 = vpop.f32.mrf.mxu2 }
 0x328   :  { %v7619_v6 = vperm.slane %v1880_v11, 0 }
 0x329   :  { %v1920_v18 = vpop.f32.mrf.mxu1 }
 0x32a   :  { %v7622_v12 = vperm.slane %v1920_v18, 0  ;;  %v2016_v63 = vmul.f32 %v7619_v6, %v1998_v40  ;;  %v2013_v54 = vmul.f32 %v7619_v6, %v1995_v56  ;;  %v2010_v20 = vmul.f32 %v7619_v6, %v1992_v5 }
 0x32b   :  { %v1963_v31 = vpop.f32.mrf.mxu3  ;;  %v2007_v2 = vmul.f32 %v7619_v6, %v1989_v36  ;;  %v2004_v61 = vmul.f32 %v7619_v6, %v1986_v37  ;;  %v2741_v29 = vmul.f32 %v2726_v1, %v7619_v6  ;;  %v2738_v3 = vmul.f32 %v2723_v43, %v7619_v6  ;;  %v7712_v36 = vld [vmem:[%s7663_s7] sm:$0xff]  ;;  %v2728_v1 = vld [vmem:[#allocation3 + $0xe8] sm:$0x3] }
 0x32c   :  { %v7624_v41 = vperm.slane %v1963_v31, 0  ;;  %v2018_v13 = vmul.f32 %v7622_v12, %v2000_v58  ;;  %v2015_v30 = vmul.f32 %v7622_v12, %v1997_v57  ;;  %v2012_v53 = vmul.f32 %v7622_v12, %v1994_v59  ;;  %v2725_v43 = vld [vmem:[#allocation3 + $0xd0] sm:$0xff] }
 0x32d   :  { %v2009_v44 = vmul.f32 %v7622_v12, %v1991_v33  ;;  %v2006_v8 = vmul.f32 %v7622_v12, %v1988_v14  ;;  %v2743_v58 = vmul.f32 %v2728_v1, %v7622_v12  ;;  %v2716_v33 = vld [vmem:[#allocation3 + $0x88] sm:$0xff]  ;;  %v7923_v1 = vld [vmem:[%s7862_s19 + $0xe0] sm:$0xff] }
 0x32e   :  { %v7636_v60 = vadd.f32 %v7624_v41, %v2017_v28  ;;  %v7639_v21 = vadd.f32 %v7624_v41, %v2014_v62  ;;  %v7646_v26 = vadd.f32 %v2742_v17, %v7624_v41  ;;  %v7649_v38 = vadd.f32 %v2739_v7, %v7624_v41  ;;  %v2720_v62 = vld [vmem:[#allocation3 + $0xa8] sm:$0xff]  ;;  %10895 = vst [vmem:[#allocation23_spill] sm:$0xff] %v7923_v1 }
 0x32f   :  { %v1943_v32 = vpop.f32.mrf.mxu2  ;;  %v7653_v47 = vadd.f32 %v7624_v41, %v2011_v10  ;;  %v7657_v16 = vadd.f32 %v7624_v41, %v2008_v27  ;;  %v7674_v55 = vadd.f32 %v7624_v41, %v2005_v46  ;;  %v2717_v10 = vld [vmem:[#allocation3 + $0x90] sm:$0xff]  ;;  %v2735_v50 = vmul.f32 %v2720_v62, %v7619_v6  ;;  %v7842_v62 = vld [vmem:[%s7760_s15 + $0x90] sm:$0xff] }
 0x330   :  { %v2019_v39 = vperm.slane %v1943_v32, 0  ;;  %v2050_v4 = vmax.f32 %v7636_v60, 0.0  ;;  %v2047_v49 = vmax.f32 %v7639_v21, 0.0  ;;  %v2732_v31 = vmul.f32 %v2717_v10, %v7619_v6  ;;  %v7781_v60 = vld [vmem:[%s7699_s11 + $0x8] sm:$0xff]  ;;  %v7786_v21 = vld [vmem:[%s7760_s15 + $0xf0] sm:$0xff]  ;;  %v7845_v10 = vld [vmem:[%s7760_s15 + $0xb8] sm:$0xff] }
 0x331   :  { %v1983_v15 = vpop.f32.mrf.mxu1  ;;  %v2044_v25 = vmax.f32 %v7653_v47, 0.0  ;;  %v2729_v27 = vmul.f32 %v2714_v52, %v7619_v6  ;;  %v2041_v46 = vmax.f32 %v7657_v16, 0.0  ;;  %v2038_v0 = vmax.f32 %v7674_v55, 0.0  ;;  %v7794_v47 = vld [vmem:[%s7663_s7 + $0x10] sm:$0x1]  ;;  %v7814_v55 = vld [vmem:[%s7760_s15 + $0xe8] sm:$0xff] }
 0x332   :  { %v7667_v45 = vperm.slane %v1983_v15, 0  ;;  %6443 = vmatpush.msk.msra.mxu3 %vm1004_vm5, %v2050_v4  ;;  %v2034_v9 = vadd.f32 %v2019_v39, %v2016_v63  ;;  %v2031_v34 = vadd.f32 %v2019_v39, %v2013_v54  ;;  %v7677_v11 = vadd.f32 %v2741_v29, %v2019_v39  ;;  %v2722_v29 = vld [vmem:[#allocation3 + $0xb8] sm:$0xff]  ;;  %10879 = vst [vmem:[#allocation7_spill] sm:$0xff] %v7794_v47  ;;  %v7800_v16 = vld [vmem:[%s7760_s15 + $0xd0] sm:$0xff]  ;;  %v7854_v52 = vld [vmem:[%s7760_s15 + $0x80] sm:$0xff] }
 0x333   :  { %v7679_v18 = vadd.f32 %v2738_v3, %v2019_v39  ;;  %v2028_v28 = vadd.f32 %v2019_v39, %v2010_v20  ;;  %v2025_v7 = vadd.f32 %v2019_v39, %v2007_v2  ;;  %v2022_v40 = vadd.f32 %v2019_v39, %v2004_v61  ;;  %10881 = vst [vmem:[#allocation9_spill] sm:$0xff] %v7854_v52 }
 0x334   :  { %2112 = vmatpush.msra.mxu3 %v2047_v49  ;;  %v2049_v19 = vmax.f32 %v2034_v9, 0.0  ;;  %v2036_v23 = vadd.f32 %v7667_v45, %v2018_v13  ;;  %v2033_v35 = vadd.f32 %v7667_v45, %v2015_v30  ;;  %v2046_v5 = vmax.f32 %v2031_v34, 0.0  ;;  %v7750_v9 = vld [vmem:[%s7699_s11] sm:$0xff] }
 0x335   :  { %v2030_v24 = vadd.f32 %v7667_v45, %v2012_v53  ;;  %v7701_v6 = vadd.f32 %v2735_v50, %v2019_v39  ;;  %v2043_v56 = vmax.f32 %v2028_v28, 0.0  ;;  %v2027_v42 = vadd.f32 %v7667_v45, %v2009_v44  ;;  %v7835_v28 = vld [vmem:[%s7760_s15 + $0xc8] sm:$0xff]  ;;  %v7867_v50 = vld [vmem:[%s7760_s15 + $0x70] sm:$0xff] }
 0x336   :  { %6439 = vmatpush.msk.msrb.mxu2 %vm1004_vm5, %v2049_v19  ;;  %2113 = vmatpush.msra.mxu3 %v2044_v25  ;;  %v2051_v17 = vmax.f32 %v2036_v23, 0.0  ;;  %v7706_v63 = vadd.f32 %v2732_v31, %v2019_v39  ;;  %v7708_v54 = vadd.f32 %v2729_v27, %v2019_v39  ;;  %v2048_v20 = vmax.f32 %v2033_v35, 0.0  ;;  %v7832_v23 = vld [vmem:[%s7760_s15 + $0xa0] sm:$0xff]  ;;  %v7857_v35 = vld [vmem:[%s7760_s15 + $0xa8] sm:$0xff]  ;;  %10882 = vst [vmem:[#allocation10_spill] sm:$0xff] %v7867_v50  ;;  %v7870_v31 = vld [vmem:[%s7760_s15 + $0x98] sm:$0xff] }
 0x337   :  { %6451 = vmatpush.msk.msra.mxu0 %vm1004_vm5, %v2049_v19  ;;  %v7716_v37 = vadd.f32 %v7626_v22, %v7624_v41  ;;  %v7720_v2 = vadd.f32 %v7628_v48, %v7624_v41  ;;  %v7724_v61 = vadd.f32 %v7633_v51, %v7624_v41  ;;  %v2040_v32 = vmax.f32 %v2025_v7, 0.0  ;;  %v2719_v51 = vld [vmem:[#allocation3 + $0xa0] sm:$0xff]  ;;  %v7822_v19 = vld [vmem:[%s7760_s15 + $0xd8] sm:$0xff]  ;;  %10883 = vst [vmem:[#allocation11_spill] sm:$0xff] %v7870_v31  ;;  %v7877_v27 = vld [vmem:[%s7760_s15 + $0x60] sm:$0xff] }
 0x338   :  { %2086 = vmatpush.msrb.mxu2 %v2046_v5  ;;  %2114 = vmatpush.msra.mxu3 %v2041_v46  ;;  %v2740_v22 = vmul.f32 %v2725_v43, %v7622_v12  ;;  %v2045_v48 = vmax.f32 %v2030_v24, 0.0  ;;  %v2024_v3 = vadd.f32 %v7667_v45, %v2006_v8  ;;  %v2737_v41 = vmul.f32 %v2722_v29, %v7622_v12  ;;  %v7819_v8 = vld [vmem:[%s7760_s15 + $0xb0] sm:$0xff]  ;;  %v7891_v7 = vld [vmem:[%s7760_s15 + $0x78] sm:$0xff]  ;;  %v7902_v24 = vld [vmem:[%s7760_s15 + $0x40] sm:$0xff] }
 0x339   :  { %6447 = vmatpush.msk.msrb.mxu1 %vm1004_vm5, %v2051_v17  ;;  %2176 = vmatpush.msra.mxu0 %v2046_v5  ;;  %v2037_v39 = vmax.f32 %v2022_v40, 0.0  ;;  %v7735_v13 = vadd.f32 %v2743_v58, %v7667_v45  ;;  %v2734_v59 = vmul.f32 %v2719_v51, %v7622_v12  ;;  %v2042_v15 = vmax.f32 %v2027_v42, 0.0  ;;  %10884 = vst [vmem:[#allocation12_spill] sm:$0xff] %v7877_v27  ;;  %v7880_v5 = vld [vmem:[%s7760_s15 + $0x88] sm:$0xff]  ;;  %v7914_v42 = vld [vmem:[%s7760_s15 + $0x30] sm:$0xff]  ;;  %v7928_v43 = vld [vmem:[%s7760_s15 + $0x20] sm:$0xff] }
 0x33a   :  { %2087 = vmatpush.msrb.mxu2 %v2043_v56  ;;  %2115 = vmatpush.msra.mxu3 %v2038_v0  ;;  %v7738_v57 = vadd.f32 %v2740_v22, %v7667_v45  ;;  %v7743_v30 = vadd.f32 %v2737_v41, %v7667_v45  ;;  %v2731_v53 = vmul.f32 %v2716_v33, %v7622_v12  ;;  %v2039_v14 = vmax.f32 %v2024_v3, 0.0  ;;  %v7766_v12 = vld [vmem:[%s7663_s7 + $0x8] sm:$0xff]  ;;  %v7936_v58 = vld [vmem:[%s7760_s15 + $0x10] sm:$0xff]  ;;  %v7939_v22 = vld [vmem:[%s7760_s15 + $0x38] sm:$0xff]  ;;  %s10380_s7 = sld [smem:[%s10713_s0 + %s6819_s4]]  }
 0x33b   :  { %2138 = vmatpush.msrb.mxu1 %v2048_v20  ;;  %2177 = vmatpush.msra.mxu0 %v2043_v56  ;;  %v7747_v44 = vadd.f32 %v2734_v59, %v7667_v45  ;;  %10885 = vst [vmem:[#allocation13_spill] sm:$0xff] %v7880_v5  ;;  %v7905_v40 = vld [vmem:[%s7760_s15 + $0x68] sm:$0xff]  ;;  %v7909_v56 = vld [vmem:[%s7862_s19 + $0xf0] sm:$0xff]  ;;  %v7947_v29 = vld [vmem:[%s7760_s15] sm:$0xff] }
 0x33c   :  { %6444 = vmatmul.msk.f32.vlgmr.msra.gmra.mxu3 %vm2055_vm12, %v7712_v36  ;;  %2088 = vmatpush.msrb.mxu2 %v2040_v32  ;;  %v7753_v34 = vadd.f32 %v2731_v53, %v7667_v45  ;;  %v7804_v45 = vld [vmem:[%s7760_s15 + $0xf8] sm:$0xff]  ;;  %10888 = vst [vmem:[#allocation16_spill] sm:$0xff] %v7891_v7  ;;  %v7962_v51 = vld [vmem:[%s7760_s15 + $0x1e8] sm:$0xff]  ;;  %v7976_v33 = vld [vmem:[%s7862_s19 + $0x1f0] sm:$0xff] }
 0x33d   :  { %6459 = vmatpush.msk.msrb.mxu3 %vm1004_vm5, %v2051_v17  ;;  %2139 = vmatpush.msrb.mxu1 %v2045_v48  ;;  %v7888_v17 = vld [vmem:[%s7760_s15 + $0x50] sm:$0xff]  ;;  %10890 = vst [vmem:[#allocation18_spill] sm:$0xff] %v7902_v24  ;;  %v7954_v3 = vld [vmem:[%s7760_s15 + $0x1f8] sm:$0xff]  ;;  %v7984_v53 = vld [vmem:[%s7862_s19 + $0x1e0] sm:$0xff] }
 0x33e   :  { %2178 = vmatpush.msra.mxu0 %v2040_v32  ;;  %2089 = vmatpush.msrb.mxu2 %v2037_v39  ;;  %10887 = vst [vmem:[#allocation15_spill] sm:$0xff] %v7888_v17  ;;  %v7931_v32 = vld [vmem:[%s7760_s15 + $0x48] sm:$0xff]  ;;  %v7958_v41 = vld [vmem:[%s7760_s15 + $0x18] sm:$0xff] }
 0x33f   :  { %2228 = vmatpush.msrb.mxu3 %v2048_v20  ;;  %2140 = vmatpush.msrb.mxu1 %v2042_v15  ;;  %10891 = vst [vmem:[#allocation19_spill] sm:$0xff] %v7905_v40  ;;  %v7917_v20 = vld [vmem:[%s7760_s15 + $0x58] sm:$0xff] }
 0x340   :  { %2179 = vmatpush.msra.mxu0 %v2037_v39  ;;  %6440 = vmatmul.msk.f32.vlgmr.msrb.gmra.mxu2 %vm2055_vm12, %v7712_v36  ;;  %10892 = vst [vmem:[#allocation20_spill] sm:$0xff] %v7909_v56  ;;  %v7969_v39 = vld [vmem:[%s7760_s15 + $0x8] sm:$0xff]  ;;  %v7972_v59 = vld [vmem:[%s7760_s15 + $0x1d8] sm:$0xff] }
 0x341   :  { %6455 = vmatpush.msk.msra.mxu2 %vm1004_vm5, %v2050_v4  ;;  %2229 = vmatpush.msrb.mxu3 %v2045_v48  ;;  %v7789_v4 = vld [vmem:[%s7760_s15 + $0xe0] sm:$0xff]  ;;  %10893 = vst [vmem:[#allocation21_spill] sm:$0xff] %v7914_v42  ;;  %v7950_v48 = vld [vmem:[%s7760_s15 + $0x28] sm:$0xff] }
 0x342   :  { %2141 = vmatpush.msrb.mxu1 %v2039_v14  ;;  %6452 = vmatmul.msk.f32.vlgmr.msra.gmra.mxu0 %vm2055_vm12, %v7750_v9  ;;  %10894 = vst [vmem:[#allocation22_spill] sm:$0xff] %v7917_v20 }
 0x343   :  { %2202 = vmatpush.msra.mxu2 %v2047_v49  ;;  %2230 = vmatpush.msrb.mxu3 %v2042_v15  ;;  %v7811_v49 = vld [vmem:[%s7760_s15 + $0xc0] sm:$0xff]  ;;  %10896 = vst [vmem:[#allocation24_spill] sm:$0xff] %v7928_v43  ;;  %v7980_v15 = vld [vmem:[%s7760_s15 + $0x1c8] sm:$0xff] }
 0x344   :  { %6445 = vmatmul.msk.f32.gmra.mxu3 %vm2055_vm12, %v7766_v12  ;;  %6448 = vmatmul.msk.f32.vlgmr.msrb.gmra.mxu1 %vm2055_vm12, %v7712_v36  ;;  %10897 = vst [vmem:[#allocation25_spill] sm:$0xff] %v7931_v32 }
 0x345   :  { %2203 = vmatpush.msra.mxu2 %v2044_v25  ;;  %2231 = vmatpush.msrb.mxu3 %v2039_v14  ;;  %v7825_v25 = vld [vmem:[%s7699_s11 + $0x10] sm:$0x1]  ;;  %10898 = vst [vmem:[#allocation26_spill] sm:$0xff] %v7936_v58  ;;  %v7989_v14 = vld [vmem:[%s7760_s15 + $0x1b8] sm:$0xff]  ;;  %s6178_s11 = sld [smem:[%s10713_s0 + %s6820_s8]]  }
 0x346   :  { %2328 = vmatpush.msra.mxu1 %v7786_v21  ;;  %10880 = vst [vmem:[#allocation8_spill] sm:$0xff] %v7825_v25 }
 0x347   :  { %2204 = vmatpush.msra.mxu2 %v2041_v46  ;;  %2406 = vmatpush.msra.mxu3 %v7804_v45  ;;  %v7883_v46 = vld [vmem:[%s7760_s15 + $0x210] sm:$0xff]  ;;  %10899 = vst [vmem:[#allocation27_spill] sm:$0xff] %v7939_v22 }
 0x348   :  { %6441 = vmatmul.msk.f32.gmra.mxu2 %vm2055_vm12, %v7766_v12  ;;  %2329 = vmatpush.msra.mxu1 %v7789_v4  ;;  %10886 = vst [vmem:[#allocation14_spill] sm:$0xff] %v7883_v46 }
 0x349   :  { %2205 = vmatpush.msra.mxu2 %v2038_v0  ;;  %2407 = vmatpush.msra.mxu3 %v7814_v55  ;;  %v7895_v0 = vld [vmem:[%s7760_s15 + $0x200] sm:$0xff]  ;;  %10900 = vst [vmem:[#allocation28_spill] sm:$0xff] %v7947_v29 }
 0x34a   :  { %6453 = vmatmul.msk.f32.gmra.mxu0 %vm2055_vm12, %v7781_v60  ;;  %2330 = vmatpush.msra.mxu1 %v7800_v16  ;;  %10889 = vst [vmem:[#allocation17_spill] sm:$0xff] %v7895_v0 }
 0x34b   :  { %2408 = vmatpush.msra.mxu3 %v7822_v19  ;;  %2394 = vmatpush.msrb.mxu2 %v7883_v46  ;;  %10901 = vst [vmem:[#allocation29_spill] sm:$0xff] %v7950_v48 }
 0x34c   :  { %6446 = vmatmul.msk.f32.gmra.mxu3 %vm2055_vm12, %v7794_v47  ;;  %6449 = vmatmul.msk.f32.gmra.mxu1 %vm2055_vm12, %v7766_v12  ;;  %10902 = vst [vmem:[#allocation30_spill] sm:$0xff] %v7954_v3 }
 0x34d   :  { %2331 = vmatpush.msra.mxu1 %v7811_v49  ;;  %2409 = vmatpush.msra.mxu3 %v7835_v28  ;;  %10903 = vst [vmem:[#allocation31_spill] sm:$0xff] %v7958_v41 }
 0x34e   :  { %2395 = vmatpush.msrb.mxu2 %v7895_v0  ;;  %10904 = vst [vmem:[#allocation32_spill] sm:$0xff] %v7962_v51  ;;  %v8183_v0 = vld [vmem:[%s7760_s15 + $0x130] sm:$0xff] }
 0x34f   :  { %2332 = vmatpush.msra.mxu1 %v7819_v8  ;;  %2410 = vmatpush.msra.mxu3 %v7845_v10  ;;  %10905 = vst [vmem:[#allocation33_spill] sm:$0xff] %v7969_v39 }
 0x350   :  { %6442 = vmatmul.msk.f32.gmra.mxu2 %vm2055_vm12, %v7794_v47  ;;  %10906 = vst [vmem:[#allocation34_spill] sm:$0xff] %v7972_v59 }
 0x351   :  { %2333 = vmatpush.msra.mxu1 %v7832_v23  ;;  %2411 = vmatpush.msra.mxu3 %v7857_v35  ;;  %10907 = vst [vmem:[#allocation35_spill] sm:$0xff] %v7976_v33 }
 0x352   :  { %6454 = vmatmul.msk.f32.gmra.mxu0 %vm2055_vm12, %v7825_v25  ;;  %10908 = vst [vmem:[#allocation36_spill] sm:$0xff] %v7980_v15 }
 0x353   :  { %2334 = vmatpush.msra.mxu1 %v7842_v62  ;;  %2412 = vmatpush.msra.mxu3 %v7870_v31  ;;  %10909 = vst [vmem:[#allocation37_spill] sm:$0xff] %v7984_v53  ;;  %v10811_v31 = vmax.f32 %v7679_v18, 0.0 }
 0x354   :  { %6460 = vmatmul.msk.f32.vlgmr.msrb.gmra.mxu3 %vm2055_vm12, %v7750_v9  ;;  %6450 = vmatmul.msk.f32.gmra.mxu1 %vm2055_vm12, %v7794_v47  ;;  %10910 = vst [vmem:[#allocation38_spill] sm:$0xff] %v7989_v14  ;;  %v8340_v47 = vld [vmem:[%s7862_s19 + $0x1b8] sm:$0xff] }
 0x355   :  { %2335 = vmatpush.msra.mxu1 %v7854_v52  ;;  %2413 = vmatpush.msra.mxu3 %v7880_v5  ;;  %v8275_v5 = vld [vmem:[%s7862_s19 + $0x78] sm:$0xff] }
 0x356   :  { %10965 = vst [vmem:[#allocation93_spill] sm:$0xff] %v8275_v5  ;;  %v8307_v52 = vld [vmem:[%s7862_s19 + $0x38] sm:$0xff] }
 0x357   :  { %2336 = vmatpush.msra.mxu1 %v7867_v50  ;;  %2414 = vmatpush.msra.mxu3 %v7891_v7  ;;  %v8244_v7 = vld [vmem:[%s7862_s19 + $0xc8] sm:$0xff]  ;;  %v8250_v50 = vld [vmem:[%s7862_s19 + $0xb8] sm:$0xff]  ;;  %10971 = vst [vmem:[#allocation99_spill] sm:$0xff] %v8307_v52 }
 0x358   :  { %6456 = vmatmul.msk.f32.vlgmr.msra.gmra.mxu2 %vm2055_vm12, %v7750_v9  ;;  %10959 = vst [vmem:[#allocation87_spill] sm:$0xff] %v8244_v7 }
 0x359   :  { %2337 = vmatpush.msra.mxu1 %v7877_v27  ;;  %2552 = vmatpush.msra.mxu2 %v7909_v56  ;;  %v8217_v56 = vld [vmem:[%s7862_s19 + $0xf8] sm:$0xff]  ;;  %10960 = vst [vmem:[#allocation88_spill] sm:$0xff] %v8250_v50 }
 0x35a   :  { %2415 = vmatpush.msra.mxu3 %v7905_v40  ;;  %10953 = vst [vmem:[#allocation81_spill] sm:$0xff] %v8217_v56  ;;  %v8228_v40 = vld [vmem:[%s7862_s19 + $0x208] sm:$0xff]  ;;  %v8238_v27 = vld [vmem:[%s7862_s19 + $0xd8] sm:$0xff] }
 0x35b   :  { %2338 = vmatpush.msra.mxu1 %v7888_v17  ;;  %2553 = vmatpush.msra.mxu2 %v7923_v1  ;;  %10956 = vst [vmem:[#allocation84_spill] sm:$0xff] %v8228_v40 }
 0x35c   :  { %6461 = vmatmul.msk.f32.gmra.mxu3 %vm2055_vm12, %v7781_v60  ;;  %10958 = vst [vmem:[#allocation86_spill] sm:$0xff] %v8238_v27 }
 0x35d   :  { %2339 = vmatpush.msra.mxu1 %v7902_v24  ;;  %2416 = vmatpush.msra.mxu3 %v7917_v20  ;;  %v8171_v24 = vld [vmem:[%s7760_s15 + $0x140] sm:$0xff] }
 0x35f   :  { %2340 = vmatpush.msra.mxu1 %v7914_v42  ;;  %2417 = vmatpush.msra.mxu3 %v7931_v32  ;;  %v8135_v42 = vld [vmem:[%s7760_s15 + $0x170] sm:$0xff]  ;;  %v8195_v32 = vld [vmem:[%s7760_s15 + $0x120] sm:$0xff] }
 0x360   :  { %6457 = vmatmul.msk.f32.gmra.mxu2 %vm2055_vm12, %v7781_v60  ;;  %10948 = vst [vmem:[#allocation76_spill] sm:$0xff] %v8195_v32 }
 0x361   :  { %2341 = vmatpush.msra.mxu1 %v7928_v43  ;;  %2418 = vmatpush.msra.mxu3 %v7939_v22  ;;  %v8072_v43 = vld [vmem:[%s7760_s15 + $0x108] sm:$0xff]  ;;  %v8147_v22 = vld [vmem:[%s7760_s15 + $0x160] sm:$0xff] }
 0x362   :  { %10927 = vst [vmem:[#allocation55_spill] sm:$0xff] %v8072_v43 }
 0x363   :  { %2342 = vmatpush.msra.mxu1 %v7936_v58  ;;  %2419 = vmatpush.msra.mxu3 %v7950_v48  ;;  %v8058_v58 = vld [vmem:[%s7760_s15 + $0x118] sm:$0xff]  ;;  %v8111_v48 = vld [vmem:[%s7760_s15 + $0x190] sm:$0xff] }
 0x364   :  { %6462 = vmatmul.msk.f32.gmra.mxu3 %vm2055_vm12, %v7825_v25  ;;  %10924 = vst [vmem:[#allocation52_spill] sm:$0xff] %v8058_v58 }
 0x365   :  { %2343 = vmatpush.msra.mxu1 %v7947_v29  ;;  %2420 = vmatpush.msra.mxu3 %v7958_v41  ;;  %v8010_v29 = vld [vmem:[%s7760_s15 + $0x168] sm:$0xff]  ;;  %v8087_v41 = vld [vmem:[%s7760_s15 + $0x1b0] sm:$0xff] }
 0x366   :  { %10915 = vst [vmem:[#allocation43_spill] sm:$0xff] %v8010_v29 }
 0x367   :  { %2432 = vmatpush.msrb.mxu1 %v7954_v3  ;;  %2421 = vmatpush.msra.mxu3 %v7969_v39  ;;  %v7998_v3 = vld [vmem:[%s7760_s15 + $0x198] sm:$0xff]  ;;  %v8066_v39 = vld [vmem:[%s7862_s19 + $0x1b0] sm:$0xff] }
 0x368   :  { %6458 = vmatmul.msk.f32.gmra.mxu2 %vm2055_vm12, %v7825_v25  ;;  %10912 = vst [vmem:[#allocation40_spill] sm:$0xff] %v7998_v3  ;;  %v8336_v25 = vld [vmem:[%s7862_s19 + $0x18] sm:$0xff] }
 0x369   :  { %2433 = vmatpush.msrb.mxu1 %v7962_v51  ;;  %2578 = vmatpush.msrb.mxu3 %v7976_v33  ;;  %v7994_v51 = vld [vmem:[%s7760_s15 + $0x1a8] sm:$0xff]  ;;  %v8048_v33 = vld [vmem:[%s7862_s19 + $0x1c0] sm:$0xff]  ;;  %10926 = vst [vmem:[#allocation54_spill] sm:$0xff] %v8066_v39 }
 0x36a   :  { %10911 = vst [vmem:[#allocation39_spill] sm:$0xff] %v7994_v51 }
 0x36b   :  { %2434 = vmatpush.msrb.mxu1 %v7972_v59  ;;  %2579 = vmatpush.msrb.mxu3 %v7984_v53  ;;  %v8002_v59 = vld [vmem:[%s7760_s15 + $0x188] sm:$0xff]  ;;  %v8029_v53 = vld [vmem:[%s7862_s19 + $0xd0] sm:$0xff]  ;;  %10923 = vst [vmem:[#allocation51_spill] sm:$0xff] %v8048_v33 }
 0x36c   :  { %10913 = vst [vmem:[#allocation41_spill] sm:$0xff] %v8002_v59  ;;  %2554 = vmatpush.msra.mxu2 %v8029_v53 }
 0x36d   :  { %2435 = vmatpush.msrb.mxu1 %v7980_v15  ;;  %v8006_v15 = vld [vmem:[%s7760_s15 + $0x178] sm:$0xff]  ;;  %10919 = vst [vmem:[#allocation47_spill] sm:$0xff] %v8029_v53  ;;  %v8159_v53 = vld [vmem:[%s7760_s15 + $0x150] sm:$0xff] }
 0x36e   :  { %10914 = vst [vmem:[#allocation42_spill] sm:$0xff] %v8006_v15 }
 0x36f   :  { %2436 = vmatpush.msrb.mxu1 %v7989_v14  ;;  %v8014_v14 = vld [vmem:[%s7760_s15 + $0x158] sm:$0xff]  ;;  %10976 = vst [vmem:[#allocation104_spill] sm:$0xff] %v8336_v25 }
 0x370   :  { %10916 = vst [vmem:[#allocation44_spill] sm:$0xff] %v8014_v14 }
 0x371   :  { %2437 = vmatpush.msrb.mxu1 %v7994_v51  ;;  %v8018_v51 = vld [vmem:[%s7760_s15 + $0x148] sm:$0xff] }
 0x372   :  { %10917 = vst [vmem:[#allocation45_spill] sm:$0xff] %v8018_v51 }
 0x373   :  { %2438 = vmatpush.msrb.mxu1 %v7998_v3  ;;  %v8023_v3 = vld [vmem:[%s7760_s15 + $0x1f0] sm:$0xff] }
 0x374   :  { %2354 = vmatpush.msrb.mxu0 %v8023_v3 }
 0x375   :  { %2439 = vmatpush.msrb.mxu1 %v8002_v59  ;;  %v8026_v59 = vld [vmem:[%s7760_s15 + $0x138] sm:$0xff] }
 0x376   :  { %10918 = vst [vmem:[#allocation46_spill] sm:$0xff] %v8026_v59 }
 0x377   :  { %2440 = vmatpush.msrb.mxu1 %v8006_v15  ;;  %v8037_v15 = vld [vmem:[%s7760_s15 + $0x1e0] sm:$0xff] }
 0x378   :  { %2355 = vmatpush.msrb.mxu0 %v8037_v15 }
 0x379   :  { %2441 = vmatpush.msrb.mxu1 %v8010_v29  ;;  %v8034_v29 = vld [vmem:[%s7862_s19 + $0x1d0] sm:$0xff] }
 0x37a   :  { %10920 = vst [vmem:[#allocation48_spill] sm:$0xff] %v8034_v29  ;;  %2580 = vmatpush.msrb.mxu3 %v8034_v29  ;;  %v8061_v29 = vld [vmem:[%s7862_s19 + $0xb0] sm:$0xff] }
 0x37b   :  { %2442 = vmatpush.msrb.mxu1 %v8014_v14  ;;  %v8045_v14 = vld [vmem:[%s7862_s19 + $0xc0] sm:$0xff]  ;;  %10925 = vst [vmem:[#allocation53_spill] sm:$0xff] %v8061_v29 }
 0x37c   :  { %10922 = vst [vmem:[#allocation50_spill] sm:$0xff] %v8045_v14  ;;  %2555 = vmatpush.msra.mxu2 %v8045_v14  ;;  %2581 = vmatpush.msrb.mxu3 %v8048_v33  ;;  %v8077_v33 = vld [vmem:[%s7862_s19 + $0xa0] sm:$0xff] }
 0x37d   :  { %2443 = vmatpush.msrb.mxu1 %v8018_v51  ;;  %v8040_v51 = vld [vmem:[%s7760_s15 + $0x128] sm:$0xff]  ;;  %10928 = vst [vmem:[#allocation56_spill] sm:$0xff] %v8077_v33  ;;  %v8123_v14 = vld [vmem:[%s7760_s15 + $0x180] sm:$0xff] }
 0x37e   :  { %10921 = vst [vmem:[#allocation49_spill] sm:$0xff] %v8040_v51  ;;  %2556 = vmatpush.msra.mxu2 %v8061_v29  ;;  %2582 = vmatpush.msrb.mxu3 %v8066_v39  ;;  %v8090_v29 = vld [vmem:[%s7862_s19 + $0x90] sm:$0xff] }
 0x37f   :  { %2444 = vmatpush.msrb.mxu1 %v8026_v59  ;;  %v8055_v59 = vld [vmem:[%s7760_s15 + $0x1d0] sm:$0xff]  ;;  %10930 = vst [vmem:[#allocation58_spill] sm:$0xff] %v8090_v29 }
 0x380   :  { %2356 = vmatpush.msrb.mxu0 %v8055_v59  ;;  %2557 = vmatpush.msra.mxu2 %v8077_v33  ;;  %v8093_v39 = vld [vmem:[%s7862_s19 + $0x190] sm:$0xff]  ;;  %v8102_v33 = vld [vmem:[%s7862_s19 + $0x80] sm:$0xff] }
 0x381   :  { %2445 = vmatpush.msrb.mxu1 %v8040_v51  ;;  %v8069_v51 = vld [vmem:[%s7760_s15 + $0x1c0] sm:$0xff]  ;;  %10931 = vst [vmem:[#allocation59_spill] sm:$0xff] %v8093_v39 }
 0x382   :  { %2357 = vmatpush.msrb.mxu0 %v8069_v51  ;;  %2558 = vmatpush.msra.mxu2 %v8090_v29  ;;  %10932 = vst [vmem:[#allocation60_spill] sm:$0xff] %v8102_v33  ;;  %v8114_v29 = vld [vmem:[%s7862_s19 + $0x70] sm:$0xff] }
 0x383   :  { %2446 = vmatpush.msrb.mxu1 %v8058_v58  ;;  %v8082_v58 = vld [vmem:[%s7862_s19 + $0x1a0] sm:$0xff]  ;;  %10934 = vst [vmem:[#allocation62_spill] sm:$0xff] %v8114_v29 }
 0x384   :  { %10929 = vst [vmem:[#allocation57_spill] sm:$0xff] %v8082_v58  ;;  %2583 = vmatpush.msrb.mxu3 %v8082_v58  ;;  %2358 = vmatpush.msrb.mxu0 %v8087_v41  ;;  %v8105_v58 = vld [vmem:[%s7862_s19 + $0x180] sm:$0xff] }
 0x385   :  { %2447 = vmatpush.msrb.mxu1 %v8072_v43  ;;  %v8099_v43 = vld [vmem:[%s7760_s15 + $0x1a0] sm:$0xff]  ;;  %10933 = vst [vmem:[#allocation61_spill] sm:$0xff] %v8105_v58  ;;  %2559 = vmatpush.msra.mxu2 %v8102_v33 }
 0x386   :  { %2584 = vmatpush.msrb.mxu3 %v8093_v39  ;;  %2359 = vmatpush.msrb.mxu0 %v8099_v43  ;;  %v8118_v39 = vld [vmem:[%s7862_s19 + $0x170] sm:$0xff]  ;;  %v8126_v33 = vld [vmem:[%s7862_s19 + $0x60] sm:$0xff] }
 0x387   :  { %10935 = vst [vmem:[#allocation63_spill] sm:$0xff] %v8118_v39  ;;  %2560 = vmatpush.msra.mxu2 %v8114_v29  ;;  %v8138_v29 = vld [vmem:[%s7862_s19 + $0x50] sm:$0xff] }
 0x388   :  { %2585 = vmatpush.msrb.mxu3 %v8105_v58  ;;  %2360 = vmatpush.msrb.mxu0 %v8111_v48  ;;  %10936 = vst [vmem:[#allocation64_spill] sm:$0xff] %v8126_v33  ;;  %v8130_v58 = vld [vmem:[%s7862_s19 + $0x160] sm:$0xff] }
 0x389   :  { %10937 = vst [vmem:[#allocation65_spill] sm:$0xff] %v8130_v58  ;;  %2561 = vmatpush.msra.mxu2 %v8126_v33  ;;  %v8150_v33 = vld [vmem:[%s7862_s19 + $0x40] sm:$0xff] }
 0x38a   :  { %2586 = vmatpush.msrb.mxu3 %v8118_v39  ;;  %2361 = vmatpush.msrb.mxu0 %v8123_v14  ;;  %10938 = vst [vmem:[#allocation66_spill] sm:$0xff] %v8138_v29  ;;  %v8141_v39 = vld [vmem:[%s7862_s19 + $0x150] sm:$0xff] }
 0x38b   :  { %10939 = vst [vmem:[#allocation67_spill] sm:$0xff] %v8141_v39  ;;  %2562 = vmatpush.msra.mxu2 %v8138_v29  ;;  %v8162_v29 = vld [vmem:[%s7862_s19 + $0x30] sm:$0xff] }
 0x38c   :  { %2587 = vmatpush.msrb.mxu3 %v8130_v58  ;;  %2362 = vmatpush.msrb.mxu0 %v8135_v42  ;;  %10940 = vst [vmem:[#allocation68_spill] sm:$0xff] %v8150_v33  ;;  %v8153_v58 = vld [vmem:[%s7862_s19 + $0x140] sm:$0xff] }
 0x38d   :  { %10941 = vst [vmem:[#allocation69_spill] sm:$0xff] %v8153_v58  ;;  %2563 = vmatpush.msra.mxu2 %v8150_v33  ;;  %v8174_v33 = vld [vmem:[%s7862_s19 + $0x20] sm:$0xff] }
 0x38e   :  { %2588 = vmatpush.msrb.mxu3 %v8141_v39  ;;  %2363 = vmatpush.msrb.mxu0 %v8147_v22  ;;  %10942 = vst [vmem:[#allocation70_spill] sm:$0xff] %v8162_v29  ;;  %v8166_v39 = vld [vmem:[%s7862_s19 + $0x130] sm:$0xff] }
 0x38f   :  { %10943 = vst [vmem:[#allocation71_spill] sm:$0xff] %v8166_v39  ;;  %2564 = vmatpush.msra.mxu2 %v8162_v29  ;;  %v8186_v29 = vld [vmem:[%s7862_s19 + $0x10] sm:$0xff] }
 0x390   :  { %2589 = vmatpush.msrb.mxu3 %v8153_v58  ;;  %2364 = vmatpush.msrb.mxu0 %v8159_v53  ;;  %10944 = vst [vmem:[#allocation72_spill] sm:$0xff] %v8174_v33  ;;  %v8178_v58 = vld [vmem:[%s7862_s19 + $0x120] sm:$0xff] }
 0x391   :  { %10945 = vst [vmem:[#allocation73_spill] sm:$0xff] %v8178_v58  ;;  %2565 = vmatpush.msra.mxu2 %v8174_v33  ;;  %v8198_v33 = vld [vmem:[%s7862_s19] sm:$0xff] }
 0x392   :  { %2590 = vmatpush.msrb.mxu3 %v8166_v39  ;;  %2365 = vmatpush.msrb.mxu0 %v8171_v24  ;;  %10946 = vst [vmem:[#allocation74_spill] sm:$0xff] %v8186_v29  ;;  %v8190_v39 = vld [vmem:[%s7862_s19 + $0x110] sm:$0xff] }
 0x393   :  { %10947 = vst [vmem:[#allocation75_spill] sm:$0xff] %v8190_v39  ;;  %2566 = vmatpush.msra.mxu2 %v8186_v29  ;;  %v8207_v29 = vld [vmem:[%s7760_s15 + $0x110] sm:$0xff] }
 0x394   :  { %2591 = vmatpush.msrb.mxu3 %v8178_v58  ;;  %2366 = vmatpush.msrb.mxu0 %v8183_v0  ;;  %10949 = vst [vmem:[#allocation77_spill] sm:$0xff] %v8198_v33  ;;  %v8202_v58 = vld [vmem:[%s7862_s19 + $0x100] sm:$0xff] }
 0x395   :  { %10950 = vst [vmem:[#allocation78_spill] sm:$0xff] %v8202_v58  ;;  %2567 = vmatpush.msra.mxu2 %v8198_v33  ;;  %v8220_v33 = vld [vmem:[%s7862_s19 + $0x218] sm:$0xff] }
 0x396   :  { %2592 = vmatpush.msrb.mxu3 %v8190_v39  ;;  %2367 = vmatpush.msrb.mxu0 %v8195_v32  ;;  %10951 = vst [vmem:[#allocation79_spill] sm:$0xff] %v8207_v29  ;;  %v8211_v39 = vld [vmem:[%s7760_s15 + $0x100] sm:$0xff] }
 0x397   :  { %10952 = vst [vmem:[#allocation80_spill] sm:$0xff] %v8211_v39 }
 0x398   :  { %2593 = vmatpush.msrb.mxu3 %v8202_v58  ;;  %2368 = vmatpush.msrb.mxu0 %v8207_v29  ;;  %10954 = vst [vmem:[#allocation82_spill] sm:$0xff] %v8220_v33  ;;  %v8225_v58 = vld [vmem:[%s7862_s19 + $0xe8] sm:$0xff] }
 0x399   :  { %10955 = vst [vmem:[#allocation83_spill] sm:$0xff] %v8225_v58 }
 0x39a   :  { %2369 = vmatpush.msrb.mxu0 %v8211_v39  ;;  %v8231_v39 = vld [vmem:[%s7760_s15 + $0x218] sm:$0xff] }
 0x39b   :  { %10957 = vst [vmem:[#allocation85_spill] sm:$0xff] %v8231_v39 }
 0x39c   :  { %2472 = vmatpush.msra.mxu0 %v8231_v39  ;;  %v8270_v39 = vld [vmem:[%s7760_s15 + $0x208] sm:$0xff]  ;;  %s6182_s15 = sld [smem:[%s10713_s0 + %s6821_s12]]  }
 0x39d   :  { %10964 = vst [vmem:[#allocation92_spill] sm:$0xff] %v8270_v39 }
 0x39e   :  { %2473 = vmatpush.msra.mxu0 %v8270_v39  ;;  %v8300_v39 = vld [vmem:[%s7862_s19 + $0x1e8] sm:$0xff] }
 0x39f   :  { %10970 = vst [vmem:[#allocation98_spill] sm:$0xff] %v8300_v39 }
 0x3bf   :  { %v2117_v1 = vpop.f32.mrf.mxu3  ;;  %v2181_v17 = vpop.f32.mrf.mxu0 }
 0x3c3   :  { %v2091_v46 = vpop.f32.mrf.mxu2 }
 0x3c4   :  { %v8214_v20 = vmax.f32 %v2091_v46, %v2181_v17 }
 0x3c6   :  { %2344 = vmatmul.f32.vlgmr.msra.gmra.mxu1 %v8214_v20  ;;  %2422 = vmatmul.f32.vlgmr.msra.gmra.mxu3 %v8214_v20 }
 0x3c7   :  { %2630 = vmatpush.msra.mxu1 %v8217_v56  ;;  %v8234_v46 = vpop.f32.mrf.mxu3  ;;  %v2184_v17 = vpop.f32.mrf.mxu0  ;;  %2696 = vmatpush.msra.mxu3 %v8220_v33 }
 0x3c9   :  { %2631 = vmatpush.msra.mxu1 %v8225_v58  ;;  %2697 = vmatpush.msra.mxu3 %v8228_v40  ;;  %v8256_v58 = vld [vmem:[%s7862_s19 + $0xa8] sm:$0xff] }
 0x3ca   :  { %10961 = vst [vmem:[#allocation89_spill] sm:$0xff] %v8256_v58 }
 0x3cb   :  { %2632 = vmatpush.msra.mxu1 %v8238_v27  ;;  %v2094_v56 = vpop.f32.mrf.mxu2  ;;  %v8262_v27 = vld [vmem:[%s7862_s19 + $0x98] sm:$0xff] }
 0x3cc   :  { %v8247_v29 = vmax.f32 %v2094_v56, %v2184_v17  ;;  %10962 = vst [vmem:[#allocation90_spill] sm:$0xff] %v8262_v27  ;;  %v2143_v17 = vpop.f32.mrf.mxu1 }
 0x3cd   :  { %2633 = vmatpush.msra.mxu1 %v8244_v7  ;;  %v8266_v7 = vld [vmem:[%s7862_s19 + $0x88] sm:$0xff] }
 0x3ce   :  { %2347 = vmatmul.f32.gmra.mxu1 %v8247_v29  ;;  %2425 = vmatmul.f32.gmra.mxu3 %v8247_v29  ;;  %10963 = vst [vmem:[#allocation91_spill] sm:$0xff] %v8266_v7 }
 0x3cf   :  { %2634 = vmatpush.msra.mxu1 %v8250_v50  ;;  %v8259_v40 = vpop.f32.mrf.mxu3  ;;  %v2187_v56 = vpop.f32.mrf.mxu0 }
 0x3d1   :  { %2635 = vmatpush.msra.mxu1 %v8256_v58  ;;  %v8282_v58 = vld [vmem:[%s7862_s19 + $0x68] sm:$0xff] }
 0x3d2   :  { %10966 = vst [vmem:[#allocation94_spill] sm:$0xff] %v8282_v58 }
 0x3d3   :  { %2636 = vmatpush.msra.mxu1 %v8262_v27  ;;  %v2097_v33 = vpop.f32.mrf.mxu2 }
 0x3d4   :  { %v8272_v50 = vmax.f32 %v2097_v33, %v2187_v56  ;;  %v8288_v33 = vld [vmem:[%s7862_s19 + $0x58] sm:$0xff] }
 0x3d5   :  { %2637 = vmatpush.msra.mxu1 %v8266_v7  ;;  %10967 = vst [vmem:[#allocation95_spill] sm:$0xff] %v8288_v33  ;;  %v8291_v56 = vld [vmem:[%s7862_s19 + $0x1f8] sm:$0xff]  ;;  %v8297_v7 = vld [vmem:[%s7862_s19 + $0x48] sm:$0xff] }
 0x3d6   :  { %2350 = vmatmul.f32.gmra.mxu1 %v8272_v50  ;;  %2428 = vmatmul.f32.gmra.mxu3 %v8272_v50  ;;  %10968 = vst [vmem:[#allocation96_spill] sm:$0xff] %v8291_v56 }
 0x3d7   :  { %2638 = vmatpush.msra.mxu1 %v8275_v5  ;;  %v2233_v27 = vpop.f32.mrf.mxu3  ;;  %10969 = vst [vmem:[#allocation97_spill] sm:$0xff] %v8297_v7 }
 0x3d8   :  { %v8285_v32 = vmax.f32 %v2143_v17, %v2233_v27  ;;  %v2146_v17 = vpop.f32.mrf.mxu1 }
 0x3d9   :  { %2639 = vmatpush.msra.mxu1 %v8282_v58  ;;  %v8312_v58 = vld [vmem:[%s7862_s19 + $0x1d8] sm:$0xff] }
 0x3da   :  { %6463 = vmatmul.msk.f32.vlgmr.msrb.gmra.mxu2 %vm1024_vm6, %v8285_v32  ;;  %10972 = vst [vmem:[#allocation100_spill] sm:$0xff] %v8312_v58 }
 0x3db   :  { %2640 = vmatpush.msra.mxu1 %v8288_v33  ;;  %2656 = vmatpush.msrb.mxu2 %v8291_v56  ;;  %v2207_v27 = vpop.f32.mrf.mxu2  ;;  %v10809_v33 = vmax.f32 %v7677_v11, 0.0  ;;  %v8318_v56 = vld [vmem:[%s7862_s19 + $0x28] sm:$0xff] }
 0x3dc   :  { %v8304_v5 = vmax.f32 %v2117_v1, %v2207_v27  ;;  %10973 = vst [vmem:[#allocation101_spill] sm:$0xff] %v8318_v56  ;;  %v8321_v1 = vld [vmem:[%s7862_s19 + $0x210] sm:$0xff] }
 0x3dd   :  { %2641 = vmatpush.msra.mxu1 %v8297_v7  ;;  %2657 = vmatpush.msrb.mxu2 %v8300_v39  ;;  %10974 = vst [vmem:[#allocation102_spill] sm:$0xff] %v8321_v1  ;;  %v8326_v7 = vld [vmem:[%s7862_s19 + $0x1c8] sm:$0xff] }
 0x3de   :  { %2370 = vmatmul.f32.vlgmr.msrb.gmra.mxu0 %v8304_v5  ;;  %2448 = vmatmul.f32.vlgmr.msrb.gmra.mxu1 %v8304_v5  ;;  %10975 = vst [vmem:[#allocation103_spill] sm:$0xff] %v8326_v7 }
 0x3df   :  { %2594 = vmatmul.f32.vlgmr.msrb.gmra.mxu3 %v8304_v5  ;;  %2642 = vmatpush.msra.mxu1 %v8307_v52  ;;  %v2236_v27 = vpop.f32.mrf.mxu3  ;;  %v10815_v52 = vmax.f32 %v7701_v6, 0.0 }
 0x3e0   :  { %2658 = vmatpush.msrb.mxu2 %v8312_v58  ;;  %6487 = vmatpush.msk.msrb.mxu3 %vm1004_vm5, %v10809_v33  ;;  %v8332_v39 = vmax.f32 %v2146_v17, %v2236_v27  ;;  %v8348_v33 = vld [vmem:[%s7862_s19 + $0x8] sm:$0xff]  ;;  %v8351_v17 = vld [vmem:[%s7862_s19 + $0x200] sm:$0xff]  ;;  %v10819_v58 = vmax.f32 %v7646_v26, 0.0 }
 0x3e1   :  { %2643 = vmatpush.msra.mxu1 %v8318_v56  ;;  %2618 = vmatpush.msrb.mxu0 %v8321_v1  ;;  %10977 = vst [vmem:[#allocation105_spill] sm:$0xff] %v8348_v33  ;;  %v8357_v56 = vld [vmem:[%s7862_s19 + $0x1a8] sm:$0xff]  ;;  %v2149_v1 = vpop.f32.mrf.mxu1 }
 0x3e2   :  { %2659 = vmatpush.msrb.mxu2 %v8326_v7  ;;  %2873 = vmatpush.msrb.mxu3 %v10811_v31  ;;  %10978 = vst [vmem:[#allocation106_spill] sm:$0xff] %v8357_v56  ;;  %v10817_v7 = vmax.f32 %v7706_v63, 0.0 }
 0x3e3   :  { %6464 = vmatmul.msk.f32.gmra.mxu2 %vm1024_vm6, %v8332_v39  ;;  %2644 = vmatpush.msra.mxu1 %v8336_v25  ;;  %v2210_v27 = vpop.f32.mrf.mxu2  ;;  %v8386_v25 = vld [vmem:[%s7862_s19 + $0x188] sm:$0xff] }
 0x3e4   :  { %2660 = vmatpush.msrb.mxu2 %v8340_v47  ;;  %2874 = vmatpush.msrb.mxu3 %v10815_v52  ;;  %v8363_v31 = vmax.f32 %v8234_v46, %v2210_v27  ;;  %v8373_v52 = vld [vmem:[%s7862_s19 + $0x198] sm:$0xff]  ;;  %v10822_v46 = vmax.f32 %v7708_v54, 0.0  ;;  %10979 = vst [vmem:[#allocation107_spill] sm:$0xff] %v8386_v25 }
 0x3e5   :  { %2645 = vmatpush.msra.mxu1 %v8348_v33  ;;  %2619 = vmatpush.msrb.mxu0 %v8351_v17 }
 0x3e6   :  { %2661 = vmatpush.msrb.mxu2 %v8357_v56  ;;  %2875 = vmatpush.msrb.mxu3 %v10817_v7  ;;  %v10821_v7 = vmax.f32 %v7649_v38, 0.0  ;;  %v8395_v56 = vld [vmem:[%s7862_s19 + $0x178] sm:$0xff] }
 0x3e7   :  { %6479 = vmatpush.msk.msrb.mxu1 %vm1004_vm5, %v10819_v58  ;;  %2373 = vmatmul.f32.gmra.mxu0 %v8363_v31  ;;  %v2239_v27 = vpop.f32.mrf.mxu3  ;;  %v10823_v58 = vmax.f32 %v7716_v37, 0.0 }
 0x3e8   :  { %2451 = vmatmul.f32.gmra.mxu1 %v8363_v31  ;;  %2597 = vmatmul.f32.gmra.mxu3 %v8363_v31  ;;  %v8382_v33 = vmax.f32 %v2149_v1, %v2239_v27 }
 0x3e9   :  { %2662 = vmatpush.msrb.mxu2 %v8373_v52  ;;  %2876 = vmatpush.msrb.mxu3 %v10822_v46  ;;  %v8407_v46 = vld [vmem:[%s7862_s19 + $0x168] sm:$0xff] }
 0x3ea   :  { %2821 = vmatpush.msrb.mxu1 %v10821_v7  ;;  %v10825_v7 = vmax.f32 %v7720_v2, 0.0  ;;  %10980 = vst [vmem:[#allocation108_spill] sm:$0xff] %v8407_v46 }
 0x3eb   :  { %2663 = vmatpush.msrb.mxu2 %v8386_v25  ;;  %v2213_v1 = vpop.f32.mrf.mxu2  ;;  %v8414_v25 = vld [vmem:[%s7862_s19 + $0x158] sm:$0xff] }
 0x3ec   :  { %2822 = vmatpush.msrb.mxu1 %v10823_v58  ;;  %6465 = vmatmul.msk.f32.gmra.mxu2 %vm1024_vm6, %v8382_v33  ;;  %v8403_v27 = vmax.f32 %v8259_v40, %v2213_v1  ;;  %v10826_v58 = vmax.f32 %v7724_v61, 0.0  ;;  %10981 = vst [vmem:[#allocation109_spill] sm:$0xff] %v8414_v25  ;;  %v8422_v40 = vld [vmem:[%s7862_s19 + $0x148] sm:$0xff]  ;;  %v8427_v1 = vld [vmem:[%s7862_s19 + $0x138] sm:$0xff] }
 0x3ed   :  { %2664 = vmatpush.msrb.mxu2 %v8395_v56  ;;  %10982 = vst [vmem:[#allocation110_spill] sm:$0xff] %v8422_v40 }
 0x3ee   :  { %2823 = vmatpush.msrb.mxu1 %v10825_v7  ;;  %10983 = vst [vmem:[#allocation111_spill] sm:$0xff] %v8427_v1  ;;  %v8432_v7 = vld [vmem:[%s7862_s19 + $0x128] sm:$0xff] }
 0x3ef   :  { %2665 = vmatpush.msrb.mxu2 %v8407_v46  ;;  %2376 = vmatmul.f32.gmra.mxu0 %v8403_v27  ;;  %10984 = vst [vmem:[#allocation112_spill] sm:$0xff] %v8432_v7  ;;  %v8448_v46 = vld [vmem:[%s7862_s19 + $0x108] sm:$0xff] }
 0x3f0   :  { %2824 = vmatpush.msrb.mxu1 %v10826_v58  ;;  %2600 = vmatmul.f32.gmra.mxu3 %v8403_v27  ;;  %v8436_v58 = vld [vmem:[%s7862_s19 + $0x118] sm:$0xff]  ;;  %s6179_s19 = sld [smem:[%s10713_s0 + %s6822_s16]]  }
 0x3f1   :  { %2454 = vmatmul.f32.gmra.mxu1 %v8403_v27  ;;  %2666 = vmatpush.msrb.mxu2 %v8414_v25  ;;  %v10985_v25 = vmax.f32 %v7677_v11, 0.0  ;;  %v2767_v11 = vmax.f32 %v7743_v30, 0.0  ;;  %v2761_v30 = vmax.f32 %v7753_v34, 0.0  ;;  %v10998_v34 = vld [vmem:[#allocation9_spill] sm:$0xff] }
 0x3f3   :  { %2667 = vmatpush.msrb.mxu2 %v8422_v40  ;;  %v2773_v40 = vmax.f32 %v7735_v13, 0.0  ;;  %v10987_v13 = vmax.f32 %v7701_v6, 0.0  ;;  %v10989_v6 = vmax.f32 %v7708_v54, 0.0  ;;  %v10991_v54 = vmax.f32 %v7649_v38, 0.0 }
 0x3f4   :  { %2568 = vmatmul.f32.vlgmr.msra.gmra.mxu2 %v8214_v20  ;;  %v10994_v38 = vmax.f32 %v7724_v61, 0.0  ;;  %v10997_v61 = vld [vmem:[#allocation11_spill] sm:$0xff] }
 0x3f5   :  { %2668 = vmatpush.msrb.mxu2 %v8427_v1  ;;  %v2770_v1 = vmax.f32 %v7738_v57, 0.0  ;;  %v10988_v57 = vmax.f32 %v7706_v63, 0.0  ;;  %v10990_v63 = vmax.f32 %v7646_v26, 0.0  ;;  %v10992_v26 = vmax.f32 %v7716_v37, 0.0  ;;  %v10995_v37 = vld [vmem:[#allocation7_spill] sm:$0xff] }
 0x3f7   :  { %2669 = vmatpush.msrb.mxu2 %v8432_v7  ;;  %6466 = vmatmul.msk.f32.vlgmr.msra.gmra.mxu0 %vm1024_vm6, %v8285_v32  ;;  %v10986_v7 = vmax.f32 %v7679_v18, 0.0  ;;  %v2764_v18 = vmax.f32 %v7747_v44, 0.0  ;;  %v10993_v44 = vmax.f32 %v7720_v2, 0.0  ;;  %v10996_v2 = vld [vmem:[#allocation8_spill] sm:$0xff] }
 0x3f8   :  { %6472 = vmatmul.msk.f32.vlgmr.msra.gmra.mxu3 %vm1024_vm6, %v8285_v32  ;;  %6475 = vmatpush.msk.msra.mxu0 %vm1004_vm5, %v10985_v25  ;;  %v11007_v25 = vld [vmem:[#allocation20_spill] sm:$0xff] }
 0x3f9   :  { %2646 = vmatmul.f32.vlgmr.msra.gmra.mxu1 %v8214_v20  ;;  %2670 = vmatpush.msrb.mxu2 %v8436_v58  ;;  %v11021_v20 = vld [vmem:[#allocation24_spill] sm:$0xff] }
 0x3fa   :  { %6495 = vmatpush.msk.msra.mxu1 %vm1004_vm5, %v2773_v40  ;;  %2795 = vmatpush.msra.mxu0 %v10986_v7  ;;  %v11017_v7 = vld [vmem:[#allocation21_spill] sm:$0xff] }
 0x3fb   :  { %2671 = vmatpush.msrb.mxu2 %v8448_v46  ;;  %2983 = vmatpush.msra.mxu3 %v8023_v3  ;;  %v11028_v3 = vld [vmem:[#allocation28_spill] sm:$0xff] }
 0x3fc   :  { %2925 = vmatpush.msra.mxu1 %v2770_v1  ;;  %2571 = vmatmul.f32.gmra.mxu2 %v8247_v29 }
 0x3fd   :  { %6483 = vmatpush.msk.msra.mxu2 %vm1004_vm5, %v2773_v40  ;;  %2796 = vmatpush.msra.mxu0 %v10987_v13  ;;  %v11038_v40 = vld [vmem:[#allocation57_spill] sm:$0xff]  ;;  %v11041_v13 = vld [vmem:[#allocation59_spill] sm:$0xff] }
 0x3fe   :  { %2926 = vmatpush.msra.mxu1 %v2767_v11  ;;  %2984 = vmatpush.msra.mxu3 %v8037_v15  ;;  %v11033_v15 = vld [vmem:[#allocation92_spill] sm:$0xff] }
 0x3ff   :  { %2847 = vmatpush.msra.mxu2 %v2770_v1  ;;  %2797 = vmatpush.msra.mxu0 %v10988_v57  ;;  %v11039_v1 = vld [vmem:[#allocation66_spill] sm:$0xff]  ;;  %v11042_v57 = vld [vmem:[#allocation68_spill] sm:$0xff] }
 0x400   :  { %2927 = vmatpush.msra.mxu1 %v2764_v18  ;;  %6467 = vmatmul.msk.f32.gmra.mxu0 %vm1024_vm6, %v8332_v39 }
 0x401   :  { %2848 = vmatpush.msra.mxu2 %v2767_v11  ;;  %2649 = vmatmul.f32.gmra.mxu1 %v8247_v29  ;;  %v11025_v29 = vld [vmem:[#allocation35_spill] sm:$0xff]  ;;  %v11040_v11 = vld [vmem:[#allocation30_spill] sm:$0xff] }
 0x402   :  { %6473 = vmatmul.msk.f32.gmra.mxu3 %vm1024_vm6, %v8332_v39  ;;  %2798 = vmatpush.msra.mxu0 %v10989_v6  ;;  %v11044_v6 = vld [vmem:[#allocation61_spill] sm:$0xff] }
 0x403   :  { %2928 = vmatpush.msra.mxu1 %v2761_v30  ;;  %2849 = vmatpush.msra.mxu2 %v2764_v18 }
 0x404   :  { %2985 = vmatpush.msra.mxu3 %v8055_v59  ;;  %2574 = vmatmul.f32.gmra.mxu2 %v8272_v50  ;;  %v11032_v59 = vld [vmem:[#allocation60_spill] sm:$0xff] }
 0x405   :  { %2850 = vmatpush.msra.mxu2 %v2761_v30  ;;  %v11043_v30 = vld [vmem:[#allocation32_spill] sm:$0xff] }
 0x406   :  { %2986 = vmatpush.msra.mxu3 %v8069_v51  ;;  %v11030_v51 = vld [vmem:[#allocation85_spill] sm:$0xff] }
 0x408   :  { %2987 = vmatpush.msra.mxu3 %v8087_v41  ;;  %6468 = vmatmul.msk.f32.gmra.mxu0 %vm1024_vm6, %v8382_v33  ;;  %v11029_v41 = vld [vmem:[#allocation58_spill] sm:$0xff] }
 0x409   :  { %2652 = vmatmul.f32.gmra.mxu1 %v8272_v50  ;;  %v11013_v50 = vld [vmem:[#allocation17_spill] sm:$0xff] }
 0x40a   :  { %6474 = vmatmul.msk.f32.gmra.mxu3 %vm1024_vm6, %v8382_v33 }
 0x40b   :  { %2988 = vmatpush.msra.mxu3 %v8099_v43  ;;  %v11022_v43 = vld [vmem:[#allocation53_spill] sm:$0xff] }
 0x40c   :  { %2672 = vmatmul.f32.vlgmr.msrb.gmra.mxu2 %v8304_v5  ;;  %v11015_v5 = vld [vmem:[#allocation47_spill] sm:$0xff] }
 0x40d   :  { %2989 = vmatpush.msra.mxu3 %v8111_v48  ;;  %2957 = vmatpush.msrb.mxu2 %v7786_v21  ;;  %v10999_v21 = vld [vmem:[#allocation76_spill] sm:$0xff] }
 0x40e   :  { %v11026_v48 = vld [vmem:[#allocation56_spill] sm:$0xff] }
 0x40f   :  { %2990 = vmatpush.msra.mxu3 %v8123_v14  ;;  %2958 = vmatpush.msrb.mxu2 %v7789_v4  ;;  %v11000_v4 = vld [vmem:[#allocation13_spill] sm:$0xff]  ;;  %v11035_v14 = vld [vmem:[#allocation62_spill] sm:$0xff] }
 0x410   :  { %6469 = vmatmul.msk.f32.vlgmr.msrb.gmra.mxu0 %vm1024_vm6, %v8285_v32  ;;  %v11023_v32 = vld [vmem:[#allocation33_spill] sm:$0xff] }
 0x411   :  { %6480 = vmatmul.msk.f32.vlgmr.msrb.gmra.mxu1 %vm2055_vm12, %v7712_v36  ;;  %6491 = vmatpush.msk.msrb.mxu0 %vm1004_vm5, %v10990_v63  ;;  %v11045_v63 = vld [vmem:[#allocation70_spill] sm:$0xff]  ;;  %vm5077_vm5 = vcmask 258048  }
 0x412   :  { %6488 = vmatmul.msk.f32.vlgmr.msrb.gmra.mxu3 %vm2055_vm12, %v7750_v9  ;;  %3035 = vmatpush.msrb.mxu1 %v7804_v45  ;;  %v11002_v45 = vld [vmem:[#allocation79_spill] sm:$0xff] }
 0x413   :  { %2899 = vmatpush.msrb.mxu0 %v10991_v54  ;;  %2991 = vmatpush.msra.mxu3 %v8135_v42  ;;  %v11020_v42 = vld [vmem:[#allocation31_spill] sm:$0xff]  ;;  %v11046_v54 = vld [vmem:[#allocation34_spill] sm:$0xff] }
 0x414   :  { %3036 = vmatpush.msrb.mxu1 %v7814_v55  ;;  %2959 = vmatpush.msrb.mxu2 %v7800_v16  ;;  %v11001_v16 = vld [vmem:[#allocation10_spill] sm:$0xff]  ;;  %v11004_v55 = vld [vmem:[#allocation12_spill] sm:$0xff] }
 0x415   :  { %2675 = vmatmul.f32.gmra.mxu2 %v8363_v31  ;;  %2900 = vmatpush.msrb.mxu0 %v10992_v26  ;;  %v11014_v31 = vld [vmem:[#allocation18_spill] sm:$0xff]  ;;  %v11047_v26 = vld [vmem:[#allocation63_spill] sm:$0xff] }
 0x416   :  { %3037 = vmatpush.msrb.mxu1 %v7822_v19  ;;  %2960 = vmatpush.msrb.mxu2 %v7811_v49  ;;  %v11003_v49 = vld [vmem:[#allocation16_spill] sm:$0xff]  ;;  %v11006_v19 = vld [vmem:[#allocation19_spill] sm:$0xff] }
 0x417   :  { %2901 = vmatpush.msrb.mxu0 %v10993_v44  ;;  %2992 = vmatpush.msra.mxu3 %v8147_v22  ;;  %v11024_v22 = vld [vmem:[#allocation26_spill] sm:$0xff]  ;;  %v11048_v44 = vld [vmem:[#allocation72_spill] sm:$0xff] }
 0x418   :  { %6470 = vmatmul.msk.f32.gmra.mxu0 %vm1024_vm6, %v8332_v39  ;;  %3038 = vmatpush.msrb.mxu1 %v7835_v28  ;;  %v11009_v28 = vld [vmem:[#allocation14_spill] sm:$0xff]  ;;  %v11031_v39 = vld [vmem:[#allocation48_spill] sm:$0xff] }
 0x419   :  { %6481 = vmatmul.msk.f32.gmra.mxu1 %vm2055_vm12, %v7766_v12  ;;  %2902 = vmatpush.msrb.mxu0 %v10994_v38  ;;  %v11050_v38 = vld [vmem:[#allocation65_spill] sm:$0xff] }
 0x41a   :  { %6489 = vmatmul.msk.f32.gmra.mxu3 %vm2055_vm12, %v7781_v60  ;;  %2961 = vmatpush.msrb.mxu2 %v7819_v8  ;;  %v11005_v8 = vld [vmem:[#allocation80_spill] sm:$0xff] }
 0x41b   :  { %2993 = vmatpush.msra.mxu3 %v8159_v53  ;;  %3039 = vmatpush.msrb.mxu1 %v7845_v10  ;;  %v11011_v10 = vld [vmem:[#allocation23_spill] sm:$0xff] }
 0x41c   :  { %2962 = vmatpush.msrb.mxu2 %v7832_v23  ;;  %v11008_v23 = vld [vmem:[#allocation22_spill] sm:$0xff]  ;;  %v11034_v53 = vld [vmem:[#allocation51_spill] sm:$0xff] }
 0x41d   :  { %2678 = vmatmul.f32.gmra.mxu2 %v8403_v27  ;;  %2994 = vmatpush.msra.mxu3 %v8171_v24  ;;  %v11019_v24 = vld [vmem:[#allocation29_spill] sm:$0xff]  ;;  %v11037_v27 = vld [vmem:[#allocation64_spill] sm:$0xff] }
 0x41e   :  { %3040 = vmatpush.msrb.mxu1 %v7857_v35  ;;  %2963 = vmatpush.msrb.mxu2 %v7842_v62  ;;  %v11010_v62 = vld [vmem:[#allocation15_spill] sm:$0xff]  ;;  %v11012_v35 = vld [vmem:[#allocation25_spill] sm:$0xff] }
 0x41f   :  { %2995 = vmatpush.msra.mxu3 %v8183_v0  ;;  %v11018_v0 = vld [vmem:[#allocation50_spill] sm:$0xff] }
 0x420   :  { %6471 = vmatmul.msk.f32.gmra.mxu0 %vm1024_vm6, %v8382_v33  ;;  %3041 = vmatpush.msrb.mxu1 %v10997_v61  ;;  %v11036_v33 = vld [vmem:[#allocation54_spill] sm:$0xff] }
 0x421   :  { %6482 = vmatmul.msk.f32.gmra.mxu1 %vm2055_vm12, %v10995_v37  ;;  %2964 = vmatpush.msrb.mxu2 %v10998_v34  ;;  %v11051_v61 = vld [vmem:[#allocation74_spill] sm:$0xff] }
 0x422   :  { %6490 = vmatmul.msk.f32.gmra.mxu3 %vm2055_vm12, %v10996_v2  ;;  %3042 = vmatpush.msrb.mxu1 %v11000_v4  ;;  %v11052_v34 = vld [vmem:[#allocation38_spill] sm:$0xff] }
 0x423   :  { %2996 = vmatpush.msra.mxu3 %v10999_v21  ;;  %2965 = vmatpush.msrb.mxu2 %v11001_v16  ;;  %v11053_v21 = vld [vmem:[#allocation67_spill] sm:$0xff]  ;;  %v11054_v16 = vld [vmem:[#allocation77_spill] sm:$0xff] }
 0x424   :  { %3043 = vmatpush.msrb.mxu1 %v11003_v49  ;;  %v11056_v49 = vld [vmem:[#allocation69_spill] sm:$0xff] }
 0x425   :  { %2997 = vmatpush.msra.mxu3 %v11002_v45  ;;  %6484 = vmatmul.msk.f32.vlgmr.msra.gmra.mxu2 %vm2055_vm12, %v7712_v36  ;;  %v11055_v45 = vld [vmem:[#allocation39_spill] sm:$0xff] }
 0x426   :  { %2966 = vmatpush.msrb.mxu2 %v11004_v55  ;;  %3044 = vmatpush.msrb.mxu1 %v11006_v19  ;;  %v11057_v55 = vld [vmem:[#allocation40_spill] sm:$0xff]  ;;  %v11059_v19 = vld [vmem:[#allocation41_spill] sm:$0xff] }
 0x427   :  { %2998 = vmatpush.msra.mxu3 %v11005_v8  ;;  %v11058_v8 = vld [vmem:[#allocation71_spill] sm:$0xff] }
 0x428   :  { %6476 = vmatmul.msk.f32.vlgmr.msra.gmra.mxu0 %vm2055_vm12, %v7712_v36  ;;  %3045 = vmatpush.msrb.mxu1 %v11008_v23  ;;  %v11016_v36 = vld [vmem:[#allocation27_spill] sm:$0xff]  ;;  %v11061_v23 = vld [vmem:[#allocation42_spill] sm:$0xff] }
 0x429   :  { %3113 = vmatpush.msrb.mxu3 %v11007_v25  ;;  %6496 = vmatmul.msk.f32.vlgmr.msra.gmra.mxu1 %vm2055_vm12, %v7750_v9 }
 0x42a   :  { %3023 = vmatpush.msra.mxu0 %v11009_v28  ;;  %2967 = vmatpush.msrb.mxu2 %v11010_v62  ;;  %v11062_v28 = vld [vmem:[#allocation75_spill] sm:$0xff] }
 0x42b   :  { %3114 = vmatpush.msrb.mxu3 %v11011_v10  ;;  %3046 = vmatpush.msrb.mxu1 %v11012_v35  ;;  %v11063_v10 = vld [vmem:[#allocation43_spill] sm:$0xff]  ;;  %v11064_v35 = vld [vmem:[#allocation78_spill] sm:$0xff] }
 0x42c   :  { %3024 = vmatpush.msra.mxu0 %v11013_v50  ;;  %2968 = vmatpush.msrb.mxu2 %v11014_v31  ;;  %v11065_v50 = vld [vmem:[#allocation44_spill] sm:$0xff]  ;;  %v11066_v31 = vld [vmem:[#allocation45_spill] sm:$0xff] }
 0x42d   :  { %3115 = vmatpush.msrb.mxu3 %v11015_v5  ;;  %6485 = vmatmul.msk.f32.gmra.mxu2 %vm2055_vm12, %v7766_v12 }
 0x42e   :  { %3047 = vmatpush.msrb.mxu1 %v11016_v36  ;;  %2969 = vmatpush.msrb.mxu2 %v11017_v7  ;;  %v11067_v36 = vld [vmem:[#allocation46_spill] sm:$0xff] }
 0x42f   :  { %3116 = vmatpush.msrb.mxu3 %v11018_v0  ;;  %v11068_v0 = vld [vmem:[#allocation49_spill] sm:$0xff] }
 0x430   :  { %3048 = vmatpush.msrb.mxu1 %v11019_v24  ;;  %6477 = vmatmul.msk.f32.gmra.mxu0 %vm2055_vm12, %v7766_v12  ;;  %v11027_v12 = vld [vmem:[#allocation37_spill] sm:$0xff] }
 0x431   :  { %6497 = vmatmul.msk.f32.gmra.mxu1 %vm2055_vm12, %v7781_v60  ;;  %2970 = vmatpush.msrb.mxu2 %v11021_v20  ;;  %v11070_v20 = vld [vmem:[#allocation55_spill] sm:$0xff] }
 0x432   :  { %3049 = vmatpush.msrb.mxu1 %v11020_v42  ;;  %3117 = vmatpush.msrb.mxu3 %v11022_v43  ;;  %v11069_v42 = vld [vmem:[#allocation52_spill] sm:$0xff] }
 0x433   :  { %2971 = vmatpush.msrb.mxu2 %v11024_v22 }
 0x434   :  { %3050 = vmatpush.msrb.mxu1 %v11023_v32  ;;  %3118 = vmatpush.msrb.mxu3 %v11026_v48 }
 0x435   :  { %6486 = vmatmul.msk.f32.gmra.mxu2 %vm2055_vm12, %v10995_v37 }
 0x436   :  { %3139 = vmatpush.msra.mxu1 %v11025_v29  ;;  %2972 = vmatpush.msrb.mxu2 %v11028_v3 }
 0x437   :  { %3119 = vmatpush.msrb.mxu3 %v11029_v41 }
 0x438   :  { %3140 = vmatpush.msra.mxu1 %v11027_v12  ;;  %3101 = vmatpush.msra.mxu2 %v11030_v51 }
 0x439   :  { %6478 = vmatmul.msk.f32.gmra.mxu0 %vm2055_vm12, %v10995_v37  ;;  %6498 = vmatmul.msk.f32.gmra.mxu1 %vm2055_vm12, %v10996_v2 }
 0x43a   :  { %3141 = vmatpush.msra.mxu1 %v11031_v39  ;;  %3120 = vmatpush.msrb.mxu3 %v11032_v59 }
 0x43b   :  { %3102 = vmatpush.msra.mxu2 %v11033_v15 }
 0x43c   :  { %3142 = vmatpush.msra.mxu1 %v11034_v53  ;;  %3121 = vmatpush.msrb.mxu3 %v11035_v14 }
 0x43e   :  { %3143 = vmatpush.msra.mxu1 %v11036_v33  ;;  %3122 = vmatpush.msrb.mxu3 %v11037_v27 }
 0x440   :  { %3144 = vmatpush.msra.mxu1 %v11038_v40  ;;  %3123 = vmatpush.msrb.mxu3 %v11039_v1 }
 0x441   :  { %6492 = vmatmul.msk.f32.vlgmr.msrb.gmra.mxu0 %vm2055_vm12, %v7750_v9  ;;  %v11049_v9 = vld [vmem:[#allocation36_spill] sm:$0xff] }
 0x442   :  { %3061 = vmatpush.msrb.mxu0 %v11040_v11  ;;  %3145 = vmatpush.msra.mxu1 %v11041_v13 }
 0x443   :  { %v2345_v18 = vpop.f32.mrf.mxu1  ;;  %3124 = vmatpush.msrb.mxu3 %v11042_v57 }
 0x444   :  { %3062 = vmatpush.msrb.mxu0 %v11043_v30  ;;  %3146 = vmatpush.msra.mxu1 %v11044_v6 }
 0x445   :  { %3125 = vmatpush.msrb.mxu3 %v11045_v63 }
 0x446   :  { %3063 = vmatpush.msrb.mxu0 %v11046_v54  ;;  %3147 = vmatpush.msra.mxu1 %v11047_v26 }
 0x447   :  { %3126 = vmatpush.msrb.mxu3 %v11048_v44 }
 0x448   :  { %3064 = vmatpush.msrb.mxu0 %v11049_v9  ;;  %3148 = vmatpush.msra.mxu1 %v11050_v38 }
 0x449   :  { %6493 = vmatmul.msk.f32.gmra.mxu0 %vm2055_vm12, %v7781_v60  ;;  %v2423_v37 = vpop.f32.mrf.mxu3  ;;  %3127 = vmatpush.msrb.mxu3 %v11051_v61  ;;  %v11060_v60 = vld [vmem:[#allocation73_spill] sm:$0xff] }
 0x44a   :  { %3065 = vmatpush.msrb.mxu0 %v11052_v34  ;;  %3149 = vmatpush.msra.mxu1 %v11053_v21 }
 0x44b   :  { %v2348_v4 = vpop.f32.mrf.mxu1  ;;  %3128 = vmatpush.msrb.mxu3 %v11054_v16 }
 0x44c   :  { %3066 = vmatpush.msrb.mxu0 %v11055_v45  ;;  %3150 = vmatpush.msra.mxu1 %v11056_v49 }
 0x44e   :  { %3067 = vmatpush.msrb.mxu0 %v11057_v55  ;;  %3151 = vmatpush.msra.mxu1 %v11058_v8 }
 0x450   :  { %3068 = vmatpush.msrb.mxu0 %v11059_v19  ;;  %3152 = vmatpush.msra.mxu1 %v11060_v60 }
 0x451   :  { %6494 = vmatmul.msk.f32.gmra.mxu0 %vm2055_vm12, %v10996_v2  ;;  %v2426_v25 = vpop.f32.mrf.mxu3  ;;  %vm5915_vm12 = vcmask 523264  }
 0x452   :  { %3069 = vmatpush.msrb.mxu0 %v11061_v23  ;;  %3153 = vmatpush.msra.mxu1 %v11062_v28 }
 0x453   :  { %v2351_v62 = vpop.f32.mrf.mxu1 }
 0x454   :  { %3070 = vmatpush.msrb.mxu0 %v11063_v10  ;;  %3154 = vmatpush.msra.mxu1 %v11064_v35 }
 0x456   :  { %3071 = vmatpush.msrb.mxu0 %v11065_v50 }
 0x458   :  { %3072 = vmatpush.msrb.mxu0 %v11066_v31 }
 0x459   :  { %v8631_v5 = vpop.f32.mrf.mxu3 }
 0x45a   :  { %3073 = vmatpush.msrb.mxu0 %v11067_v36 }
 0x45b   :  { %v2371_v7 = vpop.f32.mrf.mxu0  ;;  %v2449_v2 = vpop.f32.mrf.mxu1 }
 0x45c   :  { %3074 = vmatpush.msrb.mxu0 %v11068_v0  ;;  %v2372_v13 = vadd.f32 %v2371_v7, %v2345_v18  ;;  %v2450_v38 = vadd.f32 %v2449_v2, %v2423_v37 }
 0x45d   :  { %v2397_v24 = vpop.f32.mrf.mxu2 }
 0x45e   :  { %3075 = vmatpush.msrb.mxu0 %v11069_v42  ;;  %v2398_v54 = vadd.f32 %v2397_v24, %v2372_v13  ;;  %v11076_v13 = vld [vmem:[#allocation86_spill] sm:$0xff] }
 0x460   :  { %3076 = vmatpush.msrb.mxu0 %v11070_v20 }
 0x462   :  { %v2595_v32 = vpop.f32.mrf.mxu3 }
 0x464   :  { %v2374_v43 = vpop.f32.mrf.mxu0 }
 0x465   :  { %v2452_v22 = vpop.f32.mrf.mxu1  ;;  %v2375_v34 = vadd.f32 %v2374_v43, %v2348_v4 }
 0x466   :  { %v2400_v29 = vpop.f32.mrf.mxu2  ;;  %v2453_v37 = vadd.f32 %v2452_v22, %v2426_v25 }
 0x467   :  { %v2401_v8 = vadd.f32 %v2400_v29, %v2375_v34  ;;  %v11080_v34 = vld [vmem:[#allocation90_spill] sm:$0xff] }
 0x46b   :  { %v2598_v3 = vpop.f32.mrf.mxu3 }
 0x46c   :  { %v2377_v48 = vpop.f32.mrf.mxu0 }
 0x46d   :  { %v2378_v4 = vadd.f32 %v2377_v48, %v2351_v62 }
 0x46e   :  { %v2455_v12 = vpop.f32.mrf.mxu1 }
 0x46f   :  { %v2403_v41 = vpop.f32.mrf.mxu2  ;;  %v2456_v25 = vadd.f32 %v2455_v12, %v8631_v5  ;;  %v11071_v12 = vld [vmem:[#allocation102_spill] sm:$0xff] }
 0x470   :  { %v2404_v0 = vadd.f32 %v2403_v41, %v2378_v4 }
 0x473   :  { %v2601_v15 = vpop.f32.mrf.mxu3 }
 0x474   :  { %v2475_v51 = vpop.f32.mrf.mxu0 }
 0x475   :  { %v2476_v21 = vadd.f32 %v2475_v51, %v2450_v38 }
 0x476   :  { %v2647_v39 = vpop.f32.mrf.mxu1 }
 0x477   :  { %v2569_v59 = vpop.f32.mrf.mxu2 }
 0x478   :  { %v2596_v57 = vadd.f32 %v2595_v32, %v2569_v59  ;;  %v11072_v59 = vld [vmem:[#allocation82_spill] sm:$0xff] }
 0x47b   :  { %v2699_v27 = vpop.f32.mrf.mxu3 }
 0x47d   :  { %v2478_v53 = vpop.f32.mrf.mxu0 }
 0x47e   :  { %v2650_v14 = vpop.f32.mrf.mxu1  ;;  %v2479_v35 = vadd.f32 %v2478_v53, %v2453_v37  ;;  %v11074_v53 = vld [vmem:[#allocation84_spill] sm:$0xff]  ;;  %v11084_v37 = vld [vmem:[#allocation98_spill] sm:$0xff] }
 0x47f   :  { %v2572_v33 = vpop.f32.mrf.mxu2 }
 0x480   :  { %v2599_v45 = vadd.f32 %v2598_v3, %v2572_v33 }
 0x485   :  { %v2481_v40 = vpop.f32.mrf.mxu0  ;;  %v2702_v30 = vpop.f32.mrf.mxu3 }
 0x486   :  { %v2653_v1 = vpop.f32.mrf.mxu1  ;;  %v2482_v62 = vadd.f32 %v2481_v40, %v2456_v25  ;;  %v11075_v40 = vld [vmem:[#allocation83_spill] sm:$0xff] }
 0x487   :  { %v2575_v11 = vpop.f32.mrf.mxu2 }
 0x488   :  { %v2602_v31 = vadd.f32 %v2601_v15, %v2575_v11  ;;  %v11073_v15 = vld [vmem:[#allocation81_spill] sm:$0xff] }
 0x48d   :  { %v2621_v6 = vpop.f32.mrf.mxu0  ;;  %v2705_v60 = vpop.f32.mrf.mxu3 }
 0x48e   :  { %v8637_v63 = vpop.f32.mrf.mxu1  ;;  %v2622_v26 = vadd.f32 %v2621_v6, %v2596_v57  ;;  %v11077_v57 = vld [vmem:[#allocation87_spill] sm:$0xff] }
 0x48f   :  { %v2673_v9 = vpop.f32.mrf.mxu2 }
 0x490   :  { %v8639_v44 = vmax.f32 %v2398_v54, %v2622_v26  ;;  %v2674_v61 = vadd.f32 %v2673_v9, %v2647_v39  ;;  %v11078_v26 = vld [vmem:[#allocation88_spill] sm:$0xff] }
 0x492   :  { %3275 = vst [vmem:[#allocation4] sm:$0xff] %v8639_v44  ;;  %v2700_v16 = vadd.f32 %v2699_v27, %v2674_v61  ;;  %v11079_v61 = vld [vmem:[#allocation89_spill] sm:$0xff] }
 0x494   :  { %v2709_v49 = vmax.f32 %v2476_v21, %v2700_v16 }
 0x495   :  { %v2624_v18 = vpop.f32.mrf.mxu0  ;;  %v2878_v42 = vpop.f32.mrf.mxu3 }
 0x496   :  { %v8642_v55 = vpop.f32.mrf.mxu1  ;;  %v2625_v19 = vadd.f32 %v2624_v18, %v2599_v45  ;;  %3276 = vst.msk [vmem:[#allocation4 + $0x8] sm:$0xff] %vm1859_vm11, %v2709_v49  ;;  %v8697_v45 = vld [vmem:[%s8682_s23 + $0x200] sm:$0xff]  ;;  %v11081_v49 = vld [vmem:[#allocation91_spill] sm:$0xff] }
 0x497   :  { %v8704_v18 = vld [vmem:[%s8682_s23 + $0x1f0] sm:$0xff] }
 0x498   :  { %v8645_v23 = vmax.f32 %v2401_v8, %v2625_v19  ;;  %v2676_v28 = vpop.f32.mrf.mxu2  ;;  %v8709_v8 = vld [vmem:[%s8682_s23 + $0x1e0] sm:$0xff] }
 0x499   :  { %v2677_v10 = vadd.f32 %v2676_v28, %v2650_v14  ;;  %v11083_v19 = vld [vmem:[#allocation93_spill] sm:$0xff]  ;;  %v8719_v28 = vld [vmem:[%s8682_s23 + $0x1d0] sm:$0xff] }
 0x49a   :  { %3277 = vst [vmem:[#allocation4 + $0x10] sm:$0xff] %v8645_v23 }
 0x49b   :  { %v2703_v50 = vadd.f32 %v2702_v30, %v2677_v10  ;;  %v11085_v10 = vld [vmem:[#allocation94_spill] sm:$0xff] }
 0x49d   :  { %v2711_v36 = vmax.f32 %v2479_v35, %v2703_v50  ;;  %v2627_v7 = vpop.f32.mrf.mxu0  ;;  %v2881_v5 = vpop.f32.mrf.mxu3  ;;  %v8729_v50 = vld [vmem:[%s8682_s23 + $0x1c0] sm:$0xff] }
 0x49e   :  { %v8648_v2 = vpop.f32.mrf.mxu1  ;;  %v2628_v24 = vadd.f32 %v2627_v7, %v2602_v31  ;;  %v11086_v31 = vld [vmem:[#allocation100_spill] sm:$0xff]  ;;  %v8738_v7 = vld [vmem:[%s8682_s23 + $0x1b0] sm:$0xff] }
 0x49f   :  { %3278 = vst.msk [vmem:[#allocation4 + $0x18] sm:$0xff] %vm1859_vm11, %v2711_v36  ;;  %v11087_v36 = vld [vmem:[#allocation95_spill] sm:$0xff] }
 0x4a0   :  { %v2712_v20 = vmax.f32 %v2404_v0, %v2628_v24  ;;  %v2679_v43 = vpop.f32.mrf.mxu2  ;;  %v11088_v0 = vld [vmem:[#allocation103_spill] sm:$0xff]  ;;  %v11089_v24 = vld [vmem:[#allocation97_spill] sm:$0xff] }
 0x4a1   :  { %v2680_v32 = vadd.f32 %v2679_v43, %v2653_v1 }
 0x4a2   :  { %3279 = vst [vmem:[#allocation4 + $0x20] sm:$0x1] %v2712_v20  ;;  %v11090_v20 = vld [vmem:[#allocation99_spill] sm:$0xff] }
 0x4a3   :  { %v2706_v22 = vadd.f32 %v2705_v60, %v2680_v32  ;;  %v8714_v60 = vld [vmem:[%s8682_s23 + $0x218] sm:$0xff]  ;;  %v8759_v32 = vld [vmem:[%s8682_s23 + $0x180] sm:$0xff] }
 0x4a5   :  { %v2713_v29 = vmax.f32 %v2482_v62, %v2706_v22  ;;  %v2800_v48 = vpop.f32.mrf.mxu0  ;;  %v11091_v62 = vld [vmem:[#allocation106_spill] sm:$0xff]  ;;  %v11092_v22 = vld [vmem:[#allocation101_spill] sm:$0xff] }
 0x4a6   :  { %v2930_v3 = vpop.f32.mrf.mxu1  ;;  %v8652_v51 = vmax.f32 %v2800_v48, %v2878_v42  ;;  %v8750_v42 = vld [vmem:[%s8682_s23 + $0x190] sm:$0xff] }
 0x4a7   :  { %3281 = vst.msk [vmem:[#allocation4 + $0x28] sm:$0x1] %vm3280_vm13, %v2713_v29  ;;  %v11093_v29 = vld [vmem:[#allocation104_spill] sm:$0xff]  ;;  %v8778_v48 = vld [vmem:[%s8682_s23 + $0x210] sm:$0xff] }
 0x4a8   :  { %v2852_v41 = vpop.f32.mrf.mxu2  ;;  %2973 = vmatmul.f32.vlgmr.msrb.gmra.mxu2 %v8652_v51  ;;  %3051 = vmatmul.f32.vlgmr.msrb.gmra.mxu1 %v8652_v51 }
 0x4a9   :  { %v8657_v39 = vmax.f32 %v2852_v41, %v2930_v3  ;;  %3179 = vmatpush.msrb.mxu2 %v11071_v12  ;;  %3257 = vmatpush.msrb.mxu1 %v11072_v59  ;;  %v11094_v3 = vld [vmem:[#allocation107_spill] sm:$0xff] }
 0x4aa   :  { %v8784_v41 = vld [vmem:[%s8682_s23 + $0x150] sm:$0xff]  ;;  %v8795_v12 = vld [vmem:[%s8682_s23 + $0xf8] sm:$0xff] }
 0x4ab   :  { %6499 = vmatmul.msk.f32.vlgmr.msra.gmra.mxu0 %vm1024_vm6, %v8657_v39  ;;  %3180 = vmatpush.msrb.mxu2 %v8351_v17  ;;  %v2884_v17 = vpop.f32.mrf.mxu3  ;;  %v8801_v59 = vld [vmem:[%s8682_s23 + $0x130] sm:$0xff] }
 0x4ac   :  { %3191 = vmatpush.msra.mxu0 %v11073_v15  ;;  %3258 = vmatpush.msrb.mxu1 %v11074_v53  ;;  %v11096_v15 = vld [vmem:[#allocation108_spill] sm:$0xff] }
 0x4ad   :  { %v2803_v14 = vpop.f32.mrf.mxu0  ;;  %v8811_v53 = vld [vmem:[%s8682_s23 + $0x120] sm:$0xff] }
 0x4ae   :  { %v2933_v33 = vpop.f32.mrf.mxu1  ;;  %v8666_v27 = vmax.f32 %v2803_v14, %v2881_v5  ;;  %3192 = vmatpush.msra.mxu0 %v11075_v40  ;;  %v11095_v5 = vld [vmem:[#allocation105_spill] sm:$0xff]  ;;  %v8824_v40 = vld [vmem:[%s8682_s23 + $0x110] sm:$0xff] }
 0x4af   :  { %v8815_v14 = vld [vmem:[%s8682_s23 + $0x100] sm:$0xff] }
 0x4b0   :  { %v2855_v1 = vpop.f32.mrf.mxu2  ;;  %2976 = vmatmul.f32.gmra.mxu2 %v8666_v27  ;;  %3054 = vmatmul.f32.gmra.mxu1 %v8666_v27 }
 0x4b1   :  { %v8671_v11 = vmax.f32 %v2855_v1, %v2933_v33  ;;  %3193 = vmatpush.msra.mxu0 %v11076_v13  ;;  %v11097_v33 = vld [vmem:[#allocation109_spill] sm:$0xff]  ;;  %v11098_v1 = vld [vmem:[#allocation110_spill] sm:$0xff] }
 0x4b2   :  { %v8836_v13 = vld [vmem:[%s8682_s23 + $0xc8] sm:$0xff] }
 0x4b3   :  { %6500 = vmatmul.msk.f32.gmra.mxu0 %vm1024_vm6, %v8671_v11 }
 0x4b4   :  { %3194 = vmatpush.msra.mxu0 %v11077_v57  ;;  %v8848_v57 = vld [vmem:[%s8682_s23 + $0xb8] sm:$0xff] }
 0x4b5   :  { %11099 = vst [vmem:[#allocation7_spill] sm:$0xff] %v8848_v57 }
 0x4b6   :  { %v2806_v30 = vpop.f32.mrf.mxu0  ;;  %v2936_v54 = vpop.f32.mrf.mxu1  ;;  %3195 = vmatpush.msra.mxu0 %v11078_v26  ;;  %v8858_v26 = vld [vmem:[%s8682_s23 + $0xa8] sm:$0xff] }
 0x4b7   :  { %v8677_v6 = vmax.f32 %v2806_v30, %v2884_v17  ;;  %v8842_v17 = vld [vmem:[%s8682_s23 + $0xe0] sm:$0xff]  ;;  %v11100_v30 = vld [vmem:[#allocation111_spill] sm:$0xff]  ;;  %11101 = vst [vmem:[#allocation8_spill] sm:$0xff] %v8858_v26 }
 0x4b8   :  { %v2858_v9 = vpop.f32.mrf.mxu2  ;;  %3196 = vmatpush.msra.mxu0 %v11079_v61  ;;  %v8873_v61 = vld [vmem:[%s8682_s23 + $0xb0] sm:$0xff] }
 0x4b9   :  { %2979 = vmatmul.f32.gmra.mxu2 %v8677_v6  ;;  %3057 = vmatmul.f32.gmra.mxu1 %v8677_v6  ;;  %v8687_v38 = vmax.f32 %v2858_v9, %v2936_v54  ;;  %v8852_v54 = vld [vmem:[%s8682_s23 + $0xd0] sm:$0xff]  ;;  %v8862_v9 = vld [vmem:[%s8682_s23 + $0xc0] sm:$0xff] }
 0x4ba   :  { %3197 = vmatpush.msra.mxu0 %v11080_v34  ;;  %v8879_v34 = vld [vmem:[%s8682_s23 + $0x98] sm:$0xff] }
 0x4bb   :  { %6501 = vmatmul.msk.f32.gmra.mxu0 %vm1024_vm6, %v8687_v38  ;;  %11103 = vst [vmem:[#allocation11_spill] sm:$0xff] %v8879_v34 }
 0x4bc   :  { %3198 = vmatpush.msra.mxu0 %v11081_v49  ;;  %v3328_v49 = vld [vmem:[#allocation4] sm:$0xfe] }
 0x4be   :  { %v2904_v21 = vpop.f32.mrf.mxu0  ;;  %3199 = vmatpush.msra.mxu0 %v11083_v19  ;;  %v8895_v19 = vld [vmem:[#allocation4 + $0x18] sm:$0xff] }
 0x4bf   :  { %v8694_v16 = vmax.f32 %v8637_v63, %v2904_v21  ;;  %v11082_v63 = vld [vmem:[#allocation96_spill] sm:$0xff] }
 0x4c0   :  { %3200 = vmatpush.msra.mxu0 %v11085_v10  ;;  %v8888_v21 = vld [vmem:[%s8682_s23 + $0xa0] sm:$0xff]  ;;  %v8908_v10 = vrot.slane %v8645_v23, 1 }
 0x4c1   :  { %2999 = vmatmul.f32.vlgmr.msra.gmra.mxu3 %v8694_v16  ;;  %6502 = vmatmul.msk.f32.vlgmr.msra.gmra.mxu2 %vm1024_vm6, %v8657_v39 }
 0x4c2   :  { %3155 = vmatmul.f32.vlgmr.msra.gmra.mxu1 %v8694_v16  ;;  %3384 = vmatpush.msra.mxu2 %v8697_v45 }
 0x4c3   :  { %3217 = vmatpush.msra.mxu3 %v11082_v63  ;;  %3077 = vmatmul.f32.vlgmr.msrb.gmra.mxu0 %v8694_v16  ;;  %v8893_v63 = vld [vmem:[%s8682_s23 + $0x88] sm:$0xff] }
 0x4c4   :  { %3385 = vmatpush.msra.mxu2 %v8704_v18  ;;  %3468 = vmatpush.msra.mxu1 %v8714_v60  ;;  %11104 = vst [vmem:[#allocation9_spill] sm:$0xff] %v8893_v63 }
 0x4c5   :  { %3218 = vmatpush.msra.mxu3 %v11084_v37  ;;  %3201 = vmatpush.msra.mxu0 %v11087_v36  ;;  %v3372_v37 = vrot.slane %v3328_v49, 1  ;;  %v8917_v36 = vld [vmem:[%s8682_s23 + $0x80] sm:$0xff]  ;;  %v8975_v49 = vld [vmem:[%s8682_s23 + $0x48] sm:$0xff] }
 0x4c6   :  { %v2907_v4 = vpop.f32.mrf.mxu0  ;;  %3386 = vmatpush.msra.mxu2 %v8709_v8  ;;  %11110 = vst [vmem:[#allocation12_spill] sm:$0xff] %v8975_v49 }
 0x4c7   :  { %v8726_v35 = vmax.f32 %v8642_v55, %v2907_v4  ;;  %3219 = vmatpush.msra.mxu3 %v11086_v31  ;;  %v8743_v55 = vld [vmem:[%s8682_s23 + $0x1a0] sm:$0xff]  ;;  %3202 = vmatpush.msra.mxu0 %v11089_v24  ;;  %v3329_v4 = vld [vmem:[#allocation4 + $0x8] sm:$0xfe]  ;;  %v8911_v31 = vld [vmem:[%s8682_s23 + $0x78] sm:$0xff] }
 0x4c8   :  { %3387 = vmatpush.msra.mxu2 %v8719_v28  ;;  %11105 = vst [vmem:[#allocation76_spill] sm:$0xff] %v8911_v31  ;;  %v3375_v24 = vrot.slane %v3329_v4, 1  ;;  %v8983_v4 = vld [vmem:[%s8682_s23 + $0x2f0] sm:$0xff] }
 0x4c9   :  { %3002 = vmatmul.f32.gmra.mxu3 %v8726_v35  ;;  %6503 = vmatmul.msk.f32.gmra.mxu2 %vm1024_vm6, %v8671_v11  ;;  %11112 = vst [vmem:[#allocation19_spill] sm:$0xff] %v8983_v4 }
 0x4ca   :  { %3158 = vmatmul.f32.gmra.mxu1 %v8726_v35  ;;  %3388 = vmatpush.msra.mxu2 %v8729_v50 }
 0x4cb   :  { %3220 = vmatpush.msra.mxu3 %v11088_v0  ;;  %3080 = vmatmul.f32.gmra.mxu0 %v8726_v35  ;;  %v3376_v0 = vrot.slane %v8895_v19, 1 }
 0x4cc   :  { %3389 = vmatpush.msra.mxu2 %v8738_v7  ;;  %3203 = vmatpush.msra.mxu0 %v11090_v20  ;;  %v8924_v20 = vld [vmem:[%s8682_s23 + $0x1c8] sm:$0xff] }
 0x4cd   :  { %3221 = vmatpush.msra.mxu3 %v8340_v47  ;;  %v8768_v47 = vld [vmem:[%s8682_s23 + $0x170] sm:$0xff] }
 0x4ce   :  { %v2910_v43 = vpop.f32.mrf.mxu0  ;;  %3390 = vmatpush.msra.mxu2 %v8743_v55  ;;  %3204 = vmatpush.msra.mxu0 %v11092_v22  ;;  %v3377_v22 = vsel %vm3371_vm14, %v3375_v24, %v3376_v0  ;;  %v8990_v24 = vld [vmem:[%s8682_s23 + $0x188] sm:$0xff] }
 0x4cf   :  { %v8756_v25 = vmax.f32 %v8648_v2, %v2910_v43  ;;  %3222 = vmatpush.msra.mxu3 %v11091_v62  ;;  %v8774_v2 = vld [vmem:[%s8682_s23 + $0x160] sm:$0xff]  ;;  %v8931_v43 = vsel %vm3371_vm14, %v3372_v37, %v8908_v10  ;;  %v8934_v62 = vld [vmem:[%s8682_s23 + $0x70] sm:$0xff] }
 0x4d0   :  { %3391 = vmatpush.msra.mxu2 %v8750_v42  ;;  %3205 = vmatpush.msra.mxu0 %v11093_v29  ;;  %v8940_v29 = vld [vmem:[%s8682_s23 + $0x1b8] sm:$0xff]  ;;  %v8980_v37 = vld [vmem:[%s8682_s23 + $0x40] sm:$0xff] }
 0x4d1   :  { %3005 = vmatmul.f32.gmra.mxu3 %v8756_v25  ;;  %6504 = vmatmul.msk.f32.gmra.mxu2 %vm1024_vm6, %v8687_v38  ;;  %11111 = vst [vmem:[#allocation80_spill] sm:$0xff] %v8980_v37 }
 0x4d2   :  { %3161 = vmatmul.f32.gmra.mxu1 %v8756_v25  ;;  %3392 = vmatpush.msra.mxu2 %v8759_v32 }
 0x4d3   :  { %3223 = vmatpush.msra.mxu3 %v8373_v52  ;;  %3083 = vmatmul.f32.gmra.mxu0 %v8756_v25  ;;  %v8791_v52 = vld [vmem:[%s8682_s23 + $0x140] sm:$0xff] }
 0x4d4   :  { %3393 = vmatpush.msra.mxu2 %v8768_v47  ;;  %3206 = vmatpush.msra.mxu0 %v11095_v5  ;;  %v8948_v5 = vld [vmem:[%s8682_s23 + $0x60] sm:$0xff] }
 0x4d5   :  { %3224 = vmatpush.msra.mxu3 %v11094_v3  ;;  %v8943_v3 = vld [vmem:[%s8682_s23 + $0x68] sm:$0xff] }
 0x4d6   :  { %3394 = vmatpush.msra.mxu2 %v8774_v2  ;;  %3422 = vmatpush.msrb.mxu0 %v8778_v48  ;;  %11106 = vst [vmem:[#allocation13_spill] sm:$0xff] %v8943_v3 }
 0x4d7   :  { %3225 = vmatpush.msra.mxu3 %v8395_v56  ;;  %v8807_v56 = vld [vmem:[%s8682_s23 + $0xe8] sm:$0xff] }
 0x4d8   :  { %3395 = vmatpush.msra.mxu2 %v8784_v41 }
 0x4d9   :  { %3129 = vmatmul.f32.vlgmr.msrb.gmra.mxu3 %v8652_v51  ;;  %6505 = vmatmul.msk.f32.vlgmr.msrb.gmra.mxu2 %vm1024_vm6, %v8657_v39 }
 0x4da   :  { %6508 = vmatmul.msk.f32.vlgmr.msrb.gmra.mxu1 %vm1024_vm6, %v8657_v39  ;;  %3396 = vmatpush.msra.mxu2 %v8791_v52  ;;  %v8820_v39 = vld [vmem:[%s8682_s23 + $0xd8] sm:$0xff] }
 0x4db   :  { %3226 = vmatpush.msra.mxu3 %v11096_v15  ;;  %3528 = vmatpush.msrb.mxu1 %v8795_v12  ;;  %v8951_v15 = vld [vmem:[%s8682_s23 + $0x310] sm:$0xff] }
 0x4dc   :  { %3207 = vmatmul.f32.vlgmr.msra.gmra.mxu0 %v8652_v51  ;;  %3397 = vmatpush.msra.mxu2 %v8801_v59  ;;  %v8831_v51 = vld [vmem:[%s8682_s23 + $0xf0] sm:$0xff]  ;;  %11107 = vst [vmem:[#allocation10_spill] sm:$0xff] %v8951_v15 }
 0x4dd   :  { %3227 = vmatpush.msra.mxu3 %v11097_v33  ;;  %3529 = vmatpush.msrb.mxu1 %v8807_v56  ;;  %v8959_v33 = vld [vmem:[%s8682_s23 + $0x58] sm:$0xff] }
 0x4de   :  { %3398 = vmatpush.msra.mxu2 %v8811_v53  ;;  %3520 = vmatpush.msra.mxu0 %v8815_v14  ;;  %11108 = vst [vmem:[#allocation79_spill] sm:$0xff] %v8959_v33 }
 0x4df   :  { %3228 = vmatpush.msra.mxu3 %v11098_v1  ;;  %3530 = vmatpush.msrb.mxu1 %v8820_v39  ;;  %v8964_v1 = vld [vmem:[%s8682_s23 + $0x50] sm:$0xff] }
 0x4e0   :  { %3399 = vmatpush.msra.mxu2 %v8824_v40 }
 0x4e1   :  { %3132 = vmatmul.f32.gmra.mxu3 %v8666_v27  ;;  %6506 = vmatmul.msk.f32.gmra.mxu2 %vm1024_vm6, %v8671_v11 }
 0x4e2   :  { %6509 = vmatmul.msk.f32.gmra.mxu1 %vm1024_vm6, %v8671_v11  ;;  %3482 = vmatpush.msrb.mxu2 %v8831_v51  ;;  %v11102_v11 = vld [vmem:[#allocation112_spill] sm:$0xff] }
 0x4e3   :  { %3229 = vmatpush.msra.mxu3 %v11100_v30  ;;  %3531 = vmatpush.msrb.mxu1 %v8836_v13  ;;  %v8967_v30 = vld [vmem:[%s8682_s23 + $0x300] sm:$0xff] }
 0x4e4   :  { %3210 = vmatmul.f32.gmra.mxu0 %v8666_v27  ;;  %3483 = vmatpush.msrb.mxu2 %v8842_v17  ;;  %v8870_v27 = vld [vmem:[%s8682_s23 + $0x208] sm:$0xff]  ;;  %11109 = vst [vmem:[#allocation16_spill] sm:$0xff] %v8967_v30 }
 0x4e5   :  { %3230 = vmatpush.msra.mxu3 %v11102_v11  ;;  %3532 = vmatpush.msrb.mxu1 %v8848_v57  ;;  %v8972_v11 = vld [vmem:[%s8682_s23 + $0x198] sm:$0xff] }
 0x4e6   :  { %3484 = vmatpush.msrb.mxu2 %v8852_v54 }
 0x4e7   :  { %3231 = vmatpush.msra.mxu3 %v8436_v58  ;;  %3533 = vmatpush.msrb.mxu1 %v8858_v26  ;;  %v8885_v58 = vld [vmem:[%s8682_s23 + $0x1f8] sm:$0xff]  ;;  %v9148_v26 = vld [vmem:[%s8682_s23 + $0x2e8] sm:$0xff] }
 0x4e8   :  { %3485 = vmatpush.msrb.mxu2 %v8862_v9 }
 0x4e9   :  { %3135 = vmatmul.f32.gmra.mxu3 %v8677_v6  ;;  %6507 = vmatmul.msk.f32.gmra.mxu2 %vm1024_vm6, %v8687_v38 }
 0x4ea   :  { %3232 = vmatpush.msra.mxu3 %v8448_v46  ;;  %6510 = vmatmul.msk.f32.gmra.mxu1 %vm1024_vm6, %v8687_v38  ;;  %v8899_v46 = vld [vmem:[%s8682_s23 + $0x1e8] sm:$0xff]  ;;  %v8902_v38 = vld [vmem:[%s8682_s23 + $0x90] sm:$0xff] }
 0x4eb   :  { %3486 = vmatpush.msrb.mxu2 %v8873_v61  ;;  %3534 = vmatpush.msrb.mxu1 %v8879_v34  ;;  %v9043_v34 = vld [vmem:[%s8682_s23] sm:$0xff] }
 0x4ec   :  { %3430 = vmatpush.msrb.mxu3 %v8870_v27  ;;  %3213 = vmatmul.f32.gmra.mxu0 %v8677_v6  ;;  %v8914_v6 = vld [vmem:[%s8682_s23 + $0x1d8] sm:$0xff]  ;;  %11122 = vst [vmem:[#allocation27_spill] sm:$0xff] %v9043_v34 }
 0x4ed   :  { %3487 = vmatpush.msrb.mxu2 %v8888_v21  ;;  %3535 = vmatpush.msrb.mxu1 %v8893_v63  ;;  %v9035_v63 = vld [vmem:[%s8682_s23 + $0x2c0] sm:$0xff] }
 0x4ee   :  { %3431 = vmatpush.msrb.mxu3 %v8885_v58  ;;  %11121 = vst [vmem:[#allocation47_spill] sm:$0xff] %v9035_v63 }
 0x4ef   :  { %3488 = vmatpush.msrb.mxu2 %v8902_v38  ;;  %3536 = vmatpush.msrb.mxu1 %v8911_v31  ;;  %v9027_v31 = vld [vmem:[%s8682_s23 + $0x10] sm:$0xff] }
 0x4f0   :  { %3432 = vmatpush.msrb.mxu3 %v8899_v46  ;;  %11119 = vst [vmem:[#allocation17_spill] sm:$0xff] %v9027_v31 }
 0x4f1   :  { %3489 = vmatpush.msrb.mxu2 %v8917_v36  ;;  %3233 = vmatmul.f32.vlgmr.msra.gmra.mxu3 %v8694_v16  ;;  %v8956_v16 = vld [vmem:[%s8682_s23 + $0x1a8] sm:$0xff] }
 0x4f2   :  { %3433 = vmatpush.msrb.mxu3 %v8914_v6  ;;  %3400 = vmatmul.f32.vlgmr.msra.gmra.mxu2 %v8931_v43 }
 0x4f3   :  { %6547 = vmatmul.msk.f32.vlgmr.msra.gmra.mxu1 %vm1859_vm11, %v3377_v22  ;;  %3490 = vmatpush.msrb.mxu2 %v8934_v62 }
 0x4f4   :  { %3434 = vmatpush.msrb.mxu3 %v8924_v20  ;;  %6545 = vmatmul.msk.f32.vlgmr.msrb.gmra.mxu0 %vm1859_vm11, %v3377_v22  ;;  %v8995_v22 = vld [vmem:[%s8682_s23 + $0x30] sm:$0xff] }
 0x4f5   :  { %3537 = vmatpush.msrb.mxu1 %v8943_v3  ;;  %3491 = vmatpush.msrb.mxu2 %v8948_v5  ;;  %11113 = vst [vmem:[#allocation20_spill] sm:$0xff] %v8995_v22  ;;  %v9024_v3 = vld [vmem:[%s8682_s23 + $0x168] sm:$0xff] }
 0x4f6   :  { %3435 = vmatpush.msrb.mxu3 %v8940_v29  ;;  %3637 = vmatpush.msrb.mxu0 %v8951_v15  ;;  %v8998_v15 = vld [vmem:[%s8682_s23 + $0x38] sm:$0xff] }
 0x4f7   :  { %3538 = vmatpush.msrb.mxu1 %v8959_v33  ;;  %3492 = vmatpush.msrb.mxu2 %v8964_v1  ;;  %11114 = vst [vmem:[#allocation22_spill] sm:$0xff] %v8998_v15  ;;  %v9019_v33 = vld [vmem:[%s8682_s23 + $0x2d0] sm:$0xff] }
 0x4f8   :  { %3436 = vmatpush.msrb.mxu3 %v8956_v16  ;;  %3638 = vmatpush.msrb.mxu0 %v8967_v30  ;;  %v9003_v30 = vld [vmem:[%s8682_s23 + $0x2e0] sm:$0xff]  ;;  %11118 = vst [vmem:[#allocation25_spill] sm:$0xff] %v9019_v33 }
 0x4f9   :  { %3539 = vmatpush.msrb.mxu1 %v8975_v49  ;;  %3493 = vmatpush.msrb.mxu2 %v8980_v37  ;;  %11115 = vst [vmem:[#allocation14_spill] sm:$0xff] %v9003_v30  ;;  %v9006_v49 = vld [vmem:[%s8682_s23 + $0x178] sm:$0xff] }
 0x4fa   :  { %3437 = vmatpush.msrb.mxu3 %v8972_v11  ;;  %3639 = vmatpush.msrb.mxu0 %v8983_v4  ;;  %v9011_v4 = vld [vmem:[%s8682_s23 + $0x20] sm:$0xff] }
 0x4fb   :  { %3236 = vmatmul.f32.gmra.mxu3 %v8726_v35  ;;  %3403 = vmatmul.f32.gmra.mxu2 %v8908_v10  ;;  %11116 = vst [vmem:[#allocation15_spill] sm:$0xff] %v9011_v4  ;;  %v9016_v35 = vld [vmem:[%s8682_s23 + $0x28] sm:$0xff] }
 0x4fc   :  { %6548 = vmatmul.msk.f32.gmra.mxu1 %vm1859_vm11, %v3376_v0  ;;  %3438 = vmatpush.msrb.mxu3 %v8990_v24  ;;  %11117 = vst [vmem:[#allocation23_spill] sm:$0xff] %v9016_v35 }
 0x4fd   :  { %3494 = vmatpush.msrb.mxu2 %v8995_v22  ;;  %3540 = vmatpush.msrb.mxu1 %v8998_v15  ;;  %v9032_v15 = vld [vmem:[%s8682_s23 + $0x18] sm:$0xff] }
 0x4fe   :  { %3640 = vmatpush.msrb.mxu0 %v9003_v30  ;;  %3439 = vmatpush.msrb.mxu3 %v9006_v49  ;;  %11120 = vst [vmem:[#allocation18_spill] sm:$0xff] %v9032_v15  ;;  %v9040_v30 = vld [vmem:[%s8682_s23 + $0x158] sm:$0xff] }
 0x4ff   :  { %6546 = vmatmul.msk.f32.gmra.mxu0 %vm1859_vm11, %v3376_v0  ;;  %3495 = vmatpush.msrb.mxu2 %v9011_v4  ;;  %v9048_v0 = vld [vmem:[%s8682_s23 + $0x8] sm:$0xff]  ;;  %v9051_v4 = vld [vmem:[%s8682_s23 + $0x2b0] sm:$0xff]  ;;  %v9137_v22 = vld [vmem:[%s8682_s23 + $0x2f8] sm:$0xff] }
 0x500   :  { %3541 = vmatpush.msrb.mxu1 %v9016_v35  ;;  %3641 = vmatpush.msrb.mxu0 %v9019_v33  ;;  %11123 = vst [vmem:[#allocation21_spill] sm:$0xff] %v9048_v0  ;;  %v9058_v33 = vld [vmem:[%s8682_s23 + $0x148] sm:$0xff]  ;;  %v9063_v35 = vld [vmem:[%s8682_s23 + $0x2a0] sm:$0xff] }
 0x501   :  { %3440 = vmatpush.msrb.mxu3 %v9024_v3  ;;  %3496 = vmatpush.msrb.mxu2 %v9027_v31  ;;  %11124 = vst [vmem:[#allocation50_spill] sm:$0xff] %v9051_v4  ;;  %v9066_v31 = vld [vmem:[%s8682_s23 + $0x320] sm:$0xff] }
 0x502   :  { %3542 = vmatpush.msrb.mxu1 %v9032_v15  ;;  %3642 = vmatpush.msrb.mxu0 %v9035_v63  ;;  %11125 = vst [vmem:[#allocation29_spill] sm:$0xff] %v9063_v35  ;;  %v9071_v63 = vld [vmem:[%s8682_s23 + $0x138] sm:$0xff]  ;;  %v9082_v15 = vld [vmem:[#allocation4 + $0x8] sm:$0xff] }
 0x503   :  { %3441 = vmatpush.msrb.mxu3 %v9040_v30  ;;  %3497 = vmatpush.msrb.mxu2 %v9043_v34  ;;  %11126 = vst [vmem:[#allocation31_spill] sm:$0xff] %v9066_v31  ;;  %v9096_v34 = vld [vmem:[%s8682_s23 + $0x118] sm:$0xff] }
 0x504   :  { %3543 = vmatpush.msrb.mxu1 %v9048_v0  ;;  %3643 = vmatpush.msrb.mxu0 %v9051_v4  ;;  %v9076_v0 = vld [vmem:[%s8682_s23 + $0x290] sm:$0xff]  ;;  %v9079_v4 = vld [vmem:[%s8682_s23 + $0x328] sm:$0xff] }
 0x505   :  { %3239 = vmatmul.f32.gmra.mxu3 %v8756_v25  ;;  %3498 = vmatmul.f32.vlgmr.msrb.gmra.mxu2 %v8639_v44  ;;  %11127 = vst [vmem:[#allocation24_spill] sm:$0xff] %v9076_v0  ;;  %v9085_v25 = vld [vmem:[%s8682_s23 + $0x128] sm:$0xff] }
 0x506   :  { %3544 = vmatmul.f32.vlgmr.msrb.gmra.mxu1 %v8639_v44  ;;  %3442 = vmatpush.msrb.mxu3 %v9058_v33  ;;  %11128 = vst [vmem:[#allocation53_spill] sm:$0xff] %v9079_v4  ;;  %v9092_v44 = vld [vmem:[%s8682_s23 + $0x280] sm:$0xff] }
 0x507   :  { %3644 = vmatpush.msrb.mxu0 %v9063_v35  ;;  %3675 = vmatpush.msra.mxu2 %v9066_v31  ;;  %11129 = vst [vmem:[#allocation33_spill] sm:$0xff] %v9092_v44  ;;  %v9101_v35 = vld [vmem:[%s8682_s23 + $0x270] sm:$0xff]  ;;  %v9108_v31 = vld [vmem:[%s8682_s23 + $0x108] sm:$0xff] }
 0x508   :  { %6549 = vmatmul.msk.f32.vlgmr.msra.gmra.mxu0 %vm1859_vm11, %v9082_v15  ;;  %3443 = vmatpush.msrb.mxu3 %v9071_v63  ;;  %11130 = vst [vmem:[#allocation26_spill] sm:$0xff] %v9101_v35 }
 0x509   :  { %3645 = vmatpush.msrb.mxu0 %v9076_v0  ;;  %3721 = vmatpush.msra.mxu1 %v9079_v4  ;;  %v9111_v0 = vld [vmem:[%s8682_s23 + $0x260] sm:$0xff]  ;;  %v9117_v4 = vld [vmem:[%s8682_s23 + $0x318] sm:$0xff] }
 0x50a   :  { %3444 = vmatpush.msrb.mxu3 %v9085_v25  ;;  %3810 = vmatpush.msrb.mxu2 %v8697_v45  ;;  %11131 = vst [vmem:[#allocation35_spill] sm:$0xff] %v9111_v0  ;;  %v3292_v45 = vld [vmem:[#allocation4 + $0x10] sm:$0x7f] }
 0x50b   :  { %3646 = vmatpush.msrb.mxu0 %v9092_v44  ;;  %3856 = vmatpush.msrb.mxu1 %v8870_v27  ;;  %11132 = vst [vmem:[#allocation56_spill] sm:$0xff] %v9117_v4  ;;  %v9120_v27 = vld [vmem:[%s8682_s23 + $0x250] sm:$0xff]  ;;  %v9124_v44 = vld [vmem:[#allocation4 + $0x18] sm:$0x7f] }
 0x50c   :  { %3445 = vmatpush.msrb.mxu3 %v9096_v34  ;;  %3811 = vmatpush.msrb.mxu2 %v8704_v18  ;;  %11133 = vst [vmem:[#allocation37_spill] sm:$0xff] %v9120_v27  ;;  %v9127_v18 = vld [vmem:[%s8682_s23 + $0x308] sm:$0xff] }
 0x50d   :  { %3647 = vmatpush.msrb.mxu0 %v9101_v35  ;;  %3446 = vmatmul.f32.vlgmr.msrb.gmra.mxu3 %v8931_v43  ;;  %v9133_v43 = vld [vmem:[%s8682_s23 + $0x240] sm:$0xff] }
 0x50e   :  { %3501 = vmatmul.f32.gmra.mxu2 %v3292_v45  ;;  %3547 = vmatmul.f32.gmra.mxu1 %v3292_v45  ;;  %v3575_v45 = vld [vmem:[#allocation4 + $0x8] sm:$0xfc]  ;;  %v3574_v35 = vld [vmem:[#allocation4] sm:$0xfc] }
 0x50f   :  { %3566 = vmatpush.msra.mxu3 %v9108_v31  ;;  %3648 = vmatpush.msrb.mxu0 %v9111_v0  ;;  %v3625_v0 = vrot.slane %v8895_v19, 2  ;;  %v3624_v37 = vrot.slane %v3575_v45, 2  ;;  %v3621_v57 = vrot.slane %v3574_v35, 2  ;;  %v9161_v19 = vld [vmem:[%s8682_s23 + $0x2d8] sm:$0xff] }
 0x510   :  { %6550 = vmatmul.msk.f32.gmra.mxu0 %vm1859_vm11, %v9124_v44  ;;  %3857 = vmatpush.msrb.mxu1 %v8885_v58  ;;  %v9154_v58 = vld [vmem:[%s8682_s23 + $0x220] sm:$0xff] }
 0x511   :  { %3683 = vmatpush.msrb.mxu3 %v9117_v4  ;;  %3649 = vmatpush.msrb.mxu0 %v9120_v27  ;;  %v9143_v4 = vld [vmem:[%s8682_s23 + $0x230] sm:$0xff]  ;;  %v3622_v27 = vrot.slane %v8645_v23, 2  ;;  %v3579_v23 = vld [vmem:[#allocation4 + $0x28] sm:$0x1] }
 0x512   :  { %3812 = vmatpush.msrb.mxu2 %v8709_v8  ;;  %3858 = vmatpush.msrb.mxu1 %v8899_v46  ;;  %v3626_v8 = vsel %vm189_vm0, %v3624_v37, %v3625_v0  ;;  %v9171_v46 = vld [vmem:[%s8682_s23 + $0x2c8] sm:$0xff]  ;;  %v9176_v37 = vld [vmem:[%s8682_s23 + $0x2b8] sm:$0xff]  ;;  %v3629_v35 = vrot.slane %v3579_v23, 2 }
 0x513   :  { %3684 = vmatpush.msrb.mxu3 %v9127_v18  ;;  %3650 = vmatpush.msrb.mxu0 %v9133_v43 }
 0x514   :  { %3813 = vmatpush.msrb.mxu2 %v8719_v28  ;;  %v9168_v28 = vsel %vm189_vm0, %v3621_v57, %v3622_v27  ;;  %3859 = vmatpush.msrb.mxu1 %v8914_v6  ;;  %v9183_v57 = vld [vmem:[%s8682_s23 + $0x2a8] sm:$0xff]  ;;  %v9193_v6 = vld [vmem:[%s8682_s23 + $0x298] sm:$0xff] }
 0x515   :  { %3685 = vmatpush.msrb.mxu3 %v9137_v22  ;;  %3651 = vmatpush.msrb.mxu0 %v9143_v4 }
 0x516   :  { %3449 = vmatmul.f32.gmra.mxu3 %v8908_v10  ;;  %6587 = vmatmul.msk.f32.vlgmr.msra.gmra.mxu2 %vm1859_vm11, %v3626_v8  ;;  %v3578_v10 = vld [vmem:[#allocation4 + $0x20] sm:$0x1] }
 0x517   :  { %3686 = vmatpush.msrb.mxu3 %v9148_v26  ;;  %6589 = vmatmul.msk.f32.vlgmr.msra.gmra.mxu1 %vm1859_vm11, %v3626_v8  ;;  %v3627_v45 = vrot.slane %v3578_v10, 2 }
 0x518   :  { %3652 = vmatpush.msrb.mxu0 %v9154_v58  ;;  %3814 = vmatpush.msrb.mxu2 %v8729_v50  ;;  %v3630_v50 = vsel %vm189_vm0, %v3625_v0, %v3629_v35 }
 0x519   :  { %3687 = vmatpush.msrb.mxu3 %v9161_v19  ;;  %3653 = vmatmul.f32.vlgmr.msrb.gmra.mxu0 %v9168_v28 }
 0x51a   :  { %3848 = vmatpush.msra.mxu0 %v8778_v48  ;;  %3860 = vmatpush.msrb.mxu1 %v8924_v20  ;;  %v9201_v48 = vld [vmem:[%s8682_s23 + $0x288] sm:$0xff] }
 0x51b   :  { %3688 = vmatpush.msrb.mxu3 %v9171_v46  ;;  %3815 = vmatpush.msrb.mxu2 %v8738_v7  ;;  %v3628_v7 = vsel %vm189_vm0, %v3622_v27, %v3627_v45  ;;  %v9213_v20 = vld [vmem:[%s8682_s23 + $0x268] sm:$0xff] }
 0x51c   :  { %3908 = vmatpush.msrb.mxu0 %v8831_v51  ;;  %3861 = vmatpush.msrb.mxu1 %v8940_v29  ;;  %v9206_v51 = vld [vmem:[%s8682_s23 + $0x278] sm:$0xff]  ;;  %v11147_v29 = vld [vmem:[#allocation22_spill] sm:$0xff] }
 0x51d   :  { %3689 = vmatpush.msrb.mxu3 %v9176_v37  ;;  %3816 = vmatpush.msrb.mxu2 %v8743_v55  ;;  %v9222_v55 = vld [vmem:[%s8682_s23 + $0x258] sm:$0xff] }
 0x51e   :  { %6551 = vmatmul.msk.f32.vlgmr.msra.gmra.mxu3 %vm1859_vm11, %v9082_v15  ;;  %6588 = vmatmul.msk.f32.gmra.mxu2 %vm1859_vm11, %v3630_v50 }
 0x51f   :  { %3690 = vmatpush.msrb.mxu3 %v9183_v57  ;;  %6590 = vmatmul.msk.f32.gmra.mxu1 %vm1859_vm11, %v3630_v50 }
 0x520   :  { %3862 = vmatpush.msrb.mxu1 %v8956_v16  ;;  %3817 = vmatpush.msrb.mxu2 %v8750_v42  ;;  %v9228_v42 = vld [vmem:[%s8682_s23 + $0x248] sm:$0xff] }
 0x521   :  { %3691 = vmatpush.msrb.mxu3 %v9193_v6  ;;  %3656 = vmatmul.f32.gmra.mxu0 %v3628_v7 }
 0x522   :  { %3909 = vmatpush.msrb.mxu0 %v8842_v17  ;;  %3863 = vmatpush.msrb.mxu1 %v8972_v11 }
 0x523   :  { %3692 = vmatpush.msrb.mxu3 %v9201_v48  ;;  %3818 = vmatpush.msrb.mxu2 %v8759_v32  ;;  %v9235_v32 = vld [vmem:[%s8682_s23 + $0x238] sm:$0xff] }
 0x524   :  { %3910 = vmatpush.msrb.mxu0 %v8852_v54  ;;  %3864 = vmatpush.msrb.mxu1 %v8990_v24  ;;  %v11140_v54 = vld [vmem:[#allocation9_spill] sm:$0xff] }
 0x525   :  { %3693 = vmatpush.msrb.mxu3 %v9206_v51  ;;  %3819 = vmatpush.msrb.mxu2 %v8768_v47  ;;  %v9242_v47 = vld [vmem:[%s8682_s23 + $0x228] sm:$0xff]  ;;  %s6180_s23 = sld [smem:[%s10713_s0 + %s6823_s20]]  }
 0x526   :  { %6552 = vmatmul.msk.f32.gmra.mxu3 %vm1859_vm11, %v9124_v44  ;;  %3865 = vmatpush.msrb.mxu1 %v9006_v49 }
 0x527   :  { %3694 = vmatpush.msrb.mxu3 %v9213_v20  ;;  %3911 = vmatpush.msrb.mxu0 %v8862_v9 }
 0x528   :  { %3820 = vmatpush.msrb.mxu2 %v8774_v2  ;;  %3866 = vmatpush.msrb.mxu1 %v9024_v3  ;;  %v9248_v2 = vpop.f32.mrf.mxu1 }
 0x529   :  { %3695 = vmatpush.msrb.mxu3 %v9222_v55  ;;  %3912 = vmatpush.msrb.mxu0 %v8873_v61 }
 0x52a   :  { %3821 = vmatpush.msrb.mxu2 %v8784_v41  ;;  %3867 = vmatpush.msrb.mxu1 %v9040_v30  ;;  %v11150_v30 = vld [vmem:[#allocation21_spill] sm:$0xff] }
 0x52b   :  { %3696 = vmatpush.msrb.mxu3 %v9228_v42  ;;  %3913 = vmatpush.msrb.mxu0 %v8888_v21  ;;  %v2974_v17 = vpop.f32.mrf.mxu2  ;;  %v11143_v21 = vld [vmem:[#allocation27_spill] sm:$0xff] }
 0x52c   :  { %3822 = vmatpush.msrb.mxu2 %v8791_v52  ;;  %3868 = vmatpush.msrb.mxu1 %v9058_v33  ;;  %v11148_v33 = vld [vmem:[#allocation23_spill] sm:$0xff] }
 0x52d   :  { %3697 = vmatpush.msrb.mxu3 %v9235_v32  ;;  %3914 = vmatpush.msrb.mxu0 %v8902_v38 }
 0x52e   :  { %3823 = vmatpush.msrb.mxu2 %v8801_v59  ;;  %3869 = vmatpush.msrb.mxu1 %v9071_v63  ;;  %v11135_v59 = vld [vmem:[#allocation80_spill] sm:$0xff] }
 0x52f   :  { %3698 = vmatpush.msrb.mxu3 %v9242_v47  ;;  %3915 = vmatpush.msrb.mxu0 %v8917_v36  ;;  %v11145_v36 = vld [vmem:[#allocation79_spill] sm:$0xff] }
 0x530   :  { %3699 = vmatmul.f32.vlgmr.msrb.gmra.mxu3 %v9168_v28  ;;  %3824 = vmatpush.msrb.mxu2 %v8811_v53  ;;  %v9268_v52 = vpop.f32.mrf.mxu1 }
 0x531   :  { %3894 = vmatpush.msra.mxu3 %v8714_v60  ;;  %3870 = vmatpush.msrb.mxu1 %v9085_v25  ;;  %v3026_v60 = vpop.f32.mrf.mxu0 }
 0x532   :  { %3825 = vmatpush.msrb.mxu2 %v8824_v40  ;;  %3916 = vmatpush.msrb.mxu0 %v8934_v62  ;;  %v11139_v40 = vld [vmem:[#allocation15_spill] sm:$0xff]  ;;  %v11146_v62 = vld [vmem:[#allocation12_spill] sm:$0xff] }
 0x533   :  { %3954 = vmatpush.msrb.mxu3 %v8795_v12  ;;  %3871 = vmatpush.msrb.mxu1 %v9096_v34  ;;  %v2977_v41 = vpop.f32.mrf.mxu2  ;;  %v11134_v12 = vld [vmem:[#allocation7_spill] sm:$0xff]  ;;  %v11142_v34 = vld [vmem:[#allocation76_spill] sm:$0xff] }
 0x534   :  { %3946 = vmatpush.msra.mxu2 %v8815_v14  ;;  %3917 = vmatpush.msrb.mxu0 %v8948_v5  ;;  %v11137_v14 = vld [vmem:[#allocation20_spill] sm:$0xff] }
 0x535   :  { %3992 = vmatpush.msra.mxu1 %v9108_v31  ;;  %3955 = vmatpush.msrb.mxu3 %v8807_v56  ;;  %v11136_v56 = vld [vmem:[#allocation8_spill] sm:$0xff]  ;;  %v11144_v31 = vld [vmem:[#allocation13_spill] sm:$0xff] }
 0x536   :  { %3918 = vmatpush.msrb.mxu0 %v8964_v1  ;;  %v11149_v1 = vld [vmem:[#allocation18_spill] sm:$0xff] }
 0x537   :  { %3956 = vmatpush.msrb.mxu3 %v8820_v39  ;;  %v11138_v39 = vld [vmem:[#allocation11_spill] sm:$0xff] }
 0x538   :  { %3702 = vmatmul.f32.gmra.mxu3 %v3628_v7  ;;  %3919 = vmatpush.msrb.mxu0 %v11135_v59  ;;  %v9280_v61 = vpop.f32.mrf.mxu1 }
 0x539   :  { %3957 = vmatpush.msrb.mxu3 %v8836_v13  ;;  %v3029_v9 = vpop.f32.mrf.mxu0  ;;  %v11141_v13 = vld [vmem:[#allocation17_spill] sm:$0xff] }
 0x53a   :  { %3920 = vmatpush.msrb.mxu0 %v11137_v14 }
 0x53b   :  { %3958 = vmatpush.msrb.mxu3 %v11134_v12 }
 0x53c   :  { %v2980_v53 = vpop.f32.mrf.mxu2  ;;  %3921 = vmatpush.msrb.mxu0 %v11139_v40 }
 0x53d   :  { %3959 = vmatpush.msrb.mxu3 %v11136_v56 }
 0x53e   :  { %3922 = vmatpush.msrb.mxu0 %v11141_v13 }
 0x53f   :  { %3960 = vmatpush.msrb.mxu3 %v11138_v39 }
 0x540   :  { %3923 = vmatpush.msrb.mxu0 %v11143_v21  ;;  %v3156_v5 = vpop.f32.mrf.mxu1 }
 0x541   :  { %3961 = vmatpush.msrb.mxu3 %v11140_v54  ;;  %v3032_v3 = vpop.f32.mrf.mxu0 }
 0x543   :  { %3962 = vmatpush.msrb.mxu3 %v11142_v34 }
 0x544   :  { %v3000_v63 = vpop.f32.mrf.mxu3  ;;  %v9285_v38 = vpop.f32.mrf.mxu2 }
 0x545   :  { %3963 = vmatpush.msrb.mxu3 %v11144_v31  ;;  %v3001_v25 = vadd.f32 %v3000_v63, %v2974_v17 }
 0x547   :  { %3964 = vmatpush.msrb.mxu3 %v11145_v36  ;;  %v3027_v23 = vadd.f32 %v3026_v60, %v3001_v25  ;;  %v11156_v25 = vld [vmem:[#allocation25_spill] sm:$0xff] }
 0x548   :  { %v3159_v0 = vpop.f32.mrf.mxu1 }
 0x549   :  { %3965 = vmatpush.msrb.mxu3 %v11146_v62  ;;  %v3078_v24 = vpop.f32.mrf.mxu0  ;;  %v11151_v62 = vld [vmem:[#allocation10_spill] sm:$0xff] }
 0x54b   :  { %3966 = vmatpush.msrb.mxu3 %v11147_v29  ;;  %v11152_v29 = vld [vmem:[#allocation56_spill] sm:$0xff] }
 0x54c   :  { %v3003_v15 = vpop.f32.mrf.mxu3  ;;  %v9291_v16 = vpop.f32.mrf.mxu2 }
 0x54d   :  { %3967 = vmatpush.msrb.mxu3 %v11148_v33  ;;  %v3004_v50 = vadd.f32 %v3003_v15, %v2977_v41  ;;  %v11154_v33 = vld [vmem:[#allocation19_spill] sm:$0xff] }
 0x54f   :  { %3968 = vmatpush.msrb.mxu3 %v11149_v1  ;;  %v3030_v56 = vadd.f32 %v3029_v9, %v3004_v50 }
 0x550   :  { %v3162_v35 = vpop.f32.mrf.mxu1 }
 0x551   :  { %3969 = vmatpush.msrb.mxu3 %v11150_v30  ;;  %v3081_v28 = vpop.f32.mrf.mxu0 }
 0x554   :  { %v3006_v11 = vpop.f32.mrf.mxu3  ;;  %v9296_v49 = vpop.f32.mrf.mxu2 }
 0x555   :  { %v3007_v60 = vadd.f32 %v3006_v11, %v2980_v53  ;;  %v11153_v53 = vld [vmem:[#allocation16_spill] sm:$0xff]  ;;  %v11155_v11 = vld [vmem:[#allocation14_spill] sm:$0xff] }
 0x557   :  { %v3033_v9 = vadd.f32 %v3032_v3, %v3007_v60  ;;  %v3079_v3 = vadd.f32 %v3078_v24, %v9248_v2  ;;  %v11159_v2 = vld [vmem:[#allocation29_spill] sm:$0xff] }
 0x558   :  { %v3260_v40 = vpop.f32.mrf.mxu1 }
 0x559   :  { %v9301_v39 = vpop.f32.mrf.mxu0 }
 0x55c   :  { %v3130_v44 = vpop.f32.mrf.mxu3  ;;  %v3182_v27 = vpop.f32.mrf.mxu2 }
 0x55d   :  { %v3157_v8 = vadd.f32 %v3156_v5, %v3130_v44 }
 0x55f   :  { %v3183_v10 = vadd.f32 %v3182_v27, %v3157_v8  ;;  %v11157_v27 = vld [vmem:[#allocation47_spill] sm:$0xff]  ;;  %v11158_v8 = vld [vmem:[#allocation50_spill] sm:$0xff] }
 0x560   :  { %v3263_v1 = vpop.f32.mrf.mxu1 }
 0x561   :  { %v9298_v45 = vmax.f32 %v3027_v23, %v3183_v10  ;;  %v3208_v15 = vpop.f32.mrf.mxu0  ;;  %v11160_v10 = vld [vmem:[#allocation24_spill] sm:$0xff] }
 0x563   :  { %3283 = vst [vmem:[#allocation4 + $0x30] sm:$0xff] %v9298_v45 }
 0x564   :  { %v3133_v7 = vpop.f32.mrf.mxu3  ;;  %v3185_v12 = vpop.f32.mrf.mxu2 }
 0x565   :  { %v3160_v59 = vadd.f32 %v3159_v0, %v3133_v7 }
 0x567   :  { %v3186_v14 = vadd.f32 %v3185_v12, %v3160_v59  ;;  %v11162_v12 = vld [vmem:[#allocation26_spill] sm:$0xff] }
 0x569   :  { %v9303_v17 = vmax.f32 %v3030_v56, %v3186_v14 }
 0x56a   :  { %v3790_v54 = vld [vmem:[#allocation4 + $0x30] sm:$0xfe] }
 0x56b   :  { %3285 = vst [vmem:[#allocation4 + $0x40] sm:$0xff] %v9303_v17  ;;  %v3798_v13 = vrot.slane %v3790_v54, 1  ;;  %v3799_v34 = vrot.slane %v9303_v17, 1 }
 0x56c   :  { %v3136_v41 = vpop.f32.mrf.mxu3  ;;  %v3188_v31 = vpop.f32.mrf.mxu2 }
 0x56d   :  { %v3163_v21 = vadd.f32 %v3162_v35, %v3136_v41  ;;  %v3800_v63 = vsel %vm3371_vm14, %v3798_v13, %v3799_v34 }
 0x56e   :  { %3826 = vmatmul.f32.vlgmr.msrb.gmra.mxu2 %v3800_v63  ;;  %3872 = vmatmul.f32.vlgmr.msrb.gmra.mxu1 %v3800_v63 }
 0x56f   :  { %v3189_v36 = vadd.f32 %v3188_v31, %v3163_v21  ;;  %4028 = vmatpush.msrb.mxu2 %v11151_v62  ;;  %4074 = vmatpush.msrb.mxu1 %v11152_v29 }
 0x571   :  { %v3273_v5 = vmax.f32 %v3033_v9, %v3189_v36  ;;  %4029 = vmatpush.msrb.mxu2 %v11153_v53  ;;  %4075 = vmatpush.msrb.mxu1 %v9127_v18  ;;  %v3105_v18 = vadd.f32 %v9285_v38, %v3079_v3  ;;  %v3082_v38 = vadd.f32 %v3081_v28, %v9268_v52  ;;  %v11164_v52 = vld [vmem:[#allocation37_spill] sm:$0xff] }
 0x572   :  { %v3788_v62 = vld [vmem:[#allocation4 + $0x40] sm:$0x7f] }
 0x573   :  { %3287 = vst [vmem:[#allocation4 + $0x50] sm:$0x1] %v3273_v5  ;;  %4030 = vmatpush.msrb.mxu2 %v11154_v33  ;;  %4076 = vmatpush.msrb.mxu1 %v9137_v22 }
 0x574   :  { %v3234_v30 = vpop.f32.mrf.mxu3 }
 0x575   :  { %4031 = vmatpush.msrb.mxu2 %v11155_v11  ;;  %4077 = vmatpush.msrb.mxu1 %v9148_v26  ;;  %v3235_v0 = vadd.f32 %v3234_v30, %v3208_v15  ;;  %v3211_v26 = vpop.f32.mrf.mxu0  ;;  %v3401_v3 = vpop.f32.mrf.mxu2 }
 0x576   :  { %3829 = vmatmul.f32.gmra.mxu2 %v3799_v34  ;;  %3875 = vmatmul.f32.gmra.mxu1 %v3799_v34 }
 0x577   :  { %4032 = vmatpush.msrb.mxu2 %v11156_v25  ;;  %4078 = vmatpush.msrb.mxu1 %v9161_v19  ;;  %v3261_v44 = vadd.f32 %v3260_v40, %v3235_v0  ;;  %v3266_v19 = vpop.f32.mrf.mxu1 }
 0x579   :  { %4033 = vmatpush.msrb.mxu2 %v11157_v27  ;;  %4079 = vmatpush.msrb.mxu1 %v9171_v46  ;;  %v3270_v22 = vmax.f32 %v3105_v18, %v3261_v44  ;;  %v3108_v46 = vadd.f32 %v9291_v16, %v3082_v38 }
 0x57a   :  { %v4004_v13 = vld [vmem:[#allocation4 + $0x50] sm:$0x1] }
 0x57b   :  { %4034 = vmatpush.msrb.mxu2 %v11158_v8  ;;  %4080 = vmatpush.msrb.mxu1 %v9176_v37  ;;  %3284 = vst.msk [vmem:[#allocation4 + $0x38] sm:$0xff] %vm1859_vm11, %v3270_v22  ;;  %v11161_v37 = vld [vmem:[#allocation33_spill] sm:$0xff]  ;;  %v4018_v41 = vrot.slane %v4004_v13, 2 }
 0x57c   :  { %v4199_v13 = vld [vmem:[%s9393_s27 + $0xe8] sm:$0xff] }
 0x57d   :  { %4035 = vmatpush.msrb.mxu2 %v11159_v2  ;;  %4081 = vmatpush.msrb.mxu1 %v9183_v57  ;;  %v11163_v57 = vld [vmem:[#allocation35_spill] sm:$0xff] }
 0x57e   :  { %v3237_v24 = vpop.f32.mrf.mxu3  ;;  %v3404_v25 = vpop.f32.mrf.mxu2 }
 0x57f   :  { %v3238_v23 = vadd.f32 %v3237_v24, %v3211_v26  ;;  %4036 = vmatpush.msrb.mxu2 %v11160_v10  ;;  %4082 = vmatpush.msrb.mxu1 %v9193_v6  ;;  %v3214_v6 = vpop.f32.mrf.mxu0 }
 0x581   :  { %v3264_v35 = vadd.f32 %v3263_v1, %v3238_v23  ;;  %4037 = vmatpush.msrb.mxu2 %v11161_v37  ;;  %4083 = vmatpush.msrb.mxu1 %v9201_v48  ;;  %v9342_v48 = vpop.f32.mrf.mxu1 }
 0x582   :  { %v3787_v7 = vld [vmem:[#allocation4 + $0x38] sm:$0xff] }
 0x583   :  { %v3272_v50 = vmax.f32 %v3108_v46, %v3264_v35  ;;  %4038 = vmatpush.msrb.mxu2 %v11162_v12  ;;  %4084 = vmatpush.msrb.mxu1 %v9206_v51  ;;  %v3085_v51 = vadd.f32 %v9301_v39, %v9280_v61  ;;  %v3791_v59 = vld [vmem:[#allocation4 + $0x38] sm:$0xfe]  ;;  %v4013_v61 = vrot.slane %v9303_v17, 2  ;;  %v11166_v39 = vld [vmem:[#allocation31_spill] sm:$0xff] }
 0x584   :  { %6595 = vmatmul.msk.f32.vlgmr.msra.gmra.mxu2 %vm1859_vm11, %v3787_v7  ;;  %6597 = vmatmul.msk.f32.vlgmr.msra.gmra.mxu1 %vm1859_vm11, %v3787_v7  ;;  %v3801_v54 = vrot.slane %v3791_v59, 1  ;;  %v4001_v53 = vld [vmem:[#allocation4 + $0x38] sm:$0xfc] }
 0x585   :  { %3286 = vst.msk [vmem:[#allocation4 + $0x48] sm:$0xff] %vm1859_vm11, %v3272_v50  ;;  %4039 = vmatpush.msrb.mxu2 %v11163_v57  ;;  %4085 = vmatpush.msrb.mxu1 %v9213_v20  ;;  %v3111_v56 = vadd.f32 %v9296_v49, %v3085_v51  ;;  %v11165_v49 = vld [vmem:[#allocation53_spill] sm:$0xff]  ;;  %v4019_v17 = vsel %vm189_vm0, %v4013_v61, %v4018_v41  ;;  %v4015_v33 = vrot.slane %v4001_v53, 2  ;;  %v4185_v57 = vld [vmem:[%s9393_s27 + $0x78] sm:$0xff] }
 0x586   :  { %v4183_v51 = vld [vmem:[%s9393_s27 + $0x68] sm:$0xff] }
 0x587   :  { %4040 = vmatpush.msrb.mxu2 %v11164_v52  ;;  %4086 = vmatpush.msrb.mxu1 %v9222_v55  ;;  %v3424_v0 = vpop.f32.mrf.mxu0 }
 0x588   :  { %v3240_v16 = vpop.f32.mrf.mxu3  ;;  %v3499_v44 = vpop.f32.mrf.mxu2 }
 0x589   :  { %v3241_v28 = vadd.f32 %v3240_v16, %v3214_v6  ;;  %4041 = vmatpush.msrb.mxu2 %v9133_v43  ;;  %4087 = vmatpush.msrb.mxu1 %v9228_v42  ;;  %v4000_v43 = vld [vmem:[#allocation4 + $0x30] sm:$0xfc] }
 0x58a   :  { %v4184_v6 = vld [vmem:[%s9393_s27 + $0x70] sm:$0xff] }
 0x58b   :  { %v3267_v20 = vadd.f32 %v3266_v19, %v3241_v28  ;;  %4042 = vmatpush.msrb.mxu2 %v9143_v4  ;;  %4088 = vmatpush.msrb.mxu1 %v9235_v32  ;;  %v4012_v32 = vrot.slane %v4000_v43, 2 }
 0x58c   :  { %v3793_v55 = vld [vmem:[#allocation4 + $0x48] sm:$0xff] }
 0x58d   :  { %v3789_v14 = vld [vmem:[#allocation4 + $0x48] sm:$0x7f]  ;;  %v3274_v40 = vmax.f32 %v3111_v56, %v3267_v20  ;;  %v3802_v60 = vrot.slane %v3793_v55, 1  ;;  %4043 = vmatpush.msrb.mxu2 %v9154_v58  ;;  %4089 = vmatpush.msrb.mxu1 %v9242_v47  ;;  %v3473_v58 = vpop.f32.mrf.mxu1  ;;  %v4014_v47 = vsel %vm189_vm0, %v4012_v32, %v4013_v61  ;;  %v4016_v15 = vrot.slane %v3793_v55, 2  ;;  %v4182_v55 = vld [vmem:[%s9393_s27 + $0x60] sm:$0xff] }
 0x58e   :  { %6596 = vmatmul.msk.f32.gmra.mxu2 %vm1859_vm11, %v3789_v14  ;;  %6598 = vmatmul.msk.f32.gmra.mxu1 %vm1859_vm11, %v3789_v14  ;;  %v3289_v61 = vld [vmem:[%s6168_s1] sm:$0x3]  ;;  %s6183_s1 = sld [smem:[%s10713_s0 + %s6825_s28]]  }
 0x58f   :  { %3288 = vst.msk [vmem:[#allocation4 + $0x58] sm:$0x1] %vm3280_vm13, %v3274_v40  ;;  %v3803_v4 = vsel %vm3371_vm14, %v3801_v54, %v3802_v60  ;;  %v4017_v1 = vsel %vm189_vm0, %v4015_v33, %v4016_v15  ;;  %v3427_v18 = vpop.f32.mrf.mxu0  ;;  %4225 = vmatpush.msra.mxu2 %v4199_v13  ;;  %4268 = vmatpush.msra.mxu1 %v4199_v13  ;;  %v4197_v33 = vld [vmem:[%s9393_s27 + $0xd8] sm:$0xff]  ;;  %vm5986_vm13 = vcmask 785408  }
 0x590   :  { %v9357_v42 = vpop.f32.mrf.mxu3  ;;  %6591 = vmatmul.msk.f32.vlgmr.msra.gmra.mxu0 %vm1859_vm11, %v3803_v4  ;;  %6593 = vmatmul.msk.f32.vlgmr.msra.gmra.mxu3 %vm1859_vm11, %v3803_v4  ;;  %v3428_v59 = vadd.f32 %v3427_v18, %v3404_v25  ;;  %v4181_v4 = vld [vmem:[%s9393_s27 + $0x58] sm:$0xff]  ;;  %v9451_v18 = vperm.slane %v3289_v61, 1 }
 0x591   :  { %4112 = vmatpush.msra.mxu3 %v11165_v49  ;;  %4066 = vmatpush.msra.mxu0 %v11166_v39  ;;  %v3502_v22 = vpop.f32.mrf.mxu2  ;;  %v3471_v39 = vadd.f32 %v9342_v48, %v9357_v42 }
 0x592   :  { %v3503_v20 = vadd.f32 %v3502_v22, %v3428_v59 }
 0x595   :  { %v9367_v21 = vpop.f32.mrf.mxu1 }
 0x596   :  { %4044 = vmatmul.f32.vlgmr.msrb.gmra.mxu2 %v4014_v47  ;;  %4090 = vmatmul.f32.vlgmr.msrb.gmra.mxu1 %v4014_v47  ;;  %v4005_v30 = vld [vmem:[#allocation4 + $0x58] sm:$0x1]  ;;  %v4180_v47 = vld [vmem:[%s9393_s27 + $0x50] sm:$0xff]  ;;  %v3546_v42 = vadd.f32 %v9367_v21, %v3471_v39  ;;  %v4190_v39 = vld [vmem:[%s9393_s27 + $0xa0] sm:$0xff] }
 0x597   :  { %v9382_v27 = vpop.f32.mrf.mxu0 }
 0x598   :  { %6592 = vmatmul.msk.f32.gmra.mxu0 %vm1859_vm11, %v3802_v60  ;;  %6594 = vmatmul.msk.f32.gmra.mxu3 %vm1859_vm11, %v3802_v60  ;;  %v3425_v60 = vadd.f32 %v3424_v0, %v3401_v3  ;;  %v4196_v3 = vld [vmem:[%s9393_s27 + $0xd0] sm:$0xff] }
 0x599   :  { %v3450_v34 = vpop.f32.mrf.mxu3  ;;  %v3677_v26 = vpop.f32.mrf.mxu2 }
 0x59a   :  { %v3474_v31 = vadd.f32 %v3473_v58, %v3450_v34  ;;  %v3500_v32 = vadd.f32 %v3499_v44, %v3425_v60  ;;  %v4176_v44 = vld [vmem:[%s9393_s27 + $0x30] sm:$0xff] }
 0x59d   :  { %v3548_v9 = vpop.f32.mrf.mxu1 }
 0x59e   :  { %4047 = vmatmul.f32.gmra.mxu2 %v4019_v17  ;;  %4093 = vmatmul.f32.gmra.mxu1 %v4019_v17  ;;  %v3549_v36 = vadd.f32 %v3548_v9, %v3474_v31  ;;  %v9429_v17 = vperm.slane %v3289_v61, 0  ;;  %v4179_v9 = vld [vmem:[%s9393_s27 + $0x48] sm:$0xff] }
 0x59f   :  { %v3525_v8 = vpop.f32.mrf.mxu0  ;;  %v4171_v61 = vld [vmem:[%s9393_s27 + $0x8] sm:$0xff] }
 0x5a0   :  { %3924 = vmatmul.f32.vlgmr.msrb.gmra.mxu0 %v9298_v45  ;;  %3970 = vmatmul.f32.vlgmr.msrb.gmra.mxu3 %v9298_v45  ;;  %v4020_v45 = vrot.slane %v4005_v30, 2  ;;  %v3526_v43 = vadd.f32 %v3525_v8, %v3503_v20 }
 0x5a1   :  { %v9370_v63 = vpop.f32.mrf.mxu3  ;;  %v3680_v24 = vpop.f32.mrf.mxu2  ;;  %4203 = vmatpush.msrb.mxu0 %v4185_v57  ;;  %4246 = vmatpush.msrb.mxu3 %v4185_v57  ;;  %v4193_v57 = vld [vmem:[%s9393_s27 + $0xb8] sm:$0xff] }
 0x5a2   :  { %v4021_v11 = vsel %vm189_vm0, %v4016_v15, %v4020_v45  ;;  %v4178_v15 = vld [vmem:[%s9393_s27 + $0x40] sm:$0xff]  ;;  %v3569_v45 = vadd.f32 %v9370_v63, %v3546_v42  ;;  %vm3750_vm0 = vcmask 916480  }
 0x5a3   :  { %4204 = vmatpush.msrb.mxu0 %v4184_v6  ;;  %4247 = vmatpush.msrb.mxu3 %v4184_v6 }
 0x5a5   :  { %v9384_v2 = vpop.f32.mrf.mxu1  ;;  %4205 = vmatpush.msrb.mxu0 %v4183_v51  ;;  %4248 = vmatpush.msrb.mxu3 %v4183_v51 }
 0x5a7   :  { %v3654_v19 = vpop.f32.mrf.mxu0  ;;  %4206 = vmatpush.msrb.mxu0 %v4182_v55  ;;  %4249 = vmatpush.msrb.mxu3 %v4182_v55  ;;  %v4173_v55 = vld [vmem:[%s9393_s27 + $0x18] sm:$0xff] }
 0x5a8   :  { %3927 = vmatmul.f32.gmra.mxu0 %v3788_v62  ;;  %3973 = vmatmul.f32.gmra.mxu3 %v3788_v62  ;;  %v3678_v34 = vadd.f32 %v3677_v26, %v3654_v19  ;;  %v3523_v62 = vadd.f32 %v9382_v27, %v3500_v32  ;;  %v4195_v27 = vld [vmem:[%s9393_s27 + $0xc8] sm:$0xff]  ;;  %v4194_v19 = vld [vmem:[%s9393_s27 + $0xc0] sm:$0xff] }
 0x5a9   :  { %v3571_v29 = vpop.f32.mrf.mxu3  ;;  %4207 = vmatpush.msrb.mxu0 %v4181_v4  ;;  %4250 = vmatpush.msrb.mxu3 %v4181_v4  ;;  %v4172_v4 = vld [vmem:[%s9393_s27 + $0x10] sm:$0xff]  ;;  %v4191_v32 = vld [vmem:[%s9393_s27 + $0xa8] sm:$0xff] }
 0x5aa   :  { %v9374_v5 = vadd.f32 %v3571_v29, %v3549_v36  ;;  %v4198_v36 = vld [vmem:[%s9393_s27 + $0xe0] sm:$0xff] }
 0x5ab   :  { %4208 = vmatpush.msrb.mxu0 %v4180_v47  ;;  %4251 = vmatpush.msrb.mxu3 %v4180_v47 }
 0x5ac   :  { %4226 = vmatpush.msra.mxu2 %v4198_v36  ;;  %4269 = vmatpush.msra.mxu1 %v4198_v36  ;;  %v4189_v36 = vld [vmem:[%s9393_s27 + $0x98] sm:$0xff] }
 0x5ad   :  { %v3726_v23 = vpop.f32.mrf.mxu1  ;;  %4209 = vmatpush.msrb.mxu0 %v4179_v9  ;;  %4252 = vmatpush.msrb.mxu3 %v4179_v9  ;;  %v4170_v9 = vld [vmem:[%s9393_s27] sm:$0xff] }
 0x5ae   :  { %4227 = vmatpush.msra.mxu2 %v4197_v33  ;;  %4270 = vmatpush.msra.mxu1 %v4197_v33 }
 0x5af   :  { %v3657_v10 = vpop.f32.mrf.mxu0  ;;  %4210 = vmatpush.msrb.mxu0 %v4178_v15  ;;  %4253 = vmatpush.msrb.mxu3 %v4178_v15 }
 0x5b0   :  { %6599 = vmatmul.msk.f32.vlgmr.msra.gmra.mxu0 %vm1859_vm11, %v4017_v1  ;;  %6601 = vmatmul.msk.f32.vlgmr.msra.gmra.mxu3 %vm1859_vm11, %v4017_v1  ;;  %v3681_v54 = vadd.f32 %v3680_v24, %v3657_v10  ;;  %v3729_v1 = vadd.f32 %v3678_v34, %v3523_v62 }
 0x5b1   :  { %4228 = vmatpush.msra.mxu2 %v4196_v3  ;;  %4271 = vmatpush.msra.mxu1 %v4196_v3 }
 0x5b2   :  { %v3731_v58 = vadd.f32 %v3681_v54, %v3526_v43  ;;  %v9456_v63 = vadd.f32 %v9429_v17, %v3729_v1  ;;  %v4192_v54 = vld [vmem:[%s9393_s27 + $0xb0] sm:$0xff] }
 0x5b3   :  { %v3700_v38 = vpop.f32.mrf.mxu3  ;;  %4229 = vmatpush.msra.mxu2 %v4195_v27  ;;  %4272 = vmatpush.msra.mxu1 %v4195_v27 }
 0x5b4   :  { %v9438_v29 = vadd.f32 %v9429_v17, %v3731_v58  ;;  %v3724_v53 = vadd.f32 %v9384_v2, %v3700_v38  ;;  %v4175_v2 = vld [vmem:[%s9393_s27 + $0x28] sm:$0xff]  ;;  %v3763_v6 = vmul.f32 %v9456_v63, %v9456_v63 }
 0x5b5   :  { %4230 = vmatpush.msra.mxu2 %v4194_v19  ;;  %4273 = vmatpush.msra.mxu1 %v4194_v19 }
 0x5b6   :  { %v3765_v0 = vmul.f32 %v9438_v29, %v9438_v29  ;;  %v3730_v25 = vadd.f32 %v3724_v53, %v3569_v45  ;;  %v3742_v8 = vsel %vm3371_vm14, %v9438_v29, 0.0 }
 0x5b7   :  { %v3743_v51 = vadd.f32 %v3742_v8, %v9456_v63  ;;  %4231 = vmatpush.msra.mxu2 %v4193_v57  ;;  %4274 = vmatpush.msra.mxu1 %v4193_v57  ;;  %v4186_v8 = vld [vmem:[%s9393_s27 + $0x80] sm:$0xff] }
 0x5b8   :  { %6600 = vmatmul.msk.f32.gmra.mxu0 %vm1859_vm11, %v4021_v11  ;;  %6602 = vmatmul.msk.f32.gmra.mxu3 %vm1859_vm11, %v4021_v11  ;;  %v4177_v11 = vld [vmem:[%s9393_s27 + $0x38] sm:$0xff]  ;;  %v9471_v10 = vadd.f32 %v9451_v18, %v3730_v25  ;;  %vm5508_vm11 = vcmask 39936  }
 0x5b9   :  { %4211 = vmatpush.msrb.mxu0 %v4177_v11  ;;  %4254 = vmatpush.msrb.mxu3 %v4177_v11  ;;  %v3744_v58 = vrot.slane %v3743_v51, 4  ;;  %v4188_v11 = vld [vmem:[%s9393_s27 + $0x90] sm:$0xff] }
 0x5ba   :  { %4232 = vmatpush.msra.mxu2 %v4192_v54  ;;  %4275 = vmatpush.msra.mxu1 %v4192_v54  ;;  %v3751_v34 = vsel %vm3750_vm0, %v9471_v10, 0.0 }
 0x5bb   :  { %v3703_v35 = vpop.f32.mrf.mxu3  ;;  %4212 = vmatpush.msrb.mxu0 %v4176_v44  ;;  %4255 = vmatpush.msrb.mxu3 %v4176_v44  ;;  %v3745_v3 = vadd.f32 %v3744_v58, %v3743_v51  ;;  %v4187_v44 = vld [vmem:[%s9393_s27 + $0x88] sm:$0xff] }
 0x5bc   :  { %v3727_v31 = vadd.f32 %v3726_v23, %v3703_v35  ;;  %v3767_v23 = vsel %vm3371_vm14, %v3765_v0, 0.0  ;;  %v4174_v35 = vld [vmem:[%s9393_s27 + $0x20] sm:$0xff]  ;;  %4233 = vmatpush.msra.mxu2 %v4191_v32  ;;  %4276 = vmatpush.msra.mxu1 %v4191_v32  ;;  %s10463_s27 = sld [smem:[%s10713_s0 + %s6824_s24]]  }
 0x5bd   :  { %4213 = vmatpush.msrb.mxu0 %v4175_v2  ;;  %4256 = vmatpush.msrb.mxu3 %v4175_v2  ;;  %v3746_v2 = vrot.slane %v3745_v3, 2 }
 0x5be   :  { %v3732_v21 = vadd.f32 %v3727_v31, %v9374_v5  ;;  %4234 = vmatpush.msra.mxu2 %v4190_v39  ;;  %4277 = vmatpush.msra.mxu1 %v4190_v39 }
 0x5bf   :  { %4214 = vmatpush.msrb.mxu0 %v4174_v35  ;;  %4257 = vmatpush.msrb.mxu3 %v4174_v35  ;;  %v3747_v54 = vadd.f32 %v3746_v2, %v3745_v3 }
 0x5c0   :  { %v9463_v26 = vadd.f32 %v9451_v18, %v3732_v21  ;;  %4235 = vmatpush.msra.mxu2 %v4189_v36  ;;  %4278 = vmatpush.msra.mxu1 %v4189_v36 }
 0x5c1   :  { %4215 = vmatpush.msrb.mxu0 %v4173_v55  ;;  %4258 = vmatpush.msrb.mxu3 %v4173_v55 }
 0x5c2   :  { %4236 = vmatpush.msra.mxu2 %v4188_v11  ;;  %4279 = vmatpush.msra.mxu1 %v4188_v11 }
 0x5c3   :  { %4216 = vmatpush.msrb.mxu0 %v4172_v4  ;;  %4259 = vmatpush.msrb.mxu3 %v4172_v4 }
 0x5c4   :  { %4237 = vmatpush.msra.mxu2 %v4187_v44  ;;  %4280 = vmatpush.msra.mxu1 %v4187_v44 }
 0x5c5   :  { %4217 = vmatpush.msrb.mxu0 %v4171_v61  ;;  %4260 = vmatpush.msrb.mxu3 %v4171_v61 }
 0x5c6   :  { %4238 = vmatpush.msra.mxu2 %v4186_v8  ;;  %4281 = vmatpush.msra.mxu1 %v4186_v8 }
 0x5c7   :  { %4218 = vmatpush.msrb.mxu0 %v4170_v9  ;;  %4261 = vmatpush.msrb.mxu3 %v4170_v9 }
 0x5eb   :  { %v9388_v37 = vpop.f32.mrf.mxu1 }
 0x5f1   :  { %v9386_v46 = vpop.f32.mrf.mxu2 }
 0x5f3   :  { %v9403_v52 = vpop.f32.mrf.mxu1 }
 0x5f9   :  { %v9397_v7 = vpop.f32.mrf.mxu2 }
 0x601   :  { %v9416_v14 = vpop.f32.mrf.mxu1 }
 0x607   :  { %v9408_v28 = vpop.f32.mrf.mxu2 }
 0x60b   :  { %v9443_v30 = vpop.f32.mrf.mxu1 }
 0x60d   :  { %v9395_v50 = vpop.f32.mrf.mxu0 }
 0x60e   :  { %v3851_v24 = vadd.f32 %v9395_v50, %v9386_v46  ;;  %v3766_v50 = vmul.f32 %v9463_v26, %v9463_v26 }
 0x610   :  { %v3776_v31 = vsel %vm3752_vm15, %v3766_v50, 0.0 }
 0x611   :  { %v9421_v49 = vpop.f32.mrf.mxu2 }
 0x613   :  { %v9399_v12 = vpop.f32.mrf.mxu3  ;;  %v4091_v60 = vpop.f32.mrf.mxu1 }
 0x614   :  { %v3897_v59 = vadd.f32 %v9399_v12, %v9388_v37  ;;  %v3764_v37 = vmul.f32 %v9471_v10, %v9471_v10 }
 0x615   :  { %v9405_v16 = vpop.f32.mrf.mxu0 }
 0x616   :  { %v3854_v20 = vadd.f32 %v9405_v16, %v9397_v7  ;;  %v3753_v7 = vsel %vm3752_vm15, %v9463_v26, 0.0  ;;  %v3775_v33 = vsel %vm3750_vm0, %v3764_v37, 0.0 }
 0x617   :  { %v3777_v0 = vadd.f32 %v3776_v31, %v3775_v33  ;;  %v3748_v31 = vrot.slane %v3747_v54, 1 }
 0x619   :  { %v4045_v5 = vpop.f32.mrf.mxu2 }
 0x61b   :  { %v9413_v56 = vpop.f32.mrf.mxu3  ;;  %v4094_v19 = vpop.f32.mrf.mxu1 }
 0x61c   :  { %v3900_v42 = vadd.f32 %v9413_v56, %v9403_v52 }
 0x61d   :  { %v9418_v40 = vpop.f32.mrf.mxu0 }
 0x61e   :  { %v3926_v46 = vadd.f32 %v9418_v40, %v3851_v24  ;;  %v3768_v40 = vadd.f32 %v3767_v23, %v3763_v6 }
 0x620   :  { %v3949_v47 = vadd.f32 %v9408_v28, %v3926_v46  ;;  %v3769_v62 = vrot.slane %v3768_v40, 4 }
 0x621   :  { %v4048_v28 = vpop.f32.mrf.mxu2 }
 0x622   :  { %v3770_v27 = vadd.f32 %v3769_v62, %v3768_v40 }
 0x623   :  { %v9427_v41 = vpop.f32.mrf.mxu3 }
 0x624   :  { %v3972_v12 = vadd.f32 %v9427_v41, %v3897_v59  ;;  %v3771_v6 = vrot.slane %v3770_v27, 2 }
 0x625   :  { %v9434_v48 = vpop.f32.mrf.mxu0 }
 0x626   :  { %v3929_v16 = vadd.f32 %v9434_v48, %v3854_v20  ;;  %v3754_v48 = vadd.f32 %v3753_v7, %v3751_v34  ;;  %v3995_v1 = vadd.f32 %v9416_v14, %v3972_v12  ;;  %v3772_v37 = vadd.f32 %v3771_v6, %v3770_v27 }
 0x628   :  { %v3952_v45 = vadd.f32 %v9421_v49, %v3929_v16  ;;  %v3755_v49 = vrot.slane %v3754_v48, 4 }
 0x62b   :  { %v9458_v22 = vpop.f32.mrf.mxu3 }
 0x62c   :  { %v3975_v52 = vadd.f32 %v9458_v22, %v3900_v42  ;;  %v3778_v22 = vrot.slane %v3777_v0, 4  ;;  %v3773_v42 = vrot.slane %v3772_v37, 1 }
 0x62d   :  { %v4068_v38 = vpop.f32.mrf.mxu0 }
 0x62e   :  { %v4069_v43 = vadd.f32 %v4068_v38, %v4045_v5  ;;  %v3998_v24 = vadd.f32 %v9443_v30, %v3975_v52  ;;  %v3756_v30 = vadd.f32 %v3755_v49, %v3754_v48  ;;  %v3779_v40 = vadd.f32 %v3778_v22, %v3777_v0 }
 0x630   :  { %v4120_v53 = vadd.f32 %v4069_v43, %v3949_v47  ;;  %v3757_v7 = vrot.slane %v3756_v30, 2 }
 0x632   :  { %v9512_v14 = vadd.f32 %v4120_v53, %v9429_v17  ;;  %v3758_v48 = vadd.f32 %v3757_v7, %v3756_v30 }
 0x633   :  { %v4114_v13 = vpop.f32.mrf.mxu3 }
 0x634   :  { %v4115_v41 = vadd.f32 %v4114_v13, %v4091_v60  ;;  %v4147_v51 = vmul.f32 %v9512_v14, %v9512_v14  ;;  %v3780_v13 = vrot.slane %v3779_v40, 2  ;;  %v3759_v52 = vrot.slane %v3758_v48, 1 }
 0x635   :  { %v4071_v15 = vpop.f32.mrf.mxu0 }
 0x636   :  { %v4072_v21 = vadd.f32 %v4071_v15, %v4048_v28  ;;  %v4121_v56 = vadd.f32 %v4115_v41, %v3995_v1  ;;  %v3781_v1 = vadd.f32 %v3780_v13, %v3779_v40  ;;  %v4309_v40 = vld [vmem:[%s6172_s5 + $0x10] sm:$0xff] }
 0x637   :  { %4328 = vmatpush.msra.mxu0 %v4309_v40 }
 0x638   :  { %v4122_v25 = vadd.f32 %v4072_v21, %v3952_v45  ;;  %v9520_v23 = vadd.f32 %v4121_v56, %v9451_v18  ;;  %v3749_v45 = vadd.f32 %v3748_v31, %v3747_v54  ;;  %v3774_v56 = vadd.f32 %v3773_v42, %v3772_v37 }
 0x639   :  { %v3782_v8 = vrot.slane %v3781_v1, 1 }
 0x63a   :  { %v9515_v5 = vadd.f32 %v4122_v25, %v9429_v17  ;;  %v4148_v60 = vmul.f32 %v9520_v23, %v9520_v23  ;;  %v4136_v12 = vsel %vm3750_vm0, %v9520_v23, 0.0 }
 0x63b   :  { %v4117_v38 = vpop.f32.mrf.mxu3 }
 0x63c   :  { %v4128_v35 = vsel %vm3371_vm14, %v9515_v5, 0.0  ;;  %v4149_v57 = vmul.f32 %v9515_v5, %v9515_v5  ;;  %v4118_v17 = vadd.f32 %v4117_v38, %v4094_v19 }
 0x63d   :  { %v4129_v46 = vadd.f32 %v4128_v35, %v9512_v14 }
 0x63e   :  { %v4151_v50 = vsel %vm3371_vm14, %v4149_v57, 0.0  ;;  %v4123_v59 = vadd.f32 %v4118_v17, %v3998_v24  ;;  %v3760_v24 = vadd.f32 %v3759_v52, %v3758_v48  ;;  %v3783_v57 = vadd.f32 %v3782_v8, %v3781_v1  ;;  %v9598_v8 = vld [vmem:[%s6174_s21] sm:$0x7f]  ;;  %s6188_s21 = sld [smem:[%s10713_s0 + %s6830_s18]]  }
 0x63f   :  { %v4130_v20 = vrot.slane %v4129_v46, 4  ;;  %v4152_v55 = vadd.f32 %v4151_v50, %v4147_v51 }
 0x640   :  { %v9533_v43 = vadd.f32 %v4123_v59, %v9451_v18  ;;  %v4159_v18 = vsel %vm3750_vm0, %v4148_v60, 0.0  ;;  %v4310_v60 = vld [vmem:[%s6172_s5 + $0x18] sm:$0xff] }
 0x641   :  { %v4131_v4 = vadd.f32 %v4130_v20, %v4129_v46  ;;  %v4153_v32 = vrot.slane %v4152_v55, 4  ;;  %4348 = vmatpush.msrb.mxu2 %v4310_v60  ;;  %4391 = vmatpush.msra.mxu3 %v4310_v60  ;;  %v9679_v60 = vld [vmem:[%s9571_s25 + $0x50] sm:$0xff] }
 0x642   :  { %v4137_v16 = vsel %vm3752_vm15, %v9533_v43, 0.0  ;;  %v4150_v61 = vmul.f32 %v9533_v43, %v9533_v43 }
 0x643   :  { %v4132_v39 = vrot.slane %v4131_v4, 2  ;;  %v4154_v58 = vadd.f32 %v4153_v32, %v4152_v55  ;;  %v4138_v47 = vadd.f32 %v4137_v16, %v4136_v12  ;;  %v4308_v32 = vld [vmem:[%s6172_s5 + $0x8] sm:$0xff] }
 0x644   :  { %v4160_v34 = vsel %vm3752_vm15, %v4150_v61, 0.0  ;;  %4349 = vmatpush.msrb.mxu2 %v4308_v32  ;;  %4392 = vmatpush.msra.mxu3 %v4308_v32  ;;  %v9687_v32 = vld [vmem:[%s9582_s29 + $0x50] sm:$0xff] }
 0x645   :  { %v4133_v41 = vadd.f32 %v4132_v39, %v4131_v4  ;;  %v4155_v9 = vrot.slane %v4154_v58, 2  ;;  %v4139_v36 = vrot.slane %v4138_v47, 4  ;;  %v4161_v62 = vadd.f32 %v4160_v34, %v4159_v18  ;;  %v4307_v4 = vld [vmem:[%s6172_s5] sm:$0xff]  ;;  %s6184_s5 = sld [smem:[%s10713_s0 + %s6826_s2]]  }
 0x646   :  { %4329 = vmatpush.msra.mxu0 %v4307_v4  ;;  %v4291_v34 = vld [vmem:[%s6169_s9] sm:$0x1]  ;;  %s10504_s9 = sld [smem:[%s10713_s0 + %s6827_s6]]  }
 0x647   :  { %v4140_v28 = vadd.f32 %v4139_v36, %v4138_v47  ;;  %v4162_v53 = vrot.slane %v4161_v62, 4  ;;  %v4134_v15 = vrot.slane %v4133_v41, 1  ;;  %v4156_v33 = vadd.f32 %v4155_v9, %v4154_v58  ;;  %v4304_v36 = vld [vmem:[%s6170_s13] sm:$0x1]  ;;  %s10651_s13 = sld [smem:[%s10713_s0 + %s6828_s10]]  }
 0x649   :  { %v4141_v21 = vrot.slane %v4140_v28, 2  ;;  %v4163_v11 = vadd.f32 %v4162_v53, %v4161_v62  ;;  %v4135_v3 = vadd.f32 %v4134_v15, %v4133_v41  ;;  %v4157_v0 = vrot.slane %v4156_v33, 1 }
 0x64b   :  { %v4142_v25 = vadd.f32 %v4141_v21, %v4140_v28  ;;  %v4164_v44 = vrot.slane %v4163_v11, 2  ;;  %v4145_v27 = vadd.f32 %v4135_v3, %v3749_v45  ;;  %v4158_v49 = vadd.f32 %v4157_v0, %v4156_v33 }
 0x64d   :  { %v4143_v2 = vrot.slane %v4142_v25, 1  ;;  %v4165_v22 = vadd.f32 %v4164_v44, %v4163_v11  ;;  %4219 = vmatmul.f32.vlgmr.msrb.gmra.mxu0 %v4145_v27  ;;  %v4168_v19 = vadd.f32 %v4158_v49, %v3774_v56  ;;  %v9596_v49 = vld [vmem:[%s6173_s17] sm:$0x7f]  ;;  %s10669_s17 = sld [smem:[%s10713_s0 + %s6829_s14]]  }
 0x64e   :  { %4371 = vmatpush.msrb.mxu0 %v4309_v40  ;;  %v9674_v40 = vld [vmem:[%s9582_s29 + $0xd0] sm:$0xff] }
 0x64f   :  { %v4144_v38 = vadd.f32 %v4143_v2, %v4142_v25  ;;  %v4166_v35 = vrot.slane %v4165_v22, 1  ;;  %4262 = vmatmul.f32.vlgmr.msrb.gmra.mxu3 %v4168_v19  ;;  %v9605_v2 = vld [vmem:[%s9582_s29 + $0x78] sm:$0xff]  ;;  %v9615_v19 = vld [vmem:[%s9571_s25 + $0x70] sm:$0xff] }
 0x650   :  { %4372 = vmatpush.msrb.mxu0 %v4307_v4  ;;  %v9682_v4 = vld [vmem:[%s9571_s25 + $0xc8] sm:$0xff] }
 0x651   :  { %v4167_v17 = vadd.f32 %v4166_v35, %v4165_v22  ;;  %v4146_v6 = vadd.f32 %v4144_v38, %v3760_v24  ;;  %v9618_v24 = vld [vmem:[%s9571_s25 + $0xe8] sm:$0xff]  ;;  %v9621_v38 = vld [vmem:[%s9582_s29 + $0x70] sm:$0xff] }
 0x652   :  { %v9624_v35 = vld [vmem:[%s9582_s29 + $0xe8] sm:$0xff] }
 0x653   :  { %6603 = vmatmul.msk.f32.vlgmr.msra.gmra.mxu2 %vm3750_vm0, %v4146_v6  ;;  %v4169_v51 = vadd.f32 %v4167_v17, %v3783_v57  ;;  %v9631_v57 = vld [vmem:[%s9571_s25 + $0x68] sm:$0xff]  ;;  %v9634_v17 = vld [vmem:[%s9571_s25 + $0xe0] sm:$0xff] }
 0x654   :  { %v9639_v6 = vld [vmem:[%s9582_s29 + $0x68] sm:$0xff] }
 0x655   :  { %6604 = vmatmul.msk.f32.vlgmr.msra.gmra.mxu1 %vm3750_vm0, %v4169_v51  ;;  %v9642_v51 = vld [vmem:[%s9582_s29 + $0xe0] sm:$0xff] }
 0x6ca   :  { %v4220_v50 = vpop.f32.mrf.mxu0 }
 0x6d2   :  { %v4263_v46 = vpop.f32.mrf.mxu3  ;;  %v4283_v30 = vpop.f32.mrf.mxu1 }
 0x6d3   :  { %v4284_v20 = vadd.f32 %v4283_v30, %v4263_v46  ;;  %v9647_v46 = vld [vmem:[%s9571_s25 + $0x60] sm:$0xff]  ;;  %v9650_v30 = vld [vmem:[%s9571_s25 + $0xd8] sm:$0xff] }
 0x6d5   :  { %v4287_v37 = vmul.f32 0.0022222223, %v4284_v20  ;;  %v9663_v20 = vld [vmem:[%s9571_s25 + $0x58] sm:$0xff] }
 0x6d6   :  { %v4240_v59 = vpop.f32.mrf.mxu2 }
 0x6d7   :  { %v4241_v55 = vadd.f32 %v4240_v59, %v4220_v50  ;;  %v9655_v50 = vld [vmem:[%s9582_s29 + $0x60] sm:$0xff]  ;;  %v9658_v59 = vld [vmem:[%s9582_s29 + $0xd8] sm:$0xff] }
 0x6d9   :  { %v4286_v54 = vmul.f32 0.0022222223, %v4241_v55  ;;  %v9666_v55 = vld [vmem:[%s9571_s25 + $0xd0] sm:$0xff] }
 0x6db   :  { %v4288_v7 = vmul.f32 %v4286_v54, %v4286_v54 }
 0x6dd   :  { %v4289_v12 = vsub.f32 %v4287_v37, %v4288_v7  ;;  %v9690_v37 = vld [vmem:[%s9582_s29 + $0xc8] sm:$0xff] }
 0x6de   :  { %v9695_v7 = vld [vmem:[%s9571_s25 + $0x48] sm:$0xff] }
 0x6df   :  { %v4290_v16 = vmax.f32 %v4289_v12, 0.0  ;;  %v9698_v12 = vld [vmem:[%s9571_s25 + $0xc0] sm:$0xff] }
 0x6e1   :  { %v4292_v61 = vadd.f32 1e-05, %v4290_v16  ;;  %v9703_v16 = vld [vmem:[%s9582_s29 + $0x48] sm:$0xff] }
 0x6e3   :  { %6785 = vrsqrt.f32 %v4292_v61  ;;  %vm4299_vm2 = vweird.f32 %v4292_v61 }
 0x6e9   :  { %v6786_v39 = vpop.eup %6785 }
 0x6ea   :  { %v4294_v58 = vmul.f32 %v6786_v39, %v4292_v61  ;;  %vm4300_vm1 = vweird.f32 %v6786_v39  ;;  %v9706_v61 = vld [vmem:[%s9582_s29 + $0xc0] sm:$0xff] }
 0x6eb   :  { %vm4301_vm3 = vmor %vm4299_vm2, %vm4300_vm1  ;;  %vm6029_vm1 = vcmask 0  }
 0x6ec   :  { %v4295_v47 = vmul.f32 %v6786_v39, %v4294_v58  ;;  %v9714_v58 = vld [vmem:[%s9571_s25 + $0xb8] sm:$0xff] }
 0x6ee   :  { %v4296_v13 = vmul.f32 0.5, %v4295_v47  ;;  %v9719_v47 = vld [vmem:[%s9582_s29 + $0x40] sm:$0xff] }
 0x6f0   :  { %v4297_v18 = vsub.f32 1.5, %v4296_v13  ;;  %v9722_v13 = vld [vmem:[%s9582_s29 + $0xb8] sm:$0xff] }
 0x6f2   :  { %v4298_v31 = vmul.f32 %v6786_v39, %v4297_v18  ;;  %v9727_v18 = vld [vmem:[%s9571_s25 + $0x38] sm:$0xff] }
 0x6f4   :  { %v4302_v41 = vsel %vm4301_vm3, %v6786_v39, %v4298_v31  ;;  %v9711_v39 = vld [vmem:[%s9571_s25 + $0x40] sm:$0xff]  ;;  %v9735_v31 = vld [vmem:[%s9582_s29 + $0x38] sm:$0xff] }
 0x6f5   :  { %v4303_v9 = vmul.f32 %v4302_v41, %v4291_v34  ;;  %v9730_v34 = vld [vmem:[%s9571_s25 + $0xb0] sm:$0xff] }
 0x6f6   :  { %v9738_v41 = vld [vmem:[%s9582_s29 + $0xb0] sm:$0xff] }
 0x6f7   :  { %v4305_v62 = vmul.f32 %v4303_v9, %v4286_v54  ;;  %6605 = vmatmul.msk.f32.vlgmr.msra.gmra.mxu0 %vm1024_vm6, %v4303_v9  ;;  %6606 = vmatmul.msk.f32.vlgmr.msrb.gmra.mxu2 %vm1024_vm6, %v4303_v9  ;;  %v9671_v54 = vld [vmem:[%s9582_s29 + $0x58] sm:$0xff]  ;;  %v9743_v9 = vld [vmem:[%s9571_s25 + $0x30] sm:$0xff] }
 0x6f9   :  { %v4306_v48 = vsub.f32 %v4304_v36, %v4305_v62  ;;  %v9746_v36 = vld [vmem:[%s9571_s25 + $0xa8] sm:$0xff]  ;;  %v9751_v62 = vld [vmem:[%s9582_s29 + $0x30] sm:$0xff] }
 0x6fb   :  { %6608 = vmatmul.msk.f32.vlgmr.msra.gmra.mxu3 %vm1024_vm6, %v4306_v48 }
 0x6ff   :  { %6607 = vmatmul.msk.f32.vlgmr.msrb.gmra.mxu0 %vm1024_vm6, %v4306_v48  ;;  %v9754_v48 = vld [vmem:[%s9582_s29 + $0xa8] sm:$0xff]  ;;  %vm5069_vm6 = vcmask 1044480  }
 0x774   :  { %v4331_v42 = vpop.f32.mrf.mxu0 }
 0x775   :  { %v9558_v28 = vperm.slane %v4331_v42, 0  ;;  %v9759_v42 = vld [vmem:[%s9571_s25 + $0x28] sm:$0xff] }
 0x777   :  { %v4401_v1 = vmul.f32 %v9558_v28, %v9438_v29  ;;  %v4399_v21 = vmul.f32 %v9558_v28, %v9456_v63 }
 0x77a   :  { %v4351_v53 = vpop.f32.mrf.mxu2 }
 0x77b   :  { %v9563_v15 = vperm.slane %v4351_v53, 0  ;;  %v9762_v53 = vld [vmem:[%s9571_s25 + $0xa0] sm:$0xff] }
 0x77c   :  { %v4374_v33 = vpop.f32.mrf.mxu0 }
 0x77d   :  { %v9575_v45 = vperm.slane %v4374_v33, 0  ;;  %v4402_v3 = vmul.f32 %v9563_v15, %v9463_v26  ;;  %v4400_v25 = vmul.f32 %v9563_v15, %v9471_v10  ;;  %v9602_v10 = vld [vmem:[%s9571_s25 + $0x78] sm:$0xff]  ;;  %v9767_v33 = vld [vmem:[%s9582_s29 + $0x28] sm:$0xff] }
 0x77e   :  { %v4394_v11 = vpop.f32.mrf.mxu3 }
 0x77f   :  { %v4407_v0 = vadd.f32 %v9575_v45, %v4401_v1  ;;  %v9587_v52 = vperm.slane %v4394_v11, 0  ;;  %v4405_v29 = vadd.f32 %v9575_v45, %v4399_v21  ;;  %v9770_v1 = vld [vmem:[%s9582_s29 + $0xa0] sm:$0xff]  ;;  %v9778_v11 = vld [vmem:[%s9571_s25 + $0x98] sm:$0xff] }
 0x780   :  { %v9775_v21 = vld [vmem:[%s9571_s25 + $0x20] sm:$0xff]  ;;  %11168 = vst [vmem:[#allocation58_spill] sm:$0xff] %v9778_v11 }
 0x781   :  { %v4411_v56 = vmax.f32 %v4407_v0, 0.0  ;;  %v4408_v63 = vadd.f32 %v9587_v52, %v4402_v3  ;;  %v4409_v26 = vmax.f32 %v4405_v29, 0.0  ;;  %v4406_v27 = vadd.f32 %v9587_v52, %v4400_v25  ;;  %11167 = vst [vmem:[#allocation28_spill] sm:$0xff] %v9775_v21  ;;  %v9783_v3 = vld [vmem:[%s9582_s29 + $0x20] sm:$0xff]  ;;  %v9786_v0 = vld [vmem:[%s9582_s29 + $0x98] sm:$0xff] }
 0x782   :  { %11169 = vst [vmem:[#allocation85_spill] sm:$0xff] %v9783_v3  ;;  %v9791_v29 = vld [vmem:[%s9571_s25 + $0x18] sm:$0xff] }
 0x783   :  { %v4412_v44 = vmax.f32 %v4408_v63, 0.0  ;;  %6609 = vmatpush.msk.msra.mxu2 %vm3371_vm14, %v4411_v56  ;;  %6613 = vmatpush.msk.msrb.mxu3 %vm3371_vm14, %v4411_v56  ;;  %v4410_v22 = vmax.f32 %v4406_v27, 0.0  ;;  %11170 = vst [vmem:[#allocation48_spill] sm:$0xff] %v9786_v0  ;;  %v9794_v56 = vld [vmem:[%s9571_s25 + $0x90] sm:$0xff]  ;;  %v4656_v63 = vmul.f32 %v9558_v28, %v9515_v5  ;;  %v9801_v25 = vld [vmem:[%s9582_s29 + $0x18] sm:$0xff]  ;;  %v9812_v27 = vld [vmem:[%s9571_s25 + $0x88] sm:$0xff]  ;;  %v4657_v5 = vmul.f32 %v9563_v15, %v9533_v43 }
 0x784   :  { %11171 = vst [vmem:[#allocation60_spill] sm:$0xff] %v9791_v29  ;;  %v9830_v43 = vld [vmem:[%s9571_s25 + $0x8] sm:$0xff] }
 0x785   :  { %4439 = vmatpush.msra.mxu2 %v4409_v26  ;;  %6611 = vmatpush.msk.msra.mxu0 %vm3371_vm14, %v4412_v44  ;;  %11172 = vst [vmem:[#allocation92_spill] sm:$0xff] %v9794_v56 }
 0x786   :  { %4483 = vmatpush.msrb.mxu3 %v4409_v26  ;;  %6615 = vmatpush.msk.msrb.mxu1 %vm3371_vm14, %v4412_v44  ;;  %v9804_v44 = vld [vmem:[%s9582_s29 + $0x90] sm:$0xff]  ;;  %11175 = vst [vmem:[#allocation54_spill] sm:$0xff] %v9812_v27 }
 0x787   :  { %6610 = vmatmul.msk.f32.vlgmr.msra.gmra.mxu2 %vm4414_vm4, %v9596_v49  ;;  %6614 = vmatmul.msk.f32.vlgmr.msrb.gmra.mxu3 %vm4414_vm4, %v9598_v8  ;;  %11173 = vst [vmem:[#allocation51_spill] sm:$0xff] %v9804_v44  ;;  %v9809_v26 = vld [vmem:[%s9571_s25 + $0x10] sm:$0xff] }
 0x788   :  { %4543 = vmatpush.msrb.mxu2 %v9602_v10  ;;  %4613 = vmatpush.msra.mxu3 %v9605_v2  ;;  %11174 = vst [vmem:[#allocation62_spill] sm:$0xff] %v9809_v26 }
 0x789   :  { %4459 = vmatpush.msra.mxu0 %v4410_v22  ;;  %4503 = vmatpush.msrb.mxu1 %v4410_v22  ;;  %v4660_v22 = vadd.f32 %v4656_v63, %v9575_v45  ;;  %v9833_v63 = vld [vmem:[%s9571_s25 + $0x80] sm:$0xff] }
 0x78a   :  { %6612 = vmatmul.msk.f32.vlgmr.msra.gmra.mxu0 %vm4414_vm4, %v9596_v49  ;;  %6616 = vmatmul.msk.f32.vlgmr.msrb.gmra.mxu1 %vm4414_vm4, %v9598_v8 }
 0x78b   :  { %4544 = vmatpush.msrb.mxu2 %v9615_v19  ;;  %4565 = vmatpush.msrb.mxu0 %v9618_v24 }
 0x78c   :  { %4614 = vmatpush.msra.mxu3 %v9621_v38  ;;  %4635 = vmatpush.msra.mxu1 %v9624_v35 }
 0x78d   :  { %4545 = vmatpush.msrb.mxu2 %v9631_v57  ;;  %4566 = vmatpush.msrb.mxu0 %v9634_v17 }
 0x78e   :  { %4615 = vmatpush.msra.mxu3 %v9639_v6  ;;  %4636 = vmatpush.msra.mxu1 %v9642_v51 }
 0x78f   :  { %4546 = vmatpush.msrb.mxu2 %v9647_v46  ;;  %4567 = vmatpush.msrb.mxu0 %v9650_v30 }
 0x790   :  { %4616 = vmatpush.msra.mxu3 %v9655_v50  ;;  %4637 = vmatpush.msra.mxu1 %v9658_v59 }
 0x791   :  { %4547 = vmatpush.msrb.mxu2 %v9663_v20  ;;  %4568 = vmatpush.msrb.mxu0 %v9666_v55 }
 0x792   :  { %4617 = vmatpush.msra.mxu3 %v9671_v54  ;;  %4638 = vmatpush.msra.mxu1 %v9674_v40 }
 0x793   :  { %4548 = vmatpush.msrb.mxu2 %v9679_v60  ;;  %4569 = vmatpush.msrb.mxu0 %v9682_v4 }
 0x794   :  { %4618 = vmatpush.msra.mxu3 %v9687_v32  ;;  %4639 = vmatpush.msra.mxu1 %v9690_v37 }
 0x795   :  { %4549 = vmatpush.msrb.mxu2 %v9695_v7  ;;  %4570 = vmatpush.msrb.mxu0 %v9698_v12 }
 0x796   :  { %4619 = vmatpush.msra.mxu3 %v9703_v16  ;;  %4640 = vmatpush.msra.mxu1 %v9706_v61 }
 0x797   :  { %4550 = vmatpush.msrb.mxu2 %v9711_v39  ;;  %4571 = vmatpush.msrb.mxu0 %v9714_v58 }
 0x798   :  { %4620 = vmatpush.msra.mxu3 %v9719_v47  ;;  %4641 = vmatpush.msra.mxu1 %v9722_v13 }
 0x799   :  { %4551 = vmatpush.msrb.mxu2 %v9727_v18  ;;  %4572 = vmatpush.msrb.mxu0 %v9730_v34 }
 0x79a   :  { %4621 = vmatpush.msra.mxu3 %v9735_v31  ;;  %4642 = vmatpush.msra.mxu1 %v9738_v41 }
 0x79b   :  { %4552 = vmatpush.msrb.mxu2 %v9743_v9  ;;  %4573 = vmatpush.msrb.mxu0 %v9746_v36 }
 0x79c   :  { %4622 = vmatpush.msra.mxu3 %v9751_v62  ;;  %4643 = vmatpush.msra.mxu1 %v9754_v48 }
 0x79d   :  { %4553 = vmatpush.msrb.mxu2 %v9759_v42  ;;  %4574 = vmatpush.msrb.mxu0 %v9762_v53 }
 0x79e   :  { %4623 = vmatpush.msra.mxu3 %v9767_v33  ;;  %4644 = vmatpush.msra.mxu1 %v9770_v1 }
 0x79f   :  { %4554 = vmatpush.msrb.mxu2 %v9775_v21  ;;  %4575 = vmatpush.msrb.mxu0 %v9778_v11  ;;  %v9820_v11 = vld [vmem:[%s9582_s29 + $0x10] sm:$0xff]  ;;  %v9842_v21 = vld [vmem:[%s9582_s29 + $0x80] sm:$0xff] }
 0x7a0   :  { %4624 = vmatpush.msra.mxu3 %v9783_v3  ;;  %4645 = vmatpush.msra.mxu1 %v9786_v0  ;;  %v9823_v3 = vld [vmem:[%s9582_s29 + $0x88] sm:$0xff]  ;;  %v4654_v0 = vmul.f32 %v9558_v28, %v9512_v14  ;;  %v4655_v28 = vmul.f32 %v9563_v15, %v9520_v23 }
 0x7a1   :  { %4555 = vmatpush.msrb.mxu2 %v9791_v29  ;;  %4576 = vmatpush.msrb.mxu0 %v9794_v56  ;;  %v4661_v29 = vadd.f32 %v4657_v5, %v9587_v52  ;;  %v9839_v56 = vld [vmem:[%s9582_s29 + $0x8] sm:$0xff]  ;;  %v9852_v5 = vld [vmem:[%s9571_s25] sm:$0xff]  ;;  %s6190_s25 = sld [smem:[%s10713_s0 + %s6831_s22]]  }
 0x7a2   :  { %4625 = vmatpush.msra.mxu3 %v9801_v25  ;;  %4646 = vmatpush.msra.mxu1 %v9804_v44  ;;  %v4658_v14 = vadd.f32 %v4654_v0, %v9575_v45  ;;  %v4664_v44 = vmax.f32 %v4660_v22, 0.0 }
 0x7a3   :  { %4556 = vmatpush.msrb.mxu2 %v9809_v26  ;;  %4577 = vmatpush.msrb.mxu0 %v9812_v27  ;;  %v9855_v27 = vld [vmem:[%s9582_s29] sm:$0xff]  ;;  %v4659_v26 = vadd.f32 %v4655_v28, %v9587_v52  ;;  %v4665_v23 = vmax.f32 %v4661_v29, 0.0  ;;  %v10114_v28 = vld [vmem:[%s9918_s3 + $0x38] sm:$0xff]  ;;  %s10707_s29 = sld [smem:[%s10713_s0 + %s6832_s26]]  }
 0x7a4   :  { %4626 = vmatpush.msra.mxu3 %v9820_v11  ;;  %4647 = vmatpush.msra.mxu1 %v9823_v3  ;;  %v4662_v15 = vmax.f32 %v4658_v14, 0.0 }
 0x7a5   :  { %4557 = vmatpush.msrb.mxu2 %v9830_v43  ;;  %4578 = vmatpush.msrb.mxu0 %v9833_v63  ;;  %v4663_v45 = vmax.f32 %v4659_v26, 0.0  ;;  %v10099_v26 = vld [vmem:[%s9918_s3 + $0x70] sm:$0xff] }
 0x7a6   :  { %4627 = vmatpush.msra.mxu3 %v9839_v56  ;;  %4648 = vmatpush.msra.mxu1 %v9842_v21 }
 0x7a7   :  { %6619 = vmatpush.msk.msra.mxu0 %vm3371_vm14, %v4664_v44  ;;  %4558 = vmatpush.msrb.mxu2 %v9852_v5 }
 0x7a8   :  { %6623 = vmatpush.msk.msrb.mxu1 %vm3371_vm14, %v4664_v44  ;;  %4628 = vmatpush.msra.mxu3 %v9855_v27 }
 0x7a9   :  { %4687 = vmatpush.msra.mxu0 %v4662_v15  ;;  %6621 = vmatpush.msk.msra.mxu2 %vm3371_vm14, %v4665_v23 }
 0x7aa   :  { %4727 = vmatpush.msrb.mxu1 %v4662_v15  ;;  %6625 = vmatpush.msk.msrb.mxu3 %vm3371_vm14, %v4665_v23  ;;  %v10123_v23 = vld [vmem:[%s9918_s3 + $0x50] sm:$0xff]  ;;  %v10126_v15 = vld [vmem:[%s9918_s3 + $0x28] sm:$0xff] }
 0x7ab   :  { %4707 = vmatpush.msra.mxu2 %v4663_v45 }
 0x7ac   :  { %4747 = vmatpush.msrb.mxu3 %v4663_v45  ;;  %v10131_v45 = vld [vmem:[%s9918_s3 + $0xe0] sm:$0xff] }
 0x807   :  { %v4461_v52 = vpop.f32.mrf.mxu0  ;;  %v4505_v0 = vpop.f32.mrf.mxu1 }
 0x808   :  { %v4509_v29 = vmax.f32 %v4461_v52, %v4505_v0  ;;  %v10135_v52 = vld [vmem:[%s9918_s3 + $0x40] sm:$0xff]  ;;  %v10138_v0 = vld [vmem:[%s9918_s3 + $0x18] sm:$0xff] }
 0x80a   :  { %6617 = vmatmul.msk.f32.vlgmr.msrb.gmra.mxu0 %vm3750_vm0, %v4509_v29  ;;  %6618 = vmatmul.msk.f32.vlgmr.msra.gmra.mxu1 %vm3750_vm0, %v4509_v29  ;;  %v4441_v44 = vpop.f32.mrf.mxu2  ;;  %v4485_v22 = vpop.f32.mrf.mxu3  ;;  %v10144_v29 = vld [vmem:[%s9918_s3 + $0x30] sm:$0xff] }
 0x80b   :  { %v4508_v14 = vmax.f32 %v4441_v44, %v4485_v22  ;;  %4757 = vmatpush.msrb.mxu0 %v9602_v10  ;;  %4797 = vmatpush.msra.mxu1 %v9605_v2  ;;  %v11178_v10 = vld [vmem:[#allocation85_spill] sm:$0xff]  ;;  %v11179_v2 = vld [vmem:[#allocation48_spill] sm:$0xff]  ;;  %11185 = vst [vmem:[#allocation64_spill] sm:$0xff] %v10144_v29 }
 0x80c   :  { %v10147_v44 = vld [vmem:[%s9918_s3 + $0x8] sm:$0xff]  ;;  %v10152_v22 = vld [vmem:[%s9918_s3 + $0x20] sm:$0xff] }
 0x80d   :  { %4559 = vmatmul.f32.vlgmr.msrb.gmra.mxu2 %v4508_v14  ;;  %4629 = vmatmul.f32.vlgmr.msra.gmra.mxu3 %v4508_v14  ;;  %11186 = vst [vmem:[#allocation57_spill] sm:$0xff] %v10147_v44  ;;  %v10157_v14 = vld [vmem:[%s9918_s3 + $0x10] sm:$0xff] }
 0x80e   :  { %4758 = vmatpush.msrb.mxu0 %v9615_v19  ;;  %4779 = vmatpush.msrb.mxu2 %v9618_v24  ;;  %v11180_v19 = vld [vmem:[#allocation60_spill] sm:$0xff]  ;;  %11187 = vst [vmem:[#allocation66_spill] sm:$0xff] %v10152_v22 }
 0x80f   :  { %4798 = vmatpush.msra.mxu1 %v9621_v38  ;;  %4819 = vmatpush.msra.mxu3 %v9624_v35  ;;  %v11181_v24 = vld [vmem:[#allocation92_spill] sm:$0xff]  ;;  %v11182_v38 = vld [vmem:[#allocation51_spill] sm:$0xff]  ;;  %v11183_v35 = vld [vmem:[#allocation62_spill] sm:$0xff]  ;;  %11188 = vst [vmem:[#allocation30_spill] sm:$0xff] %v10157_v14 }
 0x810   :  { %4759 = vmatpush.msrb.mxu0 %v9631_v57  ;;  %4780 = vmatpush.msrb.mxu2 %v9634_v17  ;;  %v11184_v57 = vld [vmem:[#allocation54_spill] sm:$0xff] }
 0x811   :  { %4799 = vmatpush.msra.mxu1 %v9639_v6  ;;  %4820 = vmatpush.msra.mxu3 %v9642_v51  ;;  %v9934_v17 = vld [vmem:[%s9918_s3 + $0x1b0] sm:$0xff]  ;;  %v9940_v6 = vld [vmem:[%s9918_s3 + $0x1b8] sm:$0xff]  ;;  %v9946_v51 = vld [vmem:[%s9918_s3 + $0x1a0] sm:$0xff] }
 0x812   :  { %6620 = vmatmul.msk.f32.vlgmr.msra.gmra.mxu0 %vm4414_vm4, %v9596_v49  ;;  %6624 = vmatmul.msk.f32.vlgmr.msrb.gmra.mxu1 %vm4414_vm4, %v9598_v8 }
 0x813   :  { %4760 = vmatpush.msrb.mxu0 %v9647_v46  ;;  %4781 = vmatpush.msrb.mxu2 %v9650_v30  ;;  %v9949_v46 = vld [vmem:[%s9918_s3 + $0xd8] sm:$0xff]  ;;  %v9953_v30 = vld [vmem:[%s9918_s3 + $0x1a8] sm:$0xff] }
 0x814   :  { %4800 = vmatpush.msra.mxu1 %v9655_v50  ;;  %4821 = vmatpush.msra.mxu3 %v9658_v59  ;;  %v9959_v50 = vld [vmem:[%s9918_s3 + $0x190] sm:$0xff]  ;;  %v9962_v59 = vld [vmem:[%s9918_s3 + $0xc8] sm:$0xff] }
 0x815   :  { %6622 = vmatmul.msk.f32.vlgmr.msra.gmra.mxu2 %vm4414_vm4, %v9596_v49  ;;  %6626 = vmatmul.msk.f32.vlgmr.msrb.gmra.mxu3 %vm4414_vm4, %v9598_v8  ;;  %v11176_v49 = vld [vmem:[#allocation28_spill] sm:$0xff]  ;;  %v11177_v8 = vld [vmem:[#allocation58_spill] sm:$0xff] }
 0x816   :  { %4761 = vmatpush.msrb.mxu0 %v9663_v20  ;;  %4782 = vmatpush.msrb.mxu2 %v9666_v55  ;;  %v9965_v20 = vld [vmem:[%s9918_s3 + $0x198] sm:$0xff]  ;;  %v9971_v55 = vld [vmem:[%s9918_s3 + $0x188] sm:$0xff] }
 0x817   :  { %4801 = vmatpush.msra.mxu1 %v9671_v54  ;;  %4822 = vmatpush.msra.mxu3 %v9674_v40  ;;  %v9977_v54 = vld [vmem:[%s9918_s3 + $0x178] sm:$0xff]  ;;  %v9981_v40 = vld [vmem:[%s9918_s3 + $0x168] sm:$0xff] }
 0x818   :  { %4762 = vmatpush.msrb.mxu0 %v9679_v60  ;;  %4783 = vmatpush.msrb.mxu2 %v9682_v4  ;;  %v9985_v60 = vld [vmem:[%s9918_s3 + $0x158] sm:$0xff]  ;;  %v9989_v4 = vld [vmem:[%s9918_s3 + $0x148] sm:$0xff] }
 0x819   :  { %4802 = vmatpush.msra.mxu1 %v9687_v32  ;;  %4823 = vmatpush.msra.mxu3 %v9690_v37  ;;  %v9994_v32 = vld [vmem:[%s9918_s3 + $0x180] sm:$0xff]  ;;  %v9997_v37 = vld [vmem:[%s9918_s3 + $0x138] sm:$0xff] }
 0x81a   :  { %4763 = vmatpush.msrb.mxu0 %v9695_v7  ;;  %4784 = vmatpush.msrb.mxu2 %v9698_v12  ;;  %v10000_v7 = vld [vmem:[%s9918_s3 + $0xb8] sm:$0xff]  ;;  %v10005_v12 = vld [vmem:[%s9918_s3 + $0x170] sm:$0xff] }
 0x81b   :  { %4803 = vmatpush.msra.mxu1 %v9703_v16  ;;  %4824 = vmatpush.msra.mxu3 %v9706_v61  ;;  %v10008_v16 = vld [vmem:[%s9918_s3 + $0x128] sm:$0xff]  ;;  %v10011_v61 = vld [vmem:[%s9918_s3 + $0xd0] sm:$0xff] }
 0x81c   :  { %4764 = vmatpush.msrb.mxu0 %v9711_v39  ;;  %4785 = vmatpush.msrb.mxu2 %v9714_v58  ;;  %v10016_v39 = vld [vmem:[%s9918_s3 + $0xa8] sm:$0xff]  ;;  %v10019_v58 = vld [vmem:[%s9918_s3 + $0x160] sm:$0xff] }
 0x81d   :  { %4804 = vmatpush.msra.mxu1 %v9719_v47  ;;  %4825 = vmatpush.msra.mxu3 %v9722_v13  ;;  %v10022_v47 = vld [vmem:[%s9918_s3 + $0x118] sm:$0xff]  ;;  %v10027_v13 = vld [vmem:[%s9918_s3 + $0xc0] sm:$0xff] }
 0x81e   :  { %4765 = vmatpush.msrb.mxu0 %v9727_v18  ;;  %4786 = vmatpush.msrb.mxu2 %v9730_v34  ;;  %v10030_v18 = vld [vmem:[%s9918_s3 + $0x98] sm:$0xff]  ;;  %v10035_v34 = vld [vmem:[%s9918_s3 + $0x150] sm:$0xff] }
 0x81f   :  { %4805 = vmatpush.msra.mxu1 %v9735_v31  ;;  %4826 = vmatpush.msra.mxu3 %v9738_v41  ;;  %v10038_v31 = vld [vmem:[%s9918_s3 + $0x108] sm:$0xff]  ;;  %v10041_v41 = vld [vmem:[%s9918_s3 + $0xb0] sm:$0xff] }
 0x820   :  { %4766 = vmatpush.msrb.mxu0 %v9743_v9  ;;  %4787 = vmatpush.msrb.mxu2 %v9746_v36  ;;  %v10046_v9 = vld [vmem:[%s9918_s3 + $0x88] sm:$0xff]  ;;  %v10054_v36 = vld [vmem:[%s9918_s3 + $0x140] sm:$0xff] }
 0x821   :  { %4806 = vmatpush.msra.mxu1 %v9751_v62  ;;  %4827 = vmatpush.msra.mxu3 %v9754_v48  ;;  %v10057_v62 = vld [vmem:[%s9918_s3 + $0xf8] sm:$0xff]  ;;  %v10060_v48 = vld [vmem:[%s9918_s3 + $0xa0] sm:$0xff] }
 0x822   :  { %4767 = vmatpush.msrb.mxu0 %v9759_v42  ;;  %4788 = vmatpush.msrb.mxu2 %v9762_v53  ;;  %v10065_v42 = vld [vmem:[%s9918_s3 + $0x78] sm:$0xff]  ;;  %v10070_v53 = vld [vmem:[%s9918_s3 + $0x130] sm:$0xff] }
 0x823   :  { %4807 = vmatpush.msra.mxu1 %v9767_v33  ;;  %4828 = vmatpush.msra.mxu3 %v9770_v1  ;;  %v10073_v33 = vld [vmem:[%s9918_s3 + $0xe8] sm:$0xff]  ;;  %v10076_v1 = vld [vmem:[%s9918_s3 + $0x90] sm:$0xff] }
 0x824   :  { %4768 = vmatpush.msrb.mxu0 %v11176_v49  ;;  %4789 = vmatpush.msrb.mxu2 %v11177_v8  ;;  %v10161_v49 = vld [vmem:[%s9918_s3] sm:$0xff] }
 0x825   :  { %4808 = vmatpush.msra.mxu1 %v11178_v10  ;;  %4829 = vmatpush.msra.mxu3 %v11179_v2  ;;  %11189 = vst [vmem:[#allocation59_spill] sm:$0xff] %v10161_v49 }
 0x826   :  { %4769 = vmatpush.msrb.mxu0 %v11180_v19  ;;  %4790 = vmatpush.msrb.mxu2 %v11181_v24 }
 0x827   :  { %4809 = vmatpush.msra.mxu1 %v9801_v25  ;;  %4830 = vmatpush.msra.mxu3 %v11182_v38  ;;  %v10096_v25 = vld [vmem:[%s9918_s3 + $0x110] sm:$0xff] }
 0x828   :  { %4770 = vmatpush.msrb.mxu0 %v11183_v35  ;;  %4791 = vmatpush.msrb.mxu2 %v11184_v57  ;;  %v10166_v57 = vld [vmem:[%s9918_s3 + $0x298] sm:$0xff] }
 0x829   :  { %4810 = vmatpush.msra.mxu1 %v9820_v11  ;;  %4831 = vmatpush.msra.mxu3 %v9823_v3  ;;  %v10084_v11 = vld [vmem:[%s9918_s3 + $0x120] sm:$0xff] }
 0x82a   :  { %4771 = vmatpush.msrb.mxu0 %v9830_v43  ;;  %4792 = vmatpush.msrb.mxu2 %v9833_v63  ;;  %v10089_v3 = vld [vmem:[%s9918_s3 + $0x80] sm:$0xff] }
 0x82b   :  { %4811 = vmatpush.msra.mxu1 %v9839_v56  ;;  %4832 = vmatpush.msra.mxu3 %v9842_v21  ;;  %v10081_v21 = vld [vmem:[%s9918_s3 + $0x68] sm:$0xff]  ;;  %v10092_v56 = vld [vmem:[%s9918_s3 + $0x58] sm:$0xff]  ;;  %v10107_v43 = vld [vmem:[%s9918_s3 + $0x100] sm:$0xff] }
 0x82c   :  { %4906 = vmatpush.msra.mxu2 %v9934_v17  ;;  %4772 = vmatpush.msrb.mxu0 %v9852_v5  ;;  %v10111_v63 = vld [vmem:[%s9918_s3 + $0x60] sm:$0xff]  ;;  %v10119_v5 = vld [vmem:[%s9918_s3 + $0xf0] sm:$0xff] }
 0x82d   :  { %4812 = vmatpush.msra.mxu1 %v9855_v27  ;;  %4949 = vmatpush.msrb.mxu3 %v10011_v61  ;;  %v10102_v27 = vld [vmem:[%s9918_s3 + $0x48] sm:$0xff] }
 0x82e   :  { %4926 = vmatpush.msra.mxu0 %v9940_v6  ;;  %4907 = vmatpush.msra.mxu2 %v9946_v51 }
 0x82f   :  { %4969 = vmatpush.msrb.mxu1 %v9949_v46  ;;  %4950 = vmatpush.msrb.mxu3 %v10027_v13 }
 0x830   :  { %4927 = vmatpush.msra.mxu0 %v9953_v30  ;;  %4908 = vmatpush.msra.mxu2 %v9959_v50 }
 0x831   :  { %4970 = vmatpush.msrb.mxu1 %v9962_v59  ;;  %4951 = vmatpush.msrb.mxu3 %v10041_v41 }
 0x832   :  { %4928 = vmatpush.msra.mxu0 %v9965_v20  ;;  %4909 = vmatpush.msra.mxu2 %v9994_v32 }
 0x833   :  { %4971 = vmatpush.msrb.mxu1 %v10000_v7  ;;  %4952 = vmatpush.msrb.mxu3 %v10060_v48 }
 0x834   :  { %4929 = vmatpush.msra.mxu0 %v9971_v55  ;;  %4910 = vmatpush.msra.mxu2 %v10005_v12 }
 0x835   :  { %4972 = vmatpush.msrb.mxu1 %v10016_v39  ;;  %4953 = vmatpush.msrb.mxu3 %v10076_v1 }
 0x836   :  { %4930 = vmatpush.msra.mxu0 %v9977_v54  ;;  %4911 = vmatpush.msra.mxu2 %v10019_v58 }
 0x837   :  { %4973 = vmatpush.msrb.mxu1 %v10030_v18  ;;  %4954 = vmatpush.msrb.mxu3 %v10089_v3 }
 0x838   :  { %4931 = vmatpush.msra.mxu0 %v9981_v40  ;;  %4912 = vmatpush.msra.mxu2 %v10035_v34 }
 0x839   :  { %4974 = vmatpush.msrb.mxu1 %v10046_v9  ;;  %4955 = vmatpush.msrb.mxu3 %v10099_v26 }
 0x83a   :  { %4932 = vmatpush.msra.mxu0 %v9985_v60  ;;  %4913 = vmatpush.msra.mxu2 %v10054_v36 }
 0x83b   :  { %4975 = vmatpush.msrb.mxu1 %v10065_v42  ;;  %4956 = vmatpush.msrb.mxu3 %v10111_v63 }
 0x83c   :  { %4933 = vmatpush.msra.mxu0 %v9989_v4  ;;  %4914 = vmatpush.msra.mxu2 %v10070_v53 }
 0x83d   :  { %4976 = vmatpush.msrb.mxu1 %v10081_v21  ;;  %4957 = vmatpush.msrb.mxu3 %v10123_v23 }
 0x83e   :  { %4934 = vmatpush.msra.mxu0 %v9997_v37  ;;  %4915 = vmatpush.msra.mxu2 %v10084_v11 }
 0x83f   :  { %4977 = vmatpush.msrb.mxu1 %v10092_v56  ;;  %4958 = vmatpush.msrb.mxu3 %v10135_v52 }
 0x840   :  { %4935 = vmatpush.msra.mxu0 %v10008_v16  ;;  %4916 = vmatpush.msra.mxu2 %v10096_v25 }
 0x841   :  { %4978 = vmatpush.msrb.mxu1 %v10102_v27  ;;  %4959 = vmatpush.msrb.mxu3 %v10144_v29 }
 0x842   :  { %4936 = vmatpush.msra.mxu0 %v10022_v47  ;;  %4917 = vmatpush.msra.mxu2 %v10107_v43 }
 0x843   :  { %4979 = vmatpush.msrb.mxu1 %v10114_v28  ;;  %4960 = vmatpush.msrb.mxu3 %v10152_v22  ;;  %v10169_v22 = vld [vmem:[%s9918_s3 + $0x288] sm:$0xff] }
 0x844   :  { %4937 = vmatpush.msra.mxu0 %v10038_v31  ;;  %4918 = vmatpush.msra.mxu2 %v10119_v5 }
 0x845   :  { %4980 = vmatpush.msrb.mxu1 %v10126_v15  ;;  %4961 = vmatpush.msrb.mxu3 %v10157_v14 }
 0x846   :  { %4938 = vmatpush.msra.mxu0 %v10057_v62  ;;  %4919 = vmatpush.msra.mxu2 %v10131_v45 }
 0x847   :  { %4981 = vmatpush.msrb.mxu1 %v10138_v0  ;;  %4962 = vmatpush.msrb.mxu3 %v10161_v49  ;;  %v10232_v49 = vld [vmem:[%s9918_s3 + $0x208] sm:$0xff] }
 0x848   :  { %4939 = vmatpush.msra.mxu0 %v10073_v33 }
 0x849   :  { %4982 = vmatpush.msrb.mxu1 %v10147_v44 }
 0x887   :  { %v4580_v8 = vpop.f32.mrf.mxu0  ;;  %v4650_v10 = vpop.f32.mrf.mxu1 }
 0x88f   :  { %v4689_v2 = vpop.f32.mrf.mxu0  ;;  %v4729_v19 = vpop.f32.mrf.mxu1 }
 0x890   :  { %v4752_v24 = vmax.f32 %v4689_v2, %v4729_v19  ;;  %v4560_v38 = vpop.f32.mrf.mxu2  ;;  %v4630_v35 = vpop.f32.mrf.mxu3  ;;  %v10174_v2 = vld [vmem:[%s9918_s3 + $0x278] sm:$0xff] }
 0x891   :  { %v4581_v29 = vadd.f32 %v4580_v8, %v4560_v38  ;;  %v4651_v44 = vadd.f32 %v4650_v10, %v4630_v35  ;;  %v10180_v8 = vld [vmem:[%s9918_s3 + $0x268] sm:$0xff]  ;;  %v10185_v10 = vld [vmem:[%s9918_s3 + $0x258] sm:$0xff] }
 0x892   :  { %4773 = vmatmul.f32.vlgmr.msrb.gmra.mxu0 %v4752_v24  ;;  %4813 = vmatmul.f32.vlgmr.msra.gmra.mxu1 %v4752_v24  ;;  %v10203_v38 = vld [vmem:[%s9918_s3 + $0x238] sm:$0xff]  ;;  %v10213_v35 = vld [vmem:[%s9918_s3 + $0x228] sm:$0xff] }
 0x893   :  { %v4653_v14 = vmax.f32 %v4581_v29, %v4651_v44  ;;  %5042 = vmatpush.msrb.mxu0 %v10166_v57  ;;  %5132 = vmatpush.msra.mxu1 %v9940_v6 }
 0x895   :  { %4838 = vst.msk [vmem:[#allocation5] sm:$0x7f] %vm3752_vm15, %v4653_v14  ;;  %5043 = vmatpush.msrb.mxu0 %v10169_v22  ;;  %5133 = vmatpush.msra.mxu1 %v9953_v30  ;;  %v10189_v14 = vld [vmem:[%s9918_s3 + $0x290] sm:$0xff]  ;;  %v10193_v30 = vld [vmem:[%s9918_s3 + $0x248] sm:$0xff] }
 0x897   :  { %5044 = vmatpush.msrb.mxu0 %v10174_v2  ;;  %5134 = vmatpush.msra.mxu1 %v9965_v20  ;;  %v10198_v20 = vld [vmem:[%s9918_s3 + $0x280] sm:$0xff] }
 0x898   :  { %v4709_v29 = vpop.f32.mrf.mxu2  ;;  %v4749_v44 = vpop.f32.mrf.mxu3 }
 0x899   :  { %5045 = vmatpush.msrb.mxu0 %v10180_v8  ;;  %v4753_v6 = vmax.f32 %v4709_v29, %v4749_v44  ;;  %5135 = vmatpush.msra.mxu1 %v9971_v55  ;;  %v10208_v55 = vld [vmem:[%s9918_s3 + $0x270] sm:$0xff]  ;;  %v10217_v29 = vld [vmem:[%s9918_s3 + $0x260] sm:$0xff]  ;;  %v10222_v44 = vld [vmem:[%s9918_s3 + $0x218] sm:$0xff] }
 0x89b   :  { %5046 = vmatpush.msrb.mxu0 %v10185_v10  ;;  %6627 = vmatmul.msk.f32.vlgmr.msrb.gmra.mxu2 %vm3750_vm0, %v4753_v6 }
 0x89c   :  { %6628 = vmatmul.msk.f32.vlgmr.msra.gmra.mxu3 %vm3750_vm0, %v4753_v6  ;;  %5022 = vmatpush.msrb.mxu2 %v10189_v14  ;;  %v4871_v19 = vld [vmem:[#allocation5 + $0x1] sm:$0x1f]  ;;  %v10227_v6 = vld [vmem:[%s9918_s3 + $0x250] sm:$0xff] }
 0x89d   :  { %v4842_v24 = vld [vmem:[#allocation5] sm:$0x1f]  ;;  %5047 = vmatpush.msrb.mxu0 %v10193_v30  ;;  %5112 = vmatpush.msra.mxu3 %v9934_v17 }
 0x89e   :  { %6660 = vmatmul.msk.f32.vlgmr.msrb.gmra.mxu1 %vm3750_vm0, %v4842_v24  ;;  %6658 = vmatmul.msk.f32.vlgmr.msra.gmra.mxu0 %vm3750_vm0, %v4871_v19  ;;  %v10238_v17 = vld [vmem:[%s9918_s3 + $0x240] sm:$0xff] }
 0x89f   :  { %5023 = vmatpush.msrb.mxu2 %v10198_v20  ;;  %5048 = vmatpush.msrb.mxu0 %v10203_v38 }
 0x8a0   :  { %5136 = vmatpush.msra.mxu1 %v9977_v54  ;;  %5113 = vmatpush.msra.mxu3 %v9946_v51  ;;  %v10243_v51 = vld [vmem:[%s9918_s3 + $0x1f8] sm:$0xff]  ;;  %v10247_v54 = vld [vmem:[%s9918_s3 + $0x230] sm:$0xff] }
 0x8a1   :  { %5024 = vmatpush.msrb.mxu2 %v10208_v55  ;;  %5049 = vmatpush.msrb.mxu0 %v10213_v35 }
 0x8a2   :  { %5137 = vmatpush.msra.mxu1 %v9981_v40  ;;  %5114 = vmatpush.msra.mxu3 %v9959_v50  ;;  %v10252_v40 = vld [vmem:[%s9918_s3 + $0x1e8] sm:$0xff]  ;;  %v10267_v50 = vld [vmem:[%s9918_s3 + $0x210] sm:$0xff] }
 0x8a3   :  { %5025 = vmatpush.msrb.mxu2 %v10217_v29  ;;  %5050 = vmatpush.msrb.mxu0 %v10222_v44 }
 0x8a4   :  { %6657 = vmatmul.msk.f32.vlgmr.msra.gmra.mxu2 %vm3750_vm0, %v4871_v19  ;;  %6659 = vmatmul.msk.f32.vlgmr.msrb.gmra.mxu3 %vm3750_vm0, %v4842_v24  ;;  %v10257_v19 = vld [vmem:[%s9918_s3 + $0x220] sm:$0xff]  ;;  %v10262_v24 = vld [vmem:[%s9918_s3 + $0x1d8] sm:$0xff] }
 0x8a5   :  { %5026 = vmatpush.msrb.mxu2 %v10227_v6  ;;  %5051 = vmatpush.msrb.mxu0 %v10232_v49 }
 0x8a6   :  { %5138 = vmatpush.msra.mxu1 %v9985_v60  ;;  %5115 = vmatpush.msra.mxu3 %v9994_v32  ;;  %v10272_v60 = vld [vmem:[%s9918_s3 + $0x1c8] sm:$0xff]  ;;  %v10277_v32 = vld [vmem:[%s9918_s3 + $0x200] sm:$0xff] }
 0x8a7   :  { %5027 = vmatpush.msrb.mxu2 %v10238_v17  ;;  %5052 = vmatpush.msrb.mxu0 %v10243_v51 }
 0x8a8   :  { %5139 = vmatpush.msra.mxu1 %v9989_v4  ;;  %5116 = vmatpush.msra.mxu3 %v10005_v12  ;;  %v4987_v4 = vld [vmem:[#allocation5 + $0x2] sm:$0x1f]  ;;  %v10284_v12 = vld [vmem:[%s9918_s3 + $0x1f0] sm:$0xff] }
 0x8a9   :  { %5028 = vmatpush.msrb.mxu2 %v10247_v54  ;;  %5053 = vmatpush.msrb.mxu0 %v10252_v40 }
 0x8aa   :  { %5140 = vmatpush.msra.mxu1 %v9997_v37  ;;  %5117 = vmatpush.msra.mxu3 %v10019_v58  ;;  %v10290_v37 = vld [vmem:[%s9918_s3 + $0x1e0] sm:$0xff] }
 0x8ab   :  { %5029 = vmatpush.msrb.mxu2 %v10257_v19  ;;  %5054 = vmatpush.msrb.mxu0 %v10262_v24  ;;  %v10304_v58 = vld [vmem:[%s9918_s3 + $0x1c0] sm:$0xff] }
 0x8ac   :  { %5141 = vmatpush.msra.mxu1 %v10008_v16  ;;  %5118 = vmatpush.msra.mxu3 %v10035_v34  ;;  %v10297_v16 = vld [vmem:[%s9918_s3 + $0x1d0] sm:$0xff] }
 0x8ad   :  { %5030 = vmatpush.msrb.mxu2 %v10267_v50  ;;  %5055 = vmatpush.msrb.mxu0 %v10272_v60 }
 0x8ae   :  { %6690 = vmatmul.msk.f32.vlgmr.msrb.gmra.mxu0 %vm3750_vm0, %v4987_v4  ;;  %5119 = vmatpush.msra.mxu3 %v10054_v36 }
 0x8af   :  { %5031 = vmatpush.msrb.mxu2 %v10277_v32  ;;  %5175 = vmatpush.msra.mxu0 %v9949_v46  ;;  %v11190_v46 = vld [vmem:[#allocation57_spill] sm:$0xff] }
 0x8b0   :  { %5142 = vmatpush.msra.mxu1 %v10022_v47  ;;  %5120 = vmatpush.msra.mxu3 %v10070_v53  ;;  %v5289_v53 = vld [vmem:[%s10380_s7 + $0x70] sm:$0xff] }
 0x8b1   :  { %5032 = vmatpush.msrb.mxu2 %v10284_v12  ;;  %5176 = vmatpush.msra.mxu0 %v9962_v59  ;;  %v11191_v59 = vld [vmem:[#allocation64_spill] sm:$0xff] }
 0x8b2   :  { %5143 = vmatpush.msra.mxu1 %v10038_v31  ;;  %5121 = vmatpush.msra.mxu3 %v10084_v11 }
 0x8b3   :  { %5033 = vmatpush.msrb.mxu2 %v10290_v37  ;;  %5177 = vmatpush.msra.mxu0 %v10000_v7  ;;  %v11192_v7 = vld [vmem:[#allocation66_spill] sm:$0xff] }
 0x8b4   :  { %5144 = vmatpush.msra.mxu1 %v10057_v62  ;;  %5122 = vmatpush.msra.mxu3 %v10096_v25 }
 0x8b5   :  { %5034 = vmatpush.msrb.mxu2 %v10297_v16  ;;  %5178 = vmatpush.msra.mxu0 %v10016_v39  ;;  %v11194_v39 = vld [vmem:[#allocation59_spill] sm:$0xff] }
 0x8b6   :  { %5145 = vmatpush.msra.mxu1 %v10073_v33  ;;  %5123 = vmatpush.msra.mxu3 %v10107_v43  ;;  %v5288_v33 = vld [vmem:[%s10380_s7 + $0x68] sm:$0xff] }
 0x8b7   :  { %5035 = vmatpush.msrb.mxu2 %v10304_v58  ;;  %5179 = vmatpush.msra.mxu0 %v10030_v18 }
 0x8b8   :  { %6689 = vmatmul.msk.f32.vlgmr.msrb.gmra.mxu2 %vm3750_vm0, %v4987_v4  ;;  %5124 = vmatpush.msra.mxu3 %v10119_v5 }
 0x8b9   :  { %5155 = vmatpush.msra.mxu2 %v10011_v61  ;;  %5219 = vmatpush.msrb.mxu1 %v10166_v57  ;;  %v11193_v61 = vld [vmem:[#allocation30_spill] sm:$0xff] }
 0x8ba   :  { %5180 = vmatpush.msra.mxu0 %v10046_v9  ;;  %5125 = vmatpush.msra.mxu3 %v10131_v45 }
 0x8bb   :  { %5156 = vmatpush.msra.mxu2 %v10027_v13  ;;  %5220 = vmatpush.msrb.mxu1 %v10169_v22  ;;  %v5282_v22 = vld [vmem:[%s10380_s7 + $0x38] sm:$0xff] }
 0x8bc   :  { %5199 = vmatpush.msrb.mxu3 %v10189_v14  ;;  %5181 = vmatpush.msra.mxu0 %v10065_v42  ;;  %v5290_v42 = vld [vmem:[%s10380_s7 + $0x78] sm:$0xff]  ;;  %v5280_v14 = vld [vmem:[%s10380_s7 + $0x28] sm:$0xff] }
 0x8bd   :  { %5157 = vmatpush.msra.mxu2 %v10041_v41  ;;  %5221 = vmatpush.msrb.mxu1 %v10174_v2 }
 0x8be   :  { %5200 = vmatpush.msrb.mxu3 %v10198_v20  ;;  %5182 = vmatpush.msra.mxu0 %v10081_v21  ;;  %v5279_v20 = vld [vmem:[%s10380_s7 + $0x20] sm:$0xff] }
 0x8bf   :  { %5158 = vmatpush.msra.mxu2 %v10060_v48  ;;  %5222 = vmatpush.msrb.mxu1 %v10180_v8  ;;  %v5281_v8 = vld [vmem:[%s10380_s7 + $0x30] sm:$0xff] }
 0x8c0   :  { %5201 = vmatpush.msrb.mxu3 %v10208_v55  ;;  %5183 = vmatpush.msra.mxu0 %v10092_v56  ;;  %v10389_v56 = vld [vmem:[%s6178_s11] sm:$0x3] }
 0x8c1   :  { %5159 = vmatpush.msra.mxu2 %v10076_v1  ;;  %5223 = vmatpush.msrb.mxu1 %v10185_v10  ;;  %v5063_v57 = vperm.slane %v10389_v56, 0  ;;  %v5294_v10 = vld [vmem:[%s10380_s7 + $0x98] sm:$0xff] }
 0x8c2   :  { %5202 = vmatpush.msrb.mxu3 %v10217_v29  ;;  %5184 = vmatpush.msra.mxu0 %v10102_v27  ;;  %v5286_v27 = vld [vmem:[%s10380_s7 + $0x58] sm:$0xff] }
 0x8c3   :  { %5160 = vmatpush.msra.mxu2 %v10089_v3  ;;  %5224 = vmatpush.msrb.mxu1 %v10193_v30  ;;  %v5287_v3 = vld [vmem:[%s10380_s7 + $0x60] sm:$0xff]  ;;  %v5293_v30 = vld [vmem:[%s10380_s7 + $0x90] sm:$0xff] }
 0x8c4   :  { %5203 = vmatpush.msrb.mxu3 %v10227_v6  ;;  %5185 = vmatpush.msra.mxu0 %v10114_v28  ;;  %v5285_v28 = vld [vmem:[%s10380_s7 + $0x50] sm:$0xff]  ;;  %v5278_v6 = vld [vmem:[%s10380_s7 + $0x18] sm:$0xff] }
 0x8c5   :  { %5161 = vmatpush.msra.mxu2 %v10099_v26  ;;  %5225 = vmatpush.msrb.mxu1 %v10203_v38  ;;  %v5292_v38 = vld [vmem:[%s10380_s7 + $0x88] sm:$0xff] }
 0x8c6   :  { %5204 = vmatpush.msrb.mxu3 %v10238_v17  ;;  %5186 = vmatpush.msra.mxu0 %v10126_v15  ;;  %v5291_v17 = vld [vmem:[%s10380_s7 + $0x80] sm:$0xff] }
 0x8c7   :  { %5162 = vmatpush.msra.mxu2 %v10111_v63  ;;  %5226 = vmatpush.msrb.mxu1 %v10213_v35  ;;  %v5064_v63 = vperm.slane %v10389_v56, 1 }
 0x8c8   :  { %5205 = vmatpush.msrb.mxu3 %v10247_v54  ;;  %5187 = vmatpush.msra.mxu0 %v10138_v0  ;;  %v5277_v54 = vld [vmem:[%s10380_s7 + $0x10] sm:$0xff] }
 0x8c9   :  { %5163 = vmatpush.msra.mxu2 %v10123_v23  ;;  %5227 = vmatpush.msrb.mxu1 %v10222_v44  ;;  %v5284_v23 = vld [vmem:[%s10380_s7 + $0x48] sm:$0xff] }
 0x8ca   :  { %5206 = vmatpush.msrb.mxu3 %v10257_v19  ;;  %5188 = vmatpush.msra.mxu0 %v11190_v46 }
 0x8cb   :  { %5164 = vmatpush.msra.mxu2 %v10135_v52  ;;  %5228 = vmatpush.msrb.mxu1 %v10232_v49  ;;  %v5283_v52 = vld [vmem:[%s10380_s7 + $0x40] sm:$0xff] }
 0x8cc   :  { %5207 = vmatpush.msrb.mxu3 %v10267_v50  ;;  %5331 = vmatpush.msrb.mxu0 %v5294_v10  ;;  %v5276_v50 = vld [vmem:[%s10380_s7 + $0x8] sm:$0xff] }
 0x8cd   :  { %5165 = vmatpush.msra.mxu2 %v11191_v59  ;;  %5229 = vmatpush.msrb.mxu1 %v10243_v51 }
 0x8ce   :  { %5208 = vmatpush.msrb.mxu3 %v10277_v32  ;;  %5332 = vmatpush.msrb.mxu0 %v5293_v30 }
 0x8cf   :  { %5166 = vmatpush.msra.mxu2 %v11192_v7  ;;  %5230 = vmatpush.msrb.mxu1 %v10252_v40 }
 0x8d0   :  { %5209 = vmatpush.msrb.mxu3 %v10284_v12  ;;  %5333 = vmatpush.msrb.mxu0 %v5292_v38 }
 0x8d1   :  { %5167 = vmatpush.msra.mxu2 %v11193_v61  ;;  %5231 = vmatpush.msrb.mxu1 %v10262_v24 }
 0x8d2   :  { %5210 = vmatpush.msrb.mxu3 %v10290_v37  ;;  %5334 = vmatpush.msrb.mxu0 %v5291_v17  ;;  %v5275_v37 = vld [vmem:[%s10380_s7] sm:$0xff] }
 0x8d3   :  { %5168 = vmatpush.msra.mxu2 %v11194_v39  ;;  %5232 = vmatpush.msrb.mxu1 %v10272_v60 }
 0x8d4   :  { %5211 = vmatpush.msrb.mxu3 %v10297_v16 }
 0x8d5   :  { %5299 = vmatpush.msrb.mxu2 %v5290_v42 }
 0x8d6   :  { %5212 = vmatpush.msrb.mxu3 %v10304_v58 }
 0x8d7   :  { %5300 = vmatpush.msrb.mxu2 %v5289_v53 }
 0x8d9   :  { %5301 = vmatpush.msrb.mxu2 %v5288_v33 }
 0x8db   :  { %5302 = vmatpush.msrb.mxu2 %v5287_v3 }
 0x8dd   :  { %5303 = vmatpush.msrb.mxu2 %v5286_v27 }
 0x8df   :  { %5304 = vmatpush.msrb.mxu2 %v5285_v28 }
 0x8e1   :  { %5305 = vmatpush.msrb.mxu2 %v5284_v23 }
 0x8e3   :  { %5306 = vmatpush.msrb.mxu2 %v5283_v52 }
 0x8e5   :  { %5307 = vmatpush.msrb.mxu2 %v5282_v22 }
 0x8e7   :  { %5308 = vmatpush.msrb.mxu2 %v5281_v8 }
 0x8e9   :  { %5309 = vmatpush.msrb.mxu2 %v5280_v14 }
 0x8eb   :  { %5310 = vmatpush.msrb.mxu2 %v5279_v20 }
 0x8ed   :  { %5311 = vmatpush.msrb.mxu2 %v5278_v6 }
 0x8ef   :  { %5312 = vmatpush.msrb.mxu2 %v5277_v54 }
 0x8f1   :  { %5313 = vmatpush.msrb.mxu2 %v5276_v50 }
 0x8f3   :  { %5314 = vmatpush.msrb.mxu2 %v5275_v37 }
 0x90f   :  { %v4774_v47 = vpop.f32.mrf.mxu0  ;;  %v4814_v18 = vpop.f32.mrf.mxu1 }
 0x91b   :  { %v4941_v1 = vpop.f32.mrf.mxu0  ;;  %v4984_v21 = vpop.f32.mrf.mxu1 }
 0x91c   :  { %v4985_v26 = vadd.f32 %v4984_v21, %v4941_v1 }
 0x91e   :  { %v4794_v13 = vpop.f32.mrf.mxu2 }
 0x91f   :  { %v4795_v34 = vadd.f32 %v4794_v13, %v4774_v47  ;;  %v4834_v31 = vpop.f32.mrf.mxu3 }
 0x920   :  { %v4835_v41 = vadd.f32 %v4834_v31, %v4814_v18 }
 0x922   :  { %v4837_v9 = vmax.f32 %v4795_v34, %v4835_v41 }
 0x924   :  { %4840 = vst.msk [vmem:[#allocation5 + $0x8] sm:$0x7f] %vm3752_vm15, %v4837_v9 }
 0x927   :  { %v4921_v11 = vpop.f32.mrf.mxu2  ;;  %v4964_v5 = vpop.f32.mrf.mxu3 }
 0x928   :  { %v4965_v0 = vadd.f32 %v4964_v5, %v4921_v11 }
 0x92b   :  { %v5106_v36 = vld [vmem:[#allocation5 + $0x9] sm:$0x1f]  ;;  %v5057_v25 = vpop.f32.mrf.mxu0 }
 0x92c   :  { %v5105_v62 = vld [vmem:[#allocation5 + $0x8] sm:$0x1f]  ;;  %6691 = vmatmul.msk.f32.vlgmr.msra.gmra.mxu3 %vm3750_vm0, %v5106_v36  ;;  %6692 = vmatmul.msk.f32.vlgmr.msra.gmra.mxu1 %vm3750_vm0, %v5106_v36  ;;  %v5061_v43 = vadd.f32 %v5057_v25, %v4985_v26 }
 0x92d   :  { %6693 = vmatmul.msk.f32.vlgmr.msra.gmra.mxu2 %vm3750_vm0, %v5105_v62  ;;  %6694 = vmatmul.msk.f32.vlgmr.msra.gmra.mxu0 %vm3750_vm0, %v5105_v62  ;;  %v5193_v48 = vld [vmem:[#allocation5 + $0xa] sm:$0x1f] }
 0x92e   :  { %5342 = vmatpush.msra.mxu3 %v5290_v42  ;;  %v10397_v15 = vadd.f32 %v5064_v63, %v5061_v43  ;;  %5374 = vmatpush.msra.mxu1 %v5294_v10 }
 0x930   :  { %5343 = vmatpush.msra.mxu3 %v5289_v53  ;;  %v5088_v2 = vmul.f32 %v10397_v15, %v10397_v15  ;;  %v5078_v55 = vsel %vm5077_vm5, %v10397_v15, 0.0  ;;  %5375 = vmatpush.msra.mxu1 %v5293_v30 }
 0x931   :  { %v5079_v51 = vrot.slane %v5078_v55, 4 }
 0x932   :  { %5344 = vmatpush.msra.mxu3 %v5288_v33  ;;  %v5096_v44 = vsel %vm5077_vm5, %v5088_v2, 0.0  ;;  %5376 = vmatpush.msra.mxu1 %v5292_v38 }
 0x933   :  { %v5097_v40 = vrot.slane %v5096_v44, 4  ;;  %v5080_v4 = vadd.f32 %v5079_v51, %v5078_v55 }
 0x934   :  { %6695 = vmatmul.msk.f32.vlgmr.msrb.gmra.mxu3 %vm3750_vm0, %v5193_v48  ;;  %6696 = vmatmul.msk.f32.vlgmr.msrb.gmra.mxu1 %vm3750_vm0, %v5193_v48 }
 0x935   :  { %5345 = vmatpush.msra.mxu3 %v5287_v3  ;;  %5377 = vmatpush.msra.mxu1 %v5291_v17  ;;  %v5098_v16 = vadd.f32 %v5097_v40, %v5096_v44  ;;  %v5081_v39 = vrot.slane %v5080_v4, 2 }
 0x937   :  { %5346 = vmatpush.msra.mxu3 %v5286_v27  ;;  %v5099_v18 = vrot.slane %v5098_v16, 2  ;;  %v5082_v48 = vadd.f32 %v5081_v39, %v5080_v4  ;;  %v5410_v39 = vld [vmem:[%s6182_s15 + $0x38] sm:$0xff] }
 0x938   :  { %5446 = vmatpush.msrb.mxu1 %v5410_v39 }
 0x939   :  { %5347 = vmatpush.msra.mxu3 %v5285_v28  ;;  %v5100_v11 = vadd.f32 %v5099_v18, %v5098_v16  ;;  %v5083_v43 = vrot.slane %v5082_v48, 1 }
 0x93b   :  { %5348 = vmatpush.msra.mxu3 %v5284_v23  ;;  %v5037_v45 = vpop.f32.mrf.mxu2  ;;  %v5084_v10 = vadd.f32 %v5083_v43, %v5082_v48 }
 0x93c   :  { %v5060_v49 = vadd.f32 %v5037_v45, %v4965_v0  ;;  %v5101_v0 = vrot.slane %v5100_v11, 1 }
 0x93d   :  { %5349 = vmatpush.msra.mxu3 %v5283_v52 }
 0x93e   :  { %v10414_v35 = vadd.f32 %v5063_v57, %v5060_v49 }
 0x93f   :  { %5350 = vmatpush.msra.mxu3 %v5282_v22 }
 0x940   :  { %v5087_v19 = vmul.f32 %v10414_v35, %v10414_v35  ;;  %v5070_v60 = vsel %vm5069_vm6, %v10414_v35, 0.0 }
 0x941   :  { %5351 = vmatpush.msra.mxu3 %v5281_v8  ;;  %v5071_v59 = vrot.slane %v5070_v60, 4 }
 0x942   :  { %v5089_v58 = vsel %vm5069_vm6, %v5087_v19, 0.0 }
 0x943   :  { %5352 = vmatpush.msra.mxu3 %v5280_v14  ;;  %v5090_v47 = vrot.slane %v5089_v58, 4  ;;  %v5072_v34 = vadd.f32 %v5071_v59, %v5070_v60 }
 0x945   :  { %5353 = vmatpush.msra.mxu3 %v5279_v20  ;;  %v5091_v42 = vadd.f32 %v5090_v47, %v5089_v58  ;;  %v5073_v3 = vrot.slane %v5072_v34, 2  ;;  %v5407_v47 = vld [vmem:[%s6182_s15 + $0x20] sm:$0xff] }
 0x947   :  { %5354 = vmatpush.msra.mxu3 %v5278_v6  ;;  %v5074_v22 = vadd.f32 %v5073_v3, %v5072_v34 }
 0x949   :  { %5355 = vmatpush.msra.mxu3 %v5277_v54  ;;  %v5075_v44 = vrot.slane %v5074_v22, 1 }
 0x94b   :  { %5356 = vmatpush.msra.mxu3 %v5276_v50  ;;  %v5076_v60 = vadd.f32 %v5075_v44, %v5074_v22 }
 0x94d   :  { %5357 = vmatpush.msra.mxu3 %v5275_v37 }
 0x9a9   :  { %v5147_v29 = vpop.f32.mrf.mxu1 }
 0x9aa   :  { %v5190_v24 = vpop.f32.mrf.mxu0 }
 0x9ab   :  { %v5191_v12 = vadd.f32 %v5190_v24, %v5147_v29  ;;  %v5102_v29 = vadd.f32 %v5101_v0, %v5100_v11  ;;  %v5400_v0 = vld [vmem:[%s6180_s23] sm:$0x1] }
 0x9af   :  { %v5127_v32 = vpop.f32.mrf.mxu3 }
 0x9b0   :  { %v5170_v61 = vpop.f32.mrf.mxu2 }
 0x9b1   :  { %v5234_v46 = vpop.f32.mrf.mxu1  ;;  %v5171_v31 = vadd.f32 %v5170_v61, %v5127_v32  ;;  %v5409_v61 = vld [vmem:[%s6182_s15 + $0x30] sm:$0xff] }
 0x9b2   :  { %v5238_v7 = vadd.f32 %v5234_v46, %v5191_v12  ;;  %5426 = vmatpush.msra.mxu0 %v5409_v61 }
 0x9b4   :  { %v10429_v13 = vadd.f32 %v5238_v7, %v5064_v63  ;;  %v5092_v63 = vrot.slane %v5091_v42, 2  ;;  %5427 = vmatpush.msra.mxu0 %v5407_v47 }
 0x9b6   :  { %v5248_v41 = vsel %vm5077_vm5, %v10429_v13, 0.0  ;;  %v5258_v9 = vmul.f32 %v10429_v13, %v10429_v13  ;;  %v5093_v14 = vadd.f32 %v5092_v63, %v5091_v42 }
 0x9b7   :  { %v5249_v36 = vrot.slane %v5248_v41, 4  ;;  %v5214_v62 = vpop.f32.mrf.mxu3 }
 0x9b8   :  { %v5266_v53 = vsel %vm5077_vm5, %v5258_v9, 0.0  ;;  %v5237_v33 = vadd.f32 %v5214_v62, %v5171_v31  ;;  %v5094_v40 = vrot.slane %v5093_v14, 1  ;;  %v5408_v31 = vld [vmem:[%s6182_s15 + $0x28] sm:$0xff]  ;;  %v5406_v62 = vld [vmem:[%s6182_s15 + $0x18] sm:$0xff] }
 0x9b9   :  { %v5250_v1 = vadd.f32 %v5249_v36, %v5248_v41  ;;  %v5267_v21 = vrot.slane %v5266_v53, 4  ;;  %v5405_v36 = vld [vmem:[%s6182_s15 + $0x10] sm:$0xff]  ;;  %5447 = vmatpush.msrb.mxu1 %v5408_v31 }
 0x9ba   :  { %v10438_v25 = vadd.f32 %v5237_v33, %v5063_v57  ;;  %v5095_v37 = vadd.f32 %v5094_v40, %v5093_v14  ;;  %v5404_v33 = vld [vmem:[%s6182_s15 + $0x8] sm:$0xff]  ;;  %5428 = vmatpush.msra.mxu0 %v5405_v36  ;;  %v10481_v14 = vld [vmem:[%s10463_s27 + $0x58] sm:$0xff] }
 0x9bb   :  { %v5251_v26 = vrot.slane %v5250_v1, 2  ;;  %v5268_v27 = vadd.f32 %v5267_v21, %v5266_v53  ;;  %v5403_v53 = vld [vmem:[%s6182_s15] sm:$0xff]  ;;  %5448 = vmatpush.msrb.mxu1 %v5406_v62 }
 0x9bc   :  { %v5241_v28 = vsel %vm5069_vm6, %v10438_v25, 0.0  ;;  %v5257_v5 = vmul.f32 %v10438_v25, %v10438_v25  ;;  %5429 = vmatpush.msra.mxu0 %v5403_v53 }
 0x9bd   :  { %v5252_v23 = vadd.f32 %v5251_v26, %v5250_v1  ;;  %v5269_v45 = vrot.slane %v5268_v27, 2  ;;  %v5242_v52 = vrot.slane %v5241_v28, 4  ;;  %5449 = vmatpush.msrb.mxu1 %v5404_v33 }
 0x9be   :  { %v5259_v49 = vsel %vm5069_vm6, %v5257_v5, 0.0 }
 0x9bf   :  { %v5253_v56 = vrot.slane %v5252_v23, 1  ;;  %v5270_v57 = vadd.f32 %v5269_v45, %v5268_v27  ;;  %v5243_v2 = vadd.f32 %v5242_v52, %v5241_v28  ;;  %v5260_v8 = vrot.slane %v5259_v49, 4  ;;  %v5387_v28 = vld [vmem:[%s6179_s19] sm:$0x1] }
 0x9c1   :  { %v5254_v30 = vadd.f32 %v5253_v56, %v5252_v23  ;;  %v5271_v20 = vrot.slane %v5270_v57, 1  ;;  %v5244_v38 = vrot.slane %v5243_v2, 2  ;;  %v5261_v55 = vadd.f32 %v5260_v8, %v5259_v49  ;;  %v10466_v49 = vld [vmem:[%s10463_s27 + $0x78] sm:$0xff]  ;;  %v10469_v56 = vld [vmem:[%s10463_s27 + $0x70] sm:$0xff] }
 0x9c2   :  { %5627 = vmatpush.msrb.mxu3 %v10466_v49 }
 0x9c3   :  { %v5256_v6 = vadd.f32 %v5254_v30, %v5084_v10  ;;  %v5272_v17 = vadd.f32 %v5271_v20, %v5270_v57  ;;  %v5245_v51 = vadd.f32 %v5244_v38, %v5243_v2  ;;  %v5262_v54 = vrot.slane %v5261_v55, 2  ;;  %v10473_v57 = vld [vmem:[%s10463_s27 + $0x68] sm:$0xff]  ;;  %v10477_v2 = vld [vmem:[%s10463_s27 + $0x60] sm:$0xff]  ;;  %v10485_v30 = vld [vmem:[%s10463_s27 + $0x50] sm:$0xff] }
 0x9c4   :  { %5628 = vmatpush.msrb.mxu3 %v10469_v56  ;;  %v10489_v20 = vld [vmem:[%s10463_s27 + $0x48] sm:$0xff] }
 0x9c5   :  { %v5274_v19 = vadd.f32 %v5272_v17, %v5102_v29  ;;  %v5246_v24 = vrot.slane %v5245_v51, 1  ;;  %v5263_v50 = vadd.f32 %v5262_v54, %v5261_v55  ;;  %6697 = vmatmul.msk.f32.vlgmr.msrb.gmra.mxu0 %vm5295_vm7, %v5256_v6  ;;  %v10499_v29 = vld [vmem:[%s10463_s27 + $0x40] sm:$0xff]  ;;  %v10508_v17 = vld [vmem:[%s10463_s27 + $0x38] sm:$0xff] }
 0x9c6   :  { %5469 = vmatpush.msrb.mxu0 %v5409_v61  ;;  %5629 = vmatpush.msrb.mxu3 %v10473_v57  ;;  %v10552_v61 = vld [vmem:[%s10463_s27 + $0x88] sm:$0xff] }
 0x9c7   :  { %v5247_v32 = vadd.f32 %v5246_v24, %v5245_v51  ;;  %v5264_v4 = vrot.slane %v5263_v50, 1  ;;  %6698 = vmatmul.msk.f32.vlgmr.msra.gmra.mxu1 %vm5295_vm7, %v5274_v19  ;;  %v10514_v24 = vld [vmem:[%s10463_s27 + $0x30] sm:$0xff] }
 0x9c8   :  { %5489 = vmatpush.msra.mxu1 %v5410_v39  ;;  %5470 = vmatpush.msrb.mxu0 %v5407_v47  ;;  %v5681_v39 = vld [vmem:[%s10504_s9 + $0x70] sm:$0xff]  ;;  %v5684_v47 = vld [vmem:[%s10504_s9 + $0x88] sm:$0xff] }
 0x9c9   :  { %v5255_v12 = vadd.f32 %v5247_v32, %v5076_v60  ;;  %v5265_v16 = vadd.f32 %v5264_v4, %v5263_v50  ;;  %5630 = vmatpush.msrb.mxu3 %v10477_v2 }
 0x9ca   :  { %5490 = vmatpush.msra.mxu1 %v5408_v31  ;;  %5471 = vmatpush.msrb.mxu0 %v5405_v36  ;;  %v5680_v31 = vld [vmem:[%s10504_s9 + $0x68] sm:$0xff]  ;;  %v5679_v36 = vld [vmem:[%s10504_s9 + $0x60] sm:$0xff] }
 0x9cb   :  { %5315 = vmatmul.f32.vlgmr.msrb.gmra.mxu2 %v5255_v12  ;;  %v5273_v58 = vadd.f32 %v5265_v16, %v5095_v37  ;;  %5631 = vmatpush.msrb.mxu3 %v10481_v14  ;;  %v10517_v12 = vld [vmem:[%s6183_s1] sm:$0x3]  ;;  %v10528_v37 = vld [vmem:[%s10504_s9 + $0x98] sm:$0xff] }
 0x9cc   :  { %5491 = vmatpush.msra.mxu1 %v5406_v62  ;;  %5472 = vmatpush.msrb.mxu0 %v5403_v53  ;;  %v5676_v53 = vld [vmem:[%s10504_s9 + $0x48] sm:$0xff] }
 0x9cd   :  { %5358 = vmatmul.f32.vlgmr.msra.gmra.mxu3 %v5273_v58  ;;  %v10535_v58 = vld [vmem:[%s10463_s27 + $0x90] sm:$0xff] }
 0x9ce   :  { %5492 = vmatpush.msra.mxu1 %v5404_v33  ;;  %5632 = vmatpush.msrb.mxu3 %v10485_v30  ;;  %v5675_v33 = vld [vmem:[%s10504_s9 + $0x40] sm:$0xff] }
 0x9d0   :  { %5633 = vmatpush.msrb.mxu3 %v10489_v20 }
 0x9d2   :  { %5634 = vmatpush.msrb.mxu3 %v10499_v29 }
 0x9d4   :  { %5635 = vmatpush.msrb.mxu3 %v10508_v17 }
 0x9d6   :  { %5636 = vmatpush.msrb.mxu3 %v10514_v24 }
 0xa42   :  { %v5336_v46 = vpop.f32.mrf.mxu0 }
 0xa44   :  { %v5379_v18 = vpop.f32.mrf.mxu1 }
 0xa4e   :  { %v5316_v59 = vpop.f32.mrf.mxu2 }
 0xa4f   :  { %v5337_v7 = vadd.f32 %v5336_v46, %v5316_v59  ;;  %v10538_v46 = vld [vmem:[%s10504_s9 + $0x78] sm:$0xff]  ;;  %v10543_v59 = vld [vmem:[%s10504_s9 + $0x90] sm:$0xff] }
 0xa50   :  { %v5359_v34 = vpop.f32.mrf.mxu3 }
 0xa51   :  { %v5382_v41 = vmul.f32 0.02, %v5337_v7  ;;  %v5380_v9 = vadd.f32 %v5379_v18, %v5359_v34  ;;  %v10559_v18 = vld [vmem:[%s10463_s27 + $0x28] sm:$0xff]  ;;  %v10565_v34 = vld [vmem:[%s10463_s27 + $0x80] sm:$0xff] }
 0xa52   :  { %5637 = vmatpush.msrb.mxu3 %v10559_v18 }
 0xa53   :  { %v5384_v48 = vmul.f32 %v5382_v41, %v5382_v41  ;;  %v5383_v42 = vmul.f32 0.02, %v5380_v9 }
 0xa55   :  { %v5385_v1 = vsub.f32 %v5383_v42, %v5384_v48  ;;  %v5678_v48 = vld [vmem:[%s10504_s9 + $0x58] sm:$0xff]  ;;  %v5677_v42 = vld [vmem:[%s10504_s9 + $0x50] sm:$0xff] }
 0xa57   :  { %v5386_v21 = vmax.f32 %v5385_v1, 0.0  ;;  %v5674_v1 = vld [vmem:[%s10504_s9 + $0x38] sm:$0xff] }
 0xa59   :  { %v5388_v11 = vadd.f32 1e-05, %v5386_v21  ;;  %v5673_v21 = vld [vmem:[%s10504_s9 + $0x30] sm:$0xff] }
 0xa5b   :  { %6787 = vrsqrt.f32 %v5388_v11  ;;  %vm5395_vm9 = vweird.f32 %v5388_v11 }
 0xa61   :  { %v6788_v3 = vpop.eup %6787 }
 0xa62   :  { %v5390_v26 = vmul.f32 %v6788_v3, %v5388_v11  ;;  %vm5396_vm8 = vweird.f32 %v6788_v3  ;;  %v5672_v11 = vld [vmem:[%s10504_s9 + $0x28] sm:$0xff] }
 0xa63   :  { %vm5397_vm10 = vmor %vm5395_vm9, %vm5396_vm8 }
 0xa64   :  { %v5391_v27 = vmul.f32 %v6788_v3, %v5390_v26  ;;  %v5671_v26 = vld [vmem:[%s10504_s9 + $0x20] sm:$0xff] }
 0xa66   :  { %v5392_v43 = vmul.f32 0.5, %v5391_v27  ;;  %v10597_v27 = vld [vmem:[%s10463_s27 + $0x18] sm:$0xff] }
 0xa68   :  { %v5393_v63 = vsub.f32 1.5, %v5392_v43  ;;  %v5670_v43 = vld [vmem:[%s10504_s9 + $0x18] sm:$0xff] }
 0xa6a   :  { %v5394_v5 = vmul.f32 %v6788_v3, %v5393_v63  ;;  %v10602_v63 = vld [vmem:[%s10463_s27 + $0x10] sm:$0xff] }
 0xa6c   :  { %v5398_v23 = vsel %vm5397_vm10, %v6788_v3, %v5394_v5  ;;  %v10593_v3 = vld [vmem:[%s10463_s27 + $0x20] sm:$0xff]  ;;  %v5605_v5 = vld [vmem:[%s10463_s27 + $0x8] sm:$0xff] }
 0xa6d   :  { %v5399_v45 = vmul.f32 %v5398_v23, %v5387_v28  ;;  %5638 = vmatpush.msrb.mxu3 %v10593_v3  ;;  %v5669_v28 = vld [vmem:[%s10504_s9 + $0x10] sm:$0xff]  ;;  %v5668_v23 = vld [vmem:[%s10504_s9 + $0x8] sm:$0xff] }
 0xa6f   :  { %6699 = vmatmul.msk.f32.vlgmr.msra.gmra.mxu0 %vm5295_vm7, %v5399_v45  ;;  %6700 = vmatmul.msk.f32.vlgmr.msrb.gmra.mxu1 %vm5295_vm7, %v5399_v45  ;;  %v5401_v52 = vmul.f32 %v5399_v45, %v5382_v41  ;;  %v5683_v41 = vld [vmem:[%s10504_s9 + $0x80] sm:$0xff] }
 0xa70   :  { %5639 = vmatpush.msrb.mxu3 %v10597_v27  ;;  %v5604_v45 = vld [vmem:[%s10463_s27] sm:$0xff] }
 0xa71   :  { %v5402_v22 = vsub.f32 %v5400_v0, %v5401_v52  ;;  %v5667_v52 = vld [vmem:[%s10504_s9] sm:$0xff] }
 0xa72   :  { %5640 = vmatpush.msrb.mxu3 %v10602_v63 }
 0xa74   :  { %5641 = vmatpush.msrb.mxu3 %v5605_v5 }
 0xa76   :  { %5642 = vmatpush.msrb.mxu3 %v5604_v45 }
 0xa77   :  { %6701 = vmatmul.msk.f32.vlgmr.msrb.gmra.mxu0 %vm5295_vm7, %v5402_v22  ;;  %6702 = vmatmul.msk.f32.vlgmr.msra.gmra.mxu1 %vm5295_vm7, %v5402_v22 }
 0xa78   :  { %5865 = vmatpush.msra.mxu3 %v10538_v46 }
 0xa7a   :  { %5866 = vmatpush.msra.mxu3 %v5681_v39 }
 0xa7c   :  { %5867 = vmatpush.msra.mxu3 %v5680_v31 }
 0xa7e   :  { %5868 = vmatpush.msra.mxu3 %v5679_v36 }
 0xa80   :  { %5869 = vmatpush.msra.mxu3 %v5678_v48 }
 0xa82   :  { %5870 = vmatpush.msra.mxu3 %v5677_v42 }
 0xa84   :  { %5871 = vmatpush.msra.mxu3 %v5676_v53 }
 0xa86   :  { %5872 = vmatpush.msra.mxu3 %v5675_v33 }
 0xa88   :  { %5873 = vmatpush.msra.mxu3 %v5674_v1 }
 0xa8a   :  { %5874 = vmatpush.msra.mxu3 %v5673_v21 }
 0xa8c   :  { %5875 = vmatpush.msra.mxu3 %v5672_v11 }
 0xa8e   :  { %5876 = vmatpush.msra.mxu3 %v5671_v26 }
 0xa90   :  { %5877 = vmatpush.msra.mxu3 %v5670_v43 }
 0xa92   :  { %5878 = vmatpush.msra.mxu3 %v5669_v28 }
 0xa94   :  { %5879 = vmatpush.msra.mxu3 %v5668_v23 }
 0xa96   :  { %5880 = vmatpush.msra.mxu3 %v5667_v52 }
 0xaec   :  { %v5431_v8 = vpop.f32.mrf.mxu0  ;;  %v5451_v10 = vpop.f32.mrf.mxu1 }
 0xaed   :  { %v5497_v38 = vperm.slane %v5431_v8, 0  ;;  %v5498_v55 = vperm.slane %v5451_v10, 0 }
 0xaef   :  { %v5499_v51 = vmul.f32 %v5497_v38, %v10414_v35  ;;  %v5500_v54 = vmul.f32 %v5498_v55, %v10397_v15  ;;  %v10521_v15 = vld [vmem:[%s10463_s27 + $0x98] sm:$0xff]  ;;  %v10525_v35 = vld [vmem:[%s6184_s5] sm:$0x3]  ;;  %v5728_v16 = vmul.f32 %v5497_v38, %v10438_v25  ;;  %v5729_v25 = vmul.f32 %v5498_v55, %v10429_v13 }
 0xaf4   :  { %v5474_v44 = vpop.f32.mrf.mxu0  ;;  %v5494_v6 = vpop.f32.mrf.mxu1 }
 0xaf5   :  { %v5501_v40 = vperm.slane %v5474_v44, 0  ;;  %v5502_v19 = vperm.slane %v5494_v6, 0  ;;  %v5910_v44 = vld [vmem:[%s10651_s13 + $0x18] sm:$0xff] }
 0xaf6   :  { %v6727_v6 = vld [vmem:[%s10651_s13 + $0x58] sm:$0xff] }
 0xaf7   :  { %v5503_v50 = vadd.f32 %v5501_v40, %v5499_v51  ;;  %v5504_v60 = vadd.f32 %v5502_v19, %v5500_v54  ;;  %v10546_v7 = vadd.f32 %v5728_v16, %v5501_v40  ;;  %v10561_v13 = vadd.f32 %v5729_v25, %v5502_v19  ;;  %v6726_v51 = vld [vmem:[%s10651_s13 + $0x50] sm:$0xff]  ;;  %v5908_v54 = vld [vmem:[%s10651_s13 + $0x8] sm:$0xff]  ;;  %v5907_v19 = vld [vmem:[%s10651_s13] sm:$0xff] }
 0xaf8   :  { %v6725_v40 = vld [vmem:[%s10651_s13 + $0x48] sm:$0xff] }
 0xaf9   :  { %v5505_v32 = vmax.f32 %v5503_v50, 0.0  ;;  %v5506_v4 = vmax.f32 %v5504_v60, 0.0  ;;  %v5732_v9 = vmax.f32 %v10546_v7, 0.0  ;;  %v5733_v62 = vmax.f32 %v10561_v13, 0.0  ;;  %v5984_v50 = vld [vmem:[%s10669_s17 + $0x58] sm:$0xff]  ;;  %v5983_v60 = vld [vmem:[%s10669_s17 + $0x50] sm:$0xff] }
 0xafa   :  { %v5980_v13 = vld [vmem:[%s10669_s17 + $0x38] sm:$0xff] }
 0xafb   :  { %6703 = vmatpush.msk.msra.mxu0 %vm5069_vm6, %v5505_v32  ;;  %6705 = vmatpush.msk.msrb.mxu1 %vm5069_vm6, %v5506_v4 }
 0xafc   :  { %6707 = vmatpush.msk.msra.mxu2 %vm5069_vm6, %v5505_v32  ;;  %6704 = vmatmul.msk.f32.vlgmr.msra.gmra.mxu0 %vm5508_vm11, %v10517_v12 }
 0xafd   :  { %6709 = vmatpush.msk.msrb.mxu0 %vm5069_vm6, %v5506_v4  ;;  %5659 = vmatpush.msra.mxu1 %v10521_v15 }
 0xafe   :  { %6708 = vmatmul.msk.f32.vlgmr.msra.gmra.mxu2 %vm5508_vm11, %v10525_v35  ;;  %6706 = vmatmul.msk.f32.vlgmr.msrb.gmra.mxu1 %vm5508_vm11, %v10517_v12 }
 0xaff   :  { %5719 = vmatpush.msra.mxu0 %v10528_v37  ;;  %5660 = vmatpush.msra.mxu1 %v10535_v58 }
 0xb00   :  { %5687 = vmatpush.msrb.mxu2 %v10538_v46 }
 0xb01   :  { %5720 = vmatpush.msra.mxu0 %v10543_v59  ;;  %5661 = vmatpush.msra.mxu1 %v10552_v61 }
 0xb02   :  { %5688 = vmatpush.msrb.mxu2 %v5681_v39 }
 0xb03   :  { %5721 = vmatpush.msra.mxu0 %v5684_v47  ;;  %5662 = vmatpush.msra.mxu1 %v10565_v34 }
 0xb04   :  { %5689 = vmatpush.msrb.mxu2 %v5680_v31  ;;  %6710 = vmatmul.msk.f32.vlgmr.msrb.gmra.mxu0 %vm5508_vm11, %v10525_v35  ;;  %v5978_v31 = vld [vmem:[%s10669_s17 + $0x28] sm:$0xff] }
 0xb05   :  { %5722 = vmatpush.msra.mxu0 %v5683_v41  ;;  %6713 = vmatpush.msk.msrb.mxu1 %vm5069_vm6, %v5732_v9 }
 0xb06   :  { %5690 = vmatpush.msrb.mxu2 %v5679_v36  ;;  %v5975_v36 = vld [vmem:[%s10669_s17 + $0x10] sm:$0xff] }
 0xb07   :  { %6715 = vmatpush.msk.msrb.mxu0 %vm5069_vm6, %v5733_v62 }
 0xb08   :  { %5691 = vmatpush.msrb.mxu2 %v5678_v48  ;;  %v5973_v48 = vld [vmem:[%s10669_s17] sm:$0xff] }
 0xb0a   :  { %5692 = vmatpush.msrb.mxu2 %v5677_v42 }
 0xb0c   :  { %5693 = vmatpush.msrb.mxu2 %v5676_v53 }
 0xb0e   :  { %5694 = vmatpush.msrb.mxu2 %v5675_v33 }
 0xb10   :  { %5695 = vmatpush.msrb.mxu2 %v5674_v1 }
 0xb12   :  { %5696 = vmatpush.msrb.mxu2 %v5673_v21 }
 0xb14   :  { %5697 = vmatpush.msrb.mxu2 %v5672_v11 }
 0xb16   :  { %5698 = vmatpush.msrb.mxu2 %v5671_v26  ;;  %v5906_v26 = vld [vmem:[%s6188_s21] sm:$0x1] }
 0xb18   :  { %5699 = vmatpush.msrb.mxu2 %v5670_v43 }
 0xb1a   :  { %5700 = vmatpush.msrb.mxu2 %v5669_v28 }
 0xb1c   :  { %5701 = vmatpush.msrb.mxu2 %v5668_v23  ;;  %v78_v23 = vstv %s6190_s25 }
 0xb1d   :  { %79 = vst [vmem:[#allocation6] sm:$0x1] %v78_v23 }
 0xb1e   :  { %5702 = vmatpush.msrb.mxu2 %v5667_v52 }
 0xb20   :  { %5897 = vmatpush.msra.mxu2 %v10528_v37 }
 0xb22   :  { %5898 = vmatpush.msra.mxu2 %v10543_v59 }
 0xb24   :  { %5899 = vmatpush.msra.mxu2 %v5684_v47 }
 0xb26   :  { %5900 = vmatpush.msra.mxu2 %v5683_v41  ;;  %v5977_v41 = vld [vmem:[%s10669_s17 + $0x20] sm:$0xff] }
 0xb79   :  { %v5535_v0 = vpop.f32.mrf.mxu0 }
 0xb7b   :  { %v5555_v22 = vpop.f32.mrf.mxu1 }
 0xb81   :  { %v5579_v8 = vpop.f32.mrf.mxu2  ;;  %v5599_v38 = vpop.f32.mrf.mxu0 }
 0xb82   :  { %v5602_v10 = vmax.f32 %v5535_v0, %v5579_v8  ;;  %v5603_v55 = vmax.f32 %v5555_v22, %v5599_v38  ;;  %v5985_v0 = vld [vmem:[#allocation6] sm:$0x1] }
 0xb84   :  { %5643 = vmatmul.f32.vlgmr.msrb.gmra.mxu3 %v5602_v10  ;;  %5703 = vmatmul.f32.vlgmr.msrb.gmra.mxu2 %v5602_v10 }
 0xb85   :  { %6711 = vmatmul.msk.f32.vlgmr.msra.gmra.mxu1 %vm5295_vm7, %v5603_v55  ;;  %6712 = vmatmul.msk.f32.vlgmr.msra.gmra.mxu0 %vm5295_vm7, %v5603_v55 }
 0xb86   :  { %6717 = vmatpush.msk.msra.mxu1 %vm5069_vm6, %v5732_v9  ;;  %6719 = vmatpush.msk.msra.mxu0 %vm5069_vm6, %v5733_v62  ;;  %v5976_v9 = vld [vmem:[%s10669_s17 + $0x18] sm:$0xff]  ;;  %v5974_v62 = vld [vmem:[%s10669_s17 + $0x8] sm:$0xff] }
 0xb87   :  { %6116 = vmatpush.msrb.mxu3 %v5984_v50 }
 0xb89   :  { %6117 = vmatpush.msrb.mxu3 %v5983_v60 }
 0xb8d   :  { %6714 = vmatmul.msk.f32.vlgmr.msrb.gmra.mxu1 %vm5508_vm11, %v10517_v12  ;;  %6716 = vmatmul.msk.f32.vlgmr.msrb.gmra.mxu0 %vm5508_vm11, %v10517_v12  ;;  %v5982_v12 = vld [vmem:[%s10669_s17 + $0x48] sm:$0xff] }
 0xb8e   :  { %5825 = vmatpush.msrb.mxu1 %v10466_v49  ;;  %5857 = vmatpush.msrb.mxu0 %v10521_v15  ;;  %v5914_v49 = vld [vmem:[%s10651_s13 + $0x38] sm:$0xff] }
 0xb8f   :  { %6118 = vmatpush.msrb.mxu3 %v5982_v12 }
 0xb90   :  { %5826 = vmatpush.msrb.mxu1 %v10469_v56  ;;  %5858 = vmatpush.msrb.mxu0 %v10535_v58  ;;  %v10655_v56 = vld [vmem:[%s10651_s13 + $0x78] sm:$0xff] }
 0xb91   :  { %5960 = vmatpush.msrb.mxu2 %v10655_v56 }
 0xb92   :  { %5827 = vmatpush.msrb.mxu1 %v10473_v57  ;;  %5859 = vmatpush.msrb.mxu0 %v10552_v61  ;;  %v5913_v57 = vld [vmem:[%s10651_s13 + $0x30] sm:$0xff] }
 0xb94   :  { %5828 = vmatpush.msrb.mxu1 %v10477_v2  ;;  %5860 = vmatpush.msrb.mxu0 %v10565_v34  ;;  %v6730_v2 = vld [vmem:[%s10651_s13 + $0x70] sm:$0xff] }
 0xb95   :  { %6718 = vmatmul.msk.f32.vlgmr.msra.gmra.mxu1 %vm5508_vm11, %v10525_v35  ;;  %6720 = vmatmul.msk.f32.vlgmr.msra.gmra.mxu0 %vm5508_vm11, %v10525_v35  ;;  %v5979_v34 = vld [vmem:[%s10669_s17 + $0x30] sm:$0xff] }
 0xb96   :  { %5829 = vmatpush.msrb.mxu1 %v10481_v14  ;;  %5927 = vmatpush.msra.mxu0 %v5914_v49  ;;  %v5912_v14 = vld [vmem:[%s10651_s13 + $0x28] sm:$0xff] }
 0xb97   :  { %5961 = vmatpush.msrb.mxu2 %v6730_v2 }
 0xb98   :  { %5830 = vmatpush.msrb.mxu1 %v10485_v30  ;;  %5928 = vmatpush.msra.mxu0 %v5913_v57  ;;  %v6729_v30 = vld [vmem:[%s10651_s13 + $0x68] sm:$0xff] }
 0xb99   :  { %5962 = vmatpush.msrb.mxu2 %v6729_v30 }
 0xb9a   :  { %5831 = vmatpush.msrb.mxu1 %v10489_v20  ;;  %v5911_v20 = vld [vmem:[%s10651_s13 + $0x20] sm:$0xff]  ;;  %5929 = vmatpush.msra.mxu0 %v5912_v14 }
 0xb9c   :  { %5832 = vmatpush.msrb.mxu1 %v10499_v29  ;;  %v6728_v29 = vld [vmem:[%s10651_s13 + $0x60] sm:$0xff]  ;;  %5930 = vmatpush.msra.mxu0 %v5911_v20 }
 0xb9d   :  { %5963 = vmatpush.msrb.mxu2 %v6728_v29 }
 0xb9e   :  { %5833 = vmatpush.msrb.mxu1 %v10508_v17  ;;  %v5909_v17 = vld [vmem:[%s10651_s13 + $0x10] sm:$0xff]  ;;  %5931 = vmatpush.msra.mxu0 %v5910_v44 }
 0xb9f   :  { %5964 = vmatpush.msrb.mxu2 %v6727_v6 }
 0xba0   :  { %5834 = vmatpush.msrb.mxu1 %v10514_v24  ;;  %5932 = vmatpush.msra.mxu0 %v5909_v17  ;;  %v6724_v24 = vld [vmem:[%s10651_s13 + $0x40] sm:$0xff] }
 0xba1   :  { %5965 = vmatpush.msrb.mxu2 %v6726_v51 }
 0xba2   :  { %5835 = vmatpush.msrb.mxu1 %v10559_v18  ;;  %5933 = vmatpush.msra.mxu0 %v5908_v54  ;;  %v5981_v18 = vld [vmem:[%s10669_s17 + $0x40] sm:$0xff] }
 0xba3   :  { %5966 = vmatpush.msrb.mxu2 %v6725_v40  ;;  %6119 = vmatpush.msrb.mxu3 %v5981_v18 }
 0xba4   :  { %5836 = vmatpush.msrb.mxu1 %v10593_v3  ;;  %5934 = vmatpush.msra.mxu0 %v5907_v19 }
 0xba5   :  { %5967 = vmatpush.msrb.mxu2 %v6724_v24  ;;  %6120 = vmatpush.msrb.mxu3 %v5980_v13 }
 0xba6   :  { %5837 = vmatpush.msrb.mxu1 %v10597_v27 }
 0xba7   :  { %6121 = vmatpush.msrb.mxu3 %v5979_v34 }
 0xba8   :  { %5838 = vmatpush.msrb.mxu1 %v10602_v63 }
 0xba9   :  { %6122 = vmatpush.msrb.mxu3 %v5978_v31 }
 0xbaa   :  { %5839 = vmatpush.msrb.mxu1 %v5605_v5 }
 0xbab   :  { %6123 = vmatpush.msrb.mxu3 %v5977_v41 }
 0xbac   :  { %5840 = vmatpush.msrb.mxu1 %v5604_v45  ;;  %v6031_v45 = vld [vmem:[%s6188_s21] sm:$0x1] }
 0xbad   :  { %6124 = vmatpush.msrb.mxu3 %v5976_v9 }
 0xbae   :  { %6051 = vmatpush.msra.mxu1 %v5914_v49 }
 0xbaf   :  { %6125 = vmatpush.msrb.mxu3 %v5975_v36 }
 0xbb0   :  { %6052 = vmatpush.msra.mxu1 %v5913_v57 }
 0xbb1   :  { %6126 = vmatpush.msrb.mxu3 %v5974_v62 }
 0xbb2   :  { %6053 = vmatpush.msra.mxu1 %v5912_v14 }
 0xbb3   :  { %6127 = vmatpush.msrb.mxu3 %v5973_v48 }
 0xbb4   :  { %6054 = vmatpush.msra.mxu1 %v5911_v20 }
 0xbb6   :  { %6055 = vmatpush.msra.mxu1 %v5910_v44 }
 0xbb8   :  { %6056 = vmatpush.msra.mxu1 %v5909_v17 }
 0xbba   :  { %6057 = vmatpush.msra.mxu1 %v5908_v54 }
 0xbbc   :  { %6058 = vmatpush.msra.mxu1 %v5907_v19 }
 0xc02   :  { %v5664_v32 = vpop.f32.mrf.mxu1  ;;  %v5724_v4 = vpop.f32.mrf.mxu0 }
 0xc07   :  { %v5644_v37 = vpop.f32.mrf.mxu3  ;;  %v5704_v16 = vpop.f32.mrf.mxu2 }
 0xc08   :  { %v5665_v7 = vadd.f32 %v5664_v32, %v5644_v37  ;;  %v5725_v61 = vadd.f32 %v5724_v4, %v5704_v16 }
 0xc0a   :  { %v5757_v15 = vpop.f32.mrf.mxu1  ;;  %v5777_v35 = vpop.f32.mrf.mxu0  ;;  %v5727_v39 = vmax.f32 %v5665_v7, %v5725_v61 }
 0xc0c   :  { %v5949_v47 = vrot.slane %v5727_v39, 1 }
 0xc12   :  { %v5797_v58 = vpop.f32.mrf.mxu1  ;;  %v5817_v46 = vpop.f32.mrf.mxu0 }
 0xc13   :  { %v5820_v59 = vmax.f32 %v5757_v15, %v5797_v58  ;;  %v5821_v25 = vmax.f32 %v5777_v35, %v5817_v46 }
 0xc15   :  { %5841 = vmatmul.f32.vlgmr.msrb.gmra.mxu1 %v5820_v59  ;;  %6721 = vmatmul.msk.f32.vlgmr.msrb.gmra.mxu0 %vm5295_vm7, %v5821_v25 }
 0xc16   :  { %5881 = vmatmul.f32.vlgmr.msra.gmra.mxu3 %v5820_v59  ;;  %6722 = vmatmul.msk.f32.vlgmr.msra.gmra.mxu2 %vm5295_vm7, %v5821_v25 }
 0xc17   :  { %5994 = vmatpush.msrb.mxu0 %v5984_v50  ;;  %6083 = vmatpush.msra.mxu2 %v10655_v56 }
 0xc19   :  { %5995 = vmatpush.msrb.mxu0 %v5983_v60  ;;  %6084 = vmatpush.msra.mxu2 %v6730_v2 }
 0xc1b   :  { %5996 = vmatpush.msrb.mxu0 %v5982_v12  ;;  %6085 = vmatpush.msra.mxu2 %v6729_v30 }
 0xc1d   :  { %6723 = vmatmul.msk.f32.vlgmr.msra.gmra.mxu0 %vm5915_vm12, %v5727_v39  ;;  %6086 = vmatpush.msra.mxu2 %v6728_v29 }
 0xc1e   :  { %6732 = vmatmul.msk.f32.vlgmr.msrb.gmra.mxu2 %vm5915_vm12, %v5949_v47  ;;  %5997 = vmatpush.msrb.mxu0 %v5981_v18 }
 0xc1f   :  { %6087 = vmatpush.msra.mxu2 %v6727_v6 }
 0xc20   :  { %5998 = vmatpush.msrb.mxu0 %v5980_v13 }
 0xc21   :  { %6088 = vmatpush.msra.mxu2 %v6726_v51 }
 0xc22   :  { %5999 = vmatpush.msrb.mxu0 %v5979_v34 }
 0xc23   :  { %6089 = vmatpush.msra.mxu2 %v6725_v40  ;;  %v6108_v40 = vld [vmem:[#allocation6] sm:$0x1] }
 0xc24   :  { %6000 = vmatpush.msrb.mxu0 %v5978_v31 }
 0xc25   :  { %6090 = vmatpush.msra.mxu2 %v6724_v24 }
 0xc26   :  { %6001 = vmatpush.msrb.mxu0 %v5977_v41 }
 0xc28   :  { %6002 = vmatpush.msrb.mxu0 %v5976_v9 }
 0xc2a   :  { %6003 = vmatpush.msrb.mxu0 %v5975_v36 }
 0xc2c   :  { %6004 = vmatpush.msrb.mxu0 %v5974_v62 }
 0xc2e   :  { %6005 = vmatpush.msrb.mxu0 %v5973_v48 }
 0xc92   :  { %v5862_v42 = vpop.f32.mrf.mxu0  ;;  %v5842_v53 = vpop.f32.mrf.mxu1 }
 0xc93   :  { %v5863_v21 = vadd.f32 %v5862_v42, %v5842_v53 }
 0xc99   :  { %v5882_v33 = vpop.f32.mrf.mxu3  ;;  %v5902_v1 = vpop.f32.mrf.mxu2 }
 0xc9a   :  { %v5903_v11 = vadd.f32 %v5902_v1, %v5882_v33  ;;  %v5936_v27 = vpop.f32.mrf.mxu0 }
 0xc9b   :  { %v5939_v63 = vadd.f32 %v5936_v27, %v5906_v26 }
 0xc9c   :  { %v5905_v3 = vmax.f32 %v5863_v21, %v5903_v11 }
 0xc9e   :  { %v6072_v43 = vrot.slane %v5905_v3, 1  ;;  %6735 = vmatmul.msk.f32.vlgmr.msra.gmra.mxu1 %vm5915_vm12, %v5905_v3 }
 0xca0   :  { %6744 = vmatmul.msk.f32.vlgmr.msra.gmra.mxu2 %vm5915_vm12, %v6072_v43 }
 0xca1   :  { %v5969_v28 = vpop.f32.mrf.mxu2 }
 0xca2   :  { %v5972_v5 = vadd.f32 %v5969_v28, %v5939_v63 }
 0xca4   :  { %6733 = vmatmul.msk.f32.vlgmr.msrb.gmra.mxu0 %vm5986_vm13, %v5972_v5 }
 0xd1b   :  { %v6060_v52 = vpop.f32.mrf.mxu1 }
 0xd1c   :  { %v6063_v8 = vadd.f32 %v6060_v52, %v6031_v45 }
 0xd21   :  { %v6007_v22 = vpop.f32.mrf.mxu0 }
 0xd22   :  { %v6008_v10 = vadd.f32 %v6007_v22, %v5985_v0 }
 0xd23   :  { %v6092_v38 = vpop.f32.mrf.mxu2 }
 0xd24   :  { %v6734_v55 = vmul.f32 -1.442695, %v6008_v10  ;;  %v6095_v49 = vadd.f32 %v6092_v38, %v6063_v8 }
 0xd26   :  { %6789 = vpow2.f32 %v6734_v55  ;;  %6745 = vmatmul.msk.f32.vlgmr.msrb.gmra.mxu3 %vm5986_vm13, %v6095_v49 }
 0xd2c   :  { %v6790_v56 = vpop.eup %6789 }
 0xd2d   :  { %v6013_v57 = vadd.f32 1.0, %v6790_v56 }
 0xd2f   :  { %6791 = vrcp.f32 %v6013_v57  ;;  %v6025_v20 = vand.u32 2147483648, %v6013_v57  ;;  %v6023_v44 = vand.u32 2147483647, %v6013_v57  ;;  %vm6019_vm15 = vweird.f32 %v6013_v57 }
 0xd31   :  { %v6026_v17 = vor.u32 1.1754944e-38, %v6025_v20  ;;  %vm6024_vm2 = vcmp.eq.f32.partialorder %v6023_v44, 8.507059e+37 }
 0xd35   :  { %v6792_v2 = vpop.eup %6791 }
 0xd36   :  { %v6015_v14 = vmul.f32 %v6792_v2, %v6013_v57  ;;  %vm6020_vm14 = vweird.f32 %v6792_v2 }
 0xd37   :  { %vm6021_vm0 = vmor %vm6019_vm15, %vm6020_vm14 }
 0xd38   :  { %v6016_v30 = vsub.f32 1.0, %v6015_v14 }
 0xd3a   :  { %v6017_v29 = vmul.f32 %v6792_v2, %v6016_v30 }
 0xd3c   :  { %v6018_v6 = vadd.f32 %v6792_v2, %v6017_v29 }
 0xd3e   :  { %v6022_v51 = vsel %vm6021_vm0, %v6792_v2, %v6018_v6 }
 0xd3f   :  { %v6027_v54 = vsel %vm6024_vm2, %v6026_v17, %v6022_v51 }
 0xd40   :  { %6030 = vst.msk [vmem:[%s10707_s29] sm:$0x1] %vm6029_vm1, %v6027_v54 }
 0xda9   :  { %v6129_v19 = vpop.f32.mrf.mxu3 }
 0xdaa   :  { %v6130_v24 = vadd.f32 %v6129_v19, %v6108_v40 }
 0xdac   :  { %v6746_v50 = vmul.f32 -1.442695, %v6130_v24 }
 0xdae   :  { %6793 = vpow2.f32 %v6746_v50 }
 0xdb4   :  { %v6794_v60 = vpop.eup %6793 }
 0xdb5   :  { %v6135_v32 = vadd.f32 1.0, %v6794_v60 }
 0xdb7   :  { %6795 = vrcp.f32 %v6135_v32  ;;  %v6147_v35 = vand.u32 2147483648, %v6135_v32  ;;  %v6145_v16 = vand.u32 2147483647, %v6135_v32  ;;  %vm6141_vm4 = vweird.f32 %v6135_v32 }
 0xdb9   :  { %v6148_v46 = vor.u32 1.1754944e-38, %v6147_v35  ;;  %vm6146_vm6 = vcmp.eq.f32.partialorder %v6145_v16, 8.507059e+37 }
 0xdbd   :  { %v6796_v4 = vpop.eup %6795 }
 0xdbe   :  { %v6137_v12 = vmul.f32 %v6796_v4, %v6135_v32  ;;  %vm6142_vm3 = vweird.f32 %v6796_v4 }
 0xdbf   :  { %vm6143_vm5 = vmor %vm6141_vm4, %vm6142_vm3 }
 0xdc0   :  { %v6138_v15 = vsub.f32 1.0, %v6137_v12 }
 0xdc2   :  { %v6139_v37 = vmul.f32 %v6796_v4, %v6138_v15 }
 0xdc4   :  { %v6140_v58 = vadd.f32 %v6796_v4, %v6139_v37 }
 0xdc6   :  { %v6144_v59 = vsel %vm6143_vm5, %v6796_v4, %v6140_v58 }
 0xdc7   :  { %v6149_v25 = vsel %vm6146_vm6, %v6148_v46, %v6144_v59 }
 0xdc8   :  { %6151 = vst.msk [vmem:[%s10707_s29 + $0x1] sm:$0x1] %vm6029_vm1, %v6149_v25 }

</bundles_post_ra>
